<compile_context>
chip_gen: v5e
topology: v5e:2x2
jax: 0.10.0
libtpu: 0.0.40
codegen_flags: <defaults>
</compile_context>

<pallas_src>
import functools

import jax
import jax.numpy as jnp
from jax.experimental import pallas as pl
from jax.experimental.pallas import tpu as pltpu

_BN_EPS = 1e-5
_LANE = 128


def _round_up(x, m):
    return (x + m - 1) // m * m


def _pick_tk(kp):
    # kp is always a multiple of 128; pick the largest clean K-tile.
    for cand in (640, 512, 384, 256, 128):
        if kp % cand == 0:
            return cand
    return 128


# --------------------------------------------------------------------------
# Pallas kernels
# --------------------------------------------------------------------------
def _nin_block_kernel(a_ref, w0_ref, w1_ref, w2_ref, ss_ref, o_ref, acc_ref):
    """K-tiled matmul + fused (BN+ReLU) x3 with two chained 1x1 convs."""
    k = pl.program_id(1)

    @pl.when(k == 0)
    def _init():
        acc_ref[...] = jnp.zeros_like(acc_ref)

    acc_ref[...] += jnp.dot(a_ref[...], w0_ref[...],
                            preferred_element_type=jnp.float32)

    @pl.when(k == pl.num_programs(1) - 1)
    def _epilogue():
        # BN + ReLU for the leading conv (f32), then two 1x1 conv+BN+ReLU
        # while the tile is still resident in VMEM.
        h = jnp.maximum(acc_ref[...] * ss_ref[0:1, :] + ss_ref[1:2, :], 0.0)
        h = jnp.dot(h.astype(w1_ref.dtype), w1_ref[...],
                    preferred_element_type=jnp.float32)
        h = jnp.maximum(h * ss_ref[2:3, :] + ss_ref[3:4, :], 0.0)
        h = jnp.dot(h.astype(w2_ref.dtype), w2_ref[...],
                    preferred_element_type=jnp.float32)
        h = jnp.maximum(h * ss_ref[4:5, :] + ss_ref[5:6, :], 0.0)
        o_ref[...] = h.astype(o_ref.dtype)


def _maxpool_kernel(x_ref, o_ref):
    """Running max over the window-offset grid axis (last, 'arbitrary')."""
    j = pl.program_id(1)
    v = x_ref[0]

    @pl.when(j == 0)
    def _init():
        o_ref[...] = v

    @pl.when(j > 0)
    def _acc():
        o_ref[...] = jnp.maximum(o_ref[...], v)


def _avgpool_kernel(x_ref, o_ref, *, inv_hw):
    o_ref[...] = jnp.sum(x_ref[...].astype(jnp.float32), axis=1) * inv_hw


# --------------------------------------------------------------------------
# JAX glue + Pallas wrappers
# --------------------------------------------------------------------------
def _extract_patches(x, kh, kw, stride, padding):
    """x: (N,H,W,C) -> (N,OH,OW,KH*KW,C), plus (OH, OW)."""
    n, h, w_, c = x.shape
    if padding:
        x = jnp.pad(x, ((0, 0), (padding, padding), (padding, padding), (0, 0)))
    hp, wp = h + 2 * padding, w_ + 2 * padding
    oh = (hp - kh) // stride + 1
    ow = (wp - kw) // stride + 1
    pats = []
    for i in range(kh):
        for j in range(kw):
            pats.append(x[:, i:i + stride * (oh - 1) + 1:stride,
                            j:j + stride * (ow - 1) + 1:stride, :])
    return jnp.stack(pats, axis=3), oh, ow


def nin_block_forward(x, p, kernel, stride, padding):
    """One NIN block: conv(k,k)+BN+ReLU -> 1x1+BN+ReLU -> 1x1+BN+ReLU."""
    kh, kw = kernel
    n = x.shape[0]
    pats, oh, ow = _extract_patches(x, kh, kw, stride, padding)
    m = n * oh * ow
    k_in = pats.shape[3] * pats.shape[4]
    a = pats.reshape(m, k_in).astype(jnp.bfloat16)

    kp, cout_p = p["w0"].shape
    if k_in != kp:                                  # only block1 (363 -> 384)
        a = jnp.pad(a, ((0, 0), (0, kp - k_in)))

    tm = min(256, _round_up(m, 8))
    mp = _round_up(m, tm)
    if mp != m:
        a = jnp.pad(a, ((0, mp - m), (0, 0)))

    tk = _pick_tk(kp)
    grid = (mp // tm, kp // tk)

    out = pl.pallas_call(
        _nin_block_kernel,
        out_shape=jax.ShapeDtypeStruct((mp, cout_p), jnp.bfloat16),
        grid=grid,
        in_specs=[
            pl.BlockSpec((tm, tk), lambda i, k: (i, k)),           # patches
            pl.BlockSpec((tk, cout_p), lambda i, k: (k, 0)),       # conv w
            pl.BlockSpec((cout_p, cout_p), lambda i, k: (0, 0)),   # 1x1 w #1
            pl.BlockSpec((cout_p, cout_p), lambda i, k: (0, 0)),   # 1x1 w #2
            pl.BlockSpec((8, cout_p), lambda i, k: (0, 0)),        # bn scale/shift
        ],
        out_specs=pl.BlockSpec((tm, cout_p), lambda i, k: (i, 0)),
        scratch_shapes=[pltpu.VMEM((tm, cout_p), jnp.float32)],
        compiler_params=pltpu.CompilerParams(
            dimension_semantics=("parallel", "arbitrary")),
    )(a, p["w0"], p["w1"], p["w2"], p["ss"])

    if mp != m:
        out = out[:m]
    return out.reshape(n, oh, ow, cout_p)


def maxpool(x, kernel=3, stride=2):
    n, _, _, c = x.shape           # c is already a multiple of 128
    pats, oh, ow = _extract_patches(x, kernel, kernel, stride, 0)
    p = kernel * kernel
    m = n * oh * ow
    stacked = jnp.moveaxis(pats, 3, 0).reshape(p, m, c)

    tm = min(512, _round_up(m, 8))
    mp = _round_up(m, tm)
    if mp != m:
        stacked = jnp.pad(stacked, ((0, 0), (0, mp - m), (0, 0)))

    out = pl.pallas_call(
        _maxpool_kernel,
        out_shape=jax.ShapeDtypeStruct((mp, c), x.dtype),
        grid=(mp // tm, p),
        in_specs=[pl.BlockSpec((1, tm, c), lambda i, j: (j, i, 0))],
        out_specs=pl.BlockSpec((tm, c), lambda i, j: (i, 0)),
        compiler_params=pltpu.CompilerParams(
            dimension_semantics=("parallel", "arbitrary")),
    )(stacked)

    if mp != m:
        out = out[:m]
    return out.reshape(n, oh, ow, c)


def global_avgpool(x):
    n, h, w_, c = x.shape
    hw = h * w_
    xr = x.reshape(n, hw, c)
    hwp = _round_up(hw, 8)
    if hwp != hw:
        xr = jnp.pad(xr, ((0, 0), (0, hwp - hw), (0, 0)))
    return pl.pallas_call(
        functools.partial(_avgpool_kernel, inv_hw=1.0 / hw),
        out_shape=jax.ShapeDtypeStruct((n, c), jnp.float32),
        grid=(1,),
        in_specs=[pl.BlockSpec((n, hwp, c), lambda i: (0, 0, 0))],
        out_specs=pl.BlockSpec((n, c), lambda i: (0, 0)),
    )(xr)


# --------------------------------------------------------------------------
# Parameters (deterministic, matching the module's init recipe)
# --------------------------------------------------------------------------
def _make_conv_params(key, cin, cout, kh, kw, cin_store, cout_store):
    # Conv2d: kaiming_normal_(fan_out, relu) -> std = sqrt(2/(cout*kh*kw)),
    # bias = 0.  BN2d (eval, fresh stats): scale = 1/sqrt(1+eps), shift = 0.
    fan_out = cout * kh * kw
    std = (2.0 / fan_out) ** 0.5
    w = jax.random.normal(key, (kh, kw, cin, cout), jnp.float32) * std
    w = jnp.pad(w, ((0, 0), (0, 0),
                    (0, cin_store - cin), (0, cout_store - cout)))
    w = w.reshape(kh * kw * cin_store, cout_store)
    scale = jnp.zeros((cout_store,), jnp.float32).at[:cout].set(
        1.0 / (1.0 + _BN_EPS) ** 0.5)
    shift = jnp.zeros((cout_store,), jnp.float32)
    return w, scale, shift


def _make_block_params(keys, cin, cout, k, cin_store):
    cout_store = _round_up(cout, _LANE)
    w0, s0, b0 = _make_conv_params(keys[0], cin, cout, k, k, cin_store, cout_store)
    w1, s1, b1 = _make_conv_params(keys[1], cout, cout, 1, 1, cout_store, cout_store)
    w2, s2, b2 = _make_conv_params(keys[2], cout, cout, 1, 1, cout_store, cout_store)
    kp = _round_up(w0.shape[0], _LANE)
    if kp != w0.shape[0]:
        w0 = jnp.pad(w0, ((0, kp - w0.shape[0]), (0, 0)))
    ss = jnp.zeros((8, cout_store), jnp.float32)
    ss = (ss.at[0].set(s0).at[1].set(b0)
            .at[2].set(s1).at[3].set(b1)
            .at[4].set(s2).at[5].set(b2))
    return {"w0": w0.astype(jnp.bfloat16),
            "w1": w1.astype(jnp.bfloat16),
            "w2": w2.astype(jnp.bfloat16),
            "ss": ss}


def init_nin_params(key, num_classes=10):
    keys = jax.random.split(key, 12)
    return {
        "b1": _make_block_params(keys[0:3], 3, 96, 11, 3),
        "b2": _make_block_params(keys[3:6], 96, 256, 5, _round_up(96, _LANE)),
        "b3": _make_block_params(keys[6:9], 256, 384, 3, _round_up(256, _LANE)),
        "b4": _make_block_params(keys[9:12], 384, num_classes, 3,
                                 _round_up(384, _LANE)),
    }


# --------------------------------------------------------------------------
# Forward pass
# --------------------------------------------------------------------------
def nin_forward(x_nchw, params, num_classes=10):
    x = jnp.transpose(x_nchw, (0, 2, 3, 1)).astype(jnp.bfloat16)  # NCHW->NHWC
    x = nin_block_forward(x, params["b1"], (11, 11), 4, 0)
    x = maxpool(x, 3, 2)                      # Dropout(0.2): identity in eval
    x = nin_block_forward(x, params["b2"], (5, 5), 1, 2)
    x = maxpool(x, 3, 2)                      # Dropout(0.3): identity in eval
    x = nin_block_forward(x, params["b3"], (3, 3), 1, 1)
    x = maxpool(x, 3, 2)                      # Dropout(0.4): identity in eval
    x = nin_block_forward(x, params["b4"], (3, 3), 1, 1)
    x = global_avgpool(x)                     # AdaptiveAvgPool2d((1,1))+Flatten
    return x[:, :num_classes]                 # strip channel padding


if __name__ == "__main__":
    key = jax.random.PRNGKey(0)
    k_params, k_x = jax.random.split(key)
    params = init_nin_params(k_params, num_classes=10)

    # Smallest input that survives the conv/pool stack:
    # 67 -> conv11/s4 -> 15 -> pool -> 7 -> pool -> 3 -> pool -> 1 -> GAP.
    x = jax.random.normal(k_x, (2, 3, 67, 67), jnp.float32)

    fwd = jax.jit(nin_forward, static_argnames="num_classes")
    out = fwd(x, params, num_classes=10)
    out = jax.block_until_ready(out)

    assert out.shape == (2, 10), out.shape
    assert jnp.all(jnp.isfinite(out))
    print("KERNEL_OK")
</pallas_src>

<mosaic_0001>
module attributes {stable_mosaic.version = 11 : i64} {
  func.func @_nin_block_kernel(%arg0: i32, %arg1: i32, %arg2: memref<256x384xbf16, #tpu.memory_space<vmem>>, %arg3: memref<384x128xbf16, #tpu.memory_space<vmem>>, %arg4: memref<128x128xbf16, #tpu.memory_space<vmem>>, %arg5: memref<128x128xbf16, #tpu.memory_space<vmem>>, %arg6: memref<8x128xf32, #tpu.memory_space<vmem>>, %arg7: memref<256x128xbf16, #tpu.memory_space<vmem>>, %arg8: memref<256x128xf32, #tpu.memory_space<vmem>>) attributes {dimension_semantics = [#tpu.dimension_semantics<parallel>, #tpu.dimension_semantics<arbitrary>], iteration_bounds = array<i64: 2, 1>, scalar_prefetch = 0 : i64, scratch_operands = 1 : i64, tpu.core_type = #tpu.core_type<tc>, window_params = [{transform_indices = @transform_0, window_bounds = array<i64: 256, 384>}, {transform_indices = @transform_1, window_bounds = array<i64: 384, 128>}, {pipeline_mode = #tpu.pipeline_mode<synchronous>, transform_indices = @transform_2, window_bounds = array<i64: 128, 128>}, {pipeline_mode = #tpu.pipeline_mode<synchronous>, transform_indices = @transform_3, window_bounds = array<i64: 128, 128>}, {pipeline_mode = #tpu.pipeline_mode<synchronous>, transform_indices = @transform_4, window_bounds = array<i64: 8, 128>}, {transform_indices = @transform_5, window_bounds = array<i64: 256, 128>}]} {
    %c0_i32 = arith.constant 0 : i32
    %0 = arith.cmpi eq, %arg1, %c0_i32 : i32
    %1 = arith.extui %0 : i1 to i32
    %c0_i32_0 = arith.constant 0 : i32
    %2 = arith.cmpi ne, %1, %c0_i32_0 : i32
    scf.if %2 {
      %cst_10 = arith.constant 0.000000e+00 : f32
      %12 = vector.broadcast %cst_10 : f32 to vector<256x128xf32>
      %c0_11 = arith.constant 0 : index
      %c0_12 = arith.constant 0 : index
      %13 = vector.load %arg8[%c0_11, %c0_12] : memref<256x128xf32, #tpu.memory_space<vmem>>, vector<256x128xf32>
      tpu.vector_store %arg8[%c0_11, %c0_12], %12 {strides = array<i32>} : memref<256x128xf32, #tpu.memory_space<vmem>>, vector<256x128xf32>,
    } else {
    }
    %c0 = arith.constant 0 : index
    %c0_1 = arith.constant 0 : index
    %3 = vector.load %arg8[%c0, %c0_1] : memref<256x128xf32, #tpu.memory_space<vmem>>, vector<256x128xf32>
    %c0_2 = arith.constant 0 : index
    %c0_3 = arith.constant 0 : index
    %4 = vector.load %arg2[%c0_2, %c0_3] : memref<256x384xbf16, #tpu.memory_space<vmem>>, vector<256x384xbf16>
    %c0_4 = arith.constant 0 : index
    %c0_5 = arith.constant 0 : index
    %5 = vector.load %arg3[%c0_4, %c0_5] : memref<384x128xbf16, #tpu.memory_space<vmem>>, vector<384x128xbf16>
    %cst = arith.constant dense<0.000000e+00> : vector<256x128xf32>
    %6 = tpu.matmul %4, %5, %cst {dimension_numbers = #tpu.dot_dimension_numbers<[1], [0], [0], [1], [0, 0, 1, 1], [], []>} : vector<256x384xbf16>, vector<384x128xbf16>, vector<256x128xf32> -> vector<256x128xf32>
    %7 = arith.addf %3, %6 : vector<256x128xf32>
    %c0_6 = arith.constant 0 : index
    %c0_7 = arith.constant 0 : index
    %8 = vector.load %arg8[%c0_6, %c0_7] : memref<256x128xf32, #tpu.memory_space<vmem>>, vector<256x128xf32>
    tpu.vector_store %arg8[%c0_6, %c0_7], %7 {strides = array<i32>} : memref<256x128xf32, #tpu.memory_space<vmem>>, vector<256x128xf32>,
    %c0_i32_8 = arith.constant 0 : i32
    %9 = arith.cmpi eq, %arg1, %c0_i32_8 : i32
    %10 = arith.extui %9 : i1 to i32
    %c0_i32_9 = arith.constant 0 : i32
    %11 = arith.cmpi ne, %10, %c0_i32_9 : i32
    scf.if %11 {
      %c0_10 = arith.constant 0 : index
      %c0_11 = arith.constant 0 : index
      %12 = vector.load %arg8[%c0_10, %c0_11] : memref<256x128xf32, #tpu.memory_space<vmem>>, vector<256x128xf32>
      %c0_12 = arith.constant 0 : index
      %c0_13 = arith.constant 0 : index
      %13 = vector.load %arg6[%c0_12, %c0_13] : memref<8x128xf32, #tpu.memory_space<vmem>>, vector<1x128xf32>
      %14 = vector.broadcast %13 : vector<1x128xf32> to vector<256x128xf32>
      %15 = arith.mulf %12, %14 : vector<256x128xf32>
      %c1 = arith.constant 1 : index
      %c0_14 = arith.constant 0 : index
      %16 = vector.load %arg6[%c1, %c0_14] : memref<8x128xf32, #tpu.memory_space<vmem>>, vector<1x128xf32>
      %17 = vector.broadcast %16 : vector<1x128xf32> to vector<256x128xf32>
      %18 = arith.addf %15, %17 : vector<256x128xf32>
      %cst_15 = arith.constant 0.000000e+00 : f32
      %19 = vector.broadcast %cst_15 : f32 to vector<256x128xf32>
      %20 = arith.maximumf %18, %19 : vector<256x128xf32>
      %21 = arith.truncf %20 : vector<256x128xf32> to vector<256x128xbf16>
      %c0_16 = arith.constant 0 : index
      %c0_17 = arith.constant 0 : index
      %22 = vector.load %arg4[%c0_16, %c0_17] : memref<128x128xbf16, #tpu.memory_space<vmem>>, vector<128x128xbf16>
      %cst_18 = arith.constant dense<0.000000e+00> : vector<256x128xf32>
      %23 = tpu.matmul %21, %22, %cst_18 {dimension_numbers = #tpu.dot_dimension_numbers<[1], [0], [0], [1], [0, 0, 1, 1], [], []>} : vector<256x128xbf16>, vector<128x128xbf16>, vector<256x128xf32> -> vector<256x128xf32>
      %c2 = arith.constant 2 : index
      %c0_19 = arith.constant 0 : index
      %24 = vector.load %arg6[%c2, %c0_19] : memref<8x128xf32, #tpu.memory_space<vmem>>, vector<1x128xf32>
      %25 = vector.broadcast %24 : vector<1x128xf32> to vector<256x128xf32>
      %26 = arith.mulf %23, %25 : vector<256x128xf32>
      %c3 = arith.constant 3 : index
      %c0_20 = arith.constant 0 : index
      %27 = vector.load %arg6[%c3, %c0_20] : memref<8x128xf32, #tpu.memory_space<vmem>>, vector<1x128xf32>
      %28 = vector.broadcast %27 : vector<1x128xf32> to vector<256x128xf32>
      %29 = arith.addf %26, %28 : vector<256x128xf32>
      %cst_21 = arith.constant 0.000000e+00 : f32
      %30 = vector.broadcast %cst_21 : f32 to vector<256x128xf32>
      %31 = arith.maximumf %29, %30 : vector<256x128xf32>
      %32 = arith.truncf %31 : vector<256x128xf32> to vector<256x128xbf16>
      %c0_22 = arith.constant 0 : index
      %c0_23 = arith.constant 0 : index
      %33 = vector.load %arg5[%c0_22, %c0_23] : memref<128x128xbf16, #tpu.memory_space<vmem>>, vector<128x128xbf16>
      %cst_24 = arith.constant dense<0.000000e+00> : vector<256x128xf32>
      %34 = tpu.matmul %32, %33, %cst_24 {dimension_numbers = #tpu.dot_dimension_numbers<[1], [0], [0], [1], [0, 0, 1, 1], [], []>} : vector<256x128xbf16>, vector<128x128xbf16>, vector<256x128xf32> -> vector<256x128xf32>
      %c4 = arith.constant 4 : index
      %c0_25 = arith.constant 0 : index
      %35 = vector.load %arg6[%c4, %c0_25] : memref<8x128xf32, #tpu.memory_space<vmem>>, vector<1x128xf32>
      %36 = vector.broadcast %35 : vector<1x128xf32> to vector<256x128xf32>
      %37 = arith.mulf %34, %36 : vector<256x128xf32>
      %c5 = arith.constant 5 : index
      %c0_26 = arith.constant 0 : index
      %38 = vector.load %arg6[%c5, %c0_26] : memref<8x128xf32, #tpu.memory_space<vmem>>, vector<1x128xf32>
      %39 = vector.broadcast %38 : vector<1x128xf32> to vector<256x128xf32>
      %40 = arith.addf %37, %39 : vector<256x128xf32>
      %cst_27 = arith.constant 0.000000e+00 : f32
      %41 = vector.broadcast %cst_27 : f32 to vector<256x128xf32>
      %42 = arith.maximumf %40, %41 : vector<256x128xf32>
      %43 = arith.truncf %42 : vector<256x128xf32> to vector<256x128xbf16>
      %c0_28 = arith.constant 0 : index
      %c0_29 = arith.constant 0 : index
      %44 = vector.load %arg7[%c0_28, %c0_29] : memref<256x128xbf16, #tpu.memory_space<vmem>>, vector<256x128xbf16>
      tpu.vector_store %arg7[%c0_28, %c0_29], %43 {strides = array<i32>} : memref<256x128xbf16, #tpu.memory_space<vmem>>, vector<256x128xbf16>,
    } else {
    }
    return
  }
  func.func @transform_0(%arg0: i32, %arg1: i32) -> (i32, i32) {
    %c0_i32 = arith.constant 0 : i32
    return %arg0, %arg1 : i32, i32
  }
  func.func @transform_1(%arg0: i32, %arg1: i32) -> (i32, i32) {
    %c0_i32 = arith.constant 0 : i32
    %c0_i32_0 = arith.constant 0 : i32
    return %arg1, %c0_i32 : i32, i32
  }
  func.func @transform_2(%arg0: i32, %arg1: i32) -> (i32, i32) {
    %c0_i32 = arith.constant 0 : i32
    %c0_i32_0 = arith.constant 0 : i32
    %c0_i32_1 = arith.constant 0 : i32
    return %c0_i32, %c0_i32_0 : i32, i32
  }
  func.func @transform_3(%arg0: i32, %arg1: i32) -> (i32, i32) {
    %c0_i32 = arith.constant 0 : i32
    %c0_i32_0 = arith.constant 0 : i32
    %c0_i32_1 = arith.constant 0 : i32
    return %c0_i32, %c0_i32_0 : i32, i32
  }
  func.func @transform_4(%arg0: i32, %arg1: i32) -> (i32, i32) {
    %c0_i32 = arith.constant 0 : i32
    %c0_i32_0 = arith.constant 0 : i32
    %c0_i32_1 = arith.constant 0 : i32
    return %c0_i32, %c0_i32_0 : i32, i32
  }
  func.func @transform_5(%arg0: i32, %arg1: i32) -> (i32, i32) {
    %c0_i32 = arith.constant 0 : i32
    %c0_i32_0 = arith.constant 0 : i32
    return %arg0, %c0_i32 : i32, i32
  }
}

module attributes {stable_mosaic.version = 11 : i64} {
  func.func @_maxpool_kernel(%arg0: i32, %arg1: i32, %arg2: memref<1x104x128xbf16, #tpu.memory_space<vmem>>, %arg3: memref<104x128xbf16, #tpu.memory_space<vmem>>) attributes {dimension_semantics = [#tpu.dimension_semantics<parallel>, #tpu.dimension_semantics<arbitrary>], iteration_bounds = array<i64: 1, 9>, scalar_prefetch = 0 : i64, scratch_operands = 0 : i64, tpu.core_type = #tpu.core_type<tc>, window_params = [{transform_indices = @transform_0, window_bounds = array<i64: 1, 104, 128>}, {transform_indices = @transform_1, window_bounds = array<i64: 104, 128>}]} {
    %c0 = arith.constant 0 : index
    %c0_0 = arith.constant 0 : index
    %c0_1 = arith.constant 0 : index
    %0 = vector.load %arg2[%c0, %c0_0, %c0_1] : memref<1x104x128xbf16, #tpu.memory_space<vmem>>, vector<1x104x128xbf16>
    %1 = vector.shape_cast %0 : vector<1x104x128xbf16> to vector<104x128xbf16>
    %c0_i32 = arith.constant 0 : i32
    %2 = arith.cmpi eq, %arg1, %c0_i32 : i32
    %3 = arith.extui %2 : i1 to i32
    %c0_i32_2 = arith.constant 0 : i32
    %4 = arith.cmpi ne, %3, %c0_i32_2 : i32
    scf.if %4 {
      %c0_5 = arith.constant 0 : index
      %c0_6 = arith.constant 0 : index
      %8 = vector.load %arg3[%c0_5, %c0_6] : memref<104x128xbf16, #tpu.memory_space<vmem>>, vector<104x128xbf16>
      tpu.vector_store %arg3[%c0_5, %c0_6], %1 {strides = array<i32>} : memref<104x128xbf16, #tpu.memory_space<vmem>>, vector<104x128xbf16>,
    } else {
    }
    %c0_i32_3 = arith.constant 0 : i32
    %5 = arith.cmpi sgt, %arg1, %c0_i32_3 : i32
    %6 = arith.extui %5 : i1 to i32
    %c0_i32_4 = arith.constant 0 : i32
    %7 = arith.cmpi ne, %6, %c0_i32_4 : i32
    scf.if %7 {
      %c0_5 = arith.constant 0 : index
      %c0_6 = arith.constant 0 : index
      %8 = vector.load %arg3[%c0_5, %c0_6] : memref<104x128xbf16, #tpu.memory_space<vmem>>, vector<104x128xbf16>
      %9 = arith.maximumf %8, %1 : vector<104x128xbf16>
      %c0_7 = arith.constant 0 : index
      %c0_8 = arith.constant 0 : index
      %10 = vector.load %arg3[%c0_7, %c0_8] : memref<104x128xbf16, #tpu.memory_space<vmem>>, vector<104x128xbf16>
      tpu.vector_store %arg3[%c0_7, %c0_8], %9 {strides = array<i32>} : memref<104x128xbf16, #tpu.memory_space<vmem>>, vector<104x128xbf16>,
    } else {
    }
    return
  }
  func.func @transform_0(%arg0: i32, %arg1: i32) -> (i32, i32, i32) {
    %c0_i32 = arith.constant 0 : i32
    %c0_i32_0 = arith.constant 0 : i32
    return %arg1, %arg0, %c0_i32 : i32, i32, i32
  }
  func.func @transform_1(%arg0: i32, %arg1: i32) -> (i32, i32) {
    %c0_i32 = arith.constant 0 : i32
    %c0_i32_0 = arith.constant 0 : i32
    return %arg0, %c0_i32 : i32, i32
  }
}

module attributes {stable_mosaic.version = 11 : i64} {
  func.func @_nin_block_kernel(%arg0: i32, %arg1: i32, %arg2: memref<104x640xbf16, #tpu.memory_space<vmem>>, %arg3: memref<640x256xbf16, #tpu.memory_space<vmem>>, %arg4: memref<256x256xbf16, #tpu.memory_space<vmem>>, %arg5: memref<256x256xbf16, #tpu.memory_space<vmem>>, %arg6: memref<8x256xf32, #tpu.memory_space<vmem>>, %arg7: memref<104x256xbf16, #tpu.memory_space<vmem>>, %arg8: memref<104x256xf32, #tpu.memory_space<vmem>>) attributes {dimension_semantics = [#tpu.dimension_semantics<parallel>, #tpu.dimension_semantics<arbitrary>], iteration_bounds = array<i64: 1, 5>, scalar_prefetch = 0 : i64, scratch_operands = 1 : i64, tpu.core_type = #tpu.core_type<tc>, window_params = [{transform_indices = @transform_0, window_bounds = array<i64: 104, 640>}, {transform_indices = @transform_1, window_bounds = array<i64: 640, 256>}, {pipeline_mode = #tpu.pipeline_mode<synchronous>, transform_indices = @transform_2, window_bounds = array<i64: 256, 256>}, {pipeline_mode = #tpu.pipeline_mode<synchronous>, transform_indices = @transform_3, window_bounds = array<i64: 256, 256>}, {pipeline_mode = #tpu.pipeline_mode<synchronous>, transform_indices = @transform_4, window_bounds = array<i64: 8, 256>}, {transform_indices = @transform_5, window_bounds = array<i64: 104, 256>}]} {
    %c0_i32 = arith.constant 0 : i32
    %0 = arith.cmpi eq, %arg1, %c0_i32 : i32
    %1 = arith.extui %0 : i1 to i32
    %c0_i32_0 = arith.constant 0 : i32
    %2 = arith.cmpi ne, %1, %c0_i32_0 : i32
    scf.if %2 {
      %cst_9 = arith.constant 0.000000e+00 : f32
      %12 = vector.broadcast %cst_9 : f32 to vector<104x256xf32>
      %c0_10 = arith.constant 0 : index
      %c0_11 = arith.constant 0 : index
      %13 = vector.load %arg8[%c0_10, %c0_11] : memref<104x256xf32, #tpu.memory_space<vmem>>, vector<104x256xf32>
      tpu.vector_store %arg8[%c0_10, %c0_11], %12 {strides = array<i32>} : memref<104x256xf32, #tpu.memory_space<vmem>>, vector<104x256xf32>,
    } else {
    }
    %c0 = arith.constant 0 : index
    %c0_1 = arith.constant 0 : index
    %3 = vector.load %arg8[%c0, %c0_1] : memref<104x256xf32, #tpu.memory_space<vmem>>, vector<104x256xf32>
    %c0_2 = arith.constant 0 : index
    %c0_3 = arith.constant 0 : index
    %4 = vector.load %arg2[%c0_2, %c0_3] : memref<104x640xbf16, #tpu.memory_space<vmem>>, vector<104x640xbf16>
    %c0_4 = arith.constant 0 : index
    %c0_5 = arith.constant 0 : index
    %5 = vector.load %arg3[%c0_4, %c0_5] : memref<640x256xbf16, #tpu.memory_space<vmem>>, vector<640x256xbf16>
    %cst = arith.constant dense<0.000000e+00> : vector<104x256xf32>
    %6 = tpu.matmul %4, %5, %cst {dimension_numbers = #tpu.dot_dimension_numbers<[1], [0], [0], [1], [0, 0, 1, 1], [], []>} : vector<104x640xbf16>, vector<640x256xbf16>, vector<104x256xf32> -> vector<104x256xf32>
    %7 = arith.addf %3, %6 : vector<104x256xf32>
    %c0_6 = arith.constant 0 : index
    %c0_7 = arith.constant 0 : index
    %8 = vector.load %arg8[%c0_6, %c0_7] : memref<104x256xf32, #tpu.memory_space<vmem>>, vector<104x256xf32>
    tpu.vector_store %arg8[%c0_6, %c0_7], %7 {strides = array<i32>} : memref<104x256xf32, #tpu.memory_space<vmem>>, vector<104x256xf32>,
    %c4_i32 = arith.constant 4 : i32
    %9 = arith.cmpi eq, %arg1, %c4_i32 : i32
    %10 = arith.extui %9 : i1 to i32
    %c0_i32_8 = arith.constant 0 : i32
    %11 = arith.cmpi ne, %10, %c0_i32_8 : i32
    scf.if %11 {
      %c0_9 = arith.constant 0 : index
      %c0_10 = arith.constant 0 : index
      %12 = vector.load %arg8[%c0_9, %c0_10] : memref<104x256xf32, #tpu.memory_space<vmem>>, vector<104x256xf32>
      %c0_11 = arith.constant 0 : index
      %c0_12 = arith.constant 0 : index
      %13 = vector.load %arg6[%c0_11, %c0_12] : memref<8x256xf32, #tpu.memory_space<vmem>>, vector<1x256xf32>
      %14 = vector.broadcast %13 : vector<1x256xf32> to vector<104x256xf32>
      %15 = arith.mulf %12, %14 : vector<104x256xf32>
      %c1 = arith.constant 1 : index
      %c0_13 = arith.constant 0 : index
      %16 = vector.load %arg6[%c1, %c0_13] : memref<8x256xf32, #tpu.memory_space<vmem>>, vector<1x256xf32>
      %17 = vector.broadcast %16 : vector<1x256xf32> to vector<104x256xf32>
      %18 = arith.addf %15, %17 : vector<104x256xf32>
      %cst_14 = arith.constant 0.000000e+00 : f32
      %19 = vector.broadcast %cst_14 : f32 to vector<104x256xf32>
      %20 = arith.maximumf %18, %19 : vector<104x256xf32>
      %21 = arith.truncf %20 : vector<104x256xf32> to vector<104x256xbf16>
      %c0_15 = arith.constant 0 : index
      %c0_16 = arith.constant 0 : index
      %22 = vector.load %arg4[%c0_15, %c0_16] : memref<256x256xbf16, #tpu.memory_space<vmem>>, vector<256x256xbf16>
      %cst_17 = arith.constant dense<0.000000e+00> : vector<104x256xf32>
      %23 = tpu.matmul %21, %22, %cst_17 {dimension_numbers = #tpu.dot_dimension_numbers<[1], [0], [0], [1], [0, 0, 1, 1], [], []>} : vector<104x256xbf16>, vector<256x256xbf16>, vector<104x256xf32> -> vector<104x256xf32>
      %c2 = arith.constant 2 : index
      %c0_18 = arith.constant 0 : index
      %24 = vector.load %arg6[%c2, %c0_18] : memref<8x256xf32, #tpu.memory_space<vmem>>, vector<1x256xf32>
      %25 = vector.broadcast %24 : vector<1x256xf32> to vector<104x256xf32>
      %26 = arith.mulf %23, %25 : vector<104x256xf32>
      %c3 = arith.constant 3 : index
      %c0_19 = arith.constant 0 : index
      %27 = vector.load %arg6[%c3, %c0_19] : memref<8x256xf32, #tpu.memory_space<vmem>>, vector<1x256xf32>
      %28 = vector.broadcast %27 : vector<1x256xf32> to vector<104x256xf32>
      %29 = arith.addf %26, %28 : vector<104x256xf32>
      %cst_20 = arith.constant 0.000000e+00 : f32
      %30 = vector.broadcast %cst_20 : f32 to vector<104x256xf32>
      %31 = arith.maximumf %29, %30 : vector<104x256xf32>
      %32 = arith.truncf %31 : vector<104x256xf32> to vector<104x256xbf16>
      %c0_21 = arith.constant 0 : index
      %c0_22 = arith.constant 0 : index
      %33 = vector.load %arg5[%c0_21, %c0_22] : memref<256x256xbf16, #tpu.memory_space<vmem>>, vector<256x256xbf16>
      %cst_23 = arith.constant dense<0.000000e+00> : vector<104x256xf32>
      %34 = tpu.matmul %32, %33, %cst_23 {dimension_numbers = #tpu.dot_dimension_numbers<[1], [0], [0], [1], [0, 0, 1, 1], [], []>} : vector<104x256xbf16>, vector<256x256xbf16>, vector<104x256xf32> -> vector<104x256xf32>
      %c4 = arith.constant 4 : index
      %c0_24 = arith.constant 0 : index
      %35 = vector.load %arg6[%c4, %c0_24] : memref<8x256xf32, #tpu.memory_space<vmem>>, vector<1x256xf32>
      %36 = vector.broadcast %35 : vector<1x256xf32> to vector<104x256xf32>
      %37 = arith.mulf %34, %36 : vector<104x256xf32>
      %c5 = arith.constant 5 : index
      %c0_25 = arith.constant 0 : index
      %38 = vector.load %arg6[%c5, %c0_25] : memref<8x256xf32, #tpu.memory_space<vmem>>, vector<1x256xf32>
      %39 = vector.broadcast %38 : vector<1x256xf32> to vector<104x256xf32>
      %40 = arith.addf %37, %39 : vector<104x256xf32>
      %cst_26 = arith.constant 0.000000e+00 : f32
      %41 = vector.broadcast %cst_26 : f32 to vector<104x256xf32>
      %42 = arith.maximumf %40, %41 : vector<104x256xf32>
      %43 = arith.truncf %42 : vector<104x256xf32> to vector<104x256xbf16>
      %c0_27 = arith.constant 0 : index
      %c0_28 = arith.constant 0 : index
      %44 = vector.load %arg7[%c0_27, %c0_28] : memref<104x256xbf16, #tpu.memory_space<vmem>>, vector<104x256xbf16>
      tpu.vector_store %arg7[%c0_27, %c0_28], %43 {strides = array<i32>} : memref<104x256xbf16, #tpu.memory_space<vmem>>, vector<104x256xbf16>,
    } else {
    }
    return
  }
  func.func @transform_0(%arg0: i32, %arg1: i32) -> (i32, i32) {
    %c0_i32 = arith.constant 0 : i32
    return %arg0, %arg1 : i32, i32
  }
  func.func @transform_1(%arg0: i32, %arg1: i32) -> (i32, i32) {
    %c0_i32 = arith.constant 0 : i32
    %c0_i32_0 = arith.constant 0 : i32
    return %arg1, %c0_i32 : i32, i32
  }
  func.func @transform_2(%arg0: i32, %arg1: i32) -> (i32, i32) {
    %c0_i32 = arith.constant 0 : i32
    %c0_i32_0 = arith.constant 0 : i32
    %c0_i32_1 = arith.constant 0 : i32
    return %c0_i32, %c0_i32_0 : i32, i32
  }
  func.func @transform_3(%arg0: i32, %arg1: i32) -> (i32, i32) {
    %c0_i32 = arith.constant 0 : i32
    %c0_i32_0 = arith.constant 0 : i32
    %c0_i32_1 = arith.constant 0 : i32
    return %c0_i32, %c0_i32_0 : i32, i32
  }
  func.func @transform_4(%arg0: i32, %arg1: i32) -> (i32, i32) {
    %c0_i32 = arith.constant 0 : i32
    %c0_i32_0 = arith.constant 0 : i32
    %c0_i32_1 = arith.constant 0 : i32
    return %c0_i32, %c0_i32_0 : i32, i32
  }
  func.func @transform_5(%arg0: i32, %arg1: i32) -> (i32, i32) {
    %c0_i32 = arith.constant 0 : i32
    %c0_i32_0 = arith.constant 0 : i32
    return %arg0, %c0_i32 : i32, i32
  }
}

module attributes {stable_mosaic.version = 11 : i64} {
  func.func @_maxpool_kernel(%arg0: i32, %arg1: i32, %arg2: memref<1x24x256xbf16, #tpu.memory_space<vmem>>, %arg3: memref<24x256xbf16, #tpu.memory_space<vmem>>) attributes {dimension_semantics = [#tpu.dimension_semantics<parallel>, #tpu.dimension_semantics<arbitrary>], iteration_bounds = array<i64: 1, 9>, scalar_prefetch = 0 : i64, scratch_operands = 0 : i64, tpu.core_type = #tpu.core_type<tc>, window_params = [{transform_indices = @transform_0, window_bounds = array<i64: 1, 24, 256>}, {transform_indices = @transform_1, window_bounds = array<i64: 24, 256>}]} {
    %c0 = arith.constant 0 : index
    %c0_0 = arith.constant 0 : index
    %c0_1 = arith.constant 0 : index
    %0 = vector.load %arg2[%c0, %c0_0, %c0_1] : memref<1x24x256xbf16, #tpu.memory_space<vmem>>, vector<1x24x256xbf16>
    %1 = vector.shape_cast %0 : vector<1x24x256xbf16> to vector<24x256xbf16>
    %c0_i32 = arith.constant 0 : i32
    %2 = arith.cmpi eq, %arg1, %c0_i32 : i32
    %3 = arith.extui %2 : i1 to i32
    %c0_i32_2 = arith.constant 0 : i32
    %4 = arith.cmpi ne, %3, %c0_i32_2 : i32
    scf.if %4 {
      %c0_5 = arith.constant 0 : index
      %c0_6 = arith.constant 0 : index
      %8 = vector.load %arg3[%c0_5, %c0_6] : memref<24x256xbf16, #tpu.memory_space<vmem>>, vector<24x256xbf16>
      tpu.vector_store %arg3[%c0_5, %c0_6], %1 {strides = array<i32>} : memref<24x256xbf16, #tpu.memory_space<vmem>>, vector<24x256xbf16>,
    } else {
    }
    %c0_i32_3 = arith.constant 0 : i32
    %5 = arith.cmpi sgt, %arg1, %c0_i32_3 : i32
    %6 = arith.extui %5 : i1 to i32
    %c0_i32_4 = arith.constant 0 : i32
    %7 = arith.cmpi ne, %6, %c0_i32_4 : i32
    scf.if %7 {
      %c0_5 = arith.constant 0 : index
      %c0_6 = arith.constant 0 : index
      %8 = vector.load %arg3[%c0_5, %c0_6] : memref<24x256xbf16, #tpu.memory_space<vmem>>, vector<24x256xbf16>
      %9 = arith.maximumf %8, %1 : vector<24x256xbf16>
      %c0_7 = arith.constant 0 : index
      %c0_8 = arith.constant 0 : index
      %10 = vector.load %arg3[%c0_7, %c0_8] : memref<24x256xbf16, #tpu.memory_space<vmem>>, vector<24x256xbf16>
      tpu.vector_store %arg3[%c0_7, %c0_8], %9 {strides = array<i32>} : memref<24x256xbf16, #tpu.memory_space<vmem>>, vector<24x256xbf16>,
    } else {
    }
    return
  }
  func.func @transform_0(%arg0: i32, %arg1: i32) -> (i32, i32, i32) {
    %c0_i32 = arith.constant 0 : i32
    %c0_i32_0 = arith.constant 0 : i32
    return %arg1, %arg0, %c0_i32 : i32, i32, i32
  }
  func.func @transform_1(%arg0: i32, %arg1: i32) -> (i32, i32) {
    %c0_i32 = arith.constant 0 : i32
    %c0_i32_0 = arith.constant 0 : i32
    return %arg0, %c0_i32 : i32, i32
  }
}

module attributes {stable_mosaic.version = 11 : i64} {
  func.func @_nin_block_kernel(%arg0: i32, %arg1: i32, %arg2: memref<24x384xbf16, #tpu.memory_space<vmem>>, %arg3: memref<384x384xbf16, #tpu.memory_space<vmem>>, %arg4: memref<384x384xbf16, #tpu.memory_space<vmem>>, %arg5: memref<384x384xbf16, #tpu.memory_space<vmem>>, %arg6: memref<8x384xf32, #tpu.memory_space<vmem>>, %arg7: memref<24x384xbf16, #tpu.memory_space<vmem>>, %arg8: memref<24x384xf32, #tpu.memory_space<vmem>>) attributes {dimension_semantics = [#tpu.dimension_semantics<parallel>, #tpu.dimension_semantics<arbitrary>], iteration_bounds = array<i64: 1, 6>, scalar_prefetch = 0 : i64, scratch_operands = 1 : i64, tpu.core_type = #tpu.core_type<tc>, window_params = [{transform_indices = @transform_0, window_bounds = array<i64: 24, 384>}, {transform_indices = @transform_1, window_bounds = array<i64: 384, 384>}, {pipeline_mode = #tpu.pipeline_mode<synchronous>, transform_indices = @transform_2, window_bounds = array<i64: 384, 384>}, {pipeline_mode = #tpu.pipeline_mode<synchronous>, transform_indices = @transform_3, window_bounds = array<i64: 384, 384>}, {pipeline_mode = #tpu.pipeline_mode<synchronous>, transform_indices = @transform_4, window_bounds = array<i64: 8, 384>}, {transform_indices = @transform_5, window_bounds = array<i64: 24, 384>}]} {
    %c0_i32 = arith.constant 0 : i32
    %0 = arith.cmpi eq, %arg1, %c0_i32 : i32
    %1 = arith.extui %0 : i1 to i32
    %c0_i32_0 = arith.constant 0 : i32
    %2 = arith.cmpi ne, %1, %c0_i32_0 : i32
    scf.if %2 {
      %cst_9 = arith.constant 0.000000e+00 : f32
      %12 = vector.broadcast %cst_9 : f32 to vector<24x384xf32>
      %c0_10 = arith.constant 0 : index
      %c0_11 = arith.constant 0 : index
      %13 = vector.load %arg8[%c0_10, %c0_11] : memref<24x384xf32, #tpu.memory_space<vmem>>, vector<24x384xf32>
      tpu.vector_store %arg8[%c0_10, %c0_11], %12 {strides = array<i32>} : memref<24x384xf32, #tpu.memory_space<vmem>>, vector<24x384xf32>,
    } else {
    }
    %c0 = arith.constant 0 : index
    %c0_1 = arith.constant 0 : index
    %3 = vector.load %arg8[%c0, %c0_1] : memref<24x384xf32, #tpu.memory_space<vmem>>, vector<24x384xf32>
    %c0_2 = arith.constant 0 : index
    %c0_3 = arith.constant 0 : index
    %4 = vector.load %arg2[%c0_2, %c0_3] : memref<24x384xbf16, #tpu.memory_space<vmem>>, vector<24x384xbf16>
    %c0_4 = arith.constant 0 : index
    %c0_5 = arith.constant 0 : index
    %5 = vector.load %arg3[%c0_4, %c0_5] : memref<384x384xbf16, #tpu.memory_space<vmem>>, vector<384x384xbf16>
    %cst = arith.constant dense<0.000000e+00> : vector<24x384xf32>
    %6 = tpu.matmul %4, %5, %cst {dimension_numbers = #tpu.dot_dimension_numbers<[1], [0], [0], [1], [0, 0, 1, 1], [], []>} : vector<24x384xbf16>, vector<384x384xbf16>, vector<24x384xf32> -> vector<24x384xf32>
    %7 = arith.addf %3, %6 : vector<24x384xf32>
    %c0_6 = arith.constant 0 : index
    %c0_7 = arith.constant 0 : index
    %8 = vector.load %arg8[%c0_6, %c0_7] : memref<24x384xf32, #tpu.memory_space<vmem>>, vector<24x384xf32>
    tpu.vector_store %arg8[%c0_6, %c0_7], %7 {strides = array<i32>} : memref<24x384xf32, #tpu.memory_space<vmem>>, vector<24x384xf32>,
    %c5_i32 = arith.constant 5 : i32
    %9 = arith.cmpi eq, %arg1, %c5_i32 : i32
    %10 = arith.extui %9 : i1 to i32
    %c0_i32_8 = arith.constant 0 : i32
    %11 = arith.cmpi ne, %10, %c0_i32_8 : i32
    scf.if %11 {
      %c0_9 = arith.constant 0 : index
      %c0_10 = arith.constant 0 : index
      %12 = vector.load %arg8[%c0_9, %c0_10] : memref<24x384xf32, #tpu.memory_space<vmem>>, vector<24x384xf32>
      %c0_11 = arith.constant 0 : index
      %c0_12 = arith.constant 0 : index
      %13 = vector.load %arg6[%c0_11, %c0_12] : memref<8x384xf32, #tpu.memory_space<vmem>>, vector<1x384xf32>
      %14 = vector.broadcast %13 : vector<1x384xf32> to vector<24x384xf32>
      %15 = arith.mulf %12, %14 : vector<24x384xf32>
      %c1 = arith.constant 1 : index
      %c0_13 = arith.constant 0 : index
      %16 = vector.load %arg6[%c1, %c0_13] : memref<8x384xf32, #tpu.memory_space<vmem>>, vector<1x384xf32>
      %17 = vector.broadcast %16 : vector<1x384xf32> to vector<24x384xf32>
      %18 = arith.addf %15, %17 : vector<24x384xf32>
      %cst_14 = arith.constant 0.000000e+00 : f32
      %19 = vector.broadcast %cst_14 : f32 to vector<24x384xf32>
      %20 = arith.maximumf %18, %19 : vector<24x384xf32>
      %21 = arith.truncf %20 : vector<24x384xf32> to vector<24x384xbf16>
      %c0_15 = arith.constant 0 : index
      %c0_16 = arith.constant 0 : index
      %22 = vector.load %arg4[%c0_15, %c0_16] : memref<384x384xbf16, #tpu.memory_space<vmem>>, vector<384x384xbf16>
      %cst_17 = arith.constant dense<0.000000e+00> : vector<24x384xf32>
      %23 = tpu.matmul %21, %22, %cst_17 {dimension_numbers = #tpu.dot_dimension_numbers<[1], [0], [0], [1], [0, 0, 1, 1], [], []>} : vector<24x384xbf16>, vector<384x384xbf16>, vector<24x384xf32> -> vector<24x384xf32>
      %c2 = arith.constant 2 : index
      %c0_18 = arith.constant 0 : index
      %24 = vector.load %arg6[%c2, %c0_18] : memref<8x384xf32, #tpu.memory_space<vmem>>, vector<1x384xf32>
      %25 = vector.broadcast %24 : vector<1x384xf32> to vector<24x384xf32>
      %26 = arith.mulf %23, %25 : vector<24x384xf32>
      %c3 = arith.constant 3 : index
      %c0_19 = arith.constant 0 : index
      %27 = vector.load %arg6[%c3, %c0_19] : memref<8x384xf32, #tpu.memory_space<vmem>>, vector<1x384xf32>
      %28 = vector.broadcast %27 : vector<1x384xf32> to vector<24x384xf32>
      %29 = arith.addf %26, %28 : vector<24x384xf32>
      %cst_20 = arith.constant 0.000000e+00 : f32
      %30 = vector.broadcast %cst_20 : f32 to vector<24x384xf32>
      %31 = arith.maximumf %29, %30 : vector<24x384xf32>
      %32 = arith.truncf %31 : vector<24x384xf32> to vector<24x384xbf16>
      %c0_21 = arith.constant 0 : index
      %c0_22 = arith.constant 0 : index
      %33 = vector.load %arg5[%c0_21, %c0_22] : memref<384x384xbf16, #tpu.memory_space<vmem>>, vector<384x384xbf16>
      %cst_23 = arith.constant dense<0.000000e+00> : vector<24x384xf32>
      %34 = tpu.matmul %32, %33, %cst_23 {dimension_numbers = #tpu.dot_dimension_numbers<[1], [0], [0], [1], [0, 0, 1, 1], [], []>} : vector<24x384xbf16>, vector<384x384xbf16>, vector<24x384xf32> -> vector<24x384xf32>
      %c4 = arith.constant 4 : index
      %c0_24 = arith.constant 0 : index
      %35 = vector.load %arg6[%c4, %c0_24] : memref<8x384xf32, #tpu.memory_space<vmem>>, vector<1x384xf32>
      %36 = vector.broadcast %35 : vector<1x384xf32> to vector<24x384xf32>
      %37 = arith.mulf %34, %36 : vector<24x384xf32>
      %c5 = arith.constant 5 : index
      %c0_25 = arith.constant 0 : index
      %38 = vector.load %arg6[%c5, %c0_25] : memref<8x384xf32, #tpu.memory_space<vmem>>, vector<1x384xf32>
      %39 = vector.broadcast %38 : vector<1x384xf32> to vector<24x384xf32>
      %40 = arith.addf %37, %39 : vector<24x384xf32>
      %cst_26 = arith.constant 0.000000e+00 : f32
      %41 = vector.broadcast %cst_26 : f32 to vector<24x384xf32>
      %42 = arith.maximumf %40, %41 : vector<24x384xf32>
      %43 = arith.truncf %42 : vector<24x384xf32> to vector<24x384xbf16>
      %c0_27 = arith.constant 0 : index
      %c0_28 = arith.constant 0 : index
      %44 = vector.load %arg7[%c0_27, %c0_28] : memref<24x384xbf16, #tpu.memory_space<vmem>>, vector<24x384xbf16>
      tpu.vector_store %arg7[%c0_27, %c0_28], %43 {strides = array<i32>} : memref<24x384xbf16, #tpu.memory_space<vmem>>, vector<24x384xbf16>,
    } else {
    }
    return
  }
  func.func @transform_0(%arg0: i32, %arg1: i32) -> (i32, i32) {
    %c0_i32 = arith.constant 0 : i32
    return %arg0, %arg1 : i32, i32
  }
  func.func @transform_1(%arg0: i32, %arg1: i32) -> (i32, i32) {
    %c0_i32 = arith.constant 0 : i32
    %c0_i32_0 = arith.constant 0 : i32
    return %arg1, %c0_i32 : i32, i32
  }
  func.func @transform_2(%arg0: i32, %arg1: i32) -> (i32, i32) {
    %c0_i32 = arith.constant 0 : i32
    %c0_i32_0 = arith.constant 0 : i32
    %c0_i32_1 = arith.constant 0 : i32
    return %c0_i32, %c0_i32_0 : i32, i32
  }
  func.func @transform_3(%arg0: i32, %arg1: i32) -> (i32, i32) {
    %c0_i32 = arith.constant 0 : i32
    %c0_i32_0 = arith.constant 0 : i32
    %c0_i32_1 = arith.constant 0 : i32
    return %c0_i32, %c0_i32_0 : i32, i32
  }
  func.func @transform_4(%arg0: i32, %arg1: i32) -> (i32, i32) {
    %c0_i32 = arith.constant 0 : i32
    %c0_i32_0 = arith.constant 0 : i32
    %c0_i32_1 = arith.constant 0 : i32
    return %c0_i32, %c0_i32_0 : i32, i32
  }
  func.func @transform_5(%arg0: i32, %arg1: i32) -> (i32, i32) {
    %c0_i32 = arith.constant 0 : i32
    %c0_i32_0 = arith.constant 0 : i32
    return %arg0, %c0_i32 : i32, i32
  }
}

module attributes {stable_mosaic.version = 11 : i64} {
  func.func @_maxpool_kernel(%arg0: i32, %arg1: i32, %arg2: memref<1x8x384xbf16, #tpu.memory_space<vmem>>, %arg3: memref<8x384xbf16, #tpu.memory_space<vmem>>) attributes {dimension_semantics = [#tpu.dimension_semantics<parallel>, #tpu.dimension_semantics<arbitrary>], iteration_bounds = array<i64: 1, 9>, scalar_prefetch = 0 : i64, scratch_operands = 0 : i64, tpu.core_type = #tpu.core_type<tc>, window_params = [{transform_indices = @transform_0, window_bounds = array<i64: 1, 8, 384>}, {transform_indices = @transform_1, window_bounds = array<i64: 8, 384>}]} {
    %c0 = arith.constant 0 : index
    %c0_0 = arith.constant 0 : index
    %c0_1 = arith.constant 0 : index
    %0 = vector.load %arg2[%c0, %c0_0, %c0_1] : memref<1x8x384xbf16, #tpu.memory_space<vmem>>, vector<1x8x384xbf16>
    %1 = vector.shape_cast %0 : vector<1x8x384xbf16> to vector<8x384xbf16>
    %c0_i32 = arith.constant 0 : i32
    %2 = arith.cmpi eq, %arg1, %c0_i32 : i32
    %3 = arith.extui %2 : i1 to i32
    %c0_i32_2 = arith.constant 0 : i32
    %4 = arith.cmpi ne, %3, %c0_i32_2 : i32
    scf.if %4 {
      %c0_5 = arith.constant 0 : index
      %c0_6 = arith.constant 0 : index
      %8 = vector.load %arg3[%c0_5, %c0_6] : memref<8x384xbf16, #tpu.memory_space<vmem>>, vector<8x384xbf16>
      tpu.vector_store %arg3[%c0_5, %c0_6], %1 {strides = array<i32>} : memref<8x384xbf16, #tpu.memory_space<vmem>>, vector<8x384xbf16>,
    } else {
    }
    %c0_i32_3 = arith.constant 0 : i32
    %5 = arith.cmpi sgt, %arg1, %c0_i32_3 : i32
    %6 = arith.extui %5 : i1 to i32
    %c0_i32_4 = arith.constant 0 : i32
    %7 = arith.cmpi ne, %6, %c0_i32_4 : i32
    scf.if %7 {
      %c0_5 = arith.constant 0 : index
      %c0_6 = arith.constant 0 : index
      %8 = vector.load %arg3[%c0_5, %c0_6] : memref<8x384xbf16, #tpu.memory_space<vmem>>, vector<8x384xbf16>
      %9 = arith.maximumf %8, %1 : vector<8x384xbf16>
      %c0_7 = arith.constant 0 : index
      %c0_8 = arith.constant 0 : index
      %10 = vector.load %arg3[%c0_7, %c0_8] : memref<8x384xbf16, #tpu.memory_space<vmem>>, vector<8x384xbf16>
      tpu.vector_store %arg3[%c0_7, %c0_8], %9 {strides = array<i32>} : memref<8x384xbf16, #tpu.memory_space<vmem>>, vector<8x384xbf16>,
    } else {
    }
    return
  }
  func.func @transform_0(%arg0: i32, %arg1: i32) -> (i32, i32, i32) {
    %c0_i32 = arith.constant 0 : i32
    %c0_i32_0 = arith.constant 0 : i32
    return %arg1, %arg0, %c0_i32 : i32, i32, i32
  }
  func.func @transform_1(%arg0: i32, %arg1: i32) -> (i32, i32) {
    %c0_i32 = arith.constant 0 : i32
    %c0_i32_0 = arith.constant 0 : i32
    return %arg0, %c0_i32 : i32, i32
  }
}

module attributes {stable_mosaic.version = 11 : i64} {
  func.func @_nin_block_kernel(%arg0: i32, %arg1: i32, %arg2: memref<8x384xbf16, #tpu.memory_space<vmem>>, %arg3: memref<384x128xbf16, #tpu.memory_space<vmem>>, %arg4: memref<128x128xbf16, #tpu.memory_space<vmem>>, %arg5: memref<128x128xbf16, #tpu.memory_space<vmem>>, %arg6: memref<8x128xf32, #tpu.memory_space<vmem>>, %arg7: memref<8x128xbf16, #tpu.memory_space<vmem>>, %arg8: memref<8x128xf32, #tpu.memory_space<vmem>>) attributes {dimension_semantics = [#tpu.dimension_semantics<parallel>, #tpu.dimension_semantics<arbitrary>], iteration_bounds = array<i64: 1, 9>, scalar_prefetch = 0 : i64, scratch_operands = 1 : i64, tpu.core_type = #tpu.core_type<tc>, window_params = [{transform_indices = @transform_0, window_bounds = array<i64: 8, 384>}, {transform_indices = @transform_1, window_bounds = array<i64: 384, 128>}, {pipeline_mode = #tpu.pipeline_mode<synchronous>, transform_indices = @transform_2, window_bounds = array<i64: 128, 128>}, {pipeline_mode = #tpu.pipeline_mode<synchronous>, transform_indices = @transform_3, window_bounds = array<i64: 128, 128>}, {pipeline_mode = #tpu.pipeline_mode<synchronous>, transform_indices = @transform_4, window_bounds = array<i64: 8, 128>}, {transform_indices = @transform_5, window_bounds = array<i64: 8, 128>}]} {
    %c0_i32 = arith.constant 0 : i32
    %0 = arith.cmpi eq, %arg1, %c0_i32 : i32
    %1 = arith.extui %0 : i1 to i32
    %c0_i32_0 = arith.constant 0 : i32
    %2 = arith.cmpi ne, %1, %c0_i32_0 : i32
    scf.if %2 {
      %cst_9 = arith.constant 0.000000e+00 : f32
      %12 = vector.broadcast %cst_9 : f32 to vector<8x128xf32>
      %c0_10 = arith.constant 0 : index
      %c0_11 = arith.constant 0 : index
      %13 = vector.load %arg8[%c0_10, %c0_11] : memref<8x128xf32, #tpu.memory_space<vmem>>, vector<8x128xf32>
      tpu.vector_store %arg8[%c0_10, %c0_11], %12 {strides = array<i32>} : memref<8x128xf32, #tpu.memory_space<vmem>>, vector<8x128xf32>,
    } else {
    }
    %c0 = arith.constant 0 : index
    %c0_1 = arith.constant 0 : index
    %3 = vector.load %arg8[%c0, %c0_1] : memref<8x128xf32, #tpu.memory_space<vmem>>, vector<8x128xf32>
    %c0_2 = arith.constant 0 : index
    %c0_3 = arith.constant 0 : index
    %4 = vector.load %arg2[%c0_2, %c0_3] : memref<8x384xbf16, #tpu.memory_space<vmem>>, vector<8x384xbf16>
    %c0_4 = arith.constant 0 : index
    %c0_5 = arith.constant 0 : index
    %5 = vector.load %arg3[%c0_4, %c0_5] : memref<384x128xbf16, #tpu.memory_space<vmem>>, vector<384x128xbf16>
    %cst = arith.constant dense<0.000000e+00> : vector<8x128xf32>
    %6 = tpu.matmul %4, %5, %cst {dimension_numbers = #tpu.dot_dimension_numbers<[1], [0], [0], [1], [0, 0, 1, 1], [], []>} : vector<8x384xbf16>, vector<384x128xbf16>, vector<8x128xf32> -> vector<8x128xf32>
    %7 = arith.addf %3, %6 : vector<8x128xf32>
    %c0_6 = arith.constant 0 : index
    %c0_7 = arith.constant 0 : index
    %8 = vector.load %arg8[%c0_6, %c0_7] : memref<8x128xf32, #tpu.memory_space<vmem>>, vector<8x128xf32>
    tpu.vector_store %arg8[%c0_6, %c0_7], %7 {strides = array<i32>} : memref<8x128xf32, #tpu.memory_space<vmem>>, vector<8x128xf32>,
    %c8_i32 = arith.constant 8 : i32
    %9 = arith.cmpi eq, %arg1, %c8_i32 : i32
    %10 = arith.extui %9 : i1 to i32
    %c0_i32_8 = arith.constant 0 : i32
    %11 = arith.cmpi ne, %10, %c0_i32_8 : i32
    scf.if %11 {
      %c0_9 = arith.constant 0 : index
      %c0_10 = arith.constant 0 : index
      %12 = vector.load %arg8[%c0_9, %c0_10] : memref<8x128xf32, #tpu.memory_space<vmem>>, vector<8x128xf32>
      %c0_11 = arith.constant 0 : index
      %c0_12 = arith.constant 0 : index
      %13 = vector.load %arg6[%c0_11, %c0_12] : memref<8x128xf32, #tpu.memory_space<vmem>>, vector<1x128xf32>
      %14 = vector.broadcast %13 : vector<1x128xf32> to vector<8x128xf32>
      %15 = arith.mulf %12, %14 : vector<8x128xf32>
      %c1 = arith.constant 1 : index
      %c0_13 = arith.constant 0 : index
      %16 = vector.load %arg6[%c1, %c0_13] : memref<8x128xf32, #tpu.memory_space<vmem>>, vector<1x128xf32>
      %17 = vector.broadcast %16 : vector<1x128xf32> to vector<8x128xf32>
      %18 = arith.addf %15, %17 : vector<8x128xf32>
      %cst_14 = arith.constant 0.000000e+00 : f32
      %19 = vector.broadcast %cst_14 : f32 to vector<8x128xf32>
      %20 = arith.maximumf %18, %19 : vector<8x128xf32>
      %21 = arith.truncf %20 : vector<8x128xf32> to vector<8x128xbf16>
      %c0_15 = arith.constant 0 : index
      %c0_16 = arith.constant 0 : index
      %22 = vector.load %arg4[%c0_15, %c0_16] : memref<128x128xbf16, #tpu.memory_space<vmem>>, vector<128x128xbf16>
      %cst_17 = arith.constant dense<0.000000e+00> : vector<8x128xf32>
      %23 = tpu.matmul %21, %22, %cst_17 {dimension_numbers = #tpu.dot_dimension_numbers<[1], [0], [0], [1], [0, 0, 1, 1], [], []>} : vector<8x128xbf16>, vector<128x128xbf16>, vector<8x128xf32> -> vector<8x128xf32>
      %c2 = arith.constant 2 : index
      %c0_18 = arith.constant 0 : index
      %24 = vector.load %arg6[%c2, %c0_18] : memref<8x128xf32, #tpu.memory_space<vmem>>, vector<1x128xf32>
      %25 = vector.broadcast %24 : vector<1x128xf32> to vector<8x128xf32>
      %26 = arith.mulf %23, %25 : vector<8x128xf32>
      %c3 = arith.constant 3 : index
      %c0_19 = arith.constant 0 : index
      %27 = vector.load %arg6[%c3, %c0_19] : memref<8x128xf32, #tpu.memory_space<vmem>>, vector<1x128xf32>
      %28 = vector.broadcast %27 : vector<1x128xf32> to vector<8x128xf32>
      %29 = arith.addf %26, %28 : vector<8x128xf32>
      %cst_20 = arith.constant 0.000000e+00 : f32
      %30 = vector.broadcast %cst_20 : f32 to vector<8x128xf32>
      %31 = arith.maximumf %29, %30 : vector<8x128xf32>
      %32 = arith.truncf %31 : vector<8x128xf32> to vector<8x128xbf16>
      %c0_21 = arith.constant 0 : index
      %c0_22 = arith.constant 0 : index
      %33 = vector.load %arg5[%c0_21, %c0_22] : memref<128x128xbf16, #tpu.memory_space<vmem>>, vector<128x128xbf16>
      %cst_23 = arith.constant dense<0.000000e+00> : vector<8x128xf32>
      %34 = tpu.matmul %32, %33, %cst_23 {dimension_numbers = #tpu.dot_dimension_numbers<[1], [0], [0], [1], [0, 0, 1, 1], [], []>} : vector<8x128xbf16>, vector<128x128xbf16>, vector<8x128xf32> -> vector<8x128xf32>
      %c4 = arith.constant 4 : index
      %c0_24 = arith.constant 0 : index
      %35 = vector.load %arg6[%c4, %c0_24] : memref<8x128xf32, #tpu.memory_space<vmem>>, vector<1x128xf32>
      %36 = vector.broadcast %35 : vector<1x128xf32> to vector<8x128xf32>
      %37 = arith.mulf %34, %36 : vector<8x128xf32>
      %c5 = arith.constant 5 : index
      %c0_25 = arith.constant 0 : index
      %38 = vector.load %arg6[%c5, %c0_25] : memref<8x128xf32, #tpu.memory_space<vmem>>, vector<1x128xf32>
      %39 = vector.broadcast %38 : vector<1x128xf32> to vector<8x128xf32>
      %40 = arith.addf %37, %39 : vector<8x128xf32>
      %cst_26 = arith.constant 0.000000e+00 : f32
      %41 = vector.broadcast %cst_26 : f32 to vector<8x128xf32>
      %42 = arith.maximumf %40, %41 : vector<8x128xf32>
      %43 = arith.truncf %42 : vector<8x128xf32> to vector<8x128xbf16>
      %c0_27 = arith.constant 0 : index
      %c0_28 = arith.constant 0 : index
      %44 = vector.load %arg7[%c0_27, %c0_28] : memref<8x128xbf16, #tpu.memory_space<vmem>>, vector<8x128xbf16>
      tpu.vector_store %arg7[%c0_27, %c0_28], %43 {strides = array<i32>} : memref<8x128xbf16, #tpu.memory_space<vmem>>, vector<8x128xbf16>,
    } else {
    }
    return
  }
  func.func @transform_0(%arg0: i32, %arg1: i32) -> (i32, i32) {
    %c0_i32 = arith.constant 0 : i32
    return %arg0, %arg1 : i32, i32
  }
  func.func @transform_1(%arg0: i32, %arg1: i32) -> (i32, i32) {
    %c0_i32 = arith.constant 0 : i32
    %c0_i32_0 = arith.constant 0 : i32
    return %arg1, %c0_i32 : i32, i32
  }
  func.func @transform_2(%arg0: i32, %arg1: i32) -> (i32, i32) {
    %c0_i32 = arith.constant 0 : i32
    %c0_i32_0 = arith.constant 0 : i32
    %c0_i32_1 = arith.constant 0 : i32
    return %c0_i32, %c0_i32_0 : i32, i32
  }
  func.func @transform_3(%arg0: i32, %arg1: i32) -> (i32, i32) {
    %c0_i32 = arith.constant 0 : i32
    %c0_i32_0 = arith.constant 0 : i32
    %c0_i32_1 = arith.constant 0 : i32
    return %c0_i32, %c0_i32_0 : i32, i32
  }
  func.func @transform_4(%arg0: i32, %arg1: i32) -> (i32, i32) {
    %c0_i32 = arith.constant 0 : i32
    %c0_i32_0 = arith.constant 0 : i32
    %c0_i32_1 = arith.constant 0 : i32
    return %c0_i32, %c0_i32_0 : i32, i32
  }
  func.func @transform_5(%arg0: i32, %arg1: i32) -> (i32, i32) {
    %c0_i32 = arith.constant 0 : i32
    %c0_i32_0 = arith.constant 0 : i32
    return %arg0, %c0_i32 : i32, i32
  }
}

module attributes {stable_mosaic.version = 11 : i64} {
  func.func @_avgpool_kernel(%arg0: i32, %arg1: memref<2x8x128xbf16, #tpu.memory_space<vmem>>, %arg2: memref<2x128xf32, #tpu.memory_space<vmem>>) attributes {dimension_semantics = [#tpu.dimension_semantics<arbitrary>], iteration_bounds = array<i64: 1>, scalar_prefetch = 0 : i64, scratch_operands = 0 : i64, tpu.core_type = #tpu.core_type<tc>, window_params = [{pipeline_mode = #tpu.pipeline_mode<synchronous>, transform_indices = @transform_0, window_bounds = array<i64: 2, 8, 128>}, {pipeline_mode = #tpu.pipeline_mode<synchronous>, transform_indices = @transform_1, window_bounds = array<i64: 2, 128>}]} {
    %c0 = arith.constant 0 : index
    %c0_0 = arith.constant 0 : index
    %c0_1 = arith.constant 0 : index
    %0 = vector.load %arg1[%c0, %c0_0, %c0_1] : memref<2x8x128xbf16, #tpu.memory_space<vmem>>, vector<2x8x128xbf16>
    %1 = arith.extf %0 : vector<2x8x128xbf16> to vector<2x8x128xf32>
    %cst = arith.constant dense<0.000000e+00> : vector<2x128xf32>
    %2 = vector.multi_reduction <add>, %1, %cst [1] : vector<2x8x128xf32> to vector<2x128xf32>
    %cst_2 = arith.constant 1.000000e+00 : f32
    %3 = vector.broadcast %cst_2 : f32 to vector<2x128xf32>
    %4 = arith.mulf %2, %3 : vector<2x128xf32>
    %c0_3 = arith.constant 0 : index
    %c0_4 = arith.constant 0 : index
    %5 = vector.load %arg2[%c0_3, %c0_4] : memref<2x128xf32, #tpu.memory_space<vmem>>, vector<2x128xf32>
    tpu.vector_store %arg2[%c0_3, %c0_4], %4 {strides = array<i32>} : memref<2x128xf32, #tpu.memory_space<vmem>>, vector<2x128xf32>,
    return
  }
  func.func @transform_0(%arg0: i32) -> (i32, i32, i32) {
    %c0_i32 = arith.constant 0 : i32
    %c0_i32_0 = arith.constant 0 : i32
    %c0_i32_1 = arith.constant 0 : i32
    %c0_i32_2 = arith.constant 0 : i32
    return %c0_i32, %c0_i32_0, %c0_i32_1 : i32, i32, i32
  }
  func.func @transform_1(%arg0: i32) -> (i32, i32) {
    %c0_i32 = arith.constant 0 : i32
    %c0_i32_0 = arith.constant 0 : i32
    %c0_i32_1 = arith.constant 0 : i32
    return %c0_i32, %c0_i32_0 : i32, i32
  }
}

</mosaic_0001>

<bundles_post_ra>
// kernel: nin_forward.8
= control target key start
LH: loop header
LB: loop body
LE: loop exit
PB: predicated region body
PF: predicated region fallthrough
CT: control target
= control target key end

     0   :  { %s2671_s18 = smov 0   ;;  %s2673_s19 = smov 0   ;;  %s3241_s0 = inlined_call_operand.vmem [shape: bf16[512,384], index: 0, kind: input, shape index: {}]   ;;  %s3242_s1 = inlined_call_operand.vmem [shape: bf16[384,128], index: 1, kind: input, shape index: {}]   ;;  %s3243_s2 = inlined_call_operand.vmem [shape: bf16[128,128], index: 2, kind: input, shape index: {}]   ;;  %s3244_s3 = inlined_call_operand.vmem [shape: bf16[128,128], index: 3, kind: input, shape index: {}]   ;;  %s3245_s4 = inlined_call_operand.vmem [shape: f32[8,128], index: 4, kind: input, shape index: {}]   ;;  %s3246_s5 = inlined_call_operand.vmem [shape: bf16[512,128], index: 5, kind: output, shape index: {}]  }
   0x1   :  { %s2675_s20 = smov 0  }
   0x2 LB: > { %s27_s21 = sadd.s32 1, %s2635_s19  ;;  %p2020_p0 = scmp.ge.s32.totalorder %s2639_s20, 1  ;;  %s2639_s20 = sphi %s2675_s20, %s15_s20   ;;  %s2635_s19 = sphi %s2673_s19, %s3248_s19   ;;  %s2631_s18 = sphi %s2671_s18, %s3247_s18  }
   0x3   : > { %p29_p1 = scmp.ge.s32.totalorder %s27_s21, 2  ;;  %p219_p2 = scmp.lt.s32.totalorder %s2639_s20, 3 }
   0x5   : > { %s3250_s21 = smov (%p29_p1, %s27_s21), 0  ;;  %p220_p3 = pnand %p2020_p0, %p219_p2 }
   0x6   : > { %s2021_s28 = sshll.u32 (!%p220_p3), %s2631_s18, 5 }
   0x7   : > { %223 = sbr.rel (%p220_p3) target bundleno = 789 (0x315), region = 40  ;;  %p259_p4 = scmp.lt.s32.totalorder (!%p220_p3), %s2021_s28, 63 }
   0xc   : > { %v2434_v0 = vld [vmem:[%s3242_s1 + $0x38] sm:$0xff]  ;;  %v2433_v1 = vld [vmem:[%s3242_s1 + $0x30] sm:$0xff]  ;;  %v2432_v2 = vld [vmem:[%s3242_s1 + $0x28] sm:$0xff]  ;;  %s3252_s28 = smov (!%p259_p4, %s2021_s28), 63 }
   0xd   : > { %2562 = vmatpush.bf16.msra.mxu1 %v2434_v0  ;;  %2563 = vmatpush.bf16.msra.mxu2 %v2434_v0  ;;  %v2431_v3 = vld [vmem:[%s3242_s1 + $0x20] sm:$0xff]  ;;  %v2430_v4 = vld [vmem:[%s3242_s1 + $0x18] sm:$0xff]  ;;  %v2429_v5 = vld [vmem:[%s3242_s1 + $0x10] sm:$0xff]  ;;  %s2586_s10 = smul.u32 12, %s3252_s28  ;;  %s2024_s12 = sshll.u32 %s3252_s28, 2 }
   0xe   : > { %861 = vmatpush.bf16.msra.mxu0 %v2434_v0  ;;  %2564 = vmatpush.bf16.msra.mxu3 %v2434_v0  ;;  %v2428_v6 = vld [vmem:[%s3242_s1 + $0x8] sm:$0xff]  ;;  %v2427_v7 = vld [vmem:[%s3242_s1] sm:$0xff]  ;;  %v2450_v12 = vld [vmem:[%s3242_s1 + $0xb8] sm:$0xff]  ;;  %s3130_s16 = scalar_lea.vmem %s3246_s5, %s2024_s12 }
   0xf   : > { %s2719_s15 = scalar_lea.vmem %s3241_s0, %s2586_s10  ;;  %v2442_v13 = vld [vmem:[%s3242_s1 + $0x78] sm:$0xff]  ;;  %v2449_v16 = vld [vmem:[%s3242_s1 + $0xb0] sm:$0xff]  ;;  %v2448_v18 = vld [vmem:[%s3242_s1 + $0xa8] sm:$0xff] }
  0x10   : > { %v2075_v8 = vld [vmem:[%s2719_s15 + $0x60] sm:$0xf]  ;;  %v2392_v9 = vld [vmem:[%s2719_s15 + $0x68] sm:$0xf0]  ;;  %v2441_v17 = vld [vmem:[%s3242_s1 + $0x70] sm:$0xff] }
  0x11   : > { %2565 = vmatpush.bf16.msra.mxu1 %v2433_v1  ;;  %2566 = vmatpush.bf16.msra.mxu2 %v2433_v1  ;;  %v2123_v10 = vld [vmem:[%s2719_s15 + $0xc0] sm:$0xf]  ;;  %v2404_v11 = vld [vmem:[%s2719_s15 + $0xc8] sm:$0xf0]  ;;  %v2076_v14 = vor.u32 %v2392_v9, %v2075_v8  ;;  %v2087_v22 = vld [vmem:[%s2719_s15 + $0x78] sm:$0xf] }
  0x12   : > { %862 = vmatpush.bf16.msra.mxu0 %v2433_v1  ;;  %2567 = vmatpush.bf16.msra.mxu3 %v2433_v1  ;;  %v2124_v15 = vor.u32 %v2404_v11, %v2123_v10  ;;  %v2440_v19 = vld [vmem:[%s3242_s1 + $0x68] sm:$0xff]  ;;  %v2447_v20 = vld [vmem:[%s3242_s1 + $0xa0] sm:$0xff]  ;;  %v2135_v24 = vld [vmem:[%s2719_s15 + $0xd8] sm:$0xf] }
  0x13   : > { %v2439_v21 = vld [vmem:[%s3242_s1 + $0x60] sm:$0xff]  ;;  %v2446_v26 = vld [vmem:[%s3242_s1 + $0x98] sm:$0xff]  ;;  %v2445_v30 = vld [vmem:[%s3242_s1 + $0x90] sm:$0xff] }
  0x14   : > { %v2395_v23 = vld [vmem:[%s2719_s15 + $0x80] sm:$0xf0]  ;;  %v2438_v27 = vld [vmem:[%s3242_s1 + $0x58] sm:$0xff]  ;;  %v2437_v31 = vld [vmem:[%s3242_s1 + $0x50] sm:$0xff] }
  0x15   : > { %2568 = vmatpush.bf16.msra.mxu1 %v2432_v2  ;;  %2569 = vmatpush.bf16.msra.mxu2 %v2432_v2  ;;  %v2407_v25 = vld [vmem:[%s2719_s15 + $0xe0] sm:$0xf0]  ;;  %v2088_v28 = vor.u32 %v2395_v23, %v2087_v22  ;;  %v2027_v32 = vld [vmem:[%s2719_s15] sm:$0xf]  ;;  %v2380_v33 = vld [vmem:[%s2719_s15 + $0x8] sm:$0xf0] }
  0x16   : > { %863 = vmatpush.bf16.msra.mxu0 %v2432_v2  ;;  %2570 = vmatpush.bf16.msra.mxu3 %v2432_v2  ;;  %v2136_v29 = vor.u32 %v2407_v25, %v2135_v24  ;;  %v2444_v34 = vld [vmem:[%s3242_s1 + $0x88] sm:$0xff]  ;;  %v2028_v36 = vor.u32 %v2380_v33, %v2027_v32  ;;  %v2443_v37 = vld [vmem:[%s3242_s1 + $0x80] sm:$0xff]  ;;  %v2099_v39 = vld [vmem:[%s2719_s15 + $0x90] sm:$0xf] }
  0x17   : > { %v2436_v35 = vld [vmem:[%s3242_s1 + $0x48] sm:$0xff]  ;;  %v2435_v38 = vld [vmem:[%s3242_s1 + $0x40] sm:$0xff]  ;;  %v2398_v40 = vld [vmem:[%s2719_s15 + $0x98] sm:$0xf0] }
  0x18   : > { %v2147_v41 = vld [vmem:[%s2719_s15 + $0xf0] sm:$0xf]  ;;  %v2410_v42 = vld [vmem:[%s2719_s15 + $0xf8] sm:$0xf0]  ;;  %v2100_v43 = vor.u32 %v2398_v40, %v2099_v39  ;;  %v2039_v45 = vld [vmem:[%s2719_s15 + $0x18] sm:$0xf] }
  0x19   : > { %2571 = vmatpush.bf16.msra.mxu1 %v2431_v3  ;;  %2572 = vmatpush.bf16.msra.mxu2 %v2431_v3  ;;  %v2148_v44 = vor.u32 %v2410_v42, %v2147_v41  ;;  %v2383_v46 = vld [vmem:[%s2719_s15 + $0x20] sm:$0xf0]  ;;  %v2111_v48 = vld [vmem:[%s2719_s15 + $0xa8] sm:$0xf]  ;;  %v2401_v49 = vld [vmem:[%s2719_s15 + $0xb0] sm:$0xf0] }
  0x1a   : > { %864 = vmatpush.bf16.msra.mxu0 %v2431_v3  ;;  %2573 = vmatpush.bf16.msra.mxu3 %v2431_v3  ;;  %v2040_v47 = vor.u32 %v2383_v46, %v2039_v45  ;;  %v2159_v50 = vld [vmem:[%s2719_s15 + $0x108] sm:$0xf]  ;;  %v2413_v51 = vld [vmem:[%s2719_s15 + $0x110] sm:$0xf0]  ;;  %v2112_v52 = vor.u32 %v2401_v49, %v2111_v48  ;;  %v2051_v54 = vld [vmem:[%s2719_s15 + $0x30] sm:$0xf] }
  0x1b   : > { %v2160_v53 = vor.u32 %v2413_v51, %v2159_v50  ;;  %v2386_v55 = vld [vmem:[%s2719_s15 + $0x38] sm:$0xf0]  ;;  %v2379_v57 = vld [vmem:[%s2719_s15 + $0x4] sm:$0xf]  ;;  %v2029_v58 = vld [vmem:[%s2719_s15 + $0xc] sm:$0xf0] }
  0x1c   : > { %v2052_v56 = vor.u32 %v2386_v55, %v2051_v54  ;;  %v2035_v59 = vld [vmem:[%s2719_s15 + $0x8] sm:$0xf]  ;;  %v2381_v60 = vld [vmem:[%s2719_s15 + $0x10] sm:$0xf0]  ;;  %v2032_v61 = vor.u32 %v2379_v57, %v2029_v58  ;;  %v2382_v2 = vld [vmem:[%s2719_s15 + $0x1c] sm:$0xf] }
  0x1d   : > { %2574 = vmatpush.bf16.msra.mxu1 %v2430_v4  ;;  %2575 = vmatpush.bf16.msra.mxu2 %v2430_v4  ;;  %v2036_v62 = vor.u32 %v2381_v60, %v2035_v59  ;;  %v2063_v63 = vld [vmem:[%s2719_s15 + $0x48] sm:$0xf]  ;;  %v2389_v0 = vld [vmem:[%s2719_s15 + $0x50] sm:$0xf0]  ;;  %v2053_v9 = vld [vmem:[%s2719_s15 + $0x3c] sm:$0xf0] }
  0x1e   : > { %865 = vmatpush.bf16.msra.mxu0 %v2430_v4  ;;  %2576 = vmatpush.bf16.msra.mxu3 %v2430_v4  ;;  %v2064_v1 = vor.u32 %v2389_v0, %v2063_v63  ;;  %v2041_v3 = vld [vmem:[%s2719_s15 + $0x24] sm:$0xf0]  ;;  %v2047_v4 = vld [vmem:[%s2719_s15 + $0x20] sm:$0xf]  ;;  %v2385_v8 = vld [vmem:[%s2719_s15 + $0x34] sm:$0xf] }
  0x1f   : > { %v2059_v10 = vld [vmem:[%s2719_s15 + $0x38] sm:$0xf]  ;;  %v2387_v11 = vld [vmem:[%s2719_s15 + $0x40] sm:$0xf0]  ;;  %v2077_v25 = vld [vmem:[%s2719_s15 + $0x6c] sm:$0xf0] }
  0x20   : > { %v2458_v23 = vld [vmem:[%s3243_s2 + $0x38] sm:$0xff]  ;;  %v2391_v24 = vld [vmem:[%s2719_s15 + $0x64] sm:$0xf]  ;;  %v2089_v39 = vld [vmem:[%s2719_s15 + $0x84] sm:$0xf0] }
  0x21   : > { %2577 = vmatpush.bf16.msra.mxu1 %v2429_v5  ;;  %2578 = vmatpush.bf16.msra.mxu2 %v2429_v5  ;;  %v2095_v40 = vld [vmem:[%s2719_s15 + $0x80] sm:$0xf]  ;;  %v2396_v41 = vld [vmem:[%s2719_s15 + $0x88] sm:$0xf0]  ;;  %v2107_v55 = vld [vmem:[%s2719_s15 + $0x98] sm:$0xf] }
  0x22   : > { %866 = vmatpush.bf16.msra.mxu0 %v2429_v5  ;;  %2579 = vmatpush.bf16.msra.mxu3 %v2429_v5  ;;  %v2384_v5 = vld [vmem:[%s2719_s15 + $0x28] sm:$0xf0]  ;;  %v2096_v46 = vor.u32 %v2396_v41, %v2095_v40  ;;  %v2455_v49 = vld [vmem:[%s3243_s2 + $0x20] sm:$0xff]  ;;  %v2207_v58 = vld [vmem:[%s2719_s15 + $0x168] sm:$0xf] }
  0x23   : > { %v2101_v54 = vld [vmem:[%s2719_s15 + $0x9c] sm:$0xf0]  ;;  %v2425_v59 = vld [vmem:[%s2719_s15 + $0x170] sm:$0xf0] }
  0x24   : > { %v2453_v0 = vld [vmem:[%s3243_s2 + $0x10] sm:$0xff] }
  0x25   : > { %2580 = vmatpush.bf16.msra.mxu1 %v2428_v6  ;;  %2581 = vmatpush.bf16.msra.mxu2 %v2428_v6 }
  0x26   : > { %867 = vmatpush.bf16.msra.mxu0 %v2428_v6  ;;  %2582 = vmatpush.bf16.msra.mxu3 %v2428_v6  ;;  %v2044_v6 = vor.u32 %v2382_v2, %v2041_v3  ;;  %v2400_v3 = vld [vmem:[%s2719_s15 + $0xac] sm:$0xf] }
  0x29   : > { %2583 = vmatpush.bf16.msra.mxu1 %v2427_v7  ;;  %2584 = vmatpush.bf16.msra.mxu2 %v2427_v7 }
  0x2a   : > { %868 = vmatpush.bf16.msra.mxu0 %v2427_v7  ;;  %2585 = vmatpush.bf16.msra.mxu3 %v2427_v7  ;;  %v2048_v7 = vor.u32 %v2384_v5, %v2047_v4  ;;  %v2113_v4 = vld [vmem:[%s2719_s15 + $0xb4] sm:$0xf0]  ;;  %v2119_v5 = vld [vmem:[%s2719_s15 + $0xb0] sm:$0xf] }
  0x2c   : > { %889 = vmatmul.bf16.vlgmr.msra.gmra.mxu1 %v2076_v14  ;;  %909 = vmatmul.bf16.vlgmr.msra.gmra.mxu2 %v2124_v15  ;;  %v2388_v14 = vld [vmem:[%s2719_s15 + $0x4c] sm:$0xf]  ;;  %v2065_v15 = vld [vmem:[%s2719_s15 + $0x54] sm:$0xf0] }
  0x2d   : > { %1039 = vmatpush.bf16.msrb.mxu2 %v2450_v12  ;;  %950 = vmatpush.bf16.msrb.mxu1 %v2442_v13  ;;  %v2056_v12 = vor.u32 %v2385_v8, %v2053_v9  ;;  %v2060_v13 = vor.u32 %v2387_v11, %v2059_v10  ;;  %v2116_v9 = vor.u32 %v2400_v3, %v2113_v4  ;;  %v2155_v3 = vld [vmem:[%s2719_s15 + $0xf8] sm:$0xf]  ;;  %v2411_v4 = vld [vmem:[%s2719_s15 + $0x100] sm:$0xf0] }
  0x2e   : > { %869 = vmatmul.bf16.vlgmr.msra.gmra.mxu0 %v2028_v36  ;;  %1407 = vmatpush.bf16.msrb.mxu3 %v2458_v23 }
  0x31   : > { %1040 = vmatpush.bf16.msrb.mxu2 %v2449_v16  ;;  %951 = vmatpush.bf16.msrb.mxu1 %v2441_v17  ;;  %v2071_v16 = vld [vmem:[%s2719_s15 + $0x50] sm:$0xf]  ;;  %v2390_v17 = vld [vmem:[%s2719_s15 + $0x58] sm:$0xf0] }
  0x35   : > { %1041 = vmatpush.bf16.msrb.mxu2 %v2448_v18  ;;  %952 = vmatpush.bf16.msrb.mxu1 %v2440_v19  ;;  %v2171_v18 = vld [vmem:[%s2719_s15 + $0x120] sm:$0xf]  ;;  %v2416_v19 = vld [vmem:[%s2719_s15 + $0x128] sm:$0xf0] }
  0x36   : > { %v2172_v22 = vor.u32 %v2416_v19, %v2171_v18  ;;  %v2131_v18 = vld [vmem:[%s2719_s15 + $0xc8] sm:$0xf]  ;;  %v2405_v19 = vld [vmem:[%s2719_s15 + $0xd0] sm:$0xf0] }
  0x38   : > { %929 = vmatmul.bf16.vlgmr.msra.gmra.mxu3 %v2172_v22  ;;  %v2132_v22 = vor.u32 %v2405_v19, %v2131_v18 }
  0x39   : > { %1042 = vmatpush.bf16.msrb.mxu2 %v2447_v20  ;;  %953 = vmatpush.bf16.msrb.mxu1 %v2439_v21  ;;  %v2068_v20 = vor.u32 %v2388_v14, %v2065_v15  ;;  %v2072_v21 = vor.u32 %v2390_v17, %v2071_v16  ;;  %v2403_v16 = vld [vmem:[%s2719_s15 + $0xc4] sm:$0xf]  ;;  %v2125_v17 = vld [vmem:[%s2719_s15 + $0xcc] sm:$0xf0] }
  0x3c   : > { %894 = vmatmul.bf16.gmra.mxu1 %v2088_v28  ;;  %914 = vmatmul.bf16.gmra.mxu2 %v2136_v29  ;;  %v2183_v28 = vld [vmem:[%s2719_s15 + $0x138] sm:$0xf]  ;;  %v2419_v29 = vld [vmem:[%s2719_s15 + $0x140] sm:$0xf0] }
  0x3d   : > { %1043 = vmatpush.bf16.msrb.mxu2 %v2446_v26  ;;  %954 = vmatpush.bf16.msrb.mxu1 %v2438_v27  ;;  %v2083_v26 = vld [vmem:[%s2719_s15 + $0x68] sm:$0xf]  ;;  %v2393_v27 = vld [vmem:[%s2719_s15 + $0x70] sm:$0xf0]  ;;  %v2184_v32 = vor.u32 %v2419_v29, %v2183_v28  ;;  %v2899_v29 = vld [vmem:[%s3245_s4] ss:$0 sm:$0xff] }
  0x3e   : > { %874 = vmatmul.bf16.gmra.mxu0 %v2040_v47 }
  0x41   : > { %1044 = vmatpush.bf16.msrb.mxu2 %v2445_v30  ;;  %955 = vmatpush.bf16.msrb.mxu1 %v2437_v31  ;;  %v2080_v30 = vor.u32 %v2391_v24, %v2077_v25  ;;  %v2084_v31 = vor.u32 %v2393_v27, %v2083_v26 }
  0x45   : > { %1045 = vmatpush.bf16.msrb.mxu2 %v2444_v34  ;;  %956 = vmatpush.bf16.msrb.mxu1 %v2436_v35  ;;  %v2457_v34 = vld [vmem:[%s3243_s2 + $0x30] sm:$0xff] }
  0x46   : > { %1408 = vmatpush.bf16.msrb.mxu3 %v2457_v34  ;;  %v2143_v34 = vld [vmem:[%s2719_s15 + $0xe0] sm:$0xf] }
  0x48   : > { %934 = vmatmul.bf16.gmra.mxu3 %v2184_v32  ;;  %v2137_v32 = vld [vmem:[%s2719_s15 + $0xe4] sm:$0xf0] }
  0x49   : > { %1046 = vmatpush.bf16.msrb.mxu2 %v2443_v37  ;;  %957 = vmatpush.bf16.msrb.mxu1 %v2435_v38  ;;  %v2456_v37 = vld [vmem:[%s3243_s2 + $0x28] sm:$0xff]  ;;  %v2394_v38 = vld [vmem:[%s2719_s15 + $0x7c] sm:$0xf] }
  0x4a   : > { %1409 = vmatpush.bf16.msrb.mxu3 %v2456_v37  ;;  %v2092_v45 = vor.u32 %v2394_v38, %v2089_v39  ;;  %v2408_v37 = vld [vmem:[%s2719_s15 + $0xe8] sm:$0xf0]  ;;  %v2909_v39 = vld [vmem:[%s3245_s4 + $0x1] ss:$0 sm:$0xff] }
  0x4c   : > { %899 = vmatmul.bf16.gmra.mxu1 %v2100_v43  ;;  %919 = vmatmul.bf16.gmra.mxu2 %v2148_v44  ;;  %v2195_v43 = vld [vmem:[%s2719_s15 + $0x150] sm:$0xf]  ;;  %v2422_v44 = vld [vmem:[%s2719_s15 + $0x158] sm:$0xf0] }
  0x4d   : > { %v2196_v47 = vor.u32 %v2422_v44, %v2195_v43 }
  0x4e   : > { %879 = vmatmul.bf16.gmra.mxu0 %v2052_v56  ;;  %1410 = vmatpush.bf16.msrb.mxu3 %v2455_v49  ;;  %v2399_v56 = vld [vmem:[%s2719_s15 + $0xa0] sm:$0xf0] }
  0x58   : > { %939 = vmatmul.bf16.gmra.mxu3 %v2196_v47 }
  0x5c   : > { %904 = vmatmul.bf16.gmra.mxu1 %v2112_v52  ;;  %924 = vmatmul.bf16.gmra.mxu2 %v2160_v53  ;;  %v2454_v52 = vld [vmem:[%s3243_s2 + $0x18] sm:$0xff]  ;;  %v2397_v53 = vld [vmem:[%s2719_s15 + $0x94] sm:$0xf] }
  0x5d   : > { %1411 = vmatpush.bf16.msrb.mxu3 %v2454_v52  ;;  %v2104_v60 = vor.u32 %v2397_v53, %v2101_v54 }
  0x5e   : > { %884 = vmatmul.bf16.gmra.mxu0 %v2064_v1 }
  0x61   : > { %1412 = vmatpush.bf16.msrb.mxu3 %v2453_v0  ;;  %v2149_v0 = vld [vmem:[%s2719_s15 + $0xfc] sm:$0xf0] }
  0x6c   : > { %958 = vmatmul.bf16.vlgmr.msrb.gmra.mxu1 %v2032_v61  ;;  %1047 = vmatmul.bf16.vlgmr.msrb.gmra.mxu2 %v2036_v62  ;;  %v2108_v61 = vor.u32 %v2399_v56, %v2107_v55  ;;  %v2208_v62 = vor.u32 %v2425_v59, %v2207_v58 }
  0x6e   : > { %944 = vmatmul.bf16.gmra.mxu3 %v2208_v62  ;;  %v2409_v62 = vld [vmem:[%s2719_s15 + $0xf4] sm:$0xf] }
  0x7c   : > { %963 = vmatmul.bf16.gmra.mxu1 %v2044_v6  ;;  %1052 = vmatmul.bf16.gmra.mxu2 %v2048_v7  ;;  %v2402_v6 = vld [vmem:[%s2719_s15 + $0xb8] sm:$0xf0]  ;;  %v2452_v7 = vld [vmem:[%s3243_s2 + $0x8] sm:$0xff] }
  0x7d   : > { %v2120_v10 = vor.u32 %v2402_v6, %v2119_v5  ;;  %1413 = vmatpush.bf16.msrb.mxu3 %v2452_v7 }
  0x8c   : > { %968 = vmatmul.bf16.gmra.mxu1 %v2056_v12  ;;  %1057 = vmatmul.bf16.gmra.mxu2 %v2060_v13  ;;  %v2451_v12 = vld [vmem:[%s3243_s2] sm:$0xff] }
  0x8d   : > { %1414 = vmatpush.bf16.msrb.mxu3 %v2451_v12  ;;  %v2152_v12 = vor.u32 %v2409_v62, %v2149_v0  ;;  %v2173_v0 = vld [vmem:[%s2719_s15 + $0x12c] sm:$0xf0] }
  0x9c   : > { %973 = vmatmul.bf16.gmra.mxu1 %v2068_v20  ;;  %1062 = vmatmul.bf16.gmra.mxu2 %v2072_v21  ;;  %v2128_v21 = vor.u32 %v2403_v16, %v2125_v17 }
  0xa9   : > { %v2823_v33 = vpop.f32.mrf.mxu1 }
  0xab   : > { %v870_v14 = vpop.f32.mrf.mxu0 }
  0xac   : > { %978 = vmatmul.bf16.gmra.mxu1 %v2080_v30  ;;  %1067 = vmatmul.bf16.gmra.mxu2 %v2084_v31  ;;  %v2406_v31 = vld [vmem:[%s2719_s15 + $0xdc] sm:$0xf] }
  0xad   : > { %v2140_v44 = vor.u32 %v2406_v31, %v2137_v32  ;;  %v2161_v31 = vld [vmem:[%s2719_s15 + $0x114] sm:$0xf0]  ;;  %v2167_v32 = vld [vmem:[%s2719_s15 + $0x110] sm:$0xf] }
  0xaf   : > { %v2828_v35 = vpop.f32.mrf.mxu2 }
  0xb1   : > { %v2830_v36 = vpop.f32.mrf.mxu1 }
  0xb3   : > { %v872_v24 = vpop.f32.mrf.mxu0 }
  0xb7   : > { %v2839_v42 = vpop.f32.mrf.mxu2 }
  0xb9   : > { %v2843_v48 = vpop.f32.mrf.mxu1 }
  0xbb   : > { %v875_v30 = vpop.f32.mrf.mxu0 }
  0xbc   : > { %983 = vmatmul.bf16.gmra.mxu1 %v2092_v45  ;;  %1072 = vmatmul.bf16.gmra.mxu2 %v2096_v46  ;;  %v2144_v45 = vor.u32 %v2408_v37, %v2143_v34  ;;  %v2414_v34 = vld [vmem:[%s2719_s15 + $0x118] sm:$0xf0] }
  0xbf   : > { %v2848_v50 = vpop.f32.mrf.mxu2 }
  0xc1   : > { %v2850_v51 = vpop.f32.mrf.mxu1 }
  0xc3   : > { %v877_v53 = vpop.f32.mrf.mxu0 }
  0xc7   : > { %v2859_v57 = vpop.f32.mrf.mxu2 }
  0xc9   : > { %v2863_v63 = vpop.f32.mrf.mxu1 }
  0xcb   : > { %v880_v7 = vpop.f32.mrf.mxu0 }
  0xcc   : > { %988 = vmatmul.bf16.gmra.mxu1 %v2104_v60  ;;  %1077 = vmatmul.bf16.gmra.mxu2 %v2108_v61 }
  0xcf   : > { %v2868_v1 = vpop.f32.mrf.mxu2 }
  0xd1   : > { %v2870_v2 = vpop.f32.mrf.mxu1 }
  0xd7   : > { %v2879_v8 = vpop.f32.mrf.mxu2 }
  0xd9   : > { %v2881_v11 = vpop.f32.mrf.mxu1 }
  0xdc   : > { %993 = vmatmul.bf16.gmra.mxu1 %v2116_v9  ;;  %1082 = vmatmul.bf16.gmra.mxu2 %v2120_v10 }
  0xdf   : > { %v2886_v13 = vpop.f32.mrf.mxu2 }
  0xe1   : > { %v2888_v15 = vpop.f32.mrf.mxu1 }
  0xe7   : > { %v2894_v20 = vpop.f32.mrf.mxu2 }
  0xe9   : > { %v959_v23 = vpop.f32.mrf.mxu1 }
  0xea   : > { %v960_v25 = vadd.f32 %v959_v23, %v870_v14  ;;  %v2156_v14 = vor.u32 %v2411_v4, %v2155_v3  ;;  %v2179_v3 = vld [vmem:[%s2719_s15 + $0x128] sm:$0xf]  ;;  %v2417_v4 = vld [vmem:[%s2719_s15 + $0x130] sm:$0xf0] }
  0xec   : > { %998 = vmatmul.bf16.gmra.mxu1 %v2128_v21  ;;  %1087 = vmatmul.bf16.gmra.mxu2 %v2132_v22 }
  0xef   : > { %v1048_v26 = vpop.f32.mrf.mxu2 }
  0xf0   : > { %v1049_v28 = vadd.f32 %v1048_v26, %v960_v25  ;;  %v882_v26 = vpop.f32.mrf.mxu0 }
  0xf1   : > { %v961_v27 = vpop.f32.mrf.mxu1 }
  0xf2   : > { %v1229_v38 = vmul.f32 %v2899_v29, %v1049_v28  ;;  %v962_v40 = vadd.f32 %v961_v27, %v872_v24 }
  0xf4   : > { %v1263_v47 = vadd.f32 %v2909_v39, %v1229_v38 }
  0xf6   : > { %v1295_v54 = vmax.f32 %v1263_v47, 0.0 }
  0xf7   : > { %v1050_v41 = vpop.f32.mrf.mxu2 }
  0xf8   : > { %v1051_v43 = vadd.f32 %v1050_v41, %v962_v40 }
  0xf9   : > { %v964_v46 = vpop.f32.mrf.mxu1 }
  0xfa   : > { %v1230_v49 = vmul.f32 %v2899_v29, %v1051_v43  ;;  %v965_v55 = vadd.f32 %v964_v46, %v875_v30  ;;  %v2412_v30 = vld [vmem:[%s2719_s15 + $0x10c] sm:$0xf] }
  0xfb   : > { %v2164_v43 = vor.u32 %v2412_v30, %v2161_v31  ;;  %v2185_v30 = vld [vmem:[%s2719_s15 + $0x144] sm:$0xf0]  ;;  %v2191_v31 = vld [vmem:[%s2719_s15 + $0x140] sm:$0xf] }
  0xfc   : > { %v1264_v52 = vadd.f32 %v2909_v39, %v1230_v49  ;;  %1003 = vmatmul.bf16.gmra.mxu1 %v2140_v44  ;;  %1092 = vmatmul.bf16.gmra.mxu2 %v2144_v45  ;;  %v2168_v44 = vor.u32 %v2414_v34, %v2167_v32  ;;  %v885_v49 = vpop.f32.mrf.mxu0  ;;  %v2420_v32 = vld [vmem:[%s2719_s15 + $0x148] sm:$0xf0] }
  0xfe   : > { %v1296_v56 = vmax.f32 %v1264_v52, 0.0 }
  0xff   : > { %v1053_v58 = vpop.f32.mrf.mxu2 }
 0x100   : > { %v1327_v59 = vpack.c.bf16 %v1296_v56, %v1295_v54  ;;  %v1054_v61 = vadd.f32 %v1053_v58, %v965_v55 }
 0x101   : > { %v966_v60 = vpop.f32.mrf.mxu1 }
 0x102   : > { %1415 = vmatmul.bf16.vlgmr.msrb.gmra.mxu3 %v1327_v59  ;;  %v1231_v5 = vmul.f32 %v2899_v29, %v1054_v61  ;;  %v967_v6 = vadd.f32 %v966_v60, %v877_v53  ;;  %v2415_v61 = vld [vmem:[%s2719_s15 + $0x124] sm:$0xf] }
 0x104   : > { %v1265_v18 = vadd.f32 %v2909_v39, %v1231_v5  ;;  %v887_v62 = vpop.f32.mrf.mxu0 }
 0x106   : > { %v1297_v22 = vmax.f32 %v1265_v18, 0.0 }
 0x107   : > { %v1055_v9 = vpop.f32.mrf.mxu2 }
 0x108   : > { %v1056_v10 = vadd.f32 %v1055_v9, %v967_v6 }
 0x109   : > { %v969_v16 = vpop.f32.mrf.mxu1 }
 0x10a   : > { %v1232_v17 = vmul.f32 %v2899_v29, %v1056_v10  ;;  %v970_v21 = vadd.f32 %v969_v16, %v880_v7  ;;  %v2176_v10 = vor.u32 %v2415_v61, %v2173_v0  ;;  %v2421_v61 = vld [vmem:[%s2719_s15 + $0x154] sm:$0xf]  ;;  %v2203_v0 = vld [vmem:[%s2719_s15 + $0x158] sm:$0xf] }
 0x10c   : > { %1008 = vmatmul.bf16.gmra.mxu1 %v2152_v12  ;;  %1097 = vmatmul.bf16.gmra.mxu2 %v2156_v14  ;;  %v1266_v19 = vadd.f32 %v2909_v39, %v1232_v17  ;;  %v2180_v12 = vor.u32 %v2417_v4, %v2179_v3  ;;  %v2423_v3 = vld [vmem:[%s2719_s15 + $0x160] sm:$0xf0] }
 0x10e   : > { %v1298_v23 = vmax.f32 %v1266_v19, 0.0 }
 0x10f   : > { %v1058_v24 = vpop.f32.mrf.mxu2 }
 0x110   : > { %v1328_v25 = vpack.c.bf16 %v1298_v23, %v1297_v22  ;;  %v1059_v28 = vadd.f32 %v1058_v24, %v970_v21 }
 0x111   : > { %v971_v27 = vpop.f32.mrf.mxu1 }
 0x112   : > { %1420 = vmatmul.bf16.gmra.mxu3 %v1328_v25  ;;  %v1233_v37 = vmul.f32 %v2899_v29, %v1059_v28  ;;  %v972_v38 = vadd.f32 %v971_v27, %v882_v26  ;;  %v2466_v27 = vld [vmem:[%s3244_s3 + $0x38] sm:$0xff] }
 0x113   : > { %v2418_v28 = vld [vmem:[%s2719_s15 + $0x13c] sm:$0xf]  ;;  %1676 = vmatpush.bf16.msrb.mxu0 %v2466_v27 }
 0x114   : > { %v1267_v47 = vadd.f32 %v2909_v39, %v1233_v37 }
 0x116   : > { %v1299_v54 = vmax.f32 %v1267_v47, 0.0 }
 0x117   : > { %v1060_v40 = vpop.f32.mrf.mxu2 }
 0x118   : > { %v1061_v41 = vadd.f32 %v1060_v40, %v972_v38  ;;  %v2948_v40 = vpop.f32.mrf.mxu3 }
 0x119   : > { %v974_v45 = vpop.f32.mrf.mxu1 }
 0x11a   : > { %v1234_v46 = vmul.f32 %v2899_v29, %v1061_v41  ;;  %v975_v53 = vadd.f32 %v974_v45, %v885_v49  ;;  %v2188_v41 = vor.u32 %v2418_v28, %v2185_v30  ;;  %v2209_v28 = vld [vmem:[%s2719_s15 + $0x174] sm:$0xf0]  ;;  %v2215_v30 = vld [vmem:[%s2719_s15 + $0x170] sm:$0xf] }
 0x11c   : > { %1013 = vmatmul.bf16.gmra.mxu1 %v2164_v43  ;;  %1102 = vmatmul.bf16.gmra.mxu2 %v2168_v44  ;;  %v1268_v52 = vadd.f32 %v2909_v39, %v1234_v46  ;;  %v2192_v43 = vor.u32 %v2420_v32, %v2191_v31  ;;  %v2426_v31 = vld [vmem:[%s2719_s15 + $0x178] sm:$0xf0] }
 0x11e   : > { %v1300_v55 = vmax.f32 %v1268_v52, 0.0 }
 0x11f   : > { %v1063_v56 = vpop.f32.mrf.mxu2 }
 0x120   : > { %v1329_v58 = vpack.c.bf16 %v1300_v55, %v1299_v54  ;;  %v1064_v60 = vadd.f32 %v1063_v56, %v975_v53 }
 0x121   : > { %v976_v59 = vpop.f32.mrf.mxu1 }
 0x122   : > { %1425 = vmatmul.bf16.gmra.mxu3 %v1329_v58  ;;  %v1235_v5 = vmul.f32 %v2899_v29, %v1064_v60  ;;  %v977_v6 = vadd.f32 %v976_v59, %v887_v62  ;;  %v2957_v58 = vpop.f32.mrf.mxu3  ;;  %v2464_v60 = vld [vmem:[%s3244_s3 + $0x28] sm:$0xff]  ;;  %v2197_v62 = vld [vmem:[%s2719_s15 + $0x15c] sm:$0xf0] }
 0x124   : > { %v1269_v17 = vadd.f32 %v2909_v39, %v1235_v5 }
 0x126   : > { %v1301_v19 = vmax.f32 %v1269_v17, 0.0 }
 0x127   : > { %v1065_v7 = vpop.f32.mrf.mxu2 }
 0x128   : > { %v1066_v9 = vadd.f32 %v1065_v7, %v977_v6  ;;  %v2200_v7 = vor.u32 %v2421_v61, %v2197_v62 }
 0x129   : > { %v979_v14 = vpop.f32.mrf.mxu1 }
 0x12a   : > { %v1236_v16 = vmul.f32 %v2899_v29, %v1066_v9  ;;  %v980_v23 = vadd.f32 %v979_v14, %v2823_v33  ;;  %v2204_v9 = vor.u32 %v2423_v3, %v2203_v0  ;;  %v2973_v17 = vpop.f32.mrf.mxu3 }
 0x12c   : > { %1018 = vmatmul.bf16.gmra.mxu1 %v2176_v10  ;;  %1107 = vmatmul.bf16.gmra.mxu2 %v2180_v12  ;;  %v1270_v18 = vadd.f32 %v2909_v39, %v1236_v16  ;;  %v2463_v16 = vld [vmem:[%s3244_s3 + $0x20] sm:$0xff] }
 0x12e   : > { %v1302_v21 = vmax.f32 %v1270_v18, 0.0 }
 0x12f   : > { %v1068_v22 = vpop.f32.mrf.mxu2 }
 0x130   : > { %v1330_v24 = vpack.c.bf16 %v1302_v21, %v1301_v19  ;;  %v1069_v26 = vadd.f32 %v1068_v22, %v980_v23 }
 0x131   : > { %v981_v25 = vpop.f32.mrf.mxu1 }
 0x132   : > { %1430 = vmatmul.bf16.gmra.mxu3 %v1330_v24  ;;  %v1237_v34 = vmul.f32 %v2899_v29, %v1069_v26  ;;  %v982_v37 = vadd.f32 %v981_v25, %v2830_v36  ;;  %v2465_v36 = vld [vmem:[%s3244_s3 + $0x30] sm:$0xff]  ;;  %v2424_v26 = vld [vmem:[%s2719_s15 + $0x16c] sm:$0xf]  ;;  %v2978_v27 = vpop.f32.mrf.mxu3 }
 0x133   : > { %1677 = vmatpush.bf16.msrb.mxu0 %v2465_v36  ;;  %v2461_v36 = vld [vmem:[%s3244_s3 + $0x10] sm:$0xff] }
 0x134   : > { %v1271_v46 = vadd.f32 %v2909_v39, %v1237_v34 }
 0x136   : > { %v1303_v49 = vmax.f32 %v1271_v46, 0.0 }
 0x137   : > { %v1070_v38 = vpop.f32.mrf.mxu2  ;;  %1678 = vmatpush.bf16.msrb.mxu0 %v2464_v60 }
 0x138   : > { %v1071_v33 = vadd.f32 %v1070_v38, %v982_v37  ;;  %v2462_v37 = vld [vmem:[%s3244_s3 + $0x18] sm:$0xff] }
 0x139   : > { %v984_v44 = vpop.f32.mrf.mxu1 }
 0x13a   : > { %v1238_v45 = vmul.f32 %v2899_v29, %v1071_v33  ;;  %v985_v54 = vadd.f32 %v984_v44, %v2843_v48  ;;  %v2212_v33 = vor.u32 %v2424_v26, %v2209_v28 }
 0x13b   : > { %1679 = vmatpush.bf16.msrb.mxu0 %v2463_v16 }
 0x13c   : > { %1023 = vmatmul.bf16.gmra.mxu1 %v2188_v41  ;;  %1112 = vmatmul.bf16.gmra.mxu2 %v2192_v43  ;;  %v1272_v47 = vadd.f32 %v2909_v39, %v1238_v45  ;;  %v2216_v41 = vor.u32 %v2426_v31, %v2215_v30 }
 0x13e   : > { %v1304_v52 = vmax.f32 %v1272_v47, 0.0 }
 0x13f   : > { %v1073_v53 = vpop.f32.mrf.mxu2  ;;  %1680 = vmatpush.bf16.msrb.mxu0 %v2462_v37 }
 0x140   : > { %v1331_v55 = vpack.c.bf16 %v1304_v52, %v1303_v49  ;;  %v1074_v59 = vadd.f32 %v1073_v53, %v985_v54  ;;  %v2994_v49 = vpop.f32.mrf.mxu3 }
 0x141   : > { %v986_v56 = vpop.f32.mrf.mxu1 }
 0x142   : > { %1435 = vmatmul.bf16.gmra.mxu3 %v1331_v55  ;;  %v1239_v4 = vmul.f32 %v2899_v29, %v1074_v59  ;;  %v987_v5 = vadd.f32 %v986_v56, %v2850_v51 }
 0x143   : > { %1681 = vmatpush.bf16.msrb.mxu0 %v2461_v36 }
 0x144   : > { %v1273_v14 = vadd.f32 %v2909_v39, %v1239_v4 }
 0x146   : > { %v1305_v18 = vmax.f32 %v1273_v14, 0.0  ;;  %v2459_v14 = vld [vmem:[%s3244_s3] sm:$0xff] }
 0x147   : > { %v1075_v48 = vpop.f32.mrf.mxu2 }
 0x148   : > { %v1076_v6 = vadd.f32 %v1075_v48, %v987_v5  ;;  %v2999_v0 = vpop.f32.mrf.mxu3 }
 0x149   : > { %v989_v10 = vpop.f32.mrf.mxu1 }
 0x14a   : > { %v1240_v12 = vmul.f32 %v2899_v29, %v1076_v6  ;;  %v990_v22 = vadd.f32 %v989_v10, %v2863_v63 }
 0x14c   : > { %1028 = vmatmul.bf16.gmra.mxu1 %v2200_v7  ;;  %1117 = vmatmul.bf16.gmra.mxu2 %v2204_v9  ;;  %v1274_v51 = vadd.f32 %v2909_v39, %v1240_v12 }
 0x14e   : > { %v1306_v19 = vmax.f32 %v1274_v51, 0.0 }
 0x14f   : > { %v1078_v21 = vpop.f32.mrf.mxu2 }
 0x150   : > { %v1332_v23 = vpack.c.bf16 %v1306_v19, %v1305_v18  ;;  %v1079_v25 = vadd.f32 %v1078_v21, %v990_v22  ;;  %v3011_v51 = vpop.f32.mrf.mxu3 }
 0x151   : > { %v991_v24 = vpop.f32.mrf.mxu1 }
 0x152   : > { %1440 = vmatmul.bf16.gmra.mxu3 %v1332_v23  ;;  %v1241_v32 = vmul.f32 %v2899_v29, %v1079_v25  ;;  %v992_v34 = vadd.f32 %v991_v24, %v2870_v2 }
 0x154   : > { %v1275_v45 = vadd.f32 %v2909_v39, %v1241_v32 }
 0x156   : > { %v1307_v47 = vmax.f32 %v1275_v45, 0.0 }
 0x157   : > { %v1080_v38 = vpop.f32.mrf.mxu2 }
 0x158   : > { %v1081_v63 = vadd.f32 %v1080_v38, %v992_v34  ;;  %v3018_v26 = vpop.f32.mrf.mxu3 }
 0x159   : > { %v994_v43 = vpop.f32.mrf.mxu1 }
 0x15a   : > { %v1242_v44 = vmul.f32 %v2899_v29, %v1081_v63  ;;  %v995_v53 = vadd.f32 %v994_v43, %v2881_v11  ;;  %v2460_v11 = vld [vmem:[%s3244_s3 + $0x8] sm:$0xff] }
 0x15b   : > { %1682 = vmatpush.bf16.msrb.mxu0 %v2460_v11 }
 0x15c   : > { %1033 = vmatmul.bf16.gmra.mxu1 %v2212_v33  ;;  %1122 = vmatmul.bf16.gmra.mxu2 %v2216_v41  ;;  %v1276_v46 = vadd.f32 %v2909_v39, %v1242_v44  ;;  %v3026_v41 = vld [vmem:[%s3245_s4 + $0x2] ss:$0 sm:$0xff] }
 0x15e   : > { %v1308_v2 = vmax.f32 %v1276_v46, 0.0 }
 0x15f   : > { %v1083_v52 = vpop.f32.mrf.mxu2  ;;  %1683 = vmatpush.bf16.msrb.mxu0 %v2459_v14 }
 0x160   : > { %v1333_v54 = vpack.c.bf16 %v1308_v2, %v1307_v47  ;;  %v1084_v56 = vadd.f32 %v1083_v52, %v995_v53  ;;  %v3033_v47 = vld [vmem:[%s3245_s4 + $0x3] ss:$0 sm:$0xff] }
 0x161   : > { %v996_v55 = vpop.f32.mrf.mxu1 }
 0x162   : > { %1445 = vmatmul.bf16.gmra.mxu3 %v1333_v54  ;;  %v1243_v59 = vmul.f32 %v2899_v29, %v1084_v56  ;;  %v997_v60 = vadd.f32 %v996_v55, %v2888_v15 }
 0x164   : > { %v1277_v5 = vadd.f32 %v2909_v39, %v1243_v59 }
 0x166   : > { %v1309_v6 = vmax.f32 %v1277_v5, 0.0 }
 0x167   : > { %v1085_v61 = vpop.f32.mrf.mxu2 }
 0x168   : > { %v1086_v62 = vadd.f32 %v1085_v61, %v997_v60 }
 0x169   : > { %v999_v3 = vpop.f32.mrf.mxu1 }
 0x16a   : > { %v1244_v4 = vmul.f32 %v2899_v29, %v1086_v62  ;;  %v1000_v15 = vadd.f32 %v999_v3, %v2828_v35 }
 0x16c   : > { %v1278_v48 = vadd.f32 %v2909_v39, %v1244_v4 }
 0x16e   : > { %v1310_v7 = vmax.f32 %v1278_v48, 0.0 }
 0x16f   : > { %v1088_v9 = vpop.f32.mrf.mxu2 }
 0x170   : > { %v1334_v10 = vpack.c.bf16 %v1310_v7, %v1309_v6  ;;  %v1089_v16 = vadd.f32 %v1088_v9, %v1000_v15 }
 0x171   : > { %v1001_v12 = vpop.f32.mrf.mxu1 }
 0x172   : > { %1450 = vmatmul.bf16.gmra.mxu3 %v1334_v10  ;;  %v1245_v18 = vmul.f32 %v2899_v29, %v1089_v16  ;;  %v1002_v19 = vadd.f32 %v1001_v12, %v2839_v42 }
 0x174   : > { %v1279_v35 = vadd.f32 %v2909_v39, %v1245_v18 }
 0x176   : > { %v1311_v28 = vmax.f32 %v1279_v35, 0.0 }
 0x177   : > { %v1090_v21 = vpop.f32.mrf.mxu2 }
 0x178   : > { %v1091_v22 = vadd.f32 %v1090_v21, %v1002_v19 }
 0x179   : > { %v1004_v23 = vpop.f32.mrf.mxu1 }
 0x17a   : > { %v1246_v24 = vmul.f32 %v2899_v29, %v1091_v22  ;;  %v1005_v32 = vadd.f32 %v1004_v23, %v2848_v50 }
 0x17c   : > { %v1280_v25 = vadd.f32 %v2909_v39, %v1246_v24 }
 0x17e   : > { %v1312_v30 = vmax.f32 %v1280_v25, 0.0 }
 0x17f   : > { %v1093_v31 = vpop.f32.mrf.mxu2 }
 0x180   : > { %v1335_v34 = vpack.c.bf16 %v1312_v30, %v1311_v28  ;;  %v1094_v38 = vadd.f32 %v1093_v31, %v1005_v32 }
 0x181   : > { %v1006_v37 = vpop.f32.mrf.mxu1 }
 0x182   : > { %1455 = vmatmul.bf16.gmra.mxu3 %v1335_v34  ;;  %v1247_v63 = vmul.f32 %v2899_v29, %v1094_v38  ;;  %v1007_v33 = vadd.f32 %v1006_v37, %v2859_v57 }
 0x184   : > { %v1281_v46 = vadd.f32 %v2909_v39, %v1247_v63 }
 0x185   : > { %v1416_v42 = vpop.f32.mrf.mxu3 }
 0x186   : > { %v1498_v50 = vmul.f32 %v3026_v41, %v1416_v42  ;;  %v1313_v52 = vmax.f32 %v1281_v46, 0.0 }
 0x187   : > { %v1095_v43 = vpop.f32.mrf.mxu2 }
 0x188   : > { %v1096_v44 = vadd.f32 %v1095_v43, %v1007_v33  ;;  %v1532_v53 = vadd.f32 %v3033_v47, %v1498_v50 }
 0x189   : > { %v1009_v45 = vpop.f32.mrf.mxu1 }
 0x18a   : > { %v1248_v2 = vmul.f32 %v2899_v29, %v1096_v44  ;;  %v1010_v59 = vadd.f32 %v1009_v45, %v2868_v1  ;;  %v1564_v3 = vmax.f32 %v1532_v53, 0.0 }
 0x18c   : > { %v1282_v57 = vadd.f32 %v2909_v39, %v1248_v2 }
 0x18d   : > { %v1418_v36 = vpop.f32.mrf.mxu3 }
 0x18e   : > { %v1314_v54 = vmax.f32 %v1282_v57, 0.0  ;;  %v1499_v55 = vmul.f32 %v3026_v41, %v1418_v36 }
 0x18f   : > { %v1098_v56 = vpop.f32.mrf.mxu2 }
 0x190   : > { %v1533_v60 = vadd.f32 %v3033_v47, %v1499_v55  ;;  %v1336_v61 = vpack.c.bf16 %v1314_v54, %v1313_v52  ;;  %v1099_v5 = vadd.f32 %v1098_v56, %v1010_v59 }
 0x191   : > { %v1011_v62 = vpop.f32.mrf.mxu1 }
 0x192   : > { %v1565_v4 = vmax.f32 %v1533_v60, 0.0  ;;  %1460 = vmatmul.bf16.gmra.mxu3 %v1336_v61  ;;  %v1249_v6 = vmul.f32 %v2899_v29, %v1099_v5  ;;  %v1012_v7 = vadd.f32 %v1011_v62, %v2879_v8 }
 0x194   : > { %v1596_v11 = vpack.c.bf16 %v1565_v4, %v1564_v3  ;;  %v1283_v1 = vadd.f32 %v2909_v39, %v1249_v6 }
 0x195   : > { %v1421_v48 = vpop.f32.mrf.mxu3 }
 0x196   : > { %1684 = vmatmul.bf16.vlgmr.msrb.gmra.mxu0 %v1596_v11  ;;  %v1500_v12 = vmul.f32 %v3026_v41, %v1421_v48  ;;  %v1315_v19 = vmax.f32 %v1283_v1, 0.0 }
 0x197   : > { %v1100_v9 = vpop.f32.mrf.mxu2 }
 0x198   : > { %v1101_v15 = vadd.f32 %v1100_v9, %v1012_v7  ;;  %v1534_v21 = vadd.f32 %v3033_v47, %v1500_v12 }
 0x199   : > { %v1014_v10 = vpop.f32.mrf.mxu1 }
 0x19a   : > { %v1250_v14 = vmul.f32 %v2899_v29, %v1101_v15  ;;  %v1015_v35 = vadd.f32 %v1014_v10, %v2886_v13  ;;  %v1566_v30 = vmax.f32 %v1534_v21, 0.0 }
 0x19c   : > { %v1284_v16 = vadd.f32 %v2909_v39, %v1250_v14 }
 0x19d   : > { %v1423_v18 = vpop.f32.mrf.mxu3 }
 0x19e   : > { %v1316_v22 = vmax.f32 %v1284_v16, 0.0  ;;  %v1501_v23 = vmul.f32 %v3026_v41, %v1423_v18 }
 0x19f   : > { %v1103_v8 = vpop.f32.mrf.mxu2 }
 0x1a0   : > { %v1535_v24 = vadd.f32 %v3033_v47, %v1501_v23  ;;  %v1337_v25 = vpack.c.bf16 %v1316_v22, %v1315_v19  ;;  %v1104_v31 = vadd.f32 %v1103_v8, %v1015_v35 }
 0x1a1   : > { %v1016_v28 = vpop.f32.mrf.mxu1 }
 0x1a2   : > { %1465 = vmatmul.bf16.gmra.mxu3 %v1337_v25  ;;  %v1567_v32 = vmax.f32 %v1535_v24, 0.0  ;;  %v1251_v38 = vmul.f32 %v2899_v29, %v1104_v31  ;;  %v1017_v42 = vadd.f32 %v1016_v28, %v2894_v20 }
 0x1a4   : > { %v1597_v34 = vpack.c.bf16 %v1567_v32, %v1566_v30  ;;  %v1285_v13 = vadd.f32 %v2909_v39, %v1251_v38 }
 0x1a5   : > { %v1426_v37 = vpop.f32.mrf.mxu3 }
 0x1a6   : > { %1689 = vmatmul.bf16.gmra.mxu0 %v1597_v34  ;;  %v1502_v44 = vmul.f32 %v3026_v41, %v1426_v37  ;;  %v1317_v2 = vmax.f32 %v1285_v13, 0.0 }
 0x1a7   : > { %v1105_v63 = vpop.f32.mrf.mxu2 }
 0x1a8   : > { %v1106_v33 = vadd.f32 %v1105_v63, %v1017_v42  ;;  %v1536_v57 = vadd.f32 %v3033_v47, %v1502_v44 }
 0x1a9   : > { %v1019_v43 = vpop.f32.mrf.mxu1 }
 0x1aa   : > { %v1252_v45 = vmul.f32 %v2899_v29, %v1106_v33  ;;  %v1020_v53 = vadd.f32 %v1019_v43, %v2948_v40  ;;  %v1568_v59 = vmax.f32 %v1536_v57, 0.0 }
 0x1ac   : > { %v1286_v46 = vadd.f32 %v2909_v39, %v1252_v45 }
 0x1ad   : > { %v1428_v50 = vpop.f32.mrf.mxu3 }
 0x1ae   : > { %v1318_v36 = vmax.f32 %v1286_v46, 0.0  ;;  %v1503_v52 = vmul.f32 %v3026_v41, %v1428_v50 }
 0x1af   : > { %v1108_v20 = vpop.f32.mrf.mxu2 }
 0x1b0   : > { %v1537_v54 = vadd.f32 %v3033_v47, %v1503_v52  ;;  %v1338_v55 = vpack.c.bf16 %v1318_v36, %v1317_v2  ;;  %v1109_v60 = vadd.f32 %v1108_v20, %v1020_v53 }
 0x1b1   : > { %v1021_v56 = vpop.f32.mrf.mxu1 }
 0x1b2   : > { %1470 = vmatmul.bf16.gmra.mxu3 %v1338_v55  ;;  %v1569_v61 = vmax.f32 %v1537_v54, 0.0  ;;  %v1253_v4 = vmul.f32 %v2899_v29, %v1109_v60  ;;  %v1022_v5 = vadd.f32 %v1021_v56, %v2957_v58 }
 0x1b4   : > { %v1598_v62 = vpack.c.bf16 %v1569_v61, %v1568_v59  ;;  %v1287_v40 = vadd.f32 %v2909_v39, %v1253_v4 }
 0x1b5   : > { %v1431_v3 = vpop.f32.mrf.mxu3 }
 0x1b6   : > { %1694 = vmatmul.bf16.gmra.mxu0 %v1598_v62  ;;  %v1504_v7 = vmul.f32 %v3026_v41, %v1431_v3  ;;  %v1319_v1 = vmax.f32 %v1287_v40, 0.0 }
 0x1b7   : > { %v1110_v11 = vpop.f32.mrf.mxu2 }
 0x1b8   : > { %v1111_v48 = vadd.f32 %v1110_v11, %v1022_v5  ;;  %v1538_v12 = vadd.f32 %v3033_v47, %v1504_v7 }
 0x1b9   : > { %v1024_v6 = vpop.f32.mrf.mxu1 }
 0x1ba   : > { %v1254_v9 = vmul.f32 %v2899_v29, %v1111_v48  ;;  %v1025_v18 = vadd.f32 %v1024_v6, %v2973_v17  ;;  %v1570_v23 = vmax.f32 %v1538_v12, 0.0 }
 0x1bc   : > { %v1288_v15 = vadd.f32 %v2909_v39, %v1254_v9 }
 0x1bd   : > { %v1433_v10 = vpop.f32.mrf.mxu3 }
 0x1be   : > { %v1320_v14 = vmax.f32 %v1288_v15, 0.0  ;;  %v1505_v16 = vmul.f32 %v3026_v41, %v1433_v10 }
 0x1bf   : > { %v1113_v58 = vpop.f32.mrf.mxu2 }
 0x1c0   : > { %v1539_v19 = vadd.f32 %v3033_v47, %v1505_v16  ;;  %v1339_v21 = vpack.c.bf16 %v1320_v14, %v1319_v1  ;;  %v1114_v8 = vadd.f32 %v1113_v58, %v1025_v18 }
 0x1c1   : > { %v1026_v22 = vpop.f32.mrf.mxu1 }
 0x1c2   : > { %1475 = vmatmul.bf16.gmra.mxu3 %v1339_v21  ;;  %v1571_v35 = vmax.f32 %v1539_v19, 0.0  ;;  %v1255_v28 = vmul.f32 %v2899_v29, %v1114_v8  ;;  %v1027_v30 = vadd.f32 %v1026_v22, %v2978_v27 }
 0x1c4   : > { %v1599_v24 = vpack.c.bf16 %v1571_v35, %v1570_v23  ;;  %v1289_v17 = vadd.f32 %v2909_v39, %v1255_v28 }
 0x1c5   : > { %v1436_v25 = vpop.f32.mrf.mxu3 }
 0x1c6   : > { %1699 = vmatmul.bf16.gmra.mxu0 %v1599_v24  ;;  %v1506_v37 = vmul.f32 %v3026_v41, %v1436_v25  ;;  %v1321_v33 = vmax.f32 %v1289_v17, 0.0 }
 0x1c7   : > { %v1115_v31 = vpop.f32.mrf.mxu2 }
 0x1c8   : > { %v1116_v32 = vadd.f32 %v1115_v31, %v1027_v30  ;;  %v1540_v43 = vadd.f32 %v3033_v47, %v1506_v37 }
 0x1c9   : > { %v1029_v34 = vpop.f32.mrf.mxu1 }
 0x1ca   : > { %v1256_v38 = vmul.f32 %v2899_v29, %v1116_v32  ;;  %v1030_v45 = vadd.f32 %v1029_v34, %v2994_v49  ;;  %v1572_v57 = vmax.f32 %v1540_v43, 0.0 }
 0x1cc   : > { %v1290_v42 = vadd.f32 %v2909_v39, %v1256_v38 }
 0x1cd   : > { %v1438_v63 = vpop.f32.mrf.mxu3 }
 0x1ce   : > { %v1322_v13 = vmax.f32 %v1290_v42, 0.0  ;;  %v1507_v44 = vmul.f32 %v3026_v41, %v1438_v63 }
 0x1cf   : > { %v1118_v27 = vpop.f32.mrf.mxu2 }
 0x1d0   : > { %v1541_v46 = vadd.f32 %v3033_v47, %v1507_v44  ;;  %v1340_v50 = vpack.c.bf16 %v1322_v13, %v1321_v33  ;;  %v1119_v52 = vadd.f32 %v1118_v27, %v1030_v45 }
 0x1d1   : > { %v1031_v2 = vpop.f32.mrf.mxu1 }
 0x1d2   : > { %v1573_v36 = vmax.f32 %v1541_v46, 0.0  ;;  %1480 = vmatmul.bf16.gmra.mxu3 %v1340_v50  ;;  %v1257_v54 = vmul.f32 %v2899_v29, %v1119_v52  ;;  %v1032_v55 = vadd.f32 %v1031_v2, %v2999_v0 }
 0x1d4   : > { %v1600_v20 = vpack.c.bf16 %v1573_v36, %v1572_v57  ;;  %v1291_v49 = vadd.f32 %v2909_v39, %v1257_v54 }
 0x1d5   : > { %v1441_v53 = vpop.f32.mrf.mxu3 }
 0x1d6   : > { %1704 = vmatmul.bf16.gmra.mxu0 %v1600_v20  ;;  %v1508_v61 = vmul.f32 %v3026_v41, %v1441_v53  ;;  %v1323_v5 = vmax.f32 %v1291_v49, 0.0  ;;  %v3111_v20 = vld [vmem:[%s3245_s4 + $0x4] ss:$0 sm:$0xff] }
 0x1d7   : > { %v1120_v56 = vpop.f32.mrf.mxu2 }
 0x1d8   : > { %v1121_v59 = vadd.f32 %v1120_v56, %v1032_v55  ;;  %v1542_v11 = vadd.f32 %v3033_v47, %v1508_v61  ;;  %v3117_v56 = vld [vmem:[%s3245_s4 + $0x5] ss:$0 sm:$0xff] }
 0x1d9   : > { %v1034_v60 = vpop.f32.mrf.mxu1 }
 0x1da   : > { %v1258_v62 = vmul.f32 %v2899_v29, %v1121_v59  ;;  %v1035_v40 = vadd.f32 %v1034_v60, %v3011_v51  ;;  %v1574_v15 = vmax.f32 %v1542_v11, 0.0 }
 0x1dc   : > { %v1292_v3 = vadd.f32 %v2909_v39, %v1258_v62 }
 0x1dd   : > { %v1443_v4 = vpop.f32.mrf.mxu3 }
 0x1de   : > { %v1324_v48 = vmax.f32 %v1292_v3, 0.0  ;;  %v1509_v6 = vmul.f32 %v3026_v41, %v1443_v4 }
 0x1df   : > { %v1123_v0 = vpop.f32.mrf.mxu2 }
 0x1e0   : > { %v1543_v7 = vadd.f32 %v3033_v47, %v1509_v6  ;;  %v1341_v9 = vpack.c.bf16 %v1324_v48, %v1323_v5  ;;  %v1124_v1 = vadd.f32 %v1123_v0, %v1035_v40 }
 0x1e1   : > { %v1036_v12 = vpop.f32.mrf.mxu1 }
 0x1e2   : > { %v1575_v10 = vmax.f32 %v1543_v7, 0.0  ;;  %1485 = vmatmul.bf16.gmra.mxu3 %v1341_v9  ;;  %v1259_v58 = vmul.f32 %v2899_v29, %v1124_v1  ;;  %v1037_v18 = vadd.f32 %v1036_v12, %v3018_v26 }
 0x1e4   : > { %v1601_v14 = vpack.c.bf16 %v1575_v10, %v1574_v15  ;;  %v1293_v22 = vadd.f32 %v2909_v39, %v1259_v58 }
 0x1e5   : > { %v1446_v16 = vpop.f32.mrf.mxu3 }
 0x1e6   : > { %1709 = vmatmul.bf16.gmra.mxu0 %v1601_v14  ;;  %v1510_v51 = vmul.f32 %v3026_v41, %v1446_v16  ;;  %v1325_v24 = vmax.f32 %v1293_v22, 0.0 }
 0x1e7   : > { %v1125_v19 = vpop.f32.mrf.mxu2 }
 0x1e8   : > { %v1126_v21 = vadd.f32 %v1125_v19, %v1037_v18  ;;  %v1544_v25 = vadd.f32 %v3033_v47, %v1510_v51 }
 0x1ea   : > { %v1260_v23 = vmul.f32 %v2899_v29, %v1126_v21  ;;  %v1576_v32 = vmax.f32 %v1544_v25, 0.0 }
 0x1ec   : > { %v1294_v8 = vadd.f32 %v2909_v39, %v1260_v23 }
 0x1ed   : > { %v1448_v35 = vpop.f32.mrf.mxu3 }
 0x1ee   : > { %v1326_v28 = vmax.f32 %v1294_v8, 0.0  ;;  %v1511_v30 = vmul.f32 %v3026_v41, %v1448_v35 }
 0x1f0   : > { %v1545_v26 = vadd.f32 %v3033_v47, %v1511_v30  ;;  %v1342_v31 = vpack.c.bf16 %v1326_v28, %v1325_v24 }
 0x1f2   : > { %v1577_v34 = vmax.f32 %v1545_v26, 0.0  ;;  %1490 = vmatmul.bf16.gmra.mxu3 %v1342_v31 }
 0x1f4   : > { %v1602_v17 = vpack.c.bf16 %v1577_v34, %v1576_v32 }
 0x1f5   : > { %v1451_v37 = vpop.f32.mrf.mxu3 }
 0x1f6   : > { %1714 = vmatmul.bf16.gmra.mxu0 %v1602_v17  ;;  %v1512_v29 = vmul.f32 %v3026_v41, %v1451_v37 }
 0x1f8   : > { %v1546_v39 = vadd.f32 %v3033_v47, %v1512_v29 }
 0x1fa   : > { %v1578_v33 = vmax.f32 %v1546_v39, 0.0 }
 0x1fd   : > { %v1453_v38 = vpop.f32.mrf.mxu3 }
 0x1fe   : > { %v1513_v42 = vmul.f32 %v3026_v41, %v1453_v38 }
 0x200   : > { %v1547_v63 = vadd.f32 %v3033_v47, %v1513_v42 }
 0x202   : > { %v1579_v43 = vmax.f32 %v1547_v63, 0.0 }
 0x204   : > { %v1603_v13 = vpack.c.bf16 %v1579_v43, %v1578_v33 }
 0x205   : > { %v1456_v44 = vpop.f32.mrf.mxu3 }
 0x206   : > { %1719 = vmatmul.bf16.gmra.mxu0 %v1603_v13  ;;  %v1514_v27 = vmul.f32 %v3026_v41, %v1456_v44 }
 0x208   : > { %v1548_v46 = vadd.f32 %v3033_v47, %v1514_v27 }
 0x20a   : > { %v1580_v57 = vmax.f32 %v1548_v46, 0.0 }
 0x20d   : > { %v1458_v45 = vpop.f32.mrf.mxu3 }
 0x20e   : > { %v1515_v50 = vmul.f32 %v3026_v41, %v1458_v45 }
 0x210   : > { %v1549_v2 = vadd.f32 %v3033_v47, %v1515_v50 }
 0x212   : > { %v1581_v36 = vmax.f32 %v1549_v2, 0.0 }
 0x213   : > { %v1685_v52 = vpop.f32.mrf.mxu0 }
 0x214   : > { %v1604_v53 = vpack.c.bf16 %v1581_v36, %v1580_v57  ;;  %v1767_v55 = vmul.f32 %v3111_v20, %v1685_v52 }
 0x215   : > { %v1461_v54 = vpop.f32.mrf.mxu3 }
 0x216   : > { %1724 = vmatmul.bf16.gmra.mxu0 %v1604_v53  ;;  %v1516_v59 = vmul.f32 %v3026_v41, %v1461_v54  ;;  %v1801_v49 = vadd.f32 %v3117_v56, %v1767_v55 }
 0x218   : > { %v1550_v3 = vadd.f32 %v3033_v47, %v1516_v59  ;;  %v1833_v11 = vmax.f32 %v1801_v49, 0.0 }
 0x21a   : > { %v1582_v0 = vmax.f32 %v1550_v3, 0.0 }
 0x21b   : > { %v1687_v60 = vpop.f32.mrf.mxu0 }
 0x21c   : > { %v1768_v61 = vmul.f32 %v3111_v20, %v1687_v60 }
 0x21d   : > { %v1463_v62 = vpop.f32.mrf.mxu3 }
 0x21e   : > { %v1802_v4 = vadd.f32 %v3117_v56, %v1768_v61  ;;  %v1517_v5 = vmul.f32 %v3026_v41, %v1463_v62 }
 0x220   : > { %v1834_v48 = vmax.f32 %v1802_v4, 0.0  ;;  %v1551_v6 = vadd.f32 %v3033_v47, %v1517_v5 }
 0x222   : > { %v2470_v40 = vpack.c.bf16 %v1834_v48, %v1833_v11  ;;  %v1583_v7 = vmax.f32 %v1551_v6, 0.0 }
 0x223   : > { %v1690_v9 = vpop.f32.mrf.mxu0 }
 0x224   : > { %2471 = vst [vmem:[%s3130_s16] sm:$0xff] %v2470_v40   ;;  %v1605_v15 = vpack.c.bf16 %v1583_v7, %v1582_v0  ;;  %v1769_v1 = vmul.f32 %v3111_v20, %v1690_v9 }
 0x225   : > { %v1466_v10 = vpop.f32.mrf.mxu3 }
 0x226   : > { %1729 = vmatmul.bf16.gmra.mxu0 %v1605_v15  ;;  %v1518_v12 = vmul.f32 %v3026_v41, %v1466_v10  ;;  %v1803_v16 = vadd.f32 %v3117_v56, %v1769_v1 }
 0x228   : > { %v1552_v19 = vadd.f32 %v3033_v47, %v1518_v12  ;;  %v1835_v51 = vmax.f32 %v1803_v16, 0.0 }
 0x22a   : > { %v1584_v35 = vmax.f32 %v1552_v19, 0.0 }
 0x22b   : > { %v1692_v14 = vpop.f32.mrf.mxu0 }
 0x22c   : > { %v1770_v58 = vmul.f32 %v3111_v20, %v1692_v14 }
 0x22d   : > { %v1468_v18 = vpop.f32.mrf.mxu3 }
 0x22e   : > { %v1804_v21 = vadd.f32 %v3117_v56, %v1770_v58  ;;  %v1519_v22 = vmul.f32 %v3026_v41, %v1468_v18 }
 0x230   : > { %v1836_v23 = vmax.f32 %v1804_v21, 0.0  ;;  %v1553_v8 = vadd.f32 %v3033_v47, %v1519_v22 }
 0x232   : > { %v2475_v24 = vpack.c.bf16 %v1836_v23, %v1835_v51  ;;  %v1585_v25 = vmax.f32 %v1553_v8, 0.0 }
 0x233   : > { %v1695_v28 = vpop.f32.mrf.mxu0 }
 0x234   : > { %2547 = vst [vmem:[%s3130_s16 + $0x8] sm:$0xff] %v2475_v24   ;;  %v1606_v30 = vpack.c.bf16 %v1585_v25, %v1584_v35  ;;  %v1771_v31 = vmul.f32 %v3111_v20, %v1695_v28 }
 0x235   : > { %v1471_v26 = vpop.f32.mrf.mxu3 }
 0x236   : > { %1734 = vmatmul.bf16.gmra.mxu0 %v1606_v30  ;;  %v1520_v32 = vmul.f32 %v3026_v41, %v1471_v26  ;;  %v1805_v17 = vadd.f32 %v3117_v56, %v1771_v31 }
 0x238   : > { %v1554_v38 = vadd.f32 %v3033_v47, %v1520_v32  ;;  %v1837_v63 = vmax.f32 %v1805_v17, 0.0 }
 0x23a   : > { %v1586_v13 = vmax.f32 %v1554_v38, 0.0 }
 0x23b   : > { %v1697_v34 = vpop.f32.mrf.mxu0 }
 0x23c   : > { %v1772_v37 = vmul.f32 %v3111_v20, %v1697_v34 }
 0x23d   : > { %v1473_v29 = vpop.f32.mrf.mxu3 }
 0x23e   : > { %v1806_v39 = vadd.f32 %v3117_v56, %v1772_v37  ;;  %v1521_v42 = vmul.f32 %v3026_v41, %v1473_v29 }
 0x240   : > { %v1838_v33 = vmax.f32 %v1806_v39, 0.0  ;;  %v1555_v43 = vadd.f32 %v3033_v47, %v1521_v42 }
 0x242   : > { %v2480_v44 = vpack.c.bf16 %v1838_v33, %v1837_v63  ;;  %v1587_v27 = vmax.f32 %v1555_v43, 0.0 }
 0x243   : > { %v1700_v45 = vpop.f32.mrf.mxu0 }
 0x244   : > { %2548 = vst [vmem:[%s3130_s16 + $0x10] sm:$0xff] %v2480_v44   ;;  %v1607_v46 = vpack.c.bf16 %v1587_v27, %v1586_v13  ;;  %v1773_v2 = vmul.f32 %v3111_v20, %v1700_v45 }
 0x245   : > { %v1476_v50 = vpop.f32.mrf.mxu3 }
 0x246   : > { %1739 = vmatmul.bf16.gmra.mxu0 %v1607_v46  ;;  %v1522_v57 = vmul.f32 %v3026_v41, %v1476_v50  ;;  %v1807_v52 = vadd.f32 %v3117_v56, %v1773_v2 }
 0x248   : > { %v1556_v55 = vadd.f32 %v3033_v47, %v1522_v57  ;;  %v1839_v49 = vmax.f32 %v1807_v52, 0.0 }
 0x24a   : > { %v1588_v3 = vmax.f32 %v1556_v55, 0.0 }
 0x24b   : > { %v1702_v36 = vpop.f32.mrf.mxu0 }
 0x24c   : > { %v1774_v53 = vmul.f32 %v3111_v20, %v1702_v36 }
 0x24d   : > { %v1478_v54 = vpop.f32.mrf.mxu3 }
 0x24e   : > { %v1808_v59 = vadd.f32 %v3117_v56, %v1774_v53  ;;  %v1523_v60 = vmul.f32 %v3026_v41, %v1478_v54 }
 0x250   : > { %v1840_v61 = vmax.f32 %v1808_v59, 0.0  ;;  %v1557_v62 = vadd.f32 %v3033_v47, %v1523_v60 }
 0x252   : > { %v2485_v4 = vpack.c.bf16 %v1840_v61, %v1839_v49  ;;  %v1589_v5 = vmax.f32 %v1557_v62, 0.0 }
 0x253   : > { %v1705_v11 = vpop.f32.mrf.mxu0 }
 0x254   : > { %2549 = vst [vmem:[%s3130_s16 + $0x18] sm:$0xff] %v2485_v4   ;;  %v1608_v48 = vpack.c.bf16 %v1589_v5, %v1588_v3  ;;  %v1775_v0 = vmul.f32 %v3111_v20, %v1705_v11 }
 0x255   : > { %v1481_v6 = vpop.f32.mrf.mxu3 }
 0x256   : > { %1744 = vmatmul.bf16.gmra.mxu0 %v1608_v48  ;;  %v1524_v40 = vmul.f32 %v3026_v41, %v1481_v6  ;;  %v1809_v9 = vadd.f32 %v3117_v56, %v1775_v0 }
 0x258   : > { %v1558_v1 = vadd.f32 %v3033_v47, %v1524_v40  ;;  %v1841_v16 = vmax.f32 %v1809_v9, 0.0 }
 0x25a   : > { %v1590_v19 = vmax.f32 %v1558_v1, 0.0 }
 0x25b   : > { %v1707_v7 = vpop.f32.mrf.mxu0 }
 0x25c   : > { %v1776_v15 = vmul.f32 %v3111_v20, %v1707_v7 }
 0x25d   : > { %v1483_v10 = vpop.f32.mrf.mxu3 }
 0x25e   : > { %v1810_v12 = vadd.f32 %v3117_v56, %v1776_v15  ;;  %v1525_v14 = vmul.f32 %v3026_v41, %v1483_v10 }
 0x260   : > { %v1842_v58 = vmax.f32 %v1810_v12, 0.0  ;;  %v1559_v18 = vadd.f32 %v3033_v47, %v1525_v14 }
 0x262   : > { %v2490_v21 = vpack.c.bf16 %v1842_v58, %v1841_v16  ;;  %v1591_v22 = vmax.f32 %v1559_v18, 0.0 }
 0x263   : > { %v1710_v51 = vpop.f32.mrf.mxu0 }
 0x264   : > { %2550 = vst [vmem:[%s3130_s16 + $0x20] sm:$0xff] %v2490_v21   ;;  %v1609_v23 = vpack.c.bf16 %v1591_v22, %v1590_v19  ;;  %v1777_v35 = vmul.f32 %v3111_v20, %v1710_v51 }
 0x265   : > { %v1486_v8 = vpop.f32.mrf.mxu3 }
 0x266   : > { %1749 = vmatmul.bf16.gmra.mxu0 %v1609_v23  ;;  %v1526_v24 = vmul.f32 %v3026_v41, %v1486_v8  ;;  %v1811_v28 = vadd.f32 %v3117_v56, %v1777_v35 }
 0x268   : > { %v1560_v31 = vadd.f32 %v3033_v47, %v1526_v24  ;;  %v1843_v17 = vmax.f32 %v1811_v28, 0.0 }
 0x26a   : > { %v1592_v38 = vmax.f32 %v1560_v31, 0.0 }
 0x26b   : > { %v1712_v25 = vpop.f32.mrf.mxu0 }
 0x26c   : > { %v1778_v30 = vmul.f32 %v3111_v20, %v1712_v25 }
 0x26d   : > { %v1488_v26 = vpop.f32.mrf.mxu3 }
 0x26e   : > { %v1812_v32 = vadd.f32 %v3117_v56, %v1778_v30  ;;  %v1527_v34 = vmul.f32 %v3026_v41, %v1488_v26 }
 0x270   : > { %v1844_v37 = vmax.f32 %v1812_v32, 0.0  ;;  %v1561_v29 = vadd.f32 %v3033_v47, %v1527_v34 }
 0x272   : > { %v2495_v39 = vpack.c.bf16 %v1844_v37, %v1843_v17  ;;  %v1593_v42 = vmax.f32 %v1561_v29, 0.0 }
 0x273   : > { %v1715_v63 = vpop.f32.mrf.mxu0 }
 0x274   : > { %2551 = vst [vmem:[%s3130_s16 + $0x28] sm:$0xff] %v2495_v39   ;;  %v1610_v33 = vpack.c.bf16 %v1593_v42, %v1592_v38  ;;  %v1779_v13 = vmul.f32 %v3111_v20, %v1715_v63 }
 0x275   : > { %v1491_v43 = vpop.f32.mrf.mxu3 }
 0x276   : > { %1754 = vmatmul.bf16.gmra.mxu0 %v1610_v33  ;;  %v1528_v44 = vmul.f32 %v3026_v41, %v1491_v43  ;;  %v1813_v45 = vadd.f32 %v3117_v56, %v1779_v13 }
 0x278   : > { %v1562_v2 = vadd.f32 %v3033_v47, %v1528_v44  ;;  %v1845_v52 = vmax.f32 %v1813_v45, 0.0 }
 0x27a   : > { %v1594_v55 = vmax.f32 %v1562_v2, 0.0 }
 0x27b   : > { %v1717_v27 = vpop.f32.mrf.mxu0 }
 0x27c   : > { %v1780_v46 = vmul.f32 %v3111_v20, %v1717_v27 }
 0x27d   : > { %v1493_v50 = vpop.f32.mrf.mxu3 }
 0x27e   : > { %v1814_v57 = vadd.f32 %v3117_v56, %v1780_v46  ;;  %v1529_v36 = vmul.f32 %v3026_v41, %v1493_v50 }
 0x280   : > { %v1846_v53 = vmax.f32 %v1814_v57, 0.0  ;;  %v1563_v54 = vadd.f32 %v3033_v47, %v1529_v36 }
 0x282   : > { %v2500_v59 = vpack.c.bf16 %v1846_v53, %v1845_v52  ;;  %v1595_v60 = vmax.f32 %v1563_v54, 0.0 }
 0x283   : > { %v1720_v49 = vpop.f32.mrf.mxu0 }
 0x284   : > { %2552 = vst [vmem:[%s3130_s16 + $0x30] sm:$0xff] %v2500_v59   ;;  %v1611_v61 = vpack.c.bf16 %v1595_v60, %v1594_v55  ;;  %v1781_v62 = vmul.f32 %v3111_v20, %v1720_v49 }
 0x286   : > { %1759 = vmatmul.bf16.gmra.mxu0 %v1611_v61  ;;  %v1815_v4 = vadd.f32 %v3117_v56, %v1781_v62 }
 0x288   : > { %v1847_v11 = vmax.f32 %v1815_v4, 0.0 }
 0x28b   : > { %v1722_v3 = vpop.f32.mrf.mxu0 }
 0x28c   : > { %v1782_v5 = vmul.f32 %v3111_v20, %v1722_v3 }
 0x28e   : > { %v1816_v41 = vadd.f32 %v3117_v56, %v1782_v5 }
 0x290   : > { %v1848_v47 = vmax.f32 %v1816_v41, 0.0 }
 0x292   : > { %v2505_v48 = vpack.c.bf16 %v1848_v47, %v1847_v11 }
 0x293   : > { %v1725_v6 = vpop.f32.mrf.mxu0 }
 0x294   : > { %2553 = vst [vmem:[%s3130_s16 + $0x38] sm:$0xff] %v2505_v48   ;;  %v1783_v0 = vmul.f32 %v3111_v20, %v1725_v6 }
 0x296   : > { %v1817_v7 = vadd.f32 %v3117_v56, %v1783_v0 }
 0x298   : > { %v1849_v10 = vmax.f32 %v1817_v7, 0.0 }
 0x29b   : > { %v1727_v40 = vpop.f32.mrf.mxu0 }
 0x29c   : > { %v1784_v9 = vmul.f32 %v3111_v20, %v1727_v40 }
 0x29e   : > { %v1818_v15 = vadd.f32 %v3117_v56, %v1784_v9 }
 0x2a0   : > { %v1850_v1 = vmax.f32 %v1818_v15, 0.0 }
 0x2a2   : > { %v2510_v12 = vpack.c.bf16 %v1850_v1, %v1849_v10 }
 0x2a3   : > { %v1730_v14 = vpop.f32.mrf.mxu0 }
 0x2a4   : > { %2554 = vst [vmem:[%s3130_s16 + $0x40] sm:$0xff] %v2510_v12   ;;  %v1785_v16 = vmul.f32 %v3111_v20, %v1730_v14 }
 0x2a6   : > { %v1819_v18 = vadd.f32 %v3117_v56, %v1785_v16 }
 0x2a8   : > { %v1851_v22 = vmax.f32 %v1819_v18, 0.0 }
 0x2ab   : > { %v1732_v58 = vpop.f32.mrf.mxu0 }
 0x2ac   : > { %v1786_v19 = vmul.f32 %v3111_v20, %v1732_v58 }
 0x2ae   : > { %v1820_v21 = vadd.f32 %v3117_v56, %v1786_v19 }
 0x2b0   : > { %v1852_v51 = vmax.f32 %v1820_v21, 0.0 }
 0x2b2   : > { %v2515_v23 = vpack.c.bf16 %v1852_v51, %v1851_v22 }
 0x2b3   : > { %v1735_v8 = vpop.f32.mrf.mxu0 }
 0x2b4   : > { %2555 = vst [vmem:[%s3130_s16 + $0x48] sm:$0xff] %v2515_v23   ;;  %v1787_v35 = vmul.f32 %v3111_v20, %v1735_v8 }
 0x2b6   : > { %v1821_v25 = vadd.f32 %v3117_v56, %v1787_v35 }
 0x2b8   : > { %v1853_v26 = vmax.f32 %v1821_v25, 0.0 }
 0x2bb   : > { %v1737_v24 = vpop.f32.mrf.mxu0 }
 0x2bc   : > { %v1788_v28 = vmul.f32 %v3111_v20, %v1737_v24 }
 0x2be   : > { %v1822_v30 = vadd.f32 %v3117_v56, %v1788_v28 }
 0x2c0   : > { %v1854_v31 = vmax.f32 %v1822_v30, 0.0 }
 0x2c2   : > { %v2520_v32 = vpack.c.bf16 %v1854_v31, %v1853_v26 }
 0x2c3   : > { %v1740_v34 = vpop.f32.mrf.mxu0 }
 0x2c4   : > { %2556 = vst [vmem:[%s3130_s16 + $0x50] sm:$0xff] %v2520_v32   ;;  %v1789_v17 = vmul.f32 %v3111_v20, %v1740_v34 }
 0x2c6   : > { %v1823_v29 = vadd.f32 %v3117_v56, %v1789_v17 }
 0x2c8   : > { %v1855_v42 = vmax.f32 %v1823_v29, 0.0 }
 0x2cb   : > { %v1742_v37 = vpop.f32.mrf.mxu0 }
 0x2cc   : > { %v1790_v38 = vmul.f32 %v3111_v20, %v1742_v37 }
 0x2ce   : > { %v1824_v39 = vadd.f32 %v3117_v56, %v1790_v38 }
 0x2d0   : > { %v1856_v63 = vmax.f32 %v1824_v39, 0.0 }
 0x2d2   : > { %v2525_v33 = vpack.c.bf16 %v1856_v63, %v1855_v42 }
 0x2d3   : > { %v1745_v43 = vpop.f32.mrf.mxu0 }
 0x2d4   : > { %2557 = vst [vmem:[%s3130_s16 + $0x58] sm:$0xff] %v2525_v33   ;;  %v1791_v13 = vmul.f32 %v3111_v20, %v1745_v43 }
 0x2d6   : > { %v1825_v27 = vadd.f32 %v3117_v56, %v1791_v13 }
 0x2d8   : > { %v1857_v50 = vmax.f32 %v1825_v27, 0.0 }
 0x2db   : > { %v1747_v44 = vpop.f32.mrf.mxu0 }
 0x2dc   : > { %v1792_v45 = vmul.f32 %v3111_v20, %v1747_v44 }
 0x2de   : > { %v1826_v46 = vadd.f32 %v3117_v56, %v1792_v45 }
 0x2e0   : > { %v1858_v2 = vmax.f32 %v1826_v46, 0.0 }
 0x2e2   : > { %v2530_v57 = vpack.c.bf16 %v1858_v2, %v1857_v50 }
 0x2e3   : > { %v1750_v36 = vpop.f32.mrf.mxu0 }
 0x2e4   : > { %2558 = vst [vmem:[%s3130_s16 + $0x60] sm:$0xff] %v2530_v57   ;;  %v1793_v52 = vmul.f32 %v3111_v20, %v1750_v36 }
 0x2e6   : > { %v1827_v54 = vadd.f32 %v3117_v56, %v1793_v52 }
 0x2e8   : > { %v1859_v60 = vmax.f32 %v1827_v54, 0.0 }
 0x2eb   : > { %v1752_v53 = vpop.f32.mrf.mxu0 }
 0x2ec   : > { %v1794_v55 = vmul.f32 %v3111_v20, %v1752_v53 }
 0x2ee   : > { %v1828_v59 = vadd.f32 %v3117_v56, %v1794_v55 }
 0x2f0   : > { %v1860_v49 = vmax.f32 %v1828_v59, 0.0 }
 0x2f2   : > { %v2535_v61 = vpack.c.bf16 %v1860_v49, %v1859_v60 }
 0x2f3   : > { %v1755_v62 = vpop.f32.mrf.mxu0 }
 0x2f4   : > { %2559 = vst [vmem:[%s3130_s16 + $0x68] sm:$0xff] %v2535_v61   ;;  %v1795_v3 = vmul.f32 %v3111_v20, %v1755_v62 }
 0x2f6   : > { %v1829_v5 = vadd.f32 %v3117_v56, %v1795_v3 }
 0x2f8   : > { %v1861_v47 = vmax.f32 %v1829_v5, 0.0 }
 0x2fb   : > { %v1757_v4 = vpop.f32.mrf.mxu0 }
 0x2fc   : > { %v1796_v41 = vmul.f32 %v3111_v20, %v1757_v4 }
 0x2fe   : > { %v1830_v11 = vadd.f32 %v3117_v56, %v1796_v41 }
 0x300   : > { %v1862_v48 = vmax.f32 %v1830_v11, 0.0 }
 0x302   : > { %v2540_v6 = vpack.c.bf16 %v1862_v48, %v1861_v47 }
 0x303   : > { %v1760_v0 = vpop.f32.mrf.mxu0 }
 0x304   : > { %2560 = vst [vmem:[%s3130_s16 + $0x70] sm:$0xff] %v2540_v6   ;;  %v1797_v40 = vmul.f32 %v3111_v20, %v1760_v0 }
 0x306   : > { %v1831_v9 = vadd.f32 %v3117_v56, %v1797_v40 }
 0x308   : > { %v1863_v1 = vmax.f32 %v1831_v9, 0.0 }
 0x30b   : > { %v1762_v7 = vpop.f32.mrf.mxu0 }
 0x30c   : > { %v1798_v15 = vmul.f32 %v3111_v20, %v1762_v7 }
 0x30e   : > { %v1832_v10 = vadd.f32 %v3117_v56, %v1798_v15 }
 0x310   : > { %v1864_v12 = vmax.f32 %v1832_v10, 0.0 }
 0x312   : > { %v2545_v14 = vpack.c.bf16 %v1864_v12, %v1863_v1 }
 0x314   : > { %2561 = vst [vmem:[%s3130_s16 + $0x78] sm:$0xff] %v2545_v14  }
 0x315 PF: > { %s15_s20 = sadd.s32 1, %s2639_s20   ;;  %s3247_s18 = smov %s2635_s19 }
 0x316   : > { %p12_p5 = scmp.ge.s32.totalorder %s15_s20, 4   ;;  %s3248_s19 = smov %s3250_s21 }
 0x318   :  { %14 = sbr.rel (!%p12_p5) target bundleno = 2 (0x2), region = 81 }

// kernel: nin_forward.9
= control target key start
LH: loop header
LB: loop body
LE: loop exit
PB: predicated region body
PF: predicated region fallthrough
CT: control target
= control target key end

     0   :  { %s460_s6 = smov 0   ;;  %s462_s7 = smov 0   ;;  %s597_s0 = inlined_call_operand.vmem [shape: bf16[9,104,128], index: 0, kind: input, shape index: {}]   ;;  %s598_s1 = inlined_call_operand.vmem [shape: bf16[104,128], index: 1, kind: output, shape index: {}]  }
   0x1   :  { %s464_s8 = smov 0  }
   0x2 LB: > { %s20_s9 = sadd.s32 1, %s444_s7  ;;  %p329_p0 = scmp.ge.s32.totalorder %s448_s8, 1  ;;  %s448_s8 = sphi %s464_s8, %s11_s8   ;;  %s444_s7 = sphi %s462_s7, %s600_s7   ;;  %s440_s6 = sphi %s460_s6, %s599_s6  }
   0x3   : > { %p21_p1 = scmp.ge.s32.totalorder %s20_s9, 9  ;;  %p106_p2 = scmp.lt.s32.totalorder %s448_s8, 10 }
   0x5   : > { %s602_s9 = smov (%p21_p1, %s20_s9), 0  ;;  %p107_p3 = pnand %p329_p0, %p106_p2 }
   0x6   : > { %p131_p4 = scmp.lt.s32.totalorder (!%p107_p3), %s440_s6, 8  ;;  %p331_p5 = scmp.ne.s32.totalorder (!%p107_p3), %s440_s6, 0 }
   0x7   : > { %110 = sbr.rel (%p107_p3) target bundleno = 62 (0x3e), region = 24 }
   0xc   : > { %s132_s10 = scalar_select %p131_p4, %s440_s6, 8 }
   0xe   : > { %s401_s11 = smul.u32 52, %s132_s10 }
  0x10   : > { %s138_s14 = scalar_lea.vmem %s597_s0, %s401_s11 }
  0x11   : > { %v146_v0 = vld [vmem:[%s138_s14] sm:$0xf]  ;;  %v147_v1 = vld [vmem:[%s138_s14 + $0x4] sm:$0xf]  ;;  %v148_v2 = vld [vmem:[%s138_s14 + $0x8] sm:$0xf] }
  0x12   : > { %v149_v3 = vld [vmem:[%s138_s14 + $0xc] sm:$0xf]  ;;  %v150_v4 = vld [vmem:[%s138_s14 + $0x10] sm:$0xf]  ;;  %v151_v5 = vld [vmem:[%s138_s14 + $0x14] sm:$0xf] }
  0x13   : > { %v152_v6 = vld [vmem:[%s138_s14 + $0x18] sm:$0xf]  ;;  %v153_v7 = vld [vmem:[%s138_s14 + $0x1c] sm:$0xf]  ;;  %v485_v8 = vld [vmem:[%s138_s14 + $0x20] sm:$0xf] }
  0x14   : > { %v487_v9 = vld [vmem:[%s138_s14 + $0x24] sm:$0xf]  ;;  %v489_v10 = vld [vmem:[%s138_s14 + $0x28] sm:$0xf]  ;;  %v491_v11 = vld [vmem:[%s138_s14 + $0x2c] sm:$0xf] }
  0x15   : > { %v493_v12 = vld [vmem:[%s138_s14 + $0x30] sm:$0xf]  ;;  %162 = sbr.rel (%p331_p5) target bundleno = 39 (0x27), region = 28 }
  0x1a   : > { %163 = vst [vmem:[%s598_s1] sm:$0xf] %v146_v0 }
  0x1b   : > { %164 = vst [vmem:[%s598_s1 + $0x4] sm:$0xf] %v147_v1 }
  0x1c   : > { %165 = vst [vmem:[%s598_s1 + $0x8] sm:$0xf] %v148_v2 }
  0x1d   : > { %166 = vst [vmem:[%s598_s1 + $0xc] sm:$0xf] %v149_v3 }
  0x1e   : > { %167 = vst [vmem:[%s598_s1 + $0x10] sm:$0xf] %v150_v4 }
  0x1f   : > { %168 = vst [vmem:[%s598_s1 + $0x14] sm:$0xf] %v151_v5 }
  0x20   : > { %169 = vst [vmem:[%s598_s1 + $0x18] sm:$0xf] %v152_v6 }
  0x21   : > { %170 = vst [vmem:[%s598_s1 + $0x1c] sm:$0xf] %v153_v7 }
  0x22   : > { %171 = vst [vmem:[%s598_s1 + $0x20] sm:$0xf] %v485_v8 }
  0x23   : > { %172 = vst [vmem:[%s598_s1 + $0x24] sm:$0xf] %v487_v9 }
  0x24   : > { %173 = vst [vmem:[%s598_s1 + $0x28] sm:$0xf] %v489_v10 }
  0x25   : > { %174 = vst [vmem:[%s598_s1 + $0x2c] sm:$0xf] %v491_v11 }
  0x26   : > { %175 = vst [vmem:[%s598_s1 + $0x30] sm:$0xf] %v493_v12 }
  0x27 PF: > { %p332_p6 = scmp.le.s32.totalorder %s440_s6, 0 }
  0x29   : > { %179 = sbr.rel (%p332_p6) target bundleno = 62 (0x3e), region = 32 }
  0x2e   : > { %v338_v13 = vld [vmem:[%s598_s1] sm:$0xff]   ;;  %v206_v14 = vunpack.c.l.bf16 %v146_v0  ;;  %v207_v15 = vunpack.c.l.bf16 %v147_v1  ;;  %v391_v16 = vld [vmem:[%s598_s1 + $0x8] sm:$0xff]   ;;  %v208_v17 = vunpack.c.l.bf16 %v148_v2  ;;  %v209_v18 = vunpack.c.l.bf16 %v149_v3  ;;  %v392_v19 = vld [vmem:[%s598_s1 + $0x10] sm:$0xff]  }
  0x2f   : > { %v339_v20 = vunpack.c.l.bf16 %v338_v13  ;;  %v340_v21 = vunpack.c.h.bf16 %v338_v13  ;;  %v343_v22 = vunpack.c.l.bf16 %v391_v16  ;;  %v344_v23 = vunpack.c.h.bf16 %v391_v16  ;;  %v393_v24 = vld [vmem:[%s598_s1 + $0x18] sm:$0xff]   ;;  %v394_v33 = vld [vmem:[%s598_s1 + $0x20] sm:$0xff]   ;;  %v395_v38 = vld [vmem:[%s598_s1 + $0x28] sm:$0xff]  }
  0x30   : > { %v347_v25 = vunpack.c.l.bf16 %v392_v19  ;;  %v348_v26 = vunpack.c.h.bf16 %v392_v19  ;;  %v210_v27 = vunpack.c.l.bf16 %v150_v4  ;;  %v211_v28 = vunpack.c.l.bf16 %v151_v5  ;;  %v192_v47 = vld [vmem:[%s598_s1 + $0x30] sm:$0xf] }
  0x31   : > { %v219_v29 = vmax.f32 %v339_v20, %v206_v14  ;;  %v220_v30 = vmax.f32 %v340_v21, %v207_v15  ;;  %v221_v31 = vmax.f32 %v343_v22, %v208_v17  ;;  %v222_v32 = vmax.f32 %v344_v23, %v209_v18 }
  0x32   : > { %v223_v34 = vmax.f32 %v347_v25, %v210_v27  ;;  %v224_v35 = vmax.f32 %v348_v26, %v211_v28  ;;  %v351_v36 = vunpack.c.l.bf16 %v393_v24  ;;  %v352_v37 = vunpack.c.h.bf16 %v393_v24 }
  0x33   : > { %v364_v39 = vpack.c.bf16 %v220_v30, %v219_v29  ;;  %v369_v40 = vpack.c.bf16 %v222_v32, %v221_v31  ;;  %v212_v41 = vunpack.c.l.bf16 %v152_v6  ;;  %v213_v42 = vunpack.c.l.bf16 %v153_v7 }
  0x34   : > { %v374_v43 = vpack.c.bf16 %v224_v35, %v223_v34  ;;  %v355_v44 = vunpack.c.l.bf16 %v394_v33  ;;  %v356_v45 = vunpack.c.h.bf16 %v394_v33  ;;  %v214_v46 = vunpack.c.l.bf16 %v485_v8 }
  0x35   : > { %365 = vst [vmem:[%s598_s1] sm:$0xff] %v364_v39   ;;  %v225_v48 = vmax.f32 %v351_v36, %v212_v41  ;;  %v226_v49 = vmax.f32 %v352_v37, %v213_v42  ;;  %v215_v50 = vunpack.c.l.bf16 %v487_v9  ;;  %v359_v51 = vunpack.c.l.bf16 %v395_v38 }
  0x36   : > { %396 = vst [vmem:[%s598_s1 + $0x8] sm:$0xff] %v369_v40   ;;  %v227_v52 = vmax.f32 %v355_v44, %v214_v46  ;;  %v360_v53 = vunpack.c.h.bf16 %v395_v38  ;;  %v216_v54 = vunpack.c.l.bf16 %v489_v10  ;;  %v217_v55 = vunpack.c.l.bf16 %v491_v11 }
  0x37   : > { %397 = vst [vmem:[%s598_s1 + $0x10] sm:$0xff] %v374_v43   ;;  %v379_v56 = vpack.c.bf16 %v226_v49, %v225_v48  ;;  %v228_v57 = vmax.f32 %v356_v45, %v215_v50  ;;  %v205_v58 = vunpack.c.l.bf16 %v192_v47  ;;  %v218_v59 = vunpack.c.l.bf16 %v493_v12 }
  0x38   : > { %v229_v60 = vmax.f32 %v359_v51, %v216_v54  ;;  %v230_v61 = vmax.f32 %v360_v53, %v217_v55 }
  0x39   : > { %398 = vst [vmem:[%s598_s1 + $0x18] sm:$0xff] %v379_v56   ;;  %v384_v62 = vpack.c.bf16 %v228_v57, %v227_v52  ;;  %v231_v63 = vmax.f32 %v205_v58, %v218_v59 }
  0x3a   : > { %v389_v0 = vpack.c.bf16 %v230_v61, %v229_v60 }
  0x3b   : > { %399 = vst [vmem:[%s598_s1 + $0x20] sm:$0xff] %v384_v62   ;;  %v244_v1 = vpack.c.bf16 %v231_v63, %v231_v63 }
  0x3c   : > { %400 = vst [vmem:[%s598_s1 + $0x28] sm:$0xff] %v389_v0  }
  0x3d   : > { %257 = vst [vmem:[%s598_s1 + $0x30] sm:$0xf] %v244_v1 }
  0x3e PF: > { %s11_s8 = sadd.s32 1, %s448_s8   ;;  %s599_s6 = smov %s444_s7 }
  0x3f   : > { %p8_p7 = scmp.ge.s32.totalorder %s11_s8, 11   ;;  %s600_s7 = smov %s602_s9 }
  0x41   :  { %10 = sbr.rel (!%p8_p7) target bundleno = 2 (0x2), region = 62 }

// kernel: nin_forward.10
= control target key start
LH: loop header
LB: loop body
LE: loop exit
PB: predicated region body
PF: predicated region fallthrough
CT: control target
= control target key end

     0   :  { %s3831_s18 = smov 0   ;;  %s3833_s19 = smov 0   ;;  %s5066_s0 = inlined_call_operand.vmem [shape: bf16[104,3200], index: 0, kind: input, shape index: {}]   ;;  %s5067_s1 = inlined_call_operand.vmem [shape: bf16[3200,256], index: 1, kind: input, shape index: {}]   ;;  %s5068_s2 = inlined_call_operand.vmem [shape: bf16[256,256], index: 2, kind: input, shape index: {}]   ;;  %s5069_s3 = inlined_call_operand.vmem [shape: bf16[256,256], index: 3, kind: input, shape index: {}]   ;;  %s5070_s4 = inlined_call_operand.vmem [shape: f32[8,256], index: 4, kind: input, shape index: {}]   ;;  %s5071_s5 = inlined_call_operand.vmem [shape: bf16[104,256], index: 5, kind: output, shape index: {}]  }
   0x1   :  { %s3835_s20 = smov 0   ;;  %s3837_s21 = smov 0  }
   0x2   :  { %s3839_s22 = smov 0  }
   0x3 LB: > { %s24_s23 = sadd.s32 1, %s3794_s21  ;;  %p43_p1 = scmp.ne.s32.totalorder %s3786_s19, %s3782_s18  ;;  %s3798_s22 = sphi %s3839_s22, %s15_s22   ;;  %s3794_s21 = sphi %s3837_s21, %s5075_s21   ;;  %s3790_s20 = sphi %s3835_s20, %s5074_s20   ;;  %s3786_s19 = sphi %s3833_s19, %s5073_s19   ;;  %s3782_s18 = sphi %s3831_s18, %s5072_s18  }
   0x4   : > { %p25_p0 = scmp.ge.s32.totalorder %s24_s23, 5  ;;  %p44_p2 = scmp.eq.s32.totalorder %s3798_s22, 0 }
   0x5   : > { %s36_s25 = sadd.s32 1, %s3786_s19  ;;  %p2787_p5 = scmp.ge.s32.totalorder %s3798_s22, 5 }
   0x6   : > { %s5077_s23 = smov (%p25_p0, %s24_s23), 0  ;;  %p45_p3 = por %p44_p2, %p43_p1 }
   0x7   : > { %s32_s24 = ssub.s32 %s3794_s21, %s5077_s23  ;;  %193 = sbr.rel (%p2787_p5) target bundleno = 56 (0x38), region = 28 }
   0x8   : > { %p34_p4 = scmp.eq.s32.totalorder %s32_s24, 0 }
   0xa   : > { %s3866_s26 = scalar_select %p34_p4, %s3786_s19, %s36_s25  }
   0xc   : > { %196 = sbr.rel (!%p45_p3) target bundleno = 56 (0x38), region = 32  ;;  %s198_s27 = sand.u32 (%p45_p3), 1, %s3786_s19  }
   0xd   : > { %s3525_s28 = smul.u32 (%p45_p3), 20, %s3794_s21 }
   0xe   : > { %s3717_s29 = smul.u32 (%p45_p3), 260, %s198_s27 }
   0xf   : > { %s3874_s7 = scalar_lea.vmem (%p45_p3), %s5066_s0, %s3525_s28 }
  0x10   : > { %v221_v0 = vld [vmem:[%s3874_s7] sm:$0xff] (%p45_p3)  ;;  %v223_v1 = vld [vmem:[%s3874_s7 + $0x8] sm:$0xff] (%p45_p3)  ;;  %s3879_s8 = scalar_lea.vmem (%p45_p3), [#allocation3], %s3717_s29  ;;  %v231_v5 = vld [vmem:[%s3874_s7 + $0xd0] sm:$0xff] (%p45_p3) }
  0x11   : > { %v225_v2 = vld [vmem:[%s3874_s7 + $0x64] sm:$0xff]  ;;  %222 = vst [vmem:[%s3879_s8] sm:$0xff] %v221_v0  ;;  %v227_v3 = vld [vmem:[%s3874_s7 + $0x6c] sm:$0xff]  ;;  %v235_v7 = vld [vmem:[%s3874_s7 + $0x134] sm:$0xff] }
  0x12   : > { %224 = vst [vmem:[%s3879_s8 + $0x8] sm:$0xff] %v223_v1  ;;  %v229_v4 = vld [vmem:[%s3874_s7 + $0xc8] sm:$0xff]  ;;  %v237_v8 = vld [vmem:[%s3874_s7 + $0x190] sm:$0xff]  ;;  %v239_v9 = vld [vmem:[%s3874_s7 + $0x198] sm:$0xff] }
  0x13   : > { %226 = vst [vmem:[%s3879_s8 + $0x14] sm:$0xff] %v225_v2  ;;  %v233_v6 = vld [vmem:[%s3874_s7 + $0x12c] sm:$0xff]  ;;  %v241_v10 = vld [vmem:[%s3874_s7 + $0x1f4] sm:$0xff]  ;;  %v243_v11 = vld [vmem:[%s3874_s7 + $0x1fc] sm:$0xff] }
  0x14   : > { %228 = vst [vmem:[%s3879_s8 + $0x1c] sm:$0xff] %v227_v3  ;;  %v245_v12 = vld [vmem:[%s3874_s7 + $0x258] sm:$0xff]  ;;  %v247_v13 = vld [vmem:[%s3874_s7 + $0x260] sm:$0xff]  ;;  %v255_v17 = vld [vmem:[%s3874_s7 + $0x328] sm:$0xff] }
  0x15   : > { %230 = vst [vmem:[%s3879_s8 + $0x28] sm:$0xff] %v229_v4  ;;  %v249_v14 = vld [vmem:[%s3874_s7 + $0x2bc] sm:$0xff]  ;;  %v251_v15 = vld [vmem:[%s3874_s7 + $0x2c4] sm:$0xff]  ;;  %v259_v19 = vld [vmem:[%s3874_s7 + $0x38c] sm:$0xff] }
  0x16   : > { %232 = vst [vmem:[%s3879_s8 + $0x30] sm:$0xff] %v231_v5  ;;  %v253_v16 = vld [vmem:[%s3874_s7 + $0x320] sm:$0xff]  ;;  %v261_v20 = vld [vmem:[%s3874_s7 + $0x3e8] sm:$0xff]  ;;  %v263_v21 = vld [vmem:[%s3874_s7 + $0x3f0] sm:$0xff] }
  0x17   : > { %234 = vst [vmem:[%s3879_s8 + $0x3c] sm:$0xff] %v233_v6  ;;  %v257_v18 = vld [vmem:[%s3874_s7 + $0x384] sm:$0xff]  ;;  %v265_v22 = vld [vmem:[%s3874_s7 + $0x44c] sm:$0xff]  ;;  %v267_v23 = vld [vmem:[%s3874_s7 + $0x454] sm:$0xff] }
  0x18   : > { %236 = vst [vmem:[%s3879_s8 + $0x44] sm:$0xff] %v235_v7  ;;  %v269_v24 = vld [vmem:[%s3874_s7 + $0x4b0] sm:$0xff]  ;;  %v271_v25 = vld [vmem:[%s3874_s7 + $0x4b8] sm:$0xff]  ;;  %v2797_v30 = vld [vmem:[%s3874_s7 + $0x1a0] sm:$0xf] }
  0x19   : > { %238 = vst [vmem:[%s3879_s8 + $0x50] sm:$0xff] %v237_v8  ;;  %v2789_v26 = vld [vmem:[%s3874_s7 + $0x10] sm:$0xf]  ;;  %v2791_v27 = vld [vmem:[%s3874_s7 + $0x74] sm:$0xf] }
  0x1a   : > { %240 = vst [vmem:[%s3879_s8 + $0x58] sm:$0xff] %v239_v9  ;;  %v2793_v28 = vld [vmem:[%s3874_s7 + $0xd8] sm:$0xf]  ;;  %v2795_v29 = vld [vmem:[%s3874_s7 + $0x13c] sm:$0xf] }
  0x1b   : > { %242 = vst [vmem:[%s3879_s8 + $0x64] sm:$0xff] %v241_v10  ;;  %v2799_v31 = vld [vmem:[%s3874_s7 + $0x204] sm:$0xf]  ;;  %v2801_v32 = vld [vmem:[%s3874_s7 + $0x268] sm:$0xf] }
  0x1c   : > { %244 = vst [vmem:[%s3879_s8 + $0x6c] sm:$0xff] %v243_v11  ;;  %v2803_v33 = vld [vmem:[%s3874_s7 + $0x2cc] sm:$0xf]  ;;  %v2805_v34 = vld [vmem:[%s3874_s7 + $0x330] sm:$0xf] }
  0x1d   : > { %246 = vst [vmem:[%s3879_s8 + $0x78] sm:$0xff] %v245_v12  ;;  %v2807_v35 = vld [vmem:[%s3874_s7 + $0x394] sm:$0xf]  ;;  %v2809_v36 = vld [vmem:[%s3874_s7 + $0x3f8] sm:$0xf] }
  0x1e   : > { %248 = vst [vmem:[%s3879_s8 + $0x80] sm:$0xff] %v247_v13  ;;  %v2811_v37 = vld [vmem:[%s3874_s7 + $0x45c] sm:$0xf]  ;;  %v2813_v38 = vld [vmem:[%s3874_s7 + $0x4c0] sm:$0xf] }
  0x1f   : > { %250 = vst [vmem:[%s3879_s8 + $0x8c] sm:$0xff] %v249_v14 }
  0x20   : > { %252 = vst [vmem:[%s3879_s8 + $0x94] sm:$0xff] %v251_v15 }
  0x21   : > { %254 = vst [vmem:[%s3879_s8 + $0xa0] sm:$0xff] %v253_v16 }
  0x22   : > { %256 = vst [vmem:[%s3879_s8 + $0xa8] sm:$0xff] %v255_v17 }
  0x23   : > { %258 = vst [vmem:[%s3879_s8 + $0xb4] sm:$0xff] %v257_v18 }
  0x24   : > { %260 = vst [vmem:[%s3879_s8 + $0xbc] sm:$0xff] %v259_v19 }
  0x25   : > { %262 = vst [vmem:[%s3879_s8 + $0xc8] sm:$0xff] %v261_v20 }
  0x26   : > { %264 = vst [vmem:[%s3879_s8 + $0xd0] sm:$0xff] %v263_v21 }
  0x27   : > { %266 = vst [vmem:[%s3879_s8 + $0xdc] sm:$0xff] %v265_v22 }
  0x28   : > { %268 = vst [vmem:[%s3879_s8 + $0xe4] sm:$0xff] %v267_v23 }
  0x29   : > { %270 = vst [vmem:[%s3879_s8 + $0xf0] sm:$0xff] %v269_v24 }
  0x2a   : > { %272 = vst [vmem:[%s3879_s8 + $0xf8] sm:$0xff] %v271_v25 }
  0x2b   : > { %2790 = vst [vmem:[%s3879_s8 + $0x10] sm:$0xf] %v2789_v26 }
  0x2c   : > { %2792 = vst [vmem:[%s3879_s8 + $0x24] sm:$0xf] %v2791_v27 }
  0x2d   : > { %2794 = vst [vmem:[%s3879_s8 + $0x38] sm:$0xf] %v2793_v28 }
  0x2e   : > { %2796 = vst [vmem:[%s3879_s8 + $0x4c] sm:$0xf] %v2795_v29 }
  0x2f   : > { %2798 = vst [vmem:[%s3879_s8 + $0x60] sm:$0xf] %v2797_v30 }
  0x30   : > { %2800 = vst [vmem:[%s3879_s8 + $0x74] sm:$0xf] %v2799_v31 }
  0x31   : > { %2802 = vst [vmem:[%s3879_s8 + $0x88] sm:$0xf] %v2801_v32 }
  0x32   : > { %2804 = vst [vmem:[%s3879_s8 + $0x9c] sm:$0xf] %v2803_v33 }
  0x33   : > { %2806 = vst [vmem:[%s3879_s8 + $0xb0] sm:$0xf] %v2805_v34 }
  0x34   : > { %2808 = vst [vmem:[%s3879_s8 + $0xc4] sm:$0xf] %v2807_v35 }
  0x35   : > { %2810 = vst [vmem:[%s3879_s8 + $0xd8] sm:$0xf] %v2809_v36 }
  0x36   : > { %2812 = vst [vmem:[%s3879_s8 + $0xec] sm:$0xf] %v2811_v37 }
  0x37   : > { %2814 = vst [vmem:[%s3879_s8 + $0x100] sm:$0xf] %v2813_v38 }
  0x38 PF: > { %p2815_p6 = scmp.ge.s32.totalorder %s3798_s22, 1  ;;  %p321_p7 = scmp.lt.s32.totalorder %s3798_s22, 6 }
  0x3a   : > { %p322_p8 = pnand %p2815_p6, %p321_p7 }
  0x3b   : > { %s328_s9 = sand.u32 (!%p322_p8), 1, %s3782_s18   ;;  %s364_s10 = smul.u32 (!%p322_p8), 80, %s3790_s20 }
  0x3c   : > { %325 = sbr.rel (%p322_p8) target bundleno = 963 (0x3c3), region = 62  ;;  %p2818_p10 = scmp.ne.s32.totalorder (!%p322_p8), %s3790_s20, 0 }
  0x3d   : > { %s3718_s11 = smul.u32 (!%p322_p8), 260, %s328_s9  ;;  %p365_p9 = scmp.lt.s32.totalorder (!%p322_p8), %s364_s10, 399 }
  0x3f   : > { %s3965_s16 = scalar_lea.vmem (!%p322_p8), [#allocation3], %s3718_s11 }
  0x41   : > { %s5079_s10 = smov (!%p365_p9, %s364_s10), 399  ;;  %381 = sbr.rel (%p2818_p10) target bundleno = 97 (0x61), region = 70 }
  0x42   : > { %s3526_s12 = sshll.u32 %s5079_s10, 3 }
  0x43   : > { %s3963_s15 = scalar_lea.vmem %s5067_s1, %s3526_s12 }
  0x46   : > { %v3800_v39 = vmov 0.0  }
  0x47   : > { %382 = vst [vmem:[#allocation2 + $0xb0] sm:$0xff] %v3800_v39 }
  0x48   : > { %383 = vst [vmem:[#allocation2] sm:$0xff] %v3800_v39 }
  0x49   : > { %384 = vst [vmem:[#allocation2 + $0x10] sm:$0xff] %v3800_v39 }
  0x4a   : > { %385 = vst [vmem:[#allocation2 + $0x48] sm:$0xff] %v3800_v39 }
  0x4b   : > { %386 = vst [vmem:[#allocation2 + $0x60] sm:$0xff] %v3800_v39 }
  0x4c   : > { %387 = vst [vmem:[#allocation2 + $0x28] sm:$0xff] %v3800_v39 }
  0x4d   : > { %388 = vst [vmem:[#allocation2 + $0x40] sm:$0xff] %v3800_v39 }
  0x4e   : > { %389 = vst [vmem:[#allocation2 + $0x78] sm:$0xff] %v3800_v39 }
  0x4f   : > { %390 = vst [vmem:[#allocation2 + $0x80] sm:$0xff] %v3800_v39 }
  0x50   : > { %391 = vst [vmem:[#allocation2 + $0xa8] sm:$0xff] %v3800_v39 }
  0x51   : > { %392 = vst [vmem:[#allocation2 + $0x50] sm:$0xff] %v3800_v39 }
  0x52   : > { %393 = vst [vmem:[#allocation2 + $0x30] sm:$0xff] %v3800_v39 }
  0x53   : > { %394 = vst [vmem:[#allocation2 + $0x88] sm:$0xff] %v3800_v39 }
  0x54   : > { %395 = vst [vmem:[#allocation2 + $0x70] sm:$0xff] %v3800_v39 }
  0x55   : > { %396 = vst [vmem:[#allocation2 + $0x8] sm:$0xff] %v3800_v39 }
  0x56   : > { %397 = vst [vmem:[#allocation2 + $0x38] sm:$0xff] %v3800_v39 }
  0x57   : > { %398 = vst [vmem:[#allocation2 + $0x20] sm:$0xff] %v3800_v39 }
  0x58   : > { %399 = vst [vmem:[#allocation2 + $0xb8] sm:$0xff] %v3800_v39 }
  0x59   : > { %400 = vst [vmem:[#allocation2 + $0x58] sm:$0xff] %v3800_v39 }
  0x5a   : > { %401 = vst [vmem:[#allocation2 + $0xc8] sm:$0xff] %v3800_v39 }
  0x5b   : > { %402 = vst [vmem:[#allocation2 + $0xa0] sm:$0xff] %v3800_v39 }
  0x5c   : > { %403 = vst [vmem:[#allocation2 + $0x90] sm:$0xff] %v3800_v39 }
  0x5d   : > { %404 = vst [vmem:[#allocation2 + $0x98] sm:$0xff] %v3800_v39 }
  0x5e   : > { %405 = vst [vmem:[#allocation2 + $0x18] sm:$0xff] %v3800_v39 }
  0x5f   : > { %406 = vst [vmem:[#allocation2 + $0xc0] sm:$0xff] %v3800_v39 }
  0x60   : > { %407 = vst [vmem:[#allocation2 + $0x68] sm:$0xff] %v3800_v39 }
  0x61 PF: > { %v2997_v40 = vld [vmem:[%s3963_s15 + $0x70] sm:$0xf]  ;;  %v3572_v41 = vld [vmem:[%s3963_s15 + $0x74] sm:$0xf0]  ;;  %v2989_v45 = vld [vmem:[%s3963_s15 + $0x60] sm:$0xf] }
  0x62   : > { %v3061_v42 = vld [vmem:[%s3963_s15 + $0xf0] sm:$0xf]  ;;  %v2998_v43 = vor.u32 %v3572_v41, %v2997_v40  ;;  %v3588_v44 = vld [vmem:[%s3963_s15 + $0xf4] sm:$0xf0]  ;;  %v3570_v46 = vld [vmem:[%s3963_s15 + $0x64] sm:$0xf0] }
  0x63   : > { %v3062_v47 = vor.u32 %v3588_v44, %v3061_v42  ;;  %v3053_v48 = vld [vmem:[%s3963_s15 + $0xe0] sm:$0xf]  ;;  %v3586_v49 = vld [vmem:[%s3963_s15 + $0xe4] sm:$0xf0]  ;;  %v2990_v50 = vor.u32 %v3570_v46, %v2989_v45  ;;  %v2981_v52 = vld [vmem:[%s3963_s15 + $0x50] sm:$0xf] }
  0x64   : > { %1127 = vmatpush.bf16.msra.mxu0 %v2998_v43  ;;  %3701 = vmatpush.bf16.msra.mxu2 %v2998_v43  ;;  %v3054_v51 = vor.u32 %v3586_v49, %v3053_v48  ;;  %v3568_v53 = vld [vmem:[%s3963_s15 + $0x54] sm:$0xf0]  ;;  %v3045_v54 = vld [vmem:[%s3963_s15 + $0xd0] sm:$0xf]  ;;  %v2973_v58 = vld [vmem:[%s3963_s15 + $0x40] sm:$0xf] }
  0x65   : > { %1170 = vmatpush.bf16.msra.mxu1 %v3062_v47  ;;  %3709 = vmatpush.bf16.msra.mxu3 %v3062_v47  ;;  %v3584_v55 = vld [vmem:[%s3963_s15 + $0xd4] sm:$0xf0]  ;;  %v2982_v56 = vor.u32 %v3568_v53, %v2981_v52  ;;  %v3566_v59 = vld [vmem:[%s3963_s15 + $0x44] sm:$0xf0]  ;;  %v3037_v60 = vld [vmem:[%s3963_s15 + $0xc0] sm:$0xf] }
  0x66   : > { %v3046_v57 = vor.u32 %v3584_v55, %v3045_v54  ;;  %v3582_v61 = vld [vmem:[%s3963_s15 + $0xc4] sm:$0xf0]  ;;  %v2974_v62 = vor.u32 %v3566_v59, %v2973_v58  ;;  %v2965_v0 = vld [vmem:[%s3963_s15 + $0x30] sm:$0xf]  ;;  %v3564_v1 = vld [vmem:[%s3963_s15 + $0x34] sm:$0xf0] }
  0x67   : > { %v3038_v63 = vor.u32 %v3582_v61, %v3037_v60  ;;  %v3029_v2 = vld [vmem:[%s3963_s15 + $0xb0] sm:$0xf]  ;;  %v3580_v3 = vld [vmem:[%s3963_s15 + $0xb4] sm:$0xf0]  ;;  %v2966_v4 = vor.u32 %v3564_v1, %v2965_v0  ;;  %v2957_v6 = vld [vmem:[%s3963_s15 + $0x20] sm:$0xf] }
  0x68   : > { %1128 = vmatpush.bf16.msra.mxu0 %v2990_v50  ;;  %3702 = vmatpush.bf16.msra.mxu2 %v2990_v50  ;;  %v3030_v5 = vor.u32 %v3580_v3, %v3029_v2  ;;  %v3562_v7 = vld [vmem:[%s3963_s15 + $0x24] sm:$0xf0]  ;;  %v3021_v8 = vld [vmem:[%s3963_s15 + $0xa0] sm:$0xf]  ;;  %v2949_v12 = vld [vmem:[%s3963_s15 + $0x10] sm:$0xf] }
  0x69   : > { %1171 = vmatpush.bf16.msra.mxu1 %v3054_v51  ;;  %3710 = vmatpush.bf16.msra.mxu3 %v3054_v51  ;;  %v3578_v9 = vld [vmem:[%s3963_s15 + $0xa4] sm:$0xf0]  ;;  %v2958_v10 = vor.u32 %v3562_v7, %v2957_v6  ;;  %v3560_v13 = vld [vmem:[%s3963_s15 + $0x14] sm:$0xf0]  ;;  %v3013_v14 = vld [vmem:[%s3963_s15 + $0x90] sm:$0xf] }
  0x6a   : > { %v3022_v11 = vor.u32 %v3578_v9, %v3021_v8  ;;  %v3576_v15 = vld [vmem:[%s3963_s15 + $0x94] sm:$0xf0]  ;;  %v2950_v16 = vor.u32 %v3560_v13, %v2949_v12  ;;  %v2941_v17 = vld [vmem:[%s3963_s15] sm:$0xf]  ;;  %v3558_v19 = vld [vmem:[%s3963_s15 + $0x4] sm:$0xf0] }
  0x6b   : > { %v3014_v18 = vor.u32 %v3576_v15, %v3013_v14  ;;  %v3005_v20 = vld [vmem:[%s3963_s15 + $0x80] sm:$0xf]  ;;  %v3574_v21 = vld [vmem:[%s3963_s15 + $0x84] sm:$0xf0]  ;;  %v2821_v22 = vld [vmem:[%s3965_s16] sm:$0xf]  ;;  %v2942_v30 = vor.u32 %v3558_v19, %v2941_v17 }
  0x6c   : > { %1129 = vmatpush.bf16.msra.mxu0 %v2982_v56  ;;  %3703 = vmatpush.bf16.msra.mxu2 %v2982_v56  ;;  %v3529_v23 = vld [vmem:[%s3965_s16 + $0x10] sm:$0xf0]  ;;  %v2901_v24 = vld [vmem:[%s3965_s16 + $0xa0] sm:$0xf]  ;;  %v3636_v27 = vld [vmem:[%s3963_s15 + $0x274] sm:$0xf0]  ;;  %v3006_v34 = vor.u32 %v3574_v21, %v3005_v20 }
  0x6d   : > { %1172 = vmatpush.bf16.msra.mxu1 %v3046_v57  ;;  %3711 = vmatpush.bf16.msra.mxu3 %v3046_v57  ;;  %v3549_v25 = vld [vmem:[%s3965_s16 + $0xb0] sm:$0xf0]  ;;  %v3253_v26 = vld [vmem:[%s3963_s15 + $0x270] sm:$0xf]  ;;  %v3571_v28 = vld [vmem:[%s3963_s15 + $0x74] sm:$0xf]  ;;  %v4017_v43 = vor.u32 %v3529_v23, %v2821_v22 }
  0x6e   : > { %v2999_v29 = vld [vmem:[%s3963_s15 + $0x78] sm:$0xf0]  ;;  %v3527_v31 = vld [vmem:[%s3965_s16 + $0x4] sm:$0xf]  ;;  %v2823_v32 = vld [vmem:[%s3965_s16 + $0x14] sm:$0xf0]  ;;  %v3254_v38 = vor.u32 %v3636_v27, %v3253_v26  ;;  %v4019_v44 = vor.u32 %v3549_v25, %v2901_v24 }
  0x6f   : > { %v3547_v33 = vld [vmem:[%s3965_s16 + $0xa4] sm:$0xf]  ;;  %v2903_v35 = vld [vmem:[%s3965_s16 + $0xb4] sm:$0xf0]  ;;  %v3125_v36 = vld [vmem:[%s3963_s15 + $0x170] sm:$0xf]  ;;  %v3002_v39 = vor.u32 %v3571_v28, %v2999_v29  ;;  %v4024_v48 = vor.u32 %v3527_v31, %v2823_v32 }
  0x70   : > { %1130 = vmatpush.bf16.msra.mxu0 %v2974_v62  ;;  %3704 = vmatpush.bf16.msra.mxu2 %v2974_v62  ;;  %v3604_v37 = vld [vmem:[%s3963_s15 + $0x174] sm:$0xf0]  ;;  %v3245_v40 = vld [vmem:[%s3963_s15 + $0x260] sm:$0xf]  ;;  %v3189_v41 = vld [vmem:[%s3963_s15 + $0x1f0] sm:$0xf]  ;;  %v4026_v49 = vor.u32 %v3547_v33, %v2903_v35 }
  0x71   : > { %1173 = vmatpush.bf16.msra.mxu1 %v3038_v63  ;;  %3712 = vmatpush.bf16.msra.mxu3 %v3038_v63  ;;  %v3620_v42 = vld [vmem:[%s3963_s15 + $0x1f4] sm:$0xf0]  ;;  %v3634_v45 = vld [vmem:[%s3963_s15 + $0x264] sm:$0xf0]  ;;  %v3569_v46 = vld [vmem:[%s3963_s15 + $0x64] sm:$0xf]  ;;  %v3126_v50 = vor.u32 %v3604_v37, %v3125_v36 }
  0x72   : > { %v2991_v47 = vld [vmem:[%s3963_s15 + $0x68] sm:$0xf0]  ;;  %v3190_v51 = vor.u32 %v3620_v42, %v3189_v41  ;;  %v3117_v52 = vld [vmem:[%s3963_s15 + $0x160] sm:$0xf]  ;;  %v3602_v53 = vld [vmem:[%s3963_s15 + $0x164] sm:$0xf0]  ;;  %v3246_v54 = vor.u32 %v3634_v45, %v3245_v40 }
  0x73   : > { %v2994_v55 = vor.u32 %v3569_v46, %v2991_v47  ;;  %v3181_v56 = vld [vmem:[%s3963_s15 + $0x1e0] sm:$0xf]  ;;  %v3618_v57 = vld [vmem:[%s3963_s15 + $0x1e4] sm:$0xf0]  ;;  %v3237_v58 = vld [vmem:[%s3963_s15 + $0x250] sm:$0xf]  ;;  %v3118_v62 = vor.u32 %v3602_v53, %v3117_v52 }
  0x74   : > { %1131 = vmatpush.bf16.msra.mxu0 %v2966_v4  ;;  %3705 = vmatpush.bf16.msra.mxu2 %v2966_v4  ;;  %v3632_v59 = vld [vmem:[%s3963_s15 + $0x254] sm:$0xf0]  ;;  %v3567_v60 = vld [vmem:[%s3963_s15 + $0x54] sm:$0xf]  ;;  %v2983_v61 = vld [vmem:[%s3963_s15 + $0x58] sm:$0xf0]  ;;  %v3182_v63 = vor.u32 %v3618_v57, %v3181_v56 }
  0x75   : > { %1174 = vmatpush.bf16.msra.mxu1 %v3030_v5  ;;  %3713 = vmatpush.bf16.msra.mxu3 %v3030_v5  ;;  %v3109_v0 = vld [vmem:[%s3963_s15 + $0x150] sm:$0xf]  ;;  %v3600_v1 = vld [vmem:[%s3963_s15 + $0x154] sm:$0xf0]  ;;  %v3238_v2 = vor.u32 %v3632_v59, %v3237_v58  ;;  %v2986_v3 = vor.u32 %v3567_v60, %v2983_v61  ;;  %v3229_v6 = vld [vmem:[%s3963_s15 + $0x240] sm:$0xf] }
  0x76   : > { %v3173_v4 = vld [vmem:[%s3963_s15 + $0x1d0] sm:$0xf]  ;;  %v3616_v5 = vld [vmem:[%s3963_s15 + $0x1d4] sm:$0xf0]  ;;  %v3630_v7 = vld [vmem:[%s3963_s15 + $0x244] sm:$0xf0] }
  0x77   : > { %v3565_v8 = vld [vmem:[%s3963_s15 + $0x44] sm:$0xf]  ;;  %v2975_v9 = vld [vmem:[%s3963_s15 + $0x48] sm:$0xf0]  ;;  %v3101_v12 = vld [vmem:[%s3963_s15 + $0x140] sm:$0xf] }
  0x78   : > { %1132 = vmatpush.bf16.msra.mxu0 %v2958_v10  ;;  %3706 = vmatpush.bf16.msra.mxu2 %v2958_v10  ;;  %v3110_v10 = vor.u32 %v3600_v1, %v3109_v0  ;;  %v3598_v13 = vld [vmem:[%s3963_s15 + $0x144] sm:$0xf0]  ;;  %v2841_v14 = vld [vmem:[%s3965_s16 + $0x28] sm:$0xf]  ;;  %v3534_v15 = vld [vmem:[%s3965_s16 + $0x38] sm:$0xf0]  ;;  %v2978_v19 = vor.u32 %v3565_v8, %v2975_v9 }
  0x79   : > { %1175 = vmatpush.bf16.msra.mxu1 %v3022_v11  ;;  %3714 = vmatpush.bf16.msra.mxu3 %v3022_v11  ;;  %v3174_v11 = vor.u32 %v3616_v5, %v3173_v4  ;;  %v3554_v17 = vld [vmem:[%s3965_s16 + $0xd8] sm:$0xf0]  ;;  %v3165_v20 = vld [vmem:[%s3963_s15 + $0x1c0] sm:$0xf]  ;;  %v3614_v21 = vld [vmem:[%s3963_s15 + $0x1c4] sm:$0xf0] }
  0x7a   : > { %v3221_v22 = vld [vmem:[%s3963_s15 + $0x230] sm:$0xf]  ;;  %v3628_v23 = vld [vmem:[%s3963_s15 + $0x234] sm:$0xf0]  ;;  %v3563_v24 = vld [vmem:[%s3963_s15 + $0x34] sm:$0xf]  ;;  %v3166_v31 = vor.u32 %v3614_v21, %v3165_v20 }
  0x7b   : > { %v2967_v25 = vld [vmem:[%s3963_s15 + $0x38] sm:$0xf0]  ;;  %v2843_v27 = vld [vmem:[%s3965_s16 + $0x3c] sm:$0xf0]  ;;  %v3596_v33 = vld [vmem:[%s3963_s15 + $0x134] sm:$0xf0] }
  0x7c   : > { %1133 = vmatpush.bf16.msra.mxu0 %v2950_v16  ;;  %3707 = vmatpush.bf16.msra.mxu2 %v2950_v16  ;;  %v2921_v16 = vld [vmem:[%s3965_s16 + $0xc8] sm:$0xf]  ;;  %v3532_v26 = vld [vmem:[%s3965_s16 + $0x2c] sm:$0xf]  ;;  %v2923_v29 = vld [vmem:[%s3965_s16 + $0xdc] sm:$0xf0]  ;;  %v2970_v35 = vor.u32 %v3563_v24, %v2967_v25 }
  0x7d   : > { %1176 = vmatpush.bf16.msra.mxu1 %v3014_v18  ;;  %3715 = vmatpush.bf16.msra.mxu3 %v3014_v18  ;;  %v3230_v18 = vor.u32 %v3630_v7, %v3229_v6  ;;  %v3552_v28 = vld [vmem:[%s3965_s16 + $0xcc] sm:$0xf]  ;;  %v3093_v32 = vld [vmem:[%s3963_s15 + $0x130] sm:$0xf]  ;;  %v3612_v37 = vld [vmem:[%s3963_s15 + $0x1b4] sm:$0xf0]  ;;  %v4071_v40 = vor.u32 %v3554_v17, %v2921_v16  ;;  %v4076_v46 = vor.u32 %v3532_v26, %v2843_v27 }
  0x7e   : > { %v3157_v36 = vld [vmem:[%s3963_s15 + $0x1b0] sm:$0xf]  ;;  %v3626_v41 = vld [vmem:[%s3963_s15 + $0x224] sm:$0xf0]  ;;  %v3561_v42 = vld [vmem:[%s3963_s15 + $0x24] sm:$0xf]  ;;  %v4078_v47 = vor.u32 %v3552_v28, %v2923_v29 }
  0x7f   : > { %v2959_v45 = vld [vmem:[%s3963_s15 + $0x28] sm:$0xf0]  ;;  %v3085_v52 = vld [vmem:[%s3963_s15 + $0x120] sm:$0xf]  ;;  %v3594_v53 = vld [vmem:[%s3963_s15 + $0x124] sm:$0xf0] }
  0x80   : > { %1134 = vmatpush.bf16.msra.mxu0 %v2942_v30  ;;  %3708 = vmatpush.bf16.msra.mxu2 %v2942_v30  ;;  %v3102_v30 = vor.u32 %v3598_v13, %v3101_v12  ;;  %v2962_v57 = vor.u32 %v3561_v42, %v2959_v45  ;;  %v3205_v58 = vld [vmem:[%s3963_s15 + $0x210] sm:$0xf]  ;;  %v3624_v59 = vld [vmem:[%s3963_s15 + $0x214] sm:$0xf0]  ;;  %v3559_v60 = vld [vmem:[%s3963_s15 + $0x14] sm:$0xf]  ;;  %v3086_v61 = vor.u32 %v3594_v53, %v3085_v52 }
  0x81   : > { %1177 = vmatpush.bf16.msra.mxu1 %v3006_v34  ;;  %3716 = vmatpush.bf16.msra.mxu3 %v3006_v34  ;;  %v3222_v34 = vor.u32 %v3628_v23, %v3221_v22  ;;  %v3592_v0 = vld [vmem:[%s3963_s15 + $0x114] sm:$0xf0]  ;;  %v2951_v1 = vld [vmem:[%s3963_s15 + $0x18] sm:$0xf0]  ;;  %v3206_v4 = vor.u32 %v3624_v59, %v3205_v58  ;;  %v3197_v6 = vld [vmem:[%s3963_s15 + $0x200] sm:$0xf] }
  0x82   : > { %v2954_v5 = vor.u32 %v3559_v60, %v2951_v1  ;;  %v3622_v7 = vld [vmem:[%s3963_s15 + $0x204] sm:$0xf0]  ;;  %v3557_v8 = vld [vmem:[%s3963_s15 + $0x4] sm:$0xf]  ;;  %v2943_v9 = vld [vmem:[%s3963_s15 + $0x8] sm:$0xf0] }
  0x83   : > { %1135 = vmatmul.bf16.vlgmr.msra.gmra.mxu0 %v4017_v43  ;;  %1155 = vmatmul.bf16.vlgmr.msra.gmra.mxu2 %v4019_v44  ;;  %v3069_v13 = vld [vmem:[%s3963_s15 + $0x100] sm:$0xf]  ;;  %v3606_v16 = vld [vmem:[%s3963_s15 + $0x184] sm:$0xf0]  ;;  %v3587_v17 = vld [vmem:[%s3963_s15 + $0xf4] sm:$0xf] }
  0x84   : > { %1299 = vmatpush.bf16.msrb.mxu0 %v3254_v38  ;;  %1178 = vmatmul.bf16.vlgmr.msra.gmra.mxu1 %v4024_v48  ;;  %v3213_v38 = vld [vmem:[%s3963_s15 + $0x220] sm:$0xf]  ;;  %v3063_v21 = vld [vmem:[%s3963_s15 + $0xf8] sm:$0xf0]  ;;  %v3603_v22 = vld [vmem:[%s3963_s15 + $0x174] sm:$0xf] }
  0x85   : > { %1342 = vmatpush.bf16.msrb.mxu1 %v3002_v39  ;;  %1198 = vmatmul.bf16.vlgmr.msra.gmra.mxu3 %v4026_v49  ;;  %v4069_v39 = vor.u32 %v3534_v15, %v2841_v14  ;;  %v3214_v56 = vor.u32 %v3626_v41, %v3213_v38  ;;  %v3590_v14 = vld [vmem:[%s3963_s15 + $0x104] sm:$0xf0]  ;;  %v3133_v15 = vld [vmem:[%s3963_s15 + $0x180] sm:$0xf]  ;;  %v3127_v23 = vld [vmem:[%s3963_s15 + $0x178] sm:$0xf0] }
  0x86   : > { %1213 = vmatpush.bf16.msrb.mxu2 %v3126_v50  ;;  %1256 = vmatpush.bf16.msrb.mxu3 %v3190_v51  ;;  %v3094_v50 = vor.u32 %v3596_v33, %v3093_v32  ;;  %v3158_v51 = vor.u32 %v3612_v37, %v3157_v36  ;;  %v2861_v24 = vld [vmem:[%s3965_s16 + $0x50] sm:$0xf]  ;;  %v3539_v25 = vld [vmem:[%s3965_s16 + $0x60] sm:$0xf0]  ;;  %v3537_v27 = vld [vmem:[%s3965_s16 + $0x54] sm:$0xf]  ;;  %v3070_v29 = vor.u32 %v3590_v14, %v3069_v13 }
  0x87   : > { %v2863_v28 = vld [vmem:[%s3965_s16 + $0x64] sm:$0xf0]  ;;  %v3130_v32 = vor.u32 %v3603_v22, %v3127_v23  ;;  %v4113_v33 = vor.u32 %v3539_v25, %v2861_v24  ;;  %v3619_v37 = vld [vmem:[%s3963_s15 + $0x1f4] sm:$0xf]  ;;  %v3183_v58 = vld [vmem:[%s3963_s15 + $0x1e8] sm:$0xf0] }
  0x88   : > { %1300 = vmatpush.bf16.msrb.mxu0 %v3246_v54  ;;  %v3149_v54 = vld [vmem:[%s3963_s15 + $0x1a0] sm:$0xf]  ;;  %v3191_v38 = vld [vmem:[%s3963_s15 + $0x1f8] sm:$0xf0]  ;;  %v3635_v41 = vld [vmem:[%s3963_s15 + $0x274] sm:$0xf] }
  0x89   : > { %1343 = vmatpush.bf16.msrb.mxu1 %v2994_v55  ;;  %v3610_v55 = vld [vmem:[%s3963_s15 + $0x1a4] sm:$0xf0]  ;;  %v3194_v42 = vor.u32 %v3619_v37, %v3191_v38  ;;  %v3255_v45 = vld [vmem:[%s3963_s15 + $0x278] sm:$0xf0]  ;;  %v3633_v59 = vld [vmem:[%s3963_s15 + $0x264] sm:$0xf] }
  0x8a   : > { %1214 = vmatpush.bf16.msrb.mxu2 %v3118_v62  ;;  %1257 = vmatpush.bf16.msrb.mxu3 %v3182_v63  ;;  %v3150_v62 = vor.u32 %v3610_v55, %v3149_v54  ;;  %v3077_v63 = vld [vmem:[%s3963_s15 + $0x110] sm:$0xf]  ;;  %v3258_v52 = vor.u32 %v3635_v41, %v3255_v45  ;;  %v3601_v54 = vld [vmem:[%s3963_s15 + $0x164] sm:$0xf]  ;;  %v3119_v55 = vld [vmem:[%s3963_s15 + $0x168] sm:$0xf0] }
  0x8b   : > { %v3247_v60 = vld [vmem:[%s3963_s15 + $0x268] sm:$0xf0]  ;;  %v3599_v13 = vld [vmem:[%s3963_s15 + $0x154] sm:$0xf]  ;;  %v2849_v23 = vld [vmem:[%s3965_s16 + $0x30] sm:$0xf] }
  0x8c   : > { %1301 = vmatpush.bf16.msrb.mxu0 %v3238_v2  ;;  %v3141_v2 = vld [vmem:[%s3963_s15 + $0x190] sm:$0xf]  ;;  %v3535_v24 = vld [vmem:[%s3965_s16 + $0x40] sm:$0xf0]  ;;  %v2837_v25 = vld [vmem:[%s3965_s16 + $0x10] sm:$0xf] }
  0x8d   : > { %1344 = vmatpush.bf16.msrb.mxu1 %v2986_v3  ;;  %v3608_v3 = vld [vmem:[%s3963_s15 + $0x194] sm:$0xf0]  ;;  %v3542_v1 = vld [vmem:[%s3965_s16 + $0x7c] sm:$0xf]  ;;  %v3597_v38 = vld [vmem:[%s3963_s15 + $0x144] sm:$0xf] }
  0x8e   : > { %1215 = vmatpush.bf16.msrb.mxu2 %v3110_v10  ;;  %1258 = vmatpush.bf16.msrb.mxu3 %v3174_v11  ;;  %v470_v10 = vld [vmem:[%s3965_s16 + $0xf0] sm:$0xff]  ;;  %v3078_v11 = vor.u32 %v3592_v0, %v3077_v63  ;;  %v3142_v12 = vor.u32 %v3608_v3, %v3141_v2  ;;  %v2881_v63 = vld [vmem:[%s3965_s16 + $0x78] sm:$0xf]  ;;  %v3544_v0 = vld [vmem:[%s3965_s16 + $0x88] sm:$0xf0]  ;;  %p3259_p11 = scmp.ne.s32.totalorder %s3790_s20, 4 }
  0x8f   : > { %v652_v20 = vunpack.c.l.b16 %v470_v10  ;;  %v653_v26 = vunpack.c.h.b16 %v470_v10  ;;  %v2829_v2 = vld [vmem:[%s3965_s16 + $0x8] sm:$0xf]  ;;  %v3530_v3 = vld [vmem:[%s3965_s16 + $0x18] sm:$0xf0]  ;;  %v3613_v45 = vld [vmem:[%s3963_s15 + $0x1c4] sm:$0xf] }
  0x90   : > { %1302 = vmatpush.bf16.msrb.mxu0 %v3230_v18  ;;  %v3198_v18 = vor.u32 %v3622_v7, %v3197_v6  ;;  %v2831_v6 = vld [vmem:[%s3965_s16 + $0x1c] sm:$0xf0]  ;;  %v4145_v7 = vor.u32 %v3544_v0, %v2881_v63  ;;  %v3039_v37 = vld [vmem:[%s3963_s15 + $0xc8] sm:$0xf0]  ;;  %v2871_v63 = vld [vmem:[%s3965_s16 + $0x6c] sm:$0xf0] }
  0x91   : > { %1345 = vmatpush.bf16.msrb.mxu1 %v2978_v19  ;;  %v2946_v19 = vor.u32 %v3557_v8, %v2943_v9  ;;  %v4119_v36 = vpack.c.b16 %v653_v26, %v653_v26  ;;  %v4147_v8 = vor.u32 %v3530_v3, %v2829_v2  ;;  %v3531_v26 = vld [vmem:[%s3965_s16 + $0x20] sm:$0xf0] }
  0x92   : > { %1216 = vmatpush.bf16.msrb.mxu2 %v3102_v30  ;;  %1259 = vmatpush.bf16.msrb.mxu3 %v3166_v31  ;;  %v3134_v30 = vor.u32 %v3606_v16, %v3133_v15  ;;  %v3066_v31 = vor.u32 %v3587_v17, %v3063_v21  ;;  %v3111_v15 = vld [vmem:[%s3963_s15 + $0x158] sm:$0xf0]  ;;  %v3615_v16 = vld [vmem:[%s3963_s15 + $0x1d4] sm:$0xf] }
  0x93   : > { %1140 = vmatmul.bf16.gmra.mxu0 %v4069_v39  ;;  %1160 = vmatmul.bf16.gmra.mxu2 %v4071_v40  ;;  %v3175_v17 = vld [vmem:[%s3963_s15 + $0x1d8] sm:$0xf0]  ;;  %v3595_v3 = vld [vmem:[%s3963_s15 + $0x134] sm:$0xf] }
  0x94   : > { %1303 = vmatpush.bf16.msrb.mxu0 %v3222_v34  ;;  %1183 = vmatmul.bf16.gmra.mxu1 %v4076_v46  ;;  %v4115_v34 = vpack.c.b16 %v652_v20, %v652_v20  ;;  %v3631_v20 = vld [vmem:[%s3963_s15 + $0x254] sm:$0xf]  ;;  %v3239_v21 = vld [vmem:[%s3963_s15 + $0x258] sm:$0xf0] }
  0x95   : > { %1346 = vmatpush.bf16.msrb.mxu1 %v2970_v35  ;;  %1203 = vmatmul.bf16.gmra.mxu3 %v4078_v47  ;;  %v4117_v35 = vor.u32 %v3537_v27, %v2863_v28  ;;  %v3242_v22 = vor.u32 %v3631_v20, %v3239_v21  ;;  %v3533_v27 = vld [vmem:[%s3965_s16 + $0x34] sm:$0xf]  ;;  %v2851_v28 = vld [vmem:[%s3965_s16 + $0x44] sm:$0xf0]  ;;  %v2891_v20 = vld [vmem:[%s3965_s16 + $0x94] sm:$0xf0] }
  0x96   : > { %1217 = vmatpush.bf16.msrb.mxu2 %v3094_v50  ;;  %1260 = vmatpush.bf16.msrb.mxu3 %v3158_v51  ;;  %v3585_v50 = vld [vmem:[%s3963_s15 + $0xe4] sm:$0xf]  ;;  %v3055_v51 = vld [vmem:[%s3963_s15 + $0xe8] sm:$0xf0] }
  0x97   : > { %v3058_v53 = vor.u32 %v3585_v50, %v3055_v51  ;;  %v3167_v50 = vld [vmem:[%s3963_s15 + $0x1c8] sm:$0xf0] }
  0x98   : > { %1304 = vmatpush.bf16.msrb.mxu0 %v3214_v56  ;;  %v3617_v56 = vld [vmem:[%s3963_s15 + $0x1e4] sm:$0xf] }
  0x99   : > { %1347 = vmatpush.bf16.msrb.mxu1 %v2962_v57  ;;  %v3122_v57 = vor.u32 %v3601_v54, %v3119_v55  ;;  %v3579_v54 = vld [vmem:[%s3963_s15 + $0xb4] sm:$0xf] }
  0x9a   : > { %1218 = vmatpush.bf16.msrb.mxu2 %v3086_v61  ;;  %1261 = vmatpush.bf16.msrb.mxu3 %v3150_v62  ;;  %v3186_v61 = vor.u32 %v3617_v56, %v3183_v58  ;;  %v3250_v62 = vor.u32 %v3633_v59, %v3247_v60  ;;  %v3031_v56 = vld [vmem:[%s3963_s15 + $0xb8] sm:$0xf0]  ;;  %v2869_v58 = vld [vmem:[%s3965_s16 + $0x58] sm:$0xf] }
  0x9b   : > { %v3540_v59 = vld [vmem:[%s3965_s16 + $0x68] sm:$0xf0]  ;;  %v2857_v60 = vld [vmem:[%s3965_s16 + $0x38] sm:$0xf] }
  0x9c   : > { %1305 = vmatpush.bf16.msrb.mxu0 %v3206_v4  ;;  %v2883_v4 = vld [vmem:[%s3965_s16 + $0x8c] sm:$0xf0]  ;;  %v4197_v0 = vor.u32 %v3540_v59, %v2869_v58  ;;  %v3575_v58 = vld [vmem:[%s3963_s15 + $0x94] sm:$0xf]  ;;  %v3015_v59 = vld [vmem:[%s3963_s15 + $0x98] sm:$0xf0] }
  0x9d   : > { %1348 = vmatpush.bf16.msrb.mxu1 %v2954_v5  ;;  %v3528_v5 = vld [vmem:[%s3965_s16 + $0xc] sm:$0xf]  ;;  %v4149_v9 = vor.u32 %v3542_v1, %v2883_v4 }
  0x9e   : > { %1219 = vmatpush.bf16.msrb.mxu2 %v3078_v11  ;;  %1262 = vmatpush.bf16.msrb.mxu3 %v3142_v12  ;;  %v4151_v10 = vor.u32 %v3528_v5, %v2831_v6  ;;  %v3583_v11 = vld [vmem:[%s3963_s15 + $0xd4] sm:$0xf]  ;;  %v3047_v12 = vld [vmem:[%s3963_s15 + $0xd8] sm:$0xf0] }
  0x9f   : > { %v3050_v14 = vor.u32 %v3583_v11, %v3047_v12  ;;  %v3095_v4 = vld [vmem:[%s3963_s15 + $0x138] sm:$0xf0]  ;;  %v3611_v5 = vld [vmem:[%s3963_s15 + $0x1b4] sm:$0xf] }
  0xa0   : > { %1306 = vmatpush.bf16.msrb.mxu0 %v3198_v18  ;;  %v3114_v18 = vor.u32 %v3599_v13, %v3111_v15  ;;  %v3098_v6 = vor.u32 %v3595_v3, %v3095_v4  ;;  %v3159_v11 = vld [vmem:[%s3963_s15 + $0x1b8] sm:$0xf0]  ;;  %v3627_v12 = vld [vmem:[%s3963_s15 + $0x234] sm:$0xf] }
  0xa1   : > { %1349 = vmatpush.bf16.msrb.mxu1 %v2946_v19  ;;  %v3178_v19 = vor.u32 %v3615_v16, %v3175_v17  ;;  %v3223_v13 = vld [vmem:[%s3963_s15 + $0x238] sm:$0xf0]  ;;  %v3545_v16 = vld [vmem:[%s3965_s16 + $0x90] sm:$0xf0]  ;;  %v2877_v17 = vld [vmem:[%s3965_s16 + $0x60] sm:$0xf] }
  0xa2   : > { %1220 = vmatpush.bf16.msrb.mxu2 %v3070_v29  ;;  %1263 = vmatpush.bf16.msrb.mxu3 %v3134_v30  ;;  %v4171_v29 = vor.u32 %v3535_v24, %v2849_v23  ;;  %v4173_v30 = vor.u32 %v3531_v26, %v2837_v25  ;;  %v3226_v15 = vor.u32 %v3627_v12, %v3223_v13  ;;  %v3577_v24 = vld [vmem:[%s3963_s15 + $0xa4] sm:$0xf]  ;;  %v3023_v25 = vld [vmem:[%s3963_s15 + $0xa8] sm:$0xf0]  ;;  %v3607_v3 = vld [vmem:[%s3963_s15 + $0x194] sm:$0xf] }
  0xa3   : > { %1145 = vmatmul.bf16.gmra.mxu0 %v4113_v33  ;;  %1165 = vmatmul.bf16.gmra.mxu2 %v4115_v34  ;;  %v3593_v26 = vld [vmem:[%s3963_s15 + $0x124] sm:$0xf]  ;;  %v3143_v4 = vld [vmem:[%s3963_s15 + $0x198] sm:$0xf0] }
  0xa4   : > { %1188 = vmatmul.bf16.gmra.mxu1 %v4117_v35  ;;  %1471 = vmatpush.bf16.msra.mxu0 %v3194_v42  ;;  %v3103_v42 = vld [vmem:[%s3963_s15 + $0x148] sm:$0xf0]  ;;  %v3573_v13 = vld [vmem:[%s3963_s15 + $0x84] sm:$0xf] }
  0xa5   : > { %1208 = vmatmul.bf16.gmra.mxu3 %v4119_v36  ;;  %1514 = vmatpush.bf16.msra.mxu1 %v3258_v52  ;;  %v3106_v51 = vor.u32 %v3597_v38, %v3103_v42  ;;  %v3170_v52 = vor.u32 %v3613_v45, %v3167_v50  ;;  %v3151_v38 = vld [vmem:[%s3963_s15 + $0x1a8] sm:$0xf0]  ;;  %v2909_v42 = vld [vmem:[%s3965_s16 + $0xa8] sm:$0xf] }
  0xa6   : > { %1385 = vmatpush.bf16.msra.mxu2 %v3066_v31  ;;  %1428 = vmatpush.bf16.msra.mxu3 %v3130_v32  ;;  %v4175_v31 = vor.u32 %v3533_v27, %v2851_v28  ;;  %v3581_v32 = vld [vmem:[%s3963_s15 + $0xc4] sm:$0xf]  ;;  %v3026_v27 = vor.u32 %v3577_v24, %v3023_v25  ;;  %v3087_v28 = vld [vmem:[%s3963_s15 + $0x128] sm:$0xf0] }
  0xa7   : > { %v3042_v41 = vor.u32 %v3581_v32, %v3039_v37  ;;  %v3090_v32 = vor.u32 %v3593_v26, %v3087_v28  ;;  %v3609_v37 = vld [vmem:[%s3963_s15 + $0x1a4] sm:$0xf]  ;;  %v3215_v50 = vld [vmem:[%s3963_s15 + $0x228] sm:$0xf0] }
  0xa8   : > { %1472 = vmatpush.bf16.msra.mxu0 %v3186_v61  ;;  %v3536_v61 = vld [vmem:[%s3965_s16 + $0x48] sm:$0xf0]  ;;  %v3154_v45 = vor.u32 %v3609_v37, %v3151_v38  ;;  %v3589_v25 = vld [vmem:[%s3963_s15 + $0x104] sm:$0xf]  ;;  %v3071_v26 = vld [vmem:[%s3963_s15 + $0x108] sm:$0xf0] }
  0xa9   : > { %1515 = vmatpush.bf16.msra.mxu1 %v3250_v62  ;;  %v3538_v62 = vld [vmem:[%s3965_s16 + $0x5c] sm:$0xf]  ;;  %v4199_v1 = vor.u32 %v3536_v61, %v2857_v60  ;;  %v3018_v60 = vor.u32 %v3575_v58, %v3015_v59  ;;  %v3591_v61 = vld [vmem:[%s3963_s15 + $0x114] sm:$0xf]  ;;  %v3605_v38 = vld [vmem:[%s3963_s15 + $0x184] sm:$0xf] }
  0xaa   : > { %1386 = vmatpush.bf16.msra.mxu2 %v3058_v53  ;;  %1429 = vmatpush.bf16.msra.mxu3 %v3122_v57  ;;  %v3629_v53 = vld [vmem:[%s3963_s15 + $0x244] sm:$0xf]  ;;  %v3034_v57 = vor.u32 %v3579_v54, %v3031_v56  ;;  %v4201_v2 = vor.u32 %v3538_v62, %v2871_v63  ;;  %v2911_v54 = vld [vmem:[%s3965_s16 + $0xbc] sm:$0xf0]  ;;  %v3079_v62 = vld [vmem:[%s3963_s15 + $0x118] sm:$0xf0] }
  0xab   : > { %v3082_v63 = vor.u32 %v3591_v61, %v3079_v62  ;;  %v2937_v59 = vld [vmem:[%s3965_s16 + $0xd8] sm:$0xf] }
  0xac   : > { %1473 = vmatpush.bf16.msra.mxu0 %v3178_v19  ;;  %v3543_v19 = vld [vmem:[%s3965_s16 + $0x84] sm:$0xf] }
  0xad   : > { %1516 = vmatpush.bf16.msra.mxu1 %v3242_v22  ;;  %v4223_v23 = vor.u32 %v3543_v19, %v2891_v20  ;;  %v2931_v19 = vld [vmem:[%s3965_s16 + $0xe4] sm:$0xf0] }
  0xae   : > { %1387 = vmatpush.bf16.msra.mxu2 %v3050_v14  ;;  %1430 = vmatpush.bf16.msra.mxu3 %v3114_v18  ;;  %v3162_v14 = vor.u32 %v3611_v5, %v3159_v11  ;;  %v3541_v18 = vld [vmem:[%s3965_s16 + $0x70] sm:$0xf0]  ;;  %v3623_v5 = vld [vmem:[%s3963_s15 + $0x214] sm:$0xf]  ;;  %v3207_v11 = vld [vmem:[%s3963_s15 + $0x218] sm:$0xf0] }
  0xaf   : > { %v4221_v22 = vor.u32 %v3541_v18, %v2877_v17  ;;  %v3210_v12 = vor.u32 %v3623_v5, %v3207_v11  ;;  %v3551_v17 = vld [vmem:[%s3965_s16 + $0xc0] sm:$0xf0]  ;;  %v3553_v18 = vld [vmem:[%s3965_s16 + $0xd4] sm:$0xf] }
  0xb0   : > { %1474 = vmatpush.bf16.msra.mxu0 %v3170_v52  ;;  %v2897_v52 = vld [vmem:[%s3965_s16 + $0x88] sm:$0xf]  ;;  %v4277_v28 = vor.u32 %v3553_v18, %v2931_v19 }
  0xb2   : > { %1388 = vmatpush.bf16.msra.mxu2 %v3042_v41  ;;  %1431 = vmatpush.bf16.msra.mxu3 %v3106_v51  ;;  %v3625_v41 = vld [vmem:[%s3963_s15 + $0x224] sm:$0xf]  ;;  %v3550_v51 = vld [vmem:[%s3965_s16 + $0xb8] sm:$0xf0] }
  0xb3   : > { %1150 = vmatmul.bf16.gmra.mxu0 %v4145_v7  ;;  %1221 = vmatmul.bf16.vlgmr.msrb.gmra.mxu2 %v4147_v8 }
  0xb4   : > { %1193 = vmatmul.bf16.gmra.mxu1 %v4149_v9  ;;  %1475 = vmatpush.bf16.msra.mxu0 %v3162_v14  ;;  %v3007_v14 = vld [vmem:[%s3963_s15 + $0x88] sm:$0xf0] }
  0xb5   : > { %1264 = vmatmul.bf16.vlgmr.msrb.gmra.mxu3 %v4151_v10 }
  0xb6   : > { %1389 = vmatpush.bf16.msra.mxu2 %v3034_v57  ;;  %1432 = vmatpush.bf16.msra.mxu3 %v3098_v6  ;;  %v3146_v6 = vor.u32 %v3607_v3, %v3143_v4 }
  0xb8   : > { %1476 = vmatpush.bf16.msra.mxu0 %v3154_v45 }
  0xba   : > { %1390 = vmatpush.bf16.msra.mxu2 %v3026_v27  ;;  %1433 = vmatpush.bf16.msra.mxu3 %v3090_v32  ;;  %v3074_v32 = vor.u32 %v3589_v25, %v3071_v26 }
  0xbc   : > { %1477 = vmatpush.bf16.msra.mxu0 %v3146_v6 }
  0xbe   : > { %1391 = vmatpush.bf16.msra.mxu2 %v3018_v60  ;;  %1434 = vmatpush.bf16.msra.mxu3 %v3082_v63  ;;  %v3556_v60 = vld [vmem:[%s3965_s16 + $0xe8] sm:$0xf0] }
  0xbf   : > { %v4296_v4 = vor.u32 %v3556_v60, %v2937_v59 }
  0xc2   : > { %1435 = vmatpush.bf16.msra.mxu3 %v3074_v32 }
  0xc3   : > { %1226 = vmatmul.bf16.gmra.mxu2 %v4171_v29  ;;  %1307 = vmatmul.bf16.vlgmr.msrb.gmra.mxu0 %v4173_v30 }
  0xc4   : > { %1350 = vmatmul.bf16.vlgmr.msrb.gmra.mxu1 %v4017_v43  ;;  %v3231_v43 = vld [vmem:[%s3963_s15 + $0x248] sm:$0xf0] }
  0xc5   : > { %1269 = vmatmul.bf16.gmra.mxu3 %v4175_v31  ;;  %v3234_v55 = vor.u32 %v3629_v53, %v3231_v43  ;;  %v3546_v53 = vld [vmem:[%s3965_s16 + $0x98] sm:$0xf0]  ;;  %v3548_v43 = vld [vmem:[%s3965_s16 + $0xac] sm:$0xf] }
  0xc6   : > { %v4245_v56 = vor.u32 %v3546_v53, %v2897_v52  ;;  %v4247_v57 = vor.u32 %v3548_v43, %v2911_v54  ;;  %v471_v54 = vld [vmem:[%s3965_s16 + $0xf8] sm:$0xff] }
  0xc7   : > { %1517 = vmatpush.bf16.msra.mxu1 %v3234_v55  ;;  %v4243_v55 = vor.u32 %v3550_v51, %v2909_v42  ;;  %v3621_v42 = vld [vmem:[%s3963_s15 + $0x204] sm:$0xf]  ;;  %v655_v61 = vunpack.c.h.b16 %v471_v54 }
  0xc9   : > { %v4302_v11 = vpack.c.b16 %v655_v61, %v655_v61 }
  0xcb   : > { %1518 = vmatpush.bf16.msra.mxu1 %v3226_v15  ;;  %v2929_v15 = vld [vmem:[%s3965_s16 + $0xd0] sm:$0xf] }
  0xd3   : > { %1231 = vmatmul.bf16.gmra.mxu2 %v4197_v0  ;;  %1312 = vmatmul.bf16.gmra.mxu0 %v4199_v1 }
  0xd4   : > { %1355 = vmatmul.bf16.gmra.mxu1 %v4069_v39  ;;  %v2889_v39 = vld [vmem:[%s3965_s16 + $0x80] sm:$0xf] }
  0xd5   : > { %1274 = vmatmul.bf16.gmra.mxu3 %v4201_v2  ;;  %v4219_v21 = vor.u32 %v3545_v16, %v2889_v39  ;;  %v3555_v39 = vld [vmem:[%s3965_s16 + $0xe0] sm:$0xf0]  ;;  %v2917_v16 = vld [vmem:[%s3965_s16 + $0xb0] sm:$0xf] }
  0xd6   : > { %v4269_v20 = vor.u32 %v3555_v39, %v2929_v15  ;;  %v4271_v24 = vor.u32 %v3551_v17, %v2917_v16  ;;  %v472_v39 = vld [vmem:[%s3965_s16 + $0x100] sm:$0xf] }
  0xd7   : > { %v656_v17 = vunpack.c.l.b16 %v472_v39 }
  0xd9   : > { %v4313_v25 = vpack.c.b16 %v656_v17, %v656_v17 }
  0xe3   : > { %1236 = vmatmul.bf16.gmra.mxu2 %v4219_v21  ;;  %1317 = vmatmul.bf16.gmra.mxu0 %v4221_v22 }
  0xe4   : > { %1360 = vmatmul.bf16.gmra.mxu1 %v4113_v33  ;;  %v3218_v33 = vor.u32 %v3625_v41, %v3215_v50  ;;  %v3135_v41 = vld [vmem:[%s3963_s15 + $0x188] sm:$0xf0] }
  0xe5   : > { %1279 = vmatmul.bf16.gmra.mxu3 %v4223_v23  ;;  %v3138_v45 = vor.u32 %v3605_v38, %v3135_v41  ;;  %v3199_v50 = vld [vmem:[%s3963_s15 + $0x208] sm:$0xf0] }
  0xe6   : > { %1519 = vmatpush.bf16.msra.mxu1 %v3218_v33  ;;  %v3202_v52 = vor.u32 %v3621_v42, %v3199_v50 }
  0xe7   : > { %1478 = vmatpush.bf16.msra.mxu0 %v3138_v45 }
  0xea   : > { %1520 = vmatpush.bf16.msra.mxu1 %v3210_v12 }
  0xee   : > { %1521 = vmatpush.bf16.msra.mxu1 %v3202_v52 }
  0xf3   : > { %1241 = vmatmul.bf16.gmra.mxu2 %v4243_v55  ;;  %1322 = vmatmul.bf16.gmra.mxu0 %v4245_v56 }
  0xf4   : > { %1365 = vmatmul.bf16.gmra.mxu1 %v4145_v7  ;;  %v3010_v7 = vor.u32 %v3573_v13, %v3007_v14 }
  0xf5   : > { %1284 = vmatmul.bf16.gmra.mxu3 %v4247_v57 }
  0xf6   : > { %1392 = vmatpush.bf16.msra.mxu2 %v3010_v7 }
 0x100   : > { %v4275_v27 = vpop.f32.mrf.mxu0 }
 0x101   : > { %v4279_v37 = vpop.f32.mrf.mxu1 }
 0x103   : > { %1246 = vmatmul.bf16.gmra.mxu2 %v4269_v20  ;;  %1327 = vmatmul.bf16.gmra.mxu0 %v4271_v24 }
 0x104   : > { %1370 = vmatmul.bf16.gmra.mxu1 %v4019_v44  ;;  %v654_v44 = vunpack.c.l.b16 %v471_v54 }
 0x105   : > { %1289 = vmatmul.bf16.gmra.mxu3 %v4277_v28 }
 0x106   : > { %v1156_v51 = vpop.f32.mrf.mxu2  ;;  %v4294_v3 = vpack.c.b16 %v654_v44, %v654_v44  ;;  %v1180_v44 = vadd.f32 %v4279_v37, %v4275_v27 }
 0x108   : > { %v1199_v53 = vpop.f32.mrf.mxu3  ;;  %v1138_v43 = vpop.f32.mrf.mxu0 }
 0x109   : > { %v4289_v33 = vadd.f32 %v1199_v53, %v1156_v51  ;;  %v1181_v58 = vpop.f32.mrf.mxu1 }
 0x10e   : > { %v1158_v62 = vpop.f32.mrf.mxu2 }
 0x110   : > { %v1201_v63 = vpop.f32.mrf.mxu3  ;;  %v4300_v6 = vpop.f32.mrf.mxu0 }
 0x111   : > { %v4298_v5 = vadd.f32 %v1201_v63, %v1158_v62  ;;  %v1184_v12 = vpop.f32.mrf.mxu1 }
 0x113   : > { %1251 = vmatmul.bf16.gmra.mxu2 %v4294_v3  ;;  %1332 = vmatmul.bf16.gmra.mxu0 %v4296_v4 }
 0x114   : > { %1375 = vmatmul.bf16.gmra.mxu1 %v4071_v40 }
 0x115   : > { %1294 = vmatmul.bf16.gmra.mxu3 %v4302_v11 }
 0x116   : > { %v1161_v13 = vpop.f32.mrf.mxu2 }
 0x118   : > { %v1204_v14 = vpop.f32.mrf.mxu3  ;;  %v4310_v7 = vpop.f32.mrf.mxu0 }
 0x119   : > { %v4308_v15 = vadd.f32 %v1204_v14, %v1161_v13  ;;  %v1186_v16 = vpop.f32.mrf.mxu1 }
 0x11e   : > { %v1163_v18 = vpop.f32.mrf.mxu2 }
 0x120   : > { %v1206_v19 = vpop.f32.mrf.mxu3  ;;  %v4317_v32 = vpop.f32.mrf.mxu0 }
 0x121   : > { %v4315_v26 = vadd.f32 %v1206_v19, %v1163_v18  ;;  %v4319_v40 = vpop.f32.mrf.mxu1  ;;  %v410_v18 = vld [vmem:[#allocation2 + $0x10] sm:$0xff] }
 0x123   : > { %1337 = vmatmul.bf16.gmra.mxu0 %v4313_v25  ;;  %1393 = vmatmul.bf16.vlgmr.msra.gmra.mxu2 %v4024_v48 }
 0x124   : > { %1380 = vmatmul.bf16.gmra.mxu1 %v4115_v34 }
 0x125   : > { %1436 = vmatmul.bf16.vlgmr.msra.gmra.mxu3 %v4147_v8 }
 0x126   : > { %v1166_v38 = vpop.f32.mrf.mxu2 }
 0x128   : > { %v1209_v41 = vpop.f32.mrf.mxu3  ;;  %v4327_v45 = vpop.f32.mrf.mxu0 }
 0x129   : > { %v4325_v42 = vadd.f32 %v1209_v41, %v1166_v38  ;;  %v4329_v50 = vpop.f32.mrf.mxu1 }
 0x12e   : > { %v1168_v51 = vpop.f32.mrf.mxu2 }
 0x130   : > { %v1211_v52 = vpop.f32.mrf.mxu3  ;;  %v4331_v53 = vpop.f32.mrf.mxu0 }
 0x131   : > { %v4333_v54 = vpop.f32.mrf.mxu1 }
 0x133   : > { %1398 = vmatmul.bf16.gmra.mxu2 %v4076_v46  ;;  %1479 = vmatmul.bf16.vlgmr.msra.gmra.mxu0 %v4151_v10  ;;  %v408_v46 = vld [vmem:[#allocation2 + $0xb0] sm:$0xff]  ;;  %v1182_v10 = vadd.f32 %v1181_v58, %v1138_v43  ;;  %v1185_v43 = vadd.f32 %v1184_v12, %v4300_v6 }
 0x134   : > { %1522 = vmatmul.bf16.vlgmr.msra.gmra.mxu1 %v4173_v30 }
 0x135   : > { %1441 = vmatmul.bf16.gmra.mxu3 %v4171_v29 }
 0x136   : > { %v1222_v48 = vpop.f32.mrf.mxu2 }
 0x137   : > { %v1223_v60 = vadd.f32 %v1222_v48, %v1180_v44 }
 0x138   : > { %v1265_v34 = vpop.f32.mrf.mxu3  ;;  %v4339_v8 = vpop.f32.mrf.mxu0 }
 0x139   : > { %v4343_v59 = vpop.f32.mrf.mxu1  ;;  %v1266_v62 = vadd.f32 %v1265_v34, %v1223_v60 }
 0x13e   : > { %v1224_v61 = vpop.f32.mrf.mxu2 }
 0x13f   : > { %v1225_v29 = vadd.f32 %v1224_v61, %v1182_v10 }
 0x140   : > { %v1267_v63 = vpop.f32.mrf.mxu3  ;;  %v1308_v13 = vpop.f32.mrf.mxu0 }
 0x141   : > { %v1309_v14 = vadd.f32 %v1308_v13, %v1266_v62  ;;  %v4345_v30 = vpop.f32.mrf.mxu1  ;;  %v1268_v37 = vadd.f32 %v1267_v63, %v1225_v29  ;;  %v414_v63 = vld [vmem:[#allocation2 + $0x40] sm:$0xff] }
 0x142   : > { %v416_v29 = vld [vmem:[#allocation2 + $0x80] sm:$0xff] }
 0x143   : > { %v1557_v39 = vadd.f32 %v1309_v14, %v408_v46  ;;  %1403 = vmatmul.bf16.gmra.mxu2 %v4117_v35  ;;  %1484 = vmatmul.bf16.gmra.mxu0 %v4175_v31 }
 0x144   : > { %1527 = vmatmul.bf16.gmra.mxu1 %v4199_v1  ;;  %v412_v1 = vld [vmem:[#allocation2 + $0x60] sm:$0xff] }
 0x145   : > { %1446 = vmatmul.bf16.gmra.mxu3 %v4197_v0  ;;  %1583 = vst [vmem:[#allocation2 + $0xb0] sm:$0xff] %v1557_v39  ;;  %v1187_v0 = vadd.f32 %v1186_v16, %v4310_v7  ;;  %v1190_v7 = vadd.f32 %v4319_v40, %v4317_v32  ;;  %v1192_v39 = vadd.f32 %v4329_v50, %v4327_v45 }
 0x146   : > { %v1227_v27 = vpop.f32.mrf.mxu2  ;;  %v1195_v45 = vadd.f32 %v4333_v54, %v4331_v53 }
 0x147   : > { %v1228_v41 = vadd.f32 %v1227_v27, %v1185_v43  ;;  %v418_v43 = vld [vmem:[#allocation2 + $0x50] sm:$0xff] }
 0x148   : > { %v1270_v17 = vpop.f32.mrf.mxu3  ;;  %v1310_v19 = vpop.f32.mrf.mxu0 }
 0x149   : > { %v1311_v58 = vadd.f32 %v1310_v19, %v1268_v37  ;;  %v4352_v38 = vpop.f32.mrf.mxu1  ;;  %v1271_v31 = vadd.f32 %v1270_v17, %v1228_v41 }
 0x14b   : > { %v1559_v51 = vadd.f32 %v1311_v58, %v410_v18 }
 0x14d   : > { %1585 = vst [vmem:[#allocation2 + $0x10] sm:$0xff] %v1559_v51 }
 0x14e   : > { %v1229_v35 = vpop.f32.mrf.mxu2 }
 0x14f   : > { %v1230_v60 = vadd.f32 %v1229_v35, %v1187_v0 }
 0x150   : > { %v1272_v52 = vpop.f32.mrf.mxu3  ;;  %v1313_v48 = vpop.f32.mrf.mxu0 }
 0x151   : > { %v1314_v34 = vadd.f32 %v1313_v48, %v1271_v31  ;;  %v4355_v44 = vpop.f32.mrf.mxu1  ;;  %v1273_v12 = vadd.f32 %v1272_v52, %v1230_v60  ;;  %v420_v31 = vld [vmem:[#allocation2 + $0x88] sm:$0xff]  ;;  %v1197_v52 = vadd.f32 %v4343_v59, %v4339_v8 }
 0x153   : > { %v1561_v61 = vadd.f32 %v1314_v34, %v412_v1  ;;  %1408 = vmatmul.bf16.gmra.mxu2 %v4149_v9  ;;  %1489 = vmatmul.bf16.gmra.mxu0 %v4201_v2 }
 0x154   : > { %1532 = vmatmul.bf16.gmra.mxu1 %v4221_v22 }
 0x155   : > { %1451 = vmatmul.bf16.gmra.mxu3 %v4219_v21  ;;  %1587 = vst [vmem:[#allocation2 + $0x60] sm:$0xff] %v1561_v61  ;;  %v422_v61 = vld [vmem:[#allocation2 + $0x8] sm:$0xff] }
 0x156   : > { %v1232_v6 = vpop.f32.mrf.mxu2 }
 0x157   : > { %v1233_v10 = vadd.f32 %v1232_v6, %v1190_v7 }
 0x158   : > { %v1275_v62 = vpop.f32.mrf.mxu3  ;;  %v1315_v46 = vpop.f32.mrf.mxu0 }
 0x159   : > { %v1316_v16 = vadd.f32 %v1315_v46, %v1273_v12  ;;  %v4363_v13 = vpop.f32.mrf.mxu1  ;;  %v1276_v14 = vadd.f32 %v1275_v62, %v1233_v10  ;;  %v424_v46 = vld [vmem:[#allocation2 + $0x20] sm:$0xff] }
 0x15b   : > { %v1563_v9 = vadd.f32 %v1316_v16, %v414_v63 }
 0x15d   : > { %1589 = vst [vmem:[#allocation2 + $0x40] sm:$0xff] %v1563_v9 }
 0x15e   : > { %v1234_v2 = vpop.f32.mrf.mxu2 }
 0x15f   : > { %v1235_v17 = vadd.f32 %v1234_v2, %v1192_v39 }
 0x160   : > { %v1277_v22 = vpop.f32.mrf.mxu3  ;;  %v1318_v21 = vpop.f32.mrf.mxu0 }
 0x161   : > { %v1319_v27 = vadd.f32 %v1318_v21, %v1276_v14  ;;  %v4367_v37 = vpop.f32.mrf.mxu1  ;;  %v1278_v40 = vadd.f32 %v1277_v22, %v1235_v17  ;;  %v426_v14 = vld [vmem:[#allocation2 + $0x58] sm:$0xff]  ;;  %v428_v17 = vld [vmem:[#allocation2 + $0xa0] sm:$0xff] }
 0x163   : > { %v1565_v18 = vadd.f32 %v1319_v27, %v416_v29  ;;  %1413 = vmatmul.bf16.gmra.mxu2 %v4026_v49  ;;  %1494 = vmatmul.bf16.gmra.mxu0 %v4223_v23 }
 0x164   : > { %1537 = vmatmul.bf16.gmra.mxu1 %v4245_v56 }
 0x165   : > { %1456 = vmatmul.bf16.gmra.mxu3 %v4243_v55  ;;  %1591 = vst [vmem:[#allocation2 + $0x80] sm:$0xff] %v1565_v18 }
 0x166   : > { %v1237_v32 = vpop.f32.mrf.mxu2 }
 0x167   : > { %v1238_v51 = vadd.f32 %v1237_v32, %v1195_v45 }
 0x168   : > { %v1280_v19 = vpop.f32.mrf.mxu3  ;;  %v1320_v58 = vpop.f32.mrf.mxu0 }
 0x169   : > { %v1321_v50 = vadd.f32 %v1320_v58, %v1278_v40  ;;  %v4375_v41 = vpop.f32.mrf.mxu1  ;;  %v1281_v35 = vadd.f32 %v1280_v19, %v1238_v51  ;;  %v430_v58 = vld [vmem:[#allocation2 + $0x98] sm:$0xff] }
 0x16b   : > { %v1567_v49 = vadd.f32 %v1321_v50, %v418_v43 }
 0x16d   : > { %1593 = vst [vmem:[#allocation2 + $0x50] sm:$0xff] %v1567_v49 }
 0x16e   : > { %v1239_v23 = vpop.f32.mrf.mxu2 }
 0x16f   : > { %v1240_v0 = vadd.f32 %v1239_v23, %v1197_v52 }
 0x170   : > { %v1282_v56 = vpop.f32.mrf.mxu3  ;;  %v1323_v55 = vpop.f32.mrf.mxu0 }
 0x171   : > { %v1324_v1 = vadd.f32 %v1323_v55, %v1281_v35  ;;  %v4379_v48 = vpop.f32.mrf.mxu1  ;;  %v1283_v54 = vadd.f32 %v1282_v56, %v1240_v0 }
 0x173   : > { %v1569_v34 = vadd.f32 %v1324_v1, %v420_v31  ;;  %1418 = vmatmul.bf16.gmra.mxu2 %v4078_v47  ;;  %1499 = vmatmul.bf16.gmra.mxu0 %v4247_v57  ;;  %v432_v31 = vld [vmem:[#allocation2 + $0xc0] sm:$0xff] }
 0x174   : > { %1542 = vmatmul.bf16.gmra.mxu1 %v4271_v24 }
 0x175   : > { %1461 = vmatmul.bf16.gmra.mxu3 %v4269_v20  ;;  %1595 = vst [vmem:[#allocation2 + $0x88] sm:$0xff] %v1569_v34 }
 0x176   : > { %v1242_v53 = vpop.f32.mrf.mxu2 }
 0x177   : > { %v1243_v12 = vadd.f32 %v1242_v53, %v4289_v33 }
 0x178   : > { %v1285_v60 = vpop.f32.mrf.mxu3  ;;  %v1325_v6 = vpop.f32.mrf.mxu0 }
 0x179   : > { %v1326_v8 = vadd.f32 %v1325_v6, %v1283_v54  ;;  %v4385_v59 = vpop.f32.mrf.mxu1  ;;  %v1286_v63 = vadd.f32 %v1285_v60, %v1243_v12 }
 0x17b   : > { %v1571_v62 = vadd.f32 %v1326_v8, %v422_v61 }
 0x17d   : > { %1597 = vst [vmem:[#allocation2 + $0x8] sm:$0xff] %v1571_v62  ;;  %v409_v62 = vld [vmem:[#allocation2] sm:$0xff] }
 0x17e   : > { %v1244_v47 = vpop.f32.mrf.mxu2 }
 0x17f   : > { %v1245_v16 = vadd.f32 %v1244_v47, %v4298_v5 }
 0x180   : > { %v1287_v57 = vpop.f32.mrf.mxu3  ;;  %v1328_v24 = vpop.f32.mrf.mxu0 }
 0x181   : > { %v1329_v7 = vadd.f32 %v1328_v24, %v1286_v63  ;;  %v4388_v20 = vpop.f32.mrf.mxu1  ;;  %v1288_v9 = vadd.f32 %v1287_v57, %v1245_v16 }
 0x183   : > { %v1573_v10 = vadd.f32 %v1329_v7, %v424_v46  ;;  %1423 = vmatmul.bf16.gmra.mxu2 %v4119_v36  ;;  %1504 = vmatmul.bf16.gmra.mxu0 %v4277_v28 }
 0x184   : > { %1547 = vmatmul.bf16.gmra.mxu1 %v4296_v4 }
 0x185   : > { %1466 = vmatmul.bf16.gmra.mxu3 %v4294_v3  ;;  %1599 = vst [vmem:[#allocation2 + $0x20] sm:$0xff] %v1573_v10 }
 0x186   : > { %v1247_v33 = vpop.f32.mrf.mxu2 }
 0x187   : > { %v1248_v5 = vadd.f32 %v1247_v33, %v4308_v15 }
 0x188   : > { %v1290_v2 = vpop.f32.mrf.mxu3  ;;  %v1330_v22 = vpop.f32.mrf.mxu0 }
 0x189   : > { %v1331_v29 = vadd.f32 %v1330_v22, %v1288_v9  ;;  %v4395_v21 = vpop.f32.mrf.mxu1  ;;  %v1291_v27 = vadd.f32 %v1290_v2, %v1248_v5  ;;  %v411_v9 = vld [vmem:[#allocation2 + $0x48] sm:$0xff] }
 0x18b   : > { %v1575_v39 = vadd.f32 %v1331_v29, %v426_v14 }
 0x18d   : > { %1601 = vst [vmem:[#allocation2 + $0x58] sm:$0xff] %v1575_v39 }
 0x18e   : > { %v1249_v36 = vpop.f32.mrf.mxu2 }
 0x18f   : > { %v1250_v32 = vadd.f32 %v1249_v36, %v4315_v26 }
 0x190   : > { %v1292_v28 = vpop.f32.mrf.mxu3  ;;  %v1333_v4 = vpop.f32.mrf.mxu0 }
 0x191   : > { %v1334_v18 = vadd.f32 %v1333_v4, %v1291_v27  ;;  %v4398_v3 = vpop.f32.mrf.mxu1  ;;  %v1293_v15 = vadd.f32 %v1292_v28, %v1250_v32  ;;  %v413_v27 = vld [vmem:[#allocation2 + $0x28] sm:$0xff] }
 0x193   : > { %v1577_v40 = vadd.f32 %v1334_v18, %v428_v17  ;;  %1509 = vmatmul.bf16.gmra.mxu0 %v4302_v11 }
 0x194   : > { %1552 = vmatmul.bf16.gmra.mxu1 %v4313_v25 }
 0x195   : > { %1603 = vst [vmem:[#allocation2 + $0xa0] sm:$0xff] %v1577_v40 }
 0x196   : > { %v1252_v19 = vpop.f32.mrf.mxu2 }
 0x197   : > { %v1253_v49 = vadd.f32 %v1252_v19, %v4325_v42 }
 0x198   : > { %v1295_v43 = vpop.f32.mrf.mxu3  ;;  %v1335_v45 = vpop.f32.mrf.mxu0 }
 0x199   : > { %v1336_v50 = vadd.f32 %v1335_v45, %v1293_v15  ;;  %v4403_v51 = vpop.f32.mrf.mxu1  ;;  %v1296_v26 = vadd.f32 %v1295_v43, %v1253_v49  ;;  %v415_v43 = vld [vmem:[#allocation2 + $0x78] sm:$0xff] }
 0x19b   : > { %v1579_v23 = vadd.f32 %v1336_v50, %v430_v58 }
 0x19d   : > { %1605 = vst [vmem:[#allocation2 + $0x98] sm:$0xff] %v1579_v23 }
 0x19e   : > { %v1254_v35 = vpop.f32.mrf.mxu2 }
 0x1a0   : > { %v1297_v56 = vpop.f32.mrf.mxu3  ;;  %v1338_v11 = vpop.f32.mrf.mxu0 }
 0x1a1   : > { %v1339_v55 = vadd.f32 %v1338_v11, %v1296_v26  ;;  %v4406_v25 = vpop.f32.mrf.mxu1 }
 0x1a3   : > { %v1581_v52 = vadd.f32 %v1339_v55, %v432_v31  ;;  %v417_v31 = vld [vmem:[#allocation2 + $0xa8] sm:$0xff] }
 0x1a5   : > { %1607 = vst [vmem:[#allocation2 + $0xc0] sm:$0xff] %v1581_v52 }
 0x1a6   : > { %v1394_v1 = vpop.f32.mrf.mxu2 }
 0x1a7   : > { %v1395_v54 = vadd.f32 %v1394_v1, %v4345_v30 }
 0x1a8   : > { %v1437_v0 = vpop.f32.mrf.mxu3  ;;  %v1340_v34 = vpop.f32.mrf.mxu0 }
 0x1a9   : > { %v1383_v53 = vpop.f32.mrf.mxu1  ;;  %v1438_v42 = vadd.f32 %v1437_v0, %v1395_v54 }
 0x1ae   : > { %v1396_v60 = vpop.f32.mrf.mxu2 }
 0x1af   : > { %v1397_v47 = vadd.f32 %v1396_v60, %v4352_v38  ;;  %v419_v60 = vld [vmem:[#allocation2 + $0x30] sm:$0xff] }
 0x1b0   : > { %v1439_v61 = vpop.f32.mrf.mxu3  ;;  %v1480_v6 = vpop.f32.mrf.mxu0 }
 0x1b1   : > { %v1481_v8 = vadd.f32 %v1480_v6, %v1438_v42  ;;  %v1523_v12 = vpop.f32.mrf.mxu1  ;;  %v1440_v24 = vadd.f32 %v1439_v61, %v1397_v47 }
 0x1b3   : > { %v1524_v63 = vadd.f32 %v1523_v12, %v1481_v8 }
 0x1b5   : > { %v1558_v57 = vadd.f32 %v1524_v63, %v409_v62 }
 0x1b6   : > { %v1399_v46 = vpop.f32.mrf.mxu2 }
 0x1b7   : > { %1584 = vst [vmem:[#allocation2] sm:$0xff] %v1558_v57  ;;  %v1400_v30 = vadd.f32 %v1399_v46, %v4355_v44  ;;  %v421_v57 = vld [vmem:[#allocation2 + $0x70] sm:$0xff] }
 0x1b8   : > { %v1442_v7 = vpop.f32.mrf.mxu3  ;;  %v1482_v16 = vpop.f32.mrf.mxu0 }
 0x1b9   : > { %v1483_v10 = vadd.f32 %v1482_v16, %v1440_v24  ;;  %v1525_v33 = vpop.f32.mrf.mxu1  ;;  %v1443_v29 = vadd.f32 %v1442_v7, %v1400_v30 }
 0x1bb   : > { %v1526_v2 = vadd.f32 %v1525_v33, %v1483_v10 }
 0x1bd   : > { %v1560_v14 = vadd.f32 %v1526_v2, %v411_v9  ;;  %v423_v2 = vld [vmem:[#allocation2 + $0x38] sm:$0xff] }
 0x1be   : > { %v1401_v22 = vpop.f32.mrf.mxu2 }
 0x1bf   : > { %1586 = vst [vmem:[#allocation2 + $0x48] sm:$0xff] %v1560_v14  ;;  %v1402_v28 = vadd.f32 %v1401_v22, %v4363_v13 }
 0x1c0   : > { %v1444_v5 = vpop.f32.mrf.mxu3  ;;  %v1485_v39 = vpop.f32.mrf.mxu0 }
 0x1c1   : > { %v1486_v38 = vadd.f32 %v1485_v39, %v1443_v29  ;;  %v1528_v36 = vpop.f32.mrf.mxu1  ;;  %v1445_v32 = vadd.f32 %v1444_v5, %v1402_v28  ;;  %v425_v28 = vld [vmem:[#allocation2 + $0xb8] sm:$0xff] }
 0x1c3   : > { %v1529_v17 = vadd.f32 %v1528_v36, %v1486_v38 }
 0x1c5   : > { %v1562_v4 = vadd.f32 %v1529_v17, %v413_v27 }
 0x1c6   : > { %v1404_v18 = vpop.f32.mrf.mxu2 }
 0x1c7   : > { %1588 = vst [vmem:[#allocation2 + $0x28] sm:$0xff] %v1562_v4  ;;  %v1405_v58 = vadd.f32 %v1404_v18, %v4367_v37 }
 0x1c8   : > { %v1447_v40 = vpop.f32.mrf.mxu3  ;;  %v1487_v19 = vpop.f32.mrf.mxu0 }
 0x1c9   : > { %v1488_v44 = vadd.f32 %v1487_v19, %v1445_v32  ;;  %v1530_v15 = vpop.f32.mrf.mxu1  ;;  %v1448_v23 = vadd.f32 %v1447_v40, %v1405_v58 }
 0x1cb   : > { %v1531_v45 = vadd.f32 %v1530_v15, %v1488_v44 }
 0x1cd   : > { %v1564_v50 = vadd.f32 %v1531_v45, %v415_v43  ;;  %v427_v43 = vld [vmem:[#allocation2 + $0xc8] sm:$0xff] }
 0x1ce   : > { %v1406_v49 = vpop.f32.mrf.mxu2 }
 0x1cf   : > { %1590 = vst [vmem:[#allocation2 + $0x78] sm:$0xff] %v1564_v50  ;;  %v1407_v11 = vadd.f32 %v1406_v49, %v4375_v41 }
 0x1d0   : > { %v1449_v35 = vpop.f32.mrf.mxu3  ;;  %v1490_v26 = vpop.f32.mrf.mxu0 }
 0x1d1   : > { %v1491_v13 = vadd.f32 %v1490_v26, %v1448_v23  ;;  %v1533_v56 = vpop.f32.mrf.mxu1  ;;  %v1450_v0 = vadd.f32 %v1449_v35, %v1407_v11 }
 0x1d3   : > { %v1534_v55 = vadd.f32 %v1533_v56, %v1491_v13  ;;  %v429_v56 = vld [vmem:[#allocation2 + $0x90] sm:$0xff] }
 0x1d5   : > { %v1566_v52 = vadd.f32 %v1534_v55, %v417_v31 }
 0x1d6   : > { %v1409_v1 = vpop.f32.mrf.mxu2 }
 0x1d7   : > { %1592 = vst [vmem:[#allocation2 + $0xa8] sm:$0xff] %v1566_v52  ;;  %v1410_v42 = vadd.f32 %v1409_v1, %v4379_v48 }
 0x1d8   : > { %v1452_v34 = vpop.f32.mrf.mxu3  ;;  %v1492_v53 = vpop.f32.mrf.mxu0 }
 0x1d9   : > { %v1493_v37 = vadd.f32 %v1492_v53, %v1450_v0  ;;  %v1535_v54 = vpop.f32.mrf.mxu1  ;;  %v1453_v12 = vadd.f32 %v1452_v34, %v1410_v42 }
 0x1db   : > { %v1536_v61 = vadd.f32 %v1535_v54, %v1493_v37  ;;  %v431_v37 = vld [vmem:[#allocation2 + $0x18] sm:$0xff] }
 0x1dd   : > { %v1568_v6 = vadd.f32 %v1536_v61, %v419_v60 }
 0x1de   : > { %v1411_v8 = vpop.f32.mrf.mxu2 }
 0x1df   : > { %1594 = vst [vmem:[#allocation2 + $0x30] sm:$0xff] %v1568_v6  ;;  %v1412_v46 = vadd.f32 %v1411_v8, %v4385_v59 }
 0x1e0   : > { %v1454_v62 = vpop.f32.mrf.mxu3  ;;  %v1495_v47 = vpop.f32.mrf.mxu0 }
 0x1e1   : > { %v1496_v41 = vadd.f32 %v1495_v47, %v1453_v12  ;;  %v1538_v63 = vpop.f32.mrf.mxu1  ;;  %v1455_v10 = vadd.f32 %v1454_v62, %v1412_v46  ;;  %v433_v47 = vld [vmem:[#allocation2 + $0x68] sm:$0xff] }
 0x1e3   : > { %v1539_v24 = vadd.f32 %v1538_v63, %v1496_v41 }
 0x1e5   : > { %v1570_v7 = vadd.f32 %v1539_v24, %v421_v57 }
 0x1e6   : > { %v1414_v16 = vpop.f32.mrf.mxu2 }
 0x1e7   : > { %1596 = vst [vmem:[#allocation2 + $0x70] sm:$0xff] %v1570_v7  ;;  %v1415_v14 = vadd.f32 %v1414_v16, %v4388_v20 }
 0x1e8   : > { %v1457_v33 = vpop.f32.mrf.mxu3  ;;  %v1497_v9 = vpop.f32.mrf.mxu0 }
 0x1e9   : > { %v1498_v48 = vadd.f32 %v1497_v9, %v1455_v10  ;;  %v1540_v30 = vpop.f32.mrf.mxu1  ;;  %v1458_v39 = vadd.f32 %v1457_v33, %v1415_v14 }
 0x1eb   : > { %v1541_v22 = vadd.f32 %v1540_v30, %v1498_v48 }
 0x1ed   : > { %v1572_v29 = vadd.f32 %v1541_v22, %v423_v2 }
 0x1ee   : > { %v1416_v5 = vpop.f32.mrf.mxu2 }
 0x1ef   : > { %1598 = vst [vmem:[#allocation2 + $0x38] sm:$0xff] %v1572_v29  ;;  %v1417_v17 = vadd.f32 %v1416_v5, %v4395_v21 }
 0x1f0   : > { %v1459_v38 = vpop.f32.mrf.mxu3  ;;  %v1500_v36 = vpop.f32.mrf.mxu0 }
 0x1f1   : > { %v1501_v59 = vadd.f32 %v1500_v36, %v1458_v39  ;;  %v1543_v27 = vpop.f32.mrf.mxu1  ;;  %v1460_v40 = vadd.f32 %v1459_v38, %v1417_v17 }
 0x1f3   : > { %v1544_v4 = vadd.f32 %v1543_v27, %v1501_v59 }
 0x1f5   : > { %v1574_v18 = vadd.f32 %v1544_v4, %v425_v28 }
 0x1f6   : > { %v1419_v32 = vpop.f32.mrf.mxu2 }
 0x1f7   : > { %1600 = vst [vmem:[#allocation2 + $0xb8] sm:$0xff] %v1574_v18  ;;  %v1420_v58 = vadd.f32 %v1419_v32, %v4398_v3 }
 0x1f8   : > { %v1462_v19 = vpop.f32.mrf.mxu3  ;;  %v1502_v44 = vpop.f32.mrf.mxu0 }
 0x1f9   : > { %v1503_v20 = vadd.f32 %v1502_v44, %v1460_v40  ;;  %v1545_v15 = vpop.f32.mrf.mxu1  ;;  %v1463_v23 = vadd.f32 %v1462_v19, %v1420_v58 }
 0x1fb   : > { %v1546_v45 = vadd.f32 %v1545_v15, %v1503_v20 }
 0x1fd   : > { %v1576_v50 = vadd.f32 %v1546_v45, %v427_v43 }
 0x1fe   : > { %v1421_v49 = vpop.f32.mrf.mxu2 }
 0x1ff   : > { %1602 = vst [vmem:[#allocation2 + $0xc8] sm:$0xff] %v1576_v50  ;;  %v1422_v31 = vadd.f32 %v1421_v49, %v4403_v51 }
 0x200   : > { %v1464_v35 = vpop.f32.mrf.mxu3  ;;  %v1505_v26 = vpop.f32.mrf.mxu0 }
 0x201   : > { %v1506_v21 = vadd.f32 %v1505_v26, %v1463_v23  ;;  %v1548_v13 = vpop.f32.mrf.mxu1  ;;  %v1465_v1 = vadd.f32 %v1464_v35, %v1422_v31 }
 0x203   : > { %v1549_v11 = vadd.f32 %v1548_v13, %v1506_v21 }
 0x205   : > { %v1578_v55 = vadd.f32 %v1549_v11, %v429_v56 }
 0x206   : > { %v1424_v52 = vpop.f32.mrf.mxu2 }
 0x207   : > { %1604 = vst [vmem:[#allocation2 + $0x90] sm:$0xff] %v1578_v55  ;;  %v1425_v54 = vadd.f32 %v1424_v52, %v4406_v25 }
 0x208   : > { %v1467_v0 = vpop.f32.mrf.mxu3  ;;  %v1507_v34 = vpop.f32.mrf.mxu0 }
 0x209   : > { %v1508_v3 = vadd.f32 %v1507_v34, %v1465_v1  ;;  %v1550_v53 = vpop.f32.mrf.mxu1  ;;  %v1468_v6 = vadd.f32 %v1467_v0, %v1425_v54 }
 0x20b   : > { %v1551_v60 = vadd.f32 %v1550_v53, %v1508_v3 }
 0x20d   : > { %v1580_v42 = vadd.f32 %v1551_v60, %v431_v37 }
 0x20e   : > { %v1426_v61 = vpop.f32.mrf.mxu2 }
 0x20f   : > { %1606 = vst [vmem:[#allocation2 + $0x18] sm:$0xff] %v1580_v42 }
 0x210   : > { %v1469_v8 = vpop.f32.mrf.mxu3  ;;  %v1510_v12 = vpop.f32.mrf.mxu0 }
 0x211   : > { %v1511_v51 = vadd.f32 %v1510_v12, %v1468_v6  ;;  %v1553_v62 = vpop.f32.mrf.mxu1 }
 0x213   : > { %v1554_v41 = vadd.f32 %v1553_v62, %v1511_v51 }
 0x215   : > { %v1582_v63 = vadd.f32 %v1554_v41, %v433_v47  ;;  %1612 = sbr.rel (%p3259_p11) target bundleno = 963 (0x3c3), region = 74 }
 0x217   : > { %1608 = vst [vmem:[#allocation2 + $0x68] sm:$0xff] %v1582_v63 }
 0x218   : > { %v1512_v57 = vpop.f32.mrf.mxu0 }
 0x219   : > { %v1555_v46 = vpop.f32.mrf.mxu1 }
 0x21a   : > { %v3319_v25 = vld [vmem:[%s5068_s2 + $0x70] sm:$0xf]  ;;  %v3652_v24 = vld [vmem:[%s5068_s2 + $0x74] sm:$0xf0]  ;;  %v3651_v33 = vld [vmem:[%s5068_s2 + $0x74] sm:$0xf] }
 0x21b   : > { %v3383_v7 = vld [vmem:[%s5068_s2 + $0xf0] sm:$0xf]  ;;  %v3320_v16 = vor.u32 %v3652_v24, %v3319_v25  ;;  %v3668_v10 = vld [vmem:[%s5068_s2 + $0xf4] sm:$0xf0]  ;;  %v3321_v9 = vld [vmem:[%s5068_s2 + $0x78] sm:$0xf0] }
 0x21c   : > { %v3384_v48 = vor.u32 %v3668_v10, %v3383_v7  ;;  %v3324_v30 = vor.u32 %v3651_v33, %v3321_v9  ;;  %v3667_v2 = vld [vmem:[%s5068_s2 + $0xf4] sm:$0xf]  ;;  %v3385_v14 = vld [vmem:[%s5068_s2 + $0xf8] sm:$0xf0]  ;;  %v3311_v22 = vld [vmem:[%s5068_s2 + $0x60] sm:$0xf] }
 0x21d   : > { %1936 = vmatpush.bf16.msra.mxu0 %v3320_v16  ;;  %v3388_v29 = vor.u32 %v3667_v2, %v3385_v14  ;;  %v3650_v5 = vld [vmem:[%s5068_s2 + $0x64] sm:$0xf0]  ;;  %v3375_v39 = vld [vmem:[%s5068_s2 + $0xe0] sm:$0xf]  ;;  %v3649_v27 = vld [vmem:[%s5068_s2 + $0x64] sm:$0xf] }
 0x21e   : > { %v3666_v38 = vld [vmem:[%s5068_s2 + $0xe4] sm:$0xf0]  ;;  %1979 = vmatpush.bf16.msra.mxu1 %v3384_v48  ;;  %2022 = vmatpush.bf16.msra.mxu2 %v3324_v30  ;;  %v3312_v36 = vor.u32 %v3650_v5, %v3311_v22  ;;  %v3313_v28 = vld [vmem:[%s5068_s2 + $0x68] sm:$0xf0]  ;;  %v3665_v17 = vld [vmem:[%s5068_s2 + $0xe4] sm:$0xf] }
 0x21f   : > { %v3376_v59 = vor.u32 %v3666_v38, %v3375_v39  ;;  %2065 = vmatpush.bf16.msra.mxu3 %v3388_v29  ;;  %v3316_v4 = vor.u32 %v3649_v27, %v3313_v28  ;;  %v3377_v18 = vld [vmem:[%s5068_s2 + $0xe8] sm:$0xf0]  ;;  %v3303_v32 = vld [vmem:[%s5068_s2 + $0x50] sm:$0xf]  ;;  %v3648_v40 = vld [vmem:[%s5068_s2 + $0x54] sm:$0xf0] }
 0x220   : > { %v3380_v19 = vor.u32 %v3665_v17, %v3377_v18  ;;  %v3367_v44 = vld [vmem:[%s5068_s2 + $0xd0] sm:$0xf]  ;;  %v3664_v20 = vld [vmem:[%s5068_s2 + $0xd4] sm:$0xf0]  ;;  %v3647_v15 = vld [vmem:[%s5068_s2 + $0x54] sm:$0xf]  ;;  %v3304_v43 = vor.u32 %v3648_v40, %v3303_v32 }
 0x221   : > { %1937 = vmatpush.bf16.msra.mxu0 %v3312_v36  ;;  %v3305_v58 = vld [vmem:[%s5068_s2 + $0x58] sm:$0xf0]  ;;  %v3663_v45 = vld [vmem:[%s5068_s2 + $0xd4] sm:$0xf]  ;;  %v3368_v49 = vor.u32 %v3664_v20, %v3367_v44  ;;  %v3295_v35 = vld [vmem:[%s5068_s2 + $0x40] sm:$0xf] }
 0x222   : > { %v3369_v50 = vld [vmem:[%s5068_s2 + $0xd8] sm:$0xf0]  ;;  %1980 = vmatpush.bf16.msra.mxu1 %v3376_v59  ;;  %2023 = vmatpush.bf16.msra.mxu2 %v3316_v4  ;;  %v3308_v23 = vor.u32 %v3647_v15, %v3305_v58  ;;  %v3646_v26 = vld [vmem:[%s5068_s2 + $0x44] sm:$0xf0]  ;;  %v3359_v21 = vld [vmem:[%s5068_s2 + $0xc0] sm:$0xf] }
 0x223   : > { %2066 = vmatpush.bf16.msra.mxu3 %v3380_v19  ;;  %v3372_v13 = vor.u32 %v3663_v45, %v3369_v50  ;;  %v3662_v56 = vld [vmem:[%s5068_s2 + $0xc4] sm:$0xf0]  ;;  %v3645_v31 = vld [vmem:[%s5068_s2 + $0x44] sm:$0xf]  ;;  %v3297_v11 = vld [vmem:[%s5068_s2 + $0x48] sm:$0xf0]  ;;  %v3296_v1 = vor.u32 %v3646_v26, %v3295_v35 }
 0x224   : > { %v3661_v55 = vld [vmem:[%s5068_s2 + $0xc4] sm:$0xf]  ;;  %v3361_v52 = vld [vmem:[%s5068_s2 + $0xc8] sm:$0xf0]  ;;  %v3360_v0 = vor.u32 %v3662_v56, %v3359_v21  ;;  %v3300_v34 = vor.u32 %v3645_v31, %v3297_v11  ;;  %v3287_v3 = vld [vmem:[%s5068_s2 + $0x30] sm:$0xf] }
 0x225   : > { %1938 = vmatpush.bf16.msra.mxu0 %v3304_v43  ;;  %v3644_v53 = vld [vmem:[%s5068_s2 + $0x34] sm:$0xf0]  ;;  %v3351_v37 = vld [vmem:[%s5068_s2 + $0xb0] sm:$0xf]  ;;  %v3364_v54 = vor.u32 %v3661_v55, %v3361_v52  ;;  %v3643_v42 = vld [vmem:[%s5068_s2 + $0x34] sm:$0xf] }
 0x226   : > { %1981 = vmatpush.bf16.msra.mxu1 %v3368_v49  ;;  %2024 = vmatpush.bf16.msra.mxu2 %v3308_v23  ;;  %v3660_v60 = vld [vmem:[%s5068_s2 + $0xb4] sm:$0xf0]  ;;  %v3289_v61 = vld [vmem:[%s5068_s2 + $0x38] sm:$0xf0]  ;;  %v3659_v6 = vld [vmem:[%s5068_s2 + $0xb4] sm:$0xf]  ;;  %v3288_v12 = vor.u32 %v3644_v53, %v3287_v3 }
 0x227   : > { %2067 = vmatpush.bf16.msra.mxu3 %v3372_v13  ;;  %v3353_v8 = vld [vmem:[%s5068_s2 + $0xb8] sm:$0xf0]  ;;  %v3279_v51 = vld [vmem:[%s5068_s2 + $0x20] sm:$0xf]  ;;  %v3352_v62 = vor.u32 %v3660_v60, %v3351_v37  ;;  %v3292_v47 = vor.u32 %v3643_v42, %v3289_v61  ;;  %v3642_v41 = vld [vmem:[%s5068_s2 + $0x24] sm:$0xf0] }
 0x228   : > { %v3343_v63 = vld [vmem:[%s5068_s2 + $0xa0] sm:$0xf]  ;;  %v3658_v57 = vld [vmem:[%s5068_s2 + $0xa4] sm:$0xf0]  ;;  %v3356_v46 = vor.u32 %v3659_v6, %v3353_v8  ;;  %v3641_v25 = vld [vmem:[%s5068_s2 + $0x24] sm:$0xf]  ;;  %v3280_v9 = vor.u32 %v3642_v41, %v3279_v51 }
 0x229   : > { %1939 = vmatpush.bf16.msra.mxu0 %v3296_v1  ;;  %v3281_v24 = vld [vmem:[%s5068_s2 + $0x28] sm:$0xf0]  ;;  %v3657_v7 = vld [vmem:[%s5068_s2 + $0xa4] sm:$0xf]  ;;  %v3271_v10 = vld [vmem:[%s5068_s2 + $0x10] sm:$0xf]  ;;  %v3344_v14 = vor.u32 %v3658_v57, %v3343_v63 }
 0x22a   : > { %1982 = vmatpush.bf16.msra.mxu1 %v3360_v0  ;;  %2025 = vmatpush.bf16.msra.mxu2 %v3300_v34  ;;  %v3345_v16 = vld [vmem:[%s5068_s2 + $0xa8] sm:$0xf0]  ;;  %v3640_v33 = vld [vmem:[%s5068_s2 + $0x14] sm:$0xf0]  ;;  %v3335_v48 = vld [vmem:[%s5068_s2 + $0x90] sm:$0xf]  ;;  %v3284_v22 = vor.u32 %v3641_v25, %v3281_v24 }
 0x22b   : > { %2068 = vmatpush.bf16.msra.mxu3 %v3364_v54  ;;  %v3656_v30 = vld [vmem:[%s5068_s2 + $0x94] sm:$0xf0]  ;;  %v3639_v2 = vld [vmem:[%s5068_s2 + $0x14] sm:$0xf]  ;;  %v3273_v29 = vld [vmem:[%s5068_s2 + $0x18] sm:$0xf0]  ;;  %v3348_v38 = vor.u32 %v3657_v7, %v3345_v16  ;;  %v3272_v17 = vor.u32 %v3640_v33, %v3271_v10 }
 0x22c   : > { %v3655_v5 = vld [vmem:[%s5068_s2 + $0x94] sm:$0xf]  ;;  %v3337_v39 = vld [vmem:[%s5068_s2 + $0x98] sm:$0xf0]  ;;  %v3263_v36 = vld [vmem:[%s5068_s2] sm:$0xf]  ;;  %v3336_v43 = vor.u32 %v3656_v30, %v3335_v48  ;;  %v3276_v58 = vor.u32 %v3639_v2, %v3273_v29 }
 0x22d   : > { %1940 = vmatpush.bf16.msra.mxu0 %v3288_v12  ;;  %v3638_v59 = vld [vmem:[%s5068_s2 + $0x4] sm:$0xf0]  ;;  %v1613_v27 = vld [vmem:[#allocation2 + $0xb0] sm:$0xff]  ;;  %v1614_v19 = vld [vmem:[#allocation2] sm:$0xff]  ;;  %v3340_v45 = vor.u32 %v3655_v5, %v3337_v39 }
 0x22e   : > { %1983 = vmatpush.bf16.msra.mxu1 %v3352_v62  ;;  %2026 = vmatpush.bf16.msra.mxu2 %v3292_v47  ;;  %v1615_v28 = vld [vmem:[#allocation2 + $0x10] sm:$0xff]  ;;  %v1639_v4 = vld [vmem:[%s5070_s4] ss:$8 sm:$0x3]  ;;  %v3637_v23 = vld [vmem:[%s5068_s2 + $0x4] sm:$0xf]  ;;  %v3264_v55 = vor.u32 %v3638_v59, %v3263_v36 }
 0x22f   : > { %2069 = vmatpush.bf16.msra.mxu3 %v3356_v46  ;;  %v3260_v18 = vld [vmem:[%s5070_s4 + $0x1] ss:$8 sm:$0x3]  ;;  %v4602_v32 = vperm.slane %v1639_v4, 0  ;;  %v4606_v20 = vperm.slane %v1639_v4, 1  ;;  %v1620_v47 = vld [vmem:[#allocation2 + $0x78] sm:$0xff] }
 0x230   : > { %v4604_v40 = vperm.slane %v3260_v18, 0  ;;  %v1616_v44 = vld [vmem:[#allocation2 + $0x48] sm:$0xff]  ;;  %v4608_v15 = vperm.slane %v3260_v18, 1  ;;  %v3327_v50 = vld [vmem:[%s5068_s2 + $0x80] sm:$0xf] }
 0x231   : > { %1941 = vmatpush.bf16.msra.mxu0 %v3280_v9  ;;  %v3654_v49 = vld [vmem:[%s5068_s2 + $0x84] sm:$0xf0]  ;;  %v3265_v35 = vld [vmem:[%s5068_s2 + $0x8] sm:$0xf0]  ;;  %v3653_v26 = vld [vmem:[%s5068_s2 + $0x84] sm:$0xf]  ;;  %v1645_v13 = vmul.f32 %v4602_v32, %v1613_v27  ;;  %v1647_v56 = vmul.f32 %v4602_v32, %v1615_v28  ;;  %v1646_v31 = vmul.f32 %v4606_v20, %v1614_v19  ;;  %v1648_v11 = vmul.f32 %v4606_v20, %v1616_v44 }
 0x232   : > { %1984 = vmatpush.bf16.msra.mxu1 %v3344_v14  ;;  %2027 = vmatpush.bf16.msra.mxu2 %v3284_v22  ;;  %v3329_v21 = vld [vmem:[%s5068_s2 + $0x88] sm:$0xf0]  ;;  %v3328_v3 = vor.u32 %v3654_v49, %v3327_v50  ;;  %v3268_v53 = vor.u32 %v3637_v23, %v3265_v35  ;;  %v1617_v12 = vld [vmem:[#allocation2 + $0x60] sm:$0xff]  ;;  %v1652_v46 = vmul.f32 %v4606_v20, %v1620_v47  ;;  %v3683_v25 = vld [vmem:[%s5069_s3 + $0x74] sm:$0xf] }
 0x233   : > { %2070 = vmatpush.bf16.msra.mxu3 %v3348_v38  ;;  %v1678_v52 = vadd.f32 %v4604_v40, %v1645_v13  ;;  %v1680_v1 = vadd.f32 %v4604_v40, %v1647_v56  ;;  %v1679_v0 = vadd.f32 %v4608_v15, %v1646_v31  ;;  %v1681_v34 = vadd.f32 %v4608_v15, %v1648_v11  ;;  %v1619_v51 = vld [vmem:[#allocation2 + $0x40] sm:$0xff]  ;;  %v1618_v62 = vld [vmem:[#allocation2 + $0x28] sm:$0xff]  ;;  %v3451_v24 = vld [vmem:[%s5069_s3 + $0x78] sm:$0xf0] }
 0x234   : > { %v3332_v37 = vor.u32 %v3653_v26, %v3329_v21  ;;  %v1649_v41 = vmul.f32 %v4602_v32, %v1617_v12  ;;  %v1651_v63 = vmul.f32 %v4602_v32, %v1619_v51  ;;  %v1650_v57 = vmul.f32 %v4606_v20, %v1618_v62  ;;  %v3699_v16 = vld [vmem:[%s5069_s3 + $0xf4] sm:$0xf]  ;;  %v3515_v10 = vld [vmem:[%s5069_s3 + $0xf8] sm:$0xf0]  ;;  %v3449_v33 = vld [vmem:[%s5069_s3 + $0x70] sm:$0xf] }
 0x235   : > { %1942 = vmatpush.bf16.msra.mxu0 %v3272_v17  ;;  %v1704_v54 = vmax.f32 %v1678_v52, 0.0  ;;  %v1706_v60 = vmax.f32 %v1680_v1, 0.0  ;;  %v1705_v42 = vmax.f32 %v1679_v0, 0.0  ;;  %v1707_v61 = vmax.f32 %v1681_v34, 0.0  ;;  %v3684_v2 = vld [vmem:[%s5069_s3 + $0x74] sm:$0xf0] }
 0x236   : > { %1985 = vmatpush.bf16.msra.mxu1 %v3336_v43  ;;  %2028 = vmatpush.bf16.msra.mxu2 %v3276_v58  ;;  %v3454_v7 = vor.u32 %v3683_v25, %v3451_v24  ;;  %v1682_v9 = vadd.f32 %v4604_v40, %v1649_v41  ;;  %v1684_v48 = vadd.f32 %v4604_v40, %v1651_v63  ;;  %v3513_v14 = vld [vmem:[%s5069_s3 + $0xf0] sm:$0xf]  ;;  %v3700_v22 = vld [vmem:[%s5069_s3 + $0xf4] sm:$0xf0]  ;;  %v1621_v18 = vld [vmem:[#allocation2 + $0x80] sm:$0xff] }
 0x237   : > { %2071 = vmatpush.bf16.msra.mxu3 %v3340_v45  ;;  %v1730_v6 = vpack.c.bf16 %v1706_v60, %v1704_v54  ;;  %v1731_v8 = vpack.c.bf16 %v1707_v61, %v1705_v42  ;;  %v3518_v30 = vor.u32 %v3699_v16, %v3515_v10  ;;  %v1683_v29 = vadd.f32 %v4608_v15, %v1650_v57  ;;  %v1623_v19 = vld [vmem:[#allocation2 + $0x50] sm:$0xff]  ;;  %v1622_v44 = vld [vmem:[#allocation2 + $0xa8] sm:$0xff]  ;;  %v3681_v23 = vld [vmem:[%s5069_s3 + $0x64] sm:$0xf] }
 0x238   : > { %v1685_v5 = vadd.f32 %v4608_v15, %v1652_v46  ;;  %v3450_v39 = vor.u32 %v3684_v2, %v3449_v33  ;;  %v3514_v38 = vor.u32 %v3700_v22, %v3513_v14  ;;  %v1708_v36 = vmax.f32 %v1682_v9, 0.0  ;;  %v1624_v43 = vld [vmem:[#allocation2 + $0x30] sm:$0xff]  ;;  %v3443_v35 = vld [vmem:[%s5069_s3 + $0x68] sm:$0xf0]  ;;  %v3697_v26 = vld [vmem:[%s5069_s3 + $0xe4] sm:$0xf] }
 0x239   : > { %1943 = vmatpush.bf16.msra.mxu0 %v3264_v55  ;;  %v1710_v59 = vmax.f32 %v1684_v48, 0.0  ;;  %v1709_v27 = vmax.f32 %v1683_v29, 0.0  ;;  %v1653_v58 = vmul.f32 %v4602_v32, %v1621_v18  ;;  %v1655_v45 = vmul.f32 %v4602_v32, %v1623_v19  ;;  %v3507_v13 = vld [vmem:[%s5069_s3 + $0xe8] sm:$0xf0]  ;;  %v3441_v56 = vld [vmem:[%s5069_s3 + $0x60] sm:$0xf] }
 0x23a   : > { %1986 = vmatpush.bf16.msra.mxu1 %v3328_v3  ;;  %2029 = vmatpush.bf16.msra.mxu2 %v3268_v53  ;;  %v1711_v28 = vmax.f32 %v1685_v5, 0.0  ;;  %v1654_v50 = vmul.f32 %v4606_v20, %v1622_v44  ;;  %v1656_v49 = vmul.f32 %v4606_v20, %v1624_v43  ;;  %v3446_v21 = vor.u32 %v3681_v23, %v3443_v35  ;;  %v3682_v31 = vld [vmem:[%s5069_s3 + $0x64] sm:$0xf0]  ;;  %v3505_v0 = vld [vmem:[%s5069_s3 + $0xe0] sm:$0xf]  ;;  %v1631_v60 = vld [vmem:[#allocation2 + $0x58] sm:$0xff] }
 0x23b   : > { %2072 = vmatpush.bf16.msra.mxu3 %v3332_v37  ;;  %v1732_v17 = vpack.c.bf16 %v1710_v59, %v1708_v36  ;;  %v1686_v11 = vadd.f32 %v4604_v40, %v1653_v58  ;;  %v1688_v55 = vadd.f32 %v4604_v40, %v1655_v45  ;;  %v3510_v52 = vor.u32 %v3697_v26, %v3507_v13  ;;  %v3698_v34 = vld [vmem:[%s5069_s3 + $0xe4] sm:$0xf0]  ;;  %v1629_v3 = vld [vmem:[#allocation2 + $0x20] sm:$0xff]  ;;  %v1626_v16 = vld [vmem:[#allocation2 + $0x70] sm:$0xff] }
 0x23c   : > { %1944 = vmatmul.bf16.vlgmr.msra.gmra.mxu0 %v1730_v6  ;;  %v1733_v4 = vpack.c.bf16 %v1711_v28, %v1709_v27  ;;  %v3442_v1 = vor.u32 %v3682_v31, %v3441_v56  ;;  %v1687_v53 = vadd.f32 %v4608_v15, %v1654_v50  ;;  %v1689_v37 = vadd.f32 %v4608_v15, %v1656_v49  ;;  %v1625_v24 = vld [vmem:[#allocation2 + $0x88] sm:$0xff]  ;;  %v1628_v10 = vld [vmem:[#allocation2 + $0x38] sm:$0xff]  ;;  %v3679_v2 = vld [vmem:[%s5069_s3 + $0x54] sm:$0xf] }
 0x23d   : > { %1987 = vmatmul.bf16.vlgmr.msra.gmra.mxu1 %v1731_v8  ;;  %2030 = vmatmul.bf16.vlgmr.msra.gmra.mxu2 %v1730_v6  ;;  %v3506_v54 = vor.u32 %v3698_v34, %v3505_v0  ;;  %v1661_v42 = vmul.f32 %v4602_v32, %v1629_v3  ;;  %v1663_v61 = vmul.f32 %v4602_v32, %v1631_v60  ;;  %v1714_v12 = vmax.f32 %v1688_v55, 0.0  ;;  %v3435_v14 = vld [vmem:[%s5069_s3 + $0x58] sm:$0xf0]  ;;  %v3695_v22 = vld [vmem:[%s5069_s3 + $0xd4] sm:$0xf]  ;;  %v1633_v18 = vld [vmem:[#allocation2 + $0xa0] sm:$0xff] }
 0x23e   : > { %2073 = vmatmul.bf16.vlgmr.msra.gmra.mxu3 %v1731_v8  ;;  %2492 = vmatpush.bf16.msrb.mxu2 %v3454_v7  ;;  %v1712_v8 = vmax.f32 %v1686_v11, 0.0  ;;  %v1713_v62 = vmax.f32 %v1687_v53, 0.0  ;;  %v1715_v47 = vmax.f32 %v1689_v37, 0.0  ;;  %v1627_v7 = vld [vmem:[#allocation2 + $0x8] sm:$0xff]  ;;  %v1657_v33 = vmul.f32 %v4602_v32, %v1625_v24  ;;  %v3499_v5 = vld [vmem:[%s5069_s3 + $0xd8] sm:$0xf0] }
 0x23f   : > { %2535 = vmatpush.bf16.msrb.mxu3 %v3518_v30  ;;  %2406 = vmatpush.bf16.msrb.mxu0 %v3450_v39  ;;  %v1694_v6 = vadd.f32 %v4604_v40, %v1661_v42  ;;  %v1696_v51 = vadd.f32 %v4604_v40, %v1663_v61  ;;  %v1659_v9 = vmul.f32 %v4602_v32, %v1627_v7  ;;  %v3433_v39 = vld [vmem:[%s5069_s3 + $0x50] sm:$0xf]  ;;  %v1635_v58 = vld [vmem:[#allocation2 + $0x98] sm:$0xff]  ;;  %v1632_v0 = vld [vmem:[#allocation2 + $0xc8] sm:$0xff] }
 0x240   : > { %2449 = vmatpush.bf16.msrb.mxu1 %v3514_v38  ;;  %v1734_v57 = vpack.c.bf16 %v1714_v12, %v1712_v8  ;;  %v1735_v25 = vpack.c.bf16 %v1715_v47, %v1713_v62  ;;  %v1658_v48 = vmul.f32 %v4606_v20, %v1626_v16  ;;  %v1660_v30 = vmul.f32 %v4606_v20, %v1628_v10  ;;  %v3680_v38 = vld [vmem:[%s5069_s3 + $0x54] sm:$0xf0]  ;;  %v3677_v53 = vld [vmem:[%s5069_s3 + $0x44] sm:$0xf]  ;;  %v3427_v37 = vld [vmem:[%s5069_s3 + $0x48] sm:$0xf0] }
 0x241   : > { %v1720_v41 = vmax.f32 %v1694_v6, 0.0  ;;  %v1722_v63 = vmax.f32 %v1696_v51, 0.0  ;;  %v3438_v29 = vor.u32 %v3679_v2, %v3435_v14  ;;  %v1690_v36 = vadd.f32 %v4604_v40, %v1657_v33  ;;  %v3491_v42 = vld [vmem:[%s5069_s3 + $0xc8] sm:$0xf0]  ;;  %v3425_v61 = vld [vmem:[%s5069_s3 + $0x40] sm:$0xf] }
 0x242   : > { %2493 = vmatpush.bf16.msrb.mxu2 %v3446_v21  ;;  %v1692_v59 = vadd.f32 %v4604_v40, %v1659_v9  ;;  %v3502_v27 = vor.u32 %v3695_v22, %v3499_v5  ;;  %v3434_v28 = vor.u32 %v3680_v38, %v3433_v39  ;;  %v1691_v19 = vadd.f32 %v4608_v15, %v1658_v48  ;;  %v3678_v6 = vld [vmem:[%s5069_s3 + $0x44] sm:$0xf0]  ;;  %v3489_v51 = vld [vmem:[%s5069_s3 + $0xc0] sm:$0xf]  ;;  %v3675_v47 = vld [vmem:[%s5069_s3 + $0x34] sm:$0xf] }
 0x243   : > { %2536 = vmatpush.bf16.msrb.mxu3 %v3510_v52  ;;  %2407 = vmatpush.bf16.msrb.mxu0 %v3442_v1  ;;  %v4704_v46 = vpack.c.bf16 %v1722_v63, %v1720_v41  ;;  %v1693_v44 = vadd.f32 %v4608_v15, %v1660_v30  ;;  %v1665_v45 = vmul.f32 %v4602_v32, %v1633_v18  ;;  %v1716_v23 = vmax.f32 %v1690_v36, 0.0  ;;  %v1630_v1 = vld [vmem:[#allocation2 + $0xb8] sm:$0xff]  ;;  %v3694_v62 = vld [vmem:[%s5069_s3 + $0xc4] sm:$0xf0]  ;;  %v3691_v24 = vld [vmem:[%s5069_s3 + $0xb4] sm:$0xf] }
 0x244   : > { %2450 = vmatpush.bf16.msrb.mxu1 %v3506_v54  ;;  %v1667_v50 = vmul.f32 %v4602_v32, %v1635_v58  ;;  %v1718_v35 = vmax.f32 %v1692_v59, 0.0  ;;  %v1717_v21 = vmax.f32 %v1691_v19, 0.0  ;;  %v1662_v34 = vmul.f32 %v4606_v20, %v1630_v1  ;;  %v3693_v54 = vld [vmem:[%s5069_s3 + $0xc4] sm:$0xf]  ;;  %v3483_v7 = vld [vmem:[%s5069_s3 + $0xb8] sm:$0xf0] }
 0x245   : > { %v1698_v49 = vadd.f32 %v4604_v40, %v1665_v45  ;;  %v1719_v13 = vmax.f32 %v1693_v44, 0.0  ;;  %v1664_v3 = vmul.f32 %v4606_v20, %v1632_v0  ;;  %v3430_v60 = vor.u32 %v3677_v53, %v3427_v37  ;;  %v1637_v33 = vld [vmem:[#allocation2 + $0xc0] sm:$0xff]  ;;  %v1634_v22 = vld [vmem:[#allocation2 + $0x90] sm:$0xff]  ;;  %v3475_v18 = vld [vmem:[%s5069_s3 + $0xa8] sm:$0xf0] }
 0x246   : > { %2494 = vmatpush.bf16.msrb.mxu2 %v3438_v29  ;;  %v1700_v26 = vadd.f32 %v4604_v40, %v1667_v50  ;;  %v1736_v11 = vpack.c.bf16 %v1718_v35, %v1716_v23  ;;  %v3494_v8 = vor.u32 %v3693_v54, %v3491_v42  ;;  %v3426_v12 = vor.u32 %v3678_v6, %v3425_v61  ;;  %v1636_v29 = vld [vmem:[#allocation2 + $0x18] sm:$0xff]  ;;  %v3481_v38 = vld [vmem:[%s5069_s3 + $0xb0] sm:$0xf]  ;;  %v3673_v59 = vld [vmem:[%s5069_s3 + $0x24] sm:$0xf] }
 0x247   : > { %2537 = vmatpush.bf16.msrb.mxu3 %v3502_v27  ;;  %2408 = vmatpush.bf16.msrb.mxu0 %v3434_v28  ;;  %v1724_v56 = vmax.f32 %v1698_v49, 0.0  ;;  %v1737_v52 = vpack.c.bf16 %v1719_v13, %v1717_v21  ;;  %v1695_v41 = vadd.f32 %v4608_v15, %v1662_v34  ;;  %v1697_v63 = vadd.f32 %v4608_v15, %v1664_v3  ;;  %v3411_v27 = vld [vmem:[%s5069_s3 + $0x28] sm:$0xf0]  ;;  %v3409_v19 = vld [vmem:[%s5069_s3 + $0x20] sm:$0xf] }
 0x248   : > { %v1726_v31 = vmax.f32 %v1700_v26, 0.0  ;;  %v3486_v10 = vor.u32 %v3691_v24, %v3483_v7  ;;  %v1669_v9 = vmul.f32 %v4602_v32, %v1637_v33  ;;  %v1666_v5 = vmul.f32 %v4606_v20, %v1634_v22  ;;  %v3417_v32 = vld [vmem:[%s5069_s3 + $0x30] sm:$0xf]  ;;  %v3674_v45 = vld [vmem:[%s5069_s3 + $0x24] sm:$0xf0] }
 0x249   : > { %v1721_v48 = vmax.f32 %v1695_v41, 0.0  ;;  %v1723_v30 = vmax.f32 %v1697_v63, 0.0  ;;  %v1668_v39 = vmul.f32 %v4606_v20, %v1636_v29  ;;  %v3473_v50 = vld [vmem:[%s5069_s3 + $0xa0] sm:$0xf]  ;;  %v3690_v49 = vld [vmem:[%s5069_s3 + $0xa4] sm:$0xf0]  ;;  %v3410_v23 = vor.u32 %v3674_v45, %v3409_v19 }
 0x24a   : > { %v4742_v55 = vpack.c.bf16 %v1726_v31, %v1724_v56  ;;  %2495 = vmatpush.bf16.msrb.mxu2 %v3430_v60  ;;  %v1702_v2 = vadd.f32 %v4604_v40, %v1669_v9  ;;  %v3676_v40 = vld [vmem:[%s5069_s3 + $0x34] sm:$0xf0]  ;;  %v1699_v44 = vadd.f32 %v4608_v15, %v1666_v5  ;;  %v3474_v35 = vor.u32 %v3690_v49, %v3473_v50  ;;  %v3671_v26 = vld [vmem:[%s5069_s3 + $0x14] sm:$0xf]  ;;  %v3403_v21 = vld [vmem:[%s5069_s3 + $0x18] sm:$0xf0] }
 0x24b   : > { %2538 = vmatpush.bf16.msrb.mxu3 %v3494_v8  ;;  %2409 = vmatpush.bf16.msrb.mxu0 %v3426_v12  ;;  %v1739_v14 = vpack.c.bf16 %v1723_v30, %v1721_v48  ;;  %v3418_v36 = vor.u32 %v3676_v40, %v3417_v32  ;;  %v3687_v13 = vld [vmem:[%s5069_s3 + $0x94] sm:$0xf]  ;;  %v3406_v56 = vor.u32 %v3671_v26, %v3403_v21  ;;  %v3467_v31 = vld [vmem:[%s5069_s3 + $0x98] sm:$0xf0]  ;;  %v1638_v34 = vld [vmem:[#allocation2 + $0x68] sm:$0xff] }
 0x24c   : > { %1949 = vmatmul.bf16.gmra.mxu0 %v1732_v17  ;;  %v1670_v3 = vmul.f32 %v4606_v20, %v1638_v34  ;;  %v1728_v37 = vmax.f32 %v1702_v2, 0.0  ;;  %v3401_v61 = vld [vmem:[%s5069_s3 + $0x10] sm:$0xf]  ;;  %v3688_v6 = vld [vmem:[%s5069_s3 + $0x94] sm:$0xf0] }
 0x24d   : > { %1992 = vmatmul.bf16.gmra.mxu1 %v1733_v4  ;;  %2035 = vmatmul.bf16.gmra.mxu2 %v1732_v17  ;;  %v3497_v17 = vld [vmem:[%s5069_s3 + $0xd0] sm:$0xf]  ;;  %v3669_v12 = vld [vmem:[%s5069_s3 + $0x4] sm:$0xf]  ;;  %v3459_v41 = vld [vmem:[%s5069_s3 + $0x88] sm:$0xf0] }
 0x24e   : > { %2078 = vmatmul.bf16.gmra.mxu3 %v1733_v4  ;;  %v3696_v4 = vld [vmem:[%s5069_s3 + $0xd4] sm:$0xf0]  ;;  %v1703_v53 = vadd.f32 %v4608_v15, %v1670_v3  ;;  %v1742_v60 = vpack.c.bf16 %v1728_v37, %v1728_v37  ;;  %v3465_v20 = vld [vmem:[%s5069_s3 + $0x90] sm:$0xf]  ;;  %v3393_v63 = vld [vmem:[%s5069_s3] sm:$0xf] }
 0x24f   : > { %v3498_v43 = vor.u32 %v3696_v4, %v3497_v17  ;;  %2539 = vmatpush.bf16.msrb.mxu3 %v3486_v10  ;;  %v3414_v17 = vor.u32 %v3673_v59, %v3411_v27  ;;  %v3689_v4 = vld [vmem:[%s5069_s3 + $0xa4] sm:$0xf]  ;;  %2410 = vmatpush.bf16.msrb.mxu0 %v3418_v36  ;;  %v3466_v8 = vor.u32 %v3688_v6, %v3465_v20  ;;  %v3457_v7 = vld [vmem:[%s5069_s3 + $0x80] sm:$0xf] }
 0x250   : > { %v3478_v58 = vor.u32 %v3689_v4, %v3475_v18  ;;  %v1729_v54 = vmax.f32 %v1703_v53, 0.0  ;;  %v3389_v48 = vld [vmem:[%s5070_s4 + $0x2] ss:$8 sm:$0x3] }
 0x251   : > { %2451 = vmatpush.bf16.msrb.mxu1 %v3498_v43  ;;  %v1701_v43 = vadd.f32 %v4608_v15, %v1668_v39  ;;  %v4883_v2 = vperm.slane %v3389_v48, 0 }
 0x252   : > { %v1743_v42 = vpack.c.bf16 %v1729_v54, %v1729_v54 }
 0x253   : > { %2540 = vmatpush.bf16.msrb.mxu3 %v3478_v58  ;;  %v1727_v1 = vmax.f32 %v1701_v43, 0.0  ;;  %2411 = vmatpush.bf16.msrb.mxu0 %v3410_v23 }
 0x25c   : > { %1954 = vmatmul.bf16.gmra.mxu0 %v1734_v57 }
 0x25d   : > { %1997 = vmatmul.bf16.gmra.mxu1 %v1735_v25  ;;  %2040 = vmatmul.bf16.gmra.mxu2 %v1734_v57  ;;  %v3490_v57 = vor.u32 %v3694_v62, %v3489_v51  ;;  %v3395_v51 = vld [vmem:[%s5069_s3 + $0x8] sm:$0xf0]  ;;  %v3685_v62 = vld [vmem:[%s5069_s3 + $0x84] sm:$0xf] }
 0x25e   : > { %2083 = vmatmul.bf16.gmra.mxu3 %v1735_v25  ;;  %v3419_v25 = vld [vmem:[%s5069_s3 + $0x38] sm:$0xf0] }
 0x25f   : > { %v3422_v16 = vor.u32 %v3675_v47, %v3419_v25  ;;  %2452 = vmatpush.bf16.msrb.mxu1 %v3490_v57  ;;  %v3398_v47 = vor.u32 %v3669_v12, %v3395_v51  ;;  %v3670_v57 = vld [vmem:[%s5069_s3 + $0x4] sm:$0xf0]  ;;  %v3462_v25 = vor.u32 %v3685_v62, %v3459_v41 }
 0x260   : > { %v3394_v24 = vor.u32 %v3670_v57, %v3393_v63 }
 0x261   : > { %2496 = vmatpush.bf16.msrb.mxu2 %v3422_v16  ;;  %v3686_v16 = vld [vmem:[%s5069_s3 + $0x84] sm:$0xf0] }
 0x262   : > { %v3458_v10 = vor.u32 %v3686_v16, %v3457_v7 }
 0x265   : > { %2497 = vmatpush.bf16.msrb.mxu2 %v3414_v17 }
 0x269   : > { %2498 = vmatpush.bf16.msrb.mxu2 %v3406_v56 }
 0x26c   : > { %1959 = vmatmul.bf16.gmra.mxu0 %v1736_v11 }
 0x26d   : > { %2002 = vmatmul.bf16.gmra.mxu1 %v1737_v52  ;;  %2045 = vmatmul.bf16.gmra.mxu2 %v1736_v11  ;;  %v3470_v11 = vor.u32 %v3687_v13, %v3467_v31 }
 0x26e   : > { %2088 = vmatmul.bf16.gmra.mxu3 %v1737_v52  ;;  %v1725_v52 = vmax.f32 %v1699_v44, 0.0  ;;  %2499 = vmatpush.bf16.msrb.mxu2 %v3398_v47 }
 0x26f   : > { %2541 = vmatpush.bf16.msrb.mxu3 %v3470_v11 }
 0x270   : > { %v1741_v0 = vpack.c.bf16 %v1727_v1, %v1725_v52 }
 0x273   : > { %2542 = vmatpush.bf16.msrb.mxu3 %v3462_v25 }
 0x27c   : > { %1964 = vmatmul.bf16.gmra.mxu0 %v4704_v46 }
 0x27d   : > { %2007 = vmatmul.bf16.gmra.mxu1 %v1739_v14  ;;  %2050 = vmatmul.bf16.gmra.mxu2 %v4704_v46  ;;  %v3692_v46 = vld [vmem:[%s5069_s3 + $0xb4] sm:$0xf0] }
 0x27e   : > { %2093 = vmatmul.bf16.gmra.mxu3 %v1739_v14  ;;  %v3482_v28 = vor.u32 %v3692_v46, %v3481_v38  ;;  %v3390_v14 = vld [vmem:[%s5070_s4 + $0x3] ss:$8 sm:$0x3]  ;;  %v4891_v46 = vperm.slane %v3389_v48, 1 }
 0x27f   : > { %v4889_v5 = vperm.slane %v3390_v14, 0  ;;  %v4897_v4 = vperm.slane %v3390_v14, 1 }
 0x280   : > { %2453 = vmatpush.bf16.msrb.mxu1 %v3482_v28 }
 0x284   : > { %2454 = vmatpush.bf16.msrb.mxu1 %v3474_v35 }
 0x288   : > { %2455 = vmatpush.bf16.msrb.mxu1 %v3466_v8 }
 0x28c   : > { %1969 = vmatmul.bf16.gmra.mxu0 %v4742_v55  ;;  %2456 = vmatpush.bf16.msrb.mxu1 %v3458_v10 }
 0x28d   : > { %2012 = vmatmul.bf16.gmra.mxu1 %v1741_v0  ;;  %2055 = vmatmul.bf16.gmra.mxu2 %v4742_v55  ;;  %v3672_v55 = vld [vmem:[%s5069_s3 + $0x14] sm:$0xf0] }
 0x28e   : > { %2098 = vmatmul.bf16.gmra.mxu3 %v1741_v0  ;;  %v3402_v15 = vor.u32 %v3672_v55, %v3401_v61 }
 0x290   : > { %2412 = vmatpush.bf16.msrb.mxu0 %v3402_v15 }
 0x294   : > { %2413 = vmatpush.bf16.msrb.mxu0 %v3394_v24 }
 0x29c   : > { %1974 = vmatmul.bf16.gmra.mxu0 %v1742_v60 }
 0x29d   : > { %2060 = vmatmul.bf16.gmra.mxu2 %v1742_v60  ;;  %2017 = vmatmul.bf16.gmra.mxu1 %v1743_v42 }
 0x29e   : > { %2103 = vmatmul.bf16.gmra.mxu3 %v1743_v42 }
 0x2b9   : > { %v1945_v33 = vpop.f32.mrf.mxu0 }
 0x2ba   : > { %v1988_v9 = vpop.f32.mrf.mxu1 }
 0x2bb   : > { %v1989_v30 = vadd.f32 %v1988_v9, %v1945_v33 }
 0x2bd   : > { %v2115_v29 = vmul.f32 %v4883_v2, %v1989_v30 }
 0x2bf   : > { %v2148_v59 = vadd.f32 %v4889_v5, %v2115_v29 }
 0x2c0   : > { %v2031_v22 = vpop.f32.mrf.mxu2 }
 0x2c1   : > { %v2074_v39 = vpop.f32.mrf.mxu3  ;;  %v1947_v32 = vpop.f32.mrf.mxu0  ;;  %v2174_v19 = vmax.f32 %v2148_v59, 0.0 }
 0x2c2   : > { %v1990_v40 = vpop.f32.mrf.mxu1  ;;  %v2075_v36 = vadd.f32 %v2074_v39, %v2031_v22 }
 0x2c3   : > { %v1991_v38 = vadd.f32 %v1990_v40, %v1947_v32 }
 0x2c4   : > { %v2116_v17 = vmul.f32 %v4891_v46, %v2075_v36 }
 0x2c5   : > { %v2117_v27 = vmul.f32 %v4883_v2, %v1991_v38 }
 0x2c6   : > { %v2149_v23 = vadd.f32 %v4897_v4, %v2116_v17 }
 0x2c7   : > { %v2150_v28 = vadd.f32 %v4889_v5, %v2117_v27 }
 0x2c8   : > { %v2033_v18 = vpop.f32.mrf.mxu2  ;;  %v2175_v13 = vmax.f32 %v2149_v23, 0.0 }
 0x2c9   : > { %v2076_v44 = vpop.f32.mrf.mxu3  ;;  %v1950_v43 = vpop.f32.mrf.mxu0  ;;  %v2176_v58 = vmax.f32 %v2150_v28, 0.0 }
 0x2ca   : > { %v2077_v45 = vadd.f32 %v2076_v44, %v2033_v18  ;;  %v1993_v50 = vpop.f32.mrf.mxu1 }
 0x2cb   : > { %v2200_v49 = vpack.c.bf16 %v2176_v58, %v2174_v19  ;;  %v1994_v26 = vadd.f32 %v1993_v50, %v1950_v43 }
 0x2cc   : > { %v2118_v35 = vmul.f32 %v4891_v46, %v2077_v45 }
 0x2cd   : > { %2414 = vmatmul.bf16.vlgmr.msrb.gmra.mxu0 %v2200_v49  ;;  %2500 = vmatmul.bf16.vlgmr.msrb.gmra.mxu2 %v2200_v49  ;;  %v2119_v11 = vmul.f32 %v4883_v2, %v1994_v26 }
 0x2ce   : > { %v2151_v21 = vadd.f32 %v4897_v4, %v2118_v35 }
 0x2cf   : > { %v2152_v54 = vadd.f32 %v4889_v5, %v2119_v11 }
 0x2d0   : > { %v2036_v56 = vpop.f32.mrf.mxu2  ;;  %v2177_v31 = vmax.f32 %v2151_v21, 0.0 }
 0x2d1   : > { %v2079_v52 = vpop.f32.mrf.mxu3  ;;  %v1952_v1 = vpop.f32.mrf.mxu0  ;;  %v2178_v15 = vmax.f32 %v2152_v54, 0.0 }
 0x2d2   : > { %v1995_v0 = vpop.f32.mrf.mxu1  ;;  %v2201_v34 = vpack.c.bf16 %v2177_v31, %v2175_v13  ;;  %v2080_v53 = vadd.f32 %v2079_v52, %v2036_v56 }
 0x2d3   : > { %v1996_v3 = vadd.f32 %v1995_v0, %v1952_v1 }
 0x2d4   : > { %2457 = vmatmul.bf16.vlgmr.msrb.gmra.mxu1 %v2201_v34  ;;  %2543 = vmatmul.bf16.vlgmr.msrb.gmra.mxu3 %v2201_v34  ;;  %v2120_v42 = vmul.f32 %v4891_v46, %v2080_v53 }
 0x2d5   : > { %v2121_v37 = vmul.f32 %v4883_v2, %v1996_v3 }
 0x2d6   : > { %v2153_v47 = vadd.f32 %v4897_v4, %v2120_v42 }
 0x2d7   : > { %v2154_v60 = vadd.f32 %v4889_v5, %v2121_v37 }
 0x2d8   : > { %v2038_v61 = vpop.f32.mrf.mxu2  ;;  %v2179_v25 = vmax.f32 %v2153_v47, 0.0 }
 0x2d9   : > { %v2081_v55 = vpop.f32.mrf.mxu3  ;;  %v1955_v20 = vpop.f32.mrf.mxu0  ;;  %v2180_v6 = vmax.f32 %v2154_v60, 0.0 }
 0x2da   : > { %v2082_v8 = vadd.f32 %v2081_v55, %v2038_v61  ;;  %v1998_v12 = vpop.f32.mrf.mxu1 }
 0x2db   : > { %v2202_v51 = vpack.c.bf16 %v2180_v6, %v2178_v15  ;;  %v1999_v41 = vadd.f32 %v1998_v12, %v1955_v20 }
 0x2dc   : > { %v2122_v62 = vmul.f32 %v4891_v46, %v2082_v8 }
 0x2dd   : > { %2419 = vmatmul.bf16.gmra.mxu0 %v2202_v51  ;;  %2505 = vmatmul.bf16.gmra.mxu2 %v2202_v51  ;;  %v2123_v7 = vmul.f32 %v4883_v2, %v1999_v41 }
 0x2de   : > { %v2155_v63 = vadd.f32 %v4897_v4, %v2122_v62 }
 0x2df   : > { %v2156_v22 = vadd.f32 %v4889_v5, %v2123_v7 }
 0x2e0   : > { %v2041_v57 = vpop.f32.mrf.mxu2  ;;  %v2181_v24 = vmax.f32 %v2155_v63, 0.0 }
 0x2e1   : > { %v2084_v16 = vpop.f32.mrf.mxu3  ;;  %v1957_v10 = vpop.f32.mrf.mxu0  ;;  %v2182_v36 = vmax.f32 %v2156_v22, 0.0 }
 0x2e2   : > { %v2000_v33 = vpop.f32.mrf.mxu1  ;;  %v2203_v9 = vpack.c.bf16 %v2181_v24, %v2179_v25  ;;  %v2085_v30 = vadd.f32 %v2084_v16, %v2041_v57 }
 0x2e3   : > { %v2001_v48 = vadd.f32 %v2000_v33, %v1957_v10 }
 0x2e4   : > { %2462 = vmatmul.bf16.gmra.mxu1 %v2203_v9  ;;  %2548 = vmatmul.bf16.gmra.mxu3 %v2203_v9  ;;  %v2124_v39 = vmul.f32 %v4891_v46, %v2085_v30 }
 0x2e5   : > { %v2125_v14 = vmul.f32 %v4883_v2, %v2001_v48 }
 0x2e6   : > { %v2157_v19 = vadd.f32 %v4897_v4, %v2124_v39 }
 0x2e7   : > { %v2158_v29 = vadd.f32 %v4889_v5, %v2125_v14 }
 0x2e8   : > { %v2043_v32 = vpop.f32.mrf.mxu2  ;;  %v2183_v45 = vmax.f32 %v2157_v19, 0.0 }
 0x2e9   : > { %v2086_v40 = vpop.f32.mrf.mxu3  ;;  %v1960_v38 = vpop.f32.mrf.mxu0  ;;  %v2184_v59 = vmax.f32 %v2158_v29, 0.0 }
 0x2ea   : > { %v2087_v27 = vadd.f32 %v2086_v40, %v2043_v32  ;;  %v2003_v28 = vpop.f32.mrf.mxu1 }
 0x2eb   : > { %v2204_v17 = vpack.c.bf16 %v2184_v59, %v2182_v36  ;;  %v2004_v44 = vadd.f32 %v2003_v28, %v1960_v38 }
 0x2ec   : > { %v2126_v18 = vmul.f32 %v4891_v46, %v2087_v27 }
 0x2ed   : > { %2424 = vmatmul.bf16.gmra.mxu0 %v2204_v17  ;;  %2510 = vmatmul.bf16.gmra.mxu2 %v2204_v17  ;;  %v2127_v49 = vmul.f32 %v4883_v2, %v2004_v44 }
 0x2ee   : > { %v2159_v43 = vadd.f32 %v4897_v4, %v2126_v18 }
 0x2ef   : > { %v2160_v11 = vadd.f32 %v4889_v5, %v2127_v49 }
 0x2f0   : > { %v2046_v58 = vpop.f32.mrf.mxu2  ;;  %v2185_v50 = vmax.f32 %v2159_v43, 0.0 }
 0x2f1   : > { %v2089_v23 = vpop.f32.mrf.mxu3  ;;  %v1962_v35 = vpop.f32.mrf.mxu0  ;;  %v2186_v53 = vmax.f32 %v2160_v11, 0.0 }
 0x2f2   : > { %v2005_v26 = vpop.f32.mrf.mxu1  ;;  %v2205_v21 = vpack.c.bf16 %v2185_v50, %v2183_v45  ;;  %v2090_v56 = vadd.f32 %v2089_v23, %v2046_v58 }
 0x2f3   : > { %v2006_v13 = vadd.f32 %v2005_v26, %v1962_v35 }
 0x2f4   : > { %2467 = vmatmul.bf16.gmra.mxu1 %v2205_v21  ;;  %2553 = vmatmul.bf16.gmra.mxu3 %v2205_v21  ;;  %v2128_v1 = vmul.f32 %v4891_v46, %v2090_v56 }
 0x2f5   : > { %v2129_v31 = vmul.f32 %v4883_v2, %v2006_v13 }
 0x2f6   : > { %v2161_v55 = vadd.f32 %v4897_v4, %v2128_v1 }
 0x2f7   : > { %v2162_v52 = vadd.f32 %v4889_v5, %v2129_v31 }
 0x2f8   : > { %v2048_v0 = vpop.f32.mrf.mxu2  ;;  %v2187_v8 = vmax.f32 %v2161_v55, 0.0 }
 0x2f9   : > { %v2091_v34 = vpop.f32.mrf.mxu3  ;;  %v1965_v3 = vpop.f32.mrf.mxu0  ;;  %v2188_v37 = vmax.f32 %v2162_v52, 0.0 }
 0x2fa   : > { %v2092_v54 = vadd.f32 %v2091_v34, %v2048_v0  ;;  %v2008_v60 = vpop.f32.mrf.mxu1 }
 0x2fb   : > { %v2206_v42 = vpack.c.bf16 %v2188_v37, %v2186_v53  ;;  %v2009_v20 = vadd.f32 %v2008_v60, %v1965_v3 }
 0x2fc   : > { %v2130_v61 = vmul.f32 %v4891_v46, %v2092_v54 }
 0x2fd   : > { %2429 = vmatmul.bf16.gmra.mxu0 %v2206_v42  ;;  %2515 = vmatmul.bf16.gmra.mxu2 %v2206_v42  ;;  %v2131_v51 = vmul.f32 %v4883_v2, %v2009_v20 }
 0x2fe   : > { %v2163_v15 = vadd.f32 %v4897_v4, %v2130_v61 }
 0x2ff   : > { %v2164_v7 = vadd.f32 %v4889_v5, %v2131_v51 }
 0x300   : > { %v2051_v6 = vpop.f32.mrf.mxu2  ;;  %v2189_v12 = vmax.f32 %v2163_v15, 0.0 }
 0x301   : > { %v2094_v62 = vpop.f32.mrf.mxu3  ;;  %v1967_v47 = vpop.f32.mrf.mxu0  ;;  %v2190_v30 = vmax.f32 %v2164_v7, 0.0 }
 0x302   : > { %v2010_v41 = vpop.f32.mrf.mxu1  ;;  %v2207_v63 = vpack.c.bf16 %v2189_v12, %v2187_v8  ;;  %v2095_v25 = vadd.f32 %v2094_v62, %v2051_v6 }
 0x303   : > { %v2011_v57 = vadd.f32 %v2010_v41, %v1967_v47 }
 0x304   : > { %2472 = vmatmul.bf16.gmra.mxu1 %v2207_v63  ;;  %2558 = vmatmul.bf16.gmra.mxu3 %v2207_v63  ;;  %v2132_v10 = vmul.f32 %v4891_v46, %v2095_v25  ;;  %v3519_v25 = vld [vmem:[%s5070_s4 + $0x4] ss:$8 sm:$0x3] }
 0x305   : > { %v2133_v24 = vmul.f32 %v4883_v2, %v2011_v57 }
 0x306   : > { %v2165_v40 = vadd.f32 %v4897_v4, %v2132_v10  ;;  %v3520_v10 = vld [vmem:[%s5070_s4 + $0x5] ss:$8 sm:$0x3] }
 0x307   : > { %v2166_v16 = vadd.f32 %v4889_v5, %v2133_v24 }
 0x308   : > { %v2053_v33 = vpop.f32.mrf.mxu2  ;;  %v2191_v27 = vmax.f32 %v2165_v40, 0.0 }
 0x309   : > { %v2096_v9 = vpop.f32.mrf.mxu3  ;;  %v1970_v48 = vpop.f32.mrf.mxu0  ;;  %v2192_v14 = vmax.f32 %v2166_v16, 0.0  ;;  %v4949_v16 = vperm.slane %v3519_v25, 0 }
 0x30a   : > { %v2097_v22 = vadd.f32 %v2096_v9, %v2053_v33  ;;  %v2013_v29 = vpop.f32.mrf.mxu1  ;;  %v4955_v9 = vperm.slane %v3520_v10, 0 }
 0x30b   : > { %v2208_v39 = vpack.c.bf16 %v2192_v14, %v2190_v30  ;;  %v2014_v38 = vadd.f32 %v2013_v29, %v1970_v48  ;;  %v4957_v48 = vperm.slane %v3519_v25, 1 }
 0x30c   : > { %v2134_v32 = vmul.f32 %v4891_v46, %v2097_v22  ;;  %v4959_v22 = vperm.slane %v3520_v10, 1 }
 0x30d   : > { %2434 = vmatmul.bf16.gmra.mxu0 %v2208_v39  ;;  %2520 = vmatmul.bf16.gmra.mxu2 %v2208_v39  ;;  %v2135_v17 = vmul.f32 %v4883_v2, %v2014_v38 }
 0x30e   : > { %v2167_v36 = vadd.f32 %v4897_v4, %v2134_v32 }
 0x30f   : > { %v2168_v50 = vadd.f32 %v4889_v5, %v2135_v17 }
 0x310   : > { %v2056_v59 = vpop.f32.mrf.mxu2  ;;  %v2193_v28 = vmax.f32 %v2167_v36, 0.0 }
 0x311   : > { %v2099_v18 = vpop.f32.mrf.mxu3  ;;  %v1972_v19 = vpop.f32.mrf.mxu0  ;;  %v2194_v21 = vmax.f32 %v2168_v50, 0.0 }
 0x312   : > { %v2015_v44 = vpop.f32.mrf.mxu1  ;;  %v2209_v43 = vpack.c.bf16 %v2193_v28, %v2191_v27  ;;  %v2100_v45 = vadd.f32 %v2099_v18, %v2056_v59 }
 0x313   : > { %v2016_v58 = vadd.f32 %v2015_v44, %v1972_v19 }
 0x314   : > { %2477 = vmatmul.bf16.gmra.mxu1 %v2209_v43  ;;  %2563 = vmatmul.bf16.gmra.mxu3 %v2209_v43  ;;  %v2136_v35 = vmul.f32 %v4891_v46, %v2100_v45 }
 0x315   : > { %v2137_v49 = vmul.f32 %v4883_v2, %v2016_v58 }
 0x316   : > { %v2169_v34 = vadd.f32 %v4897_v4, %v2136_v35 }
 0x317   : > { %v2170_v23 = vadd.f32 %v4889_v5, %v2137_v49 }
 0x318   : > { %v2058_v26 = vpop.f32.mrf.mxu2  ;;  %v2195_v54 = vmax.f32 %v2169_v34, 0.0 }
 0x319   : > { %v2196_v13 = vmax.f32 %v2170_v23, 0.0  ;;  %v2101_v56 = vpop.f32.mrf.mxu3  ;;  %v1975_v31 = vpop.f32.mrf.mxu0 }
 0x31a   : > { %v2102_v11 = vadd.f32 %v2101_v56, %v2058_v26  ;;  %v2018_v52 = vpop.f32.mrf.mxu1 }
 0x31b   : > { %v2210_v1 = vpack.c.bf16 %v2196_v13, %v2194_v21  ;;  %v2019_v0 = vadd.f32 %v2018_v52, %v1975_v31 }
 0x31c   : > { %v2138_v3 = vmul.f32 %v4891_v46, %v2102_v11 }
 0x31d   : > { %2439 = vmatmul.bf16.gmra.mxu0 %v2210_v1  ;;  %2525 = vmatmul.bf16.gmra.mxu2 %v2210_v1  ;;  %v2139_v53 = vmul.f32 %v4883_v2, %v2019_v0 }
 0x31e   : > { %v2171_v37 = vadd.f32 %v4897_v4, %v2138_v3 }
 0x31f   : > { %v2172_v61 = vadd.f32 %v4889_v5, %v2139_v53 }
 0x320   : > { %v2197_v60 = vmax.f32 %v2171_v37, 0.0  ;;  %v2061_v42 = vpop.f32.mrf.mxu2 }
 0x321   : > { %v2104_v55 = vpop.f32.mrf.mxu3  ;;  %v1977_v20 = vpop.f32.mrf.mxu0  ;;  %v2198_v51 = vmax.f32 %v2172_v61, 0.0 }
 0x322   : > { %v2105_v15 = vadd.f32 %v2104_v55, %v2061_v42  ;;  %v2211_v6 = vpack.c.bf16 %v2197_v60, %v2195_v54  ;;  %v2020_v8 = vpop.f32.mrf.mxu1 }
 0x323   : > { %v2212_v41 = vpack.c.bf16 %v2198_v51, %v2198_v51 }
 0x324   : > { %v2140_v12 = vmul.f32 %v4891_v46, %v2105_v15  ;;  %2482 = vmatmul.bf16.gmra.mxu1 %v2211_v6  ;;  %2568 = vmatmul.bf16.gmra.mxu3 %v2211_v6 }
 0x326   : > { %v2173_v62 = vadd.f32 %v4897_v4, %v2140_v12 }
 0x328   : > { %v2063_v2 = vpop.f32.mrf.mxu2  ;;  %v2199_v63 = vmax.f32 %v2173_v62, 0.0 }
 0x329   : > { %v2106_v47 = vpop.f32.mrf.mxu3 }
 0x32a   : > { %v2213_v57 = vpack.c.bf16 %v2199_v63, %v2199_v63 }
 0x32d   : > { %2444 = vmatmul.bf16.gmra.mxu0 %v2212_v41  ;;  %2530 = vmatmul.bf16.gmra.mxu2 %v2212_v41 }
 0x334   : > { %2487 = vmatmul.bf16.gmra.mxu1 %v2213_v57  ;;  %2573 = vmatmul.bf16.gmra.mxu3 %v2213_v57 }
 0x34a   : > { %v2415_v5 = vpop.f32.mrf.mxu0 }
 0x350   : > { %v2501_v46 = vpop.f32.mrf.mxu2 }
 0x351   : > { %v2458_v24 = vpop.f32.mrf.mxu1 }
 0x352   : > { %v2459_v7 = vadd.f32 %v2458_v24, %v2415_v5  ;;  %v2417_v4 = vpop.f32.mrf.mxu0 }
 0x354   : > { %v2585_v33 = vmul.f32 %v4949_v16, %v2459_v7 }
 0x356   : > { %v2618_v32 = vadd.f32 %v4955_v9, %v2585_v33 }
 0x357   : > { %v2544_v30 = vpop.f32.mrf.mxu3 }
 0x358   : > { %v2545_v14 = vadd.f32 %v2544_v30, %v2501_v46  ;;  %v2503_v29 = vpop.f32.mrf.mxu2  ;;  %v2644_v27 = vmax.f32 %v2618_v32, 0.0 }
 0x359   : > { %v2460_v39 = vpop.f32.mrf.mxu1 }
 0x35a   : > { %v2586_v40 = vmul.f32 %v4957_v48, %v2545_v14  ;;  %v2461_v38 = vadd.f32 %v2460_v39, %v2417_v4  ;;  %v2420_v36 = vpop.f32.mrf.mxu0 }
 0x35c   : > { %v2619_v59 = vadd.f32 %v4959_v22, %v2586_v40  ;;  %v2587_v17 = vmul.f32 %v4949_v16, %v2461_v38 }
 0x35e   : > { %v2645_v28 = vmax.f32 %v2619_v59, 0.0  ;;  %v2620_v45 = vadd.f32 %v4955_v9, %v2587_v17 }
 0x35f   : > { %v2546_v18 = vpop.f32.mrf.mxu3 }
 0x360   : > { %v2670_v19 = vpack.c.bf16 %v2645_v28, %v2644_v27  ;;  %v2547_v44 = vadd.f32 %v2546_v18, %v2503_v29  ;;  %v2506_v43 = vpop.f32.mrf.mxu2  ;;  %v2646_v26 = vmax.f32 %v2620_v45, 0.0 }
 0x361   : > { %v2463_v58 = vpop.f32.mrf.mxu1 }
 0x362   : > { %2683 = vst [vmem:[%s5071_s5] sm:$0xff] %v2670_v19  ;;  %v2588_v50 = vmul.f32 %v4957_v48, %v2547_v44  ;;  %v2464_v49 = vadd.f32 %v2463_v58, %v2420_v36  ;;  %v2422_v23 = vpop.f32.mrf.mxu0 }
 0x364   : > { %v2621_v35 = vadd.f32 %v4959_v22, %v2588_v50  ;;  %v2589_v13 = vmul.f32 %v4949_v16, %v2464_v49 }
 0x366   : > { %v2647_v21 = vmax.f32 %v2621_v35, 0.0  ;;  %v2622_v0 = vadd.f32 %v4955_v9, %v2589_v13 }
 0x367   : > { %v2549_v56 = vpop.f32.mrf.mxu3 }
 0x368   : > { %v2671_v31 = vpack.c.bf16 %v2647_v21, %v2646_v26  ;;  %v2550_v11 = vadd.f32 %v2549_v56, %v2506_v43  ;;  %v2508_v52 = vpop.f32.mrf.mxu2  ;;  %v2648_v54 = vmax.f32 %v2622_v0, 0.0 }
 0x369   : > { %v2465_v1 = vpop.f32.mrf.mxu1 }
 0x36a   : > { %2684 = vst [vmem:[%s5071_s5 + $0x8] sm:$0xff] %v2671_v31  ;;  %v2590_v34 = vmul.f32 %v4957_v48, %v2550_v11  ;;  %v2466_v3 = vadd.f32 %v2465_v1, %v2422_v23  ;;  %v2425_v53 = vpop.f32.mrf.mxu0 }
 0x36c   : > { %v2623_v37 = vadd.f32 %v4959_v22, %v2590_v34  ;;  %v2591_v42 = vmul.f32 %v4949_v16, %v2466_v3 }
 0x36e   : > { %v2649_v60 = vmax.f32 %v2623_v37, 0.0  ;;  %v2624_v8 = vadd.f32 %v4955_v9, %v2591_v42 }
 0x36f   : > { %v2551_v61 = vpop.f32.mrf.mxu3 }
 0x370   : > { %v2672_v55 = vpack.c.bf16 %v2649_v60, %v2648_v54  ;;  %v2552_v20 = vadd.f32 %v2551_v61, %v2508_v52  ;;  %v2511_v15 = vpop.f32.mrf.mxu2  ;;  %v2650_v47 = vmax.f32 %v2624_v8, 0.0 }
 0x371   : > { %v2468_v6 = vpop.f32.mrf.mxu1 }
 0x372   : > { %2685 = vst [vmem:[%s5071_s5 + $0x10] sm:$0xff] %v2672_v55  ;;  %v2592_v12 = vmul.f32 %v4957_v48, %v2552_v20  ;;  %v2469_v51 = vadd.f32 %v2468_v6, %v2425_v53  ;;  %v2427_v62 = vpop.f32.mrf.mxu0 }
 0x374   : > { %v2625_v2 = vadd.f32 %v4959_v22, %v2592_v12  ;;  %v2593_v63 = vmul.f32 %v4949_v16, %v2469_v51 }
 0x376   : > { %v2651_v41 = vmax.f32 %v2625_v2, 0.0  ;;  %v2626_v7 = vadd.f32 %v4955_v9, %v2593_v63 }
 0x377   : > { %v2554_v57 = vpop.f32.mrf.mxu3 }
 0x378   : > { %v2673_v5 = vpack.c.bf16 %v2651_v41, %v2650_v47  ;;  %v2555_v25 = vadd.f32 %v2554_v57, %v2511_v15  ;;  %v2513_v46 = vpop.f32.mrf.mxu2  ;;  %v2652_v14 = vmax.f32 %v2626_v7, 0.0 }
 0x379   : > { %v2470_v24 = vpop.f32.mrf.mxu1 }
 0x37a   : > { %2686 = vst [vmem:[%s5071_s5 + $0x18] sm:$0xff] %v2673_v5  ;;  %v2594_v4 = vmul.f32 %v4957_v48, %v2555_v25  ;;  %v2471_v10 = vadd.f32 %v2470_v24, %v2427_v62  ;;  %v2430_v33 = vpop.f32.mrf.mxu0 }
 0x37c   : > { %v2627_v30 = vadd.f32 %v4959_v22, %v2594_v4  ;;  %v2595_v39 = vmul.f32 %v4949_v16, %v2471_v10 }
 0x37e   : > { %v2653_v29 = vmax.f32 %v2627_v30, 0.0  ;;  %v2628_v27 = vadd.f32 %v4955_v9, %v2595_v39 }
 0x37f   : > { %v2556_v32 = vpop.f32.mrf.mxu3 }
 0x380   : > { %v2674_v40 = vpack.c.bf16 %v2653_v29, %v2652_v14  ;;  %v2557_v38 = vadd.f32 %v2556_v32, %v2513_v46  ;;  %v2516_v36 = vpop.f32.mrf.mxu2  ;;  %v2654_v44 = vmax.f32 %v2628_v27, 0.0 }
 0x381   : > { %v2473_v59 = vpop.f32.mrf.mxu1 }
 0x382   : > { %2687 = vst [vmem:[%s5071_s5 + $0x20] sm:$0xff] %v2674_v40  ;;  %v2596_v28 = vmul.f32 %v4957_v48, %v2557_v38  ;;  %v2474_v17 = vadd.f32 %v2473_v59, %v2430_v33  ;;  %v2432_v18 = vpop.f32.mrf.mxu0 }
 0x384   : > { %v2629_v19 = vadd.f32 %v4959_v22, %v2596_v28  ;;  %v2597_v58 = vmul.f32 %v4949_v16, %v2474_v17 }
 0x386   : > { %v2655_v43 = vmax.f32 %v2629_v19, 0.0  ;;  %v2630_v26 = vadd.f32 %v4955_v9, %v2597_v58 }
 0x387   : > { %v2559_v45 = vpop.f32.mrf.mxu3 }
 0x388   : > { %v2675_v50 = vpack.c.bf16 %v2655_v43, %v2654_v44  ;;  %v2560_v49 = vadd.f32 %v2559_v45, %v2516_v36  ;;  %v2518_v23 = vpop.f32.mrf.mxu2  ;;  %v2656_v11 = vmax.f32 %v2630_v26, 0.0 }
 0x389   : > { %v2475_v35 = vpop.f32.mrf.mxu1 }
 0x38a   : > { %2688 = vst [vmem:[%s5071_s5 + $0x28] sm:$0xff] %v2675_v50  ;;  %v2598_v21 = vmul.f32 %v4957_v48, %v2560_v49  ;;  %v2476_v13 = vadd.f32 %v2475_v35, %v2432_v18  ;;  %v2435_v56 = vpop.f32.mrf.mxu0 }
 0x38c   : > { %v2631_v31 = vadd.f32 %v4959_v22, %v2598_v21  ;;  %v2599_v1 = vmul.f32 %v4949_v16, %v2476_v13 }
 0x38e   : > { %v2657_v52 = vmax.f32 %v2631_v31, 0.0  ;;  %v2632_v54 = vadd.f32 %v4955_v9, %v2599_v1 }
 0x38f   : > { %v2561_v0 = vpop.f32.mrf.mxu3 }
 0x390   : > { %v2676_v34 = vpack.c.bf16 %v2657_v52, %v2656_v11  ;;  %v2562_v3 = vadd.f32 %v2561_v0, %v2518_v23  ;;  %v2521_v53 = vpop.f32.mrf.mxu2  ;;  %v2658_v20 = vmax.f32 %v2632_v54, 0.0 }
 0x391   : > { %v2478_v37 = vpop.f32.mrf.mxu1 }
 0x392   : > { %2689 = vst [vmem:[%s5071_s5 + $0x30] sm:$0xff] %v2676_v34  ;;  %v2600_v60 = vmul.f32 %v4957_v48, %v2562_v3  ;;  %v2479_v42 = vadd.f32 %v2478_v37, %v2435_v56  ;;  %v2437_v61 = vpop.f32.mrf.mxu0 }
 0x394   : > { %v2633_v55 = vadd.f32 %v4959_v22, %v2600_v60  ;;  %v2601_v6 = vmul.f32 %v4949_v16, %v2479_v42 }
 0x396   : > { %v2659_v15 = vmax.f32 %v2633_v55, 0.0  ;;  %v2634_v47 = vadd.f32 %v4955_v9, %v2601_v6 }
 0x397   : > { %v2564_v8 = vpop.f32.mrf.mxu3 }
 0x398   : > { %v2677_v12 = vpack.c.bf16 %v2659_v15, %v2658_v20  ;;  %v2565_v51 = vadd.f32 %v2564_v8, %v2521_v53  ;;  %v2523_v62 = vpop.f32.mrf.mxu2  ;;  %v2660_v25 = vmax.f32 %v2634_v47, 0.0 }
 0x399   : > { %v2480_v2 = vpop.f32.mrf.mxu1 }
 0x39a   : > { %2690 = vst [vmem:[%s5071_s5 + $0x38] sm:$0xff] %v2677_v12  ;;  %v2602_v41 = vmul.f32 %v4957_v48, %v2565_v51  ;;  %v2481_v63 = vadd.f32 %v2480_v2, %v2437_v61  ;;  %v2440_v57 = vpop.f32.mrf.mxu0 }
 0x39c   : > { %v2635_v5 = vadd.f32 %v4959_v22, %v2602_v41  ;;  %v2603_v24 = vmul.f32 %v4949_v16, %v2481_v63 }
 0x39e   : > { %v2661_v46 = vmax.f32 %v2635_v5, 0.0  ;;  %v2636_v14 = vadd.f32 %v4955_v9, %v2603_v24 }
 0x39f   : > { %v2566_v7 = vpop.f32.mrf.mxu3 }
 0x3a0   : > { %v2678_v4 = vpack.c.bf16 %v2661_v46, %v2660_v25  ;;  %v2567_v10 = vadd.f32 %v2566_v7, %v2523_v62  ;;  %v2526_v33 = vpop.f32.mrf.mxu2  ;;  %v2662_v38 = vmax.f32 %v2636_v14, 0.0 }
 0x3a1   : > { %v2483_v30 = vpop.f32.mrf.mxu1 }
 0x3a2   : > { %2691 = vst [vmem:[%s5071_s5 + $0x40] sm:$0xff] %v2678_v4  ;;  %v2604_v29 = vmul.f32 %v4957_v48, %v2567_v10  ;;  %v2484_v39 = vadd.f32 %v2483_v30, %v2440_v57  ;;  %v2442_v32 = vpop.f32.mrf.mxu0 }
 0x3a4   : > { %v2637_v40 = vadd.f32 %v4959_v22, %v2604_v29  ;;  %v2605_v59 = vmul.f32 %v4949_v16, %v2484_v39 }
 0x3a6   : > { %v2663_v36 = vmax.f32 %v2637_v40, 0.0  ;;  %v2638_v44 = vadd.f32 %v4955_v9, %v2605_v59 }
 0x3a7   : > { %v2569_v27 = vpop.f32.mrf.mxu3 }
 0x3a8   : > { %v2679_v28 = vpack.c.bf16 %v2663_v36, %v2662_v38  ;;  %v2570_v17 = vadd.f32 %v2569_v27, %v2526_v33  ;;  %v2528_v18 = vpop.f32.mrf.mxu2  ;;  %v2664_v49 = vmax.f32 %v2638_v44, 0.0 }
 0x3a9   : > { %v2485_v19 = vpop.f32.mrf.mxu1 }
 0x3aa   : > { %2692 = vst [vmem:[%s5071_s5 + $0x48] sm:$0xff] %v2679_v28  ;;  %v2606_v43 = vmul.f32 %v4957_v48, %v2570_v17  ;;  %v2486_v58 = vadd.f32 %v2485_v19, %v2442_v32  ;;  %v2445_v45 = vpop.f32.mrf.mxu0 }
 0x3ac   : > { %v2639_v50 = vadd.f32 %v4959_v22, %v2606_v43  ;;  %v2607_v35 = vmul.f32 %v4949_v16, %v2486_v58 }
 0x3ae   : > { %v2665_v23 = vmax.f32 %v2639_v50, 0.0  ;;  %v2640_v11 = vadd.f32 %v4955_v9, %v2607_v35 }
 0x3af   : > { %v2571_v26 = vpop.f32.mrf.mxu3 }
 0x3b0   : > { %v2680_v21 = vpack.c.bf16 %v2665_v23, %v2664_v49  ;;  %v2572_v13 = vadd.f32 %v2571_v26, %v2528_v18  ;;  %v2531_v56 = vpop.f32.mrf.mxu2  ;;  %v2666_v3 = vmax.f32 %v2640_v11, 0.0 }
 0x3b1   : > { %v2488_v31 = vpop.f32.mrf.mxu1 }
 0x3b2   : > { %2693 = vst [vmem:[%s5071_s5 + $0x50] sm:$0xff] %v2680_v21  ;;  %v2608_v52 = vmul.f32 %v4957_v48, %v2572_v13  ;;  %v2489_v1 = vadd.f32 %v2488_v31, %v2445_v45  ;;  %v2447_v0 = vpop.f32.mrf.mxu0 }
 0x3b4   : > { %v2641_v34 = vadd.f32 %v4959_v22, %v2608_v52  ;;  %v2609_v37 = vmul.f32 %v4949_v16, %v2489_v1 }
 0x3b6   : > { %v2667_v53 = vmax.f32 %v2641_v34, 0.0  ;;  %v2642_v20 = vadd.f32 %v4955_v9, %v2609_v37 }
 0x3b7   : > { %v2574_v54 = vpop.f32.mrf.mxu3 }
 0x3b8   : > { %v2681_v60 = vpack.c.bf16 %v2667_v53, %v2666_v3  ;;  %v2575_v42 = vadd.f32 %v2574_v54, %v2531_v56  ;;  %v2533_v61 = vpop.f32.mrf.mxu2  ;;  %v2668_v8 = vmax.f32 %v2642_v20, 0.0 }
 0x3b9   : > { %v2490_v55 = vpop.f32.mrf.mxu1 }
 0x3ba   : > { %2694 = vst [vmem:[%s5071_s5 + $0x58] sm:$0xff] %v2681_v60  ;;  %v2610_v15 = vmul.f32 %v4957_v48, %v2575_v42 }
 0x3bc   : > { %v2643_v6 = vadd.f32 %v4959_v22, %v2610_v15 }
 0x3be   : > { %v2669_v12 = vmax.f32 %v2643_v6, 0.0 }
 0x3bf   : > { %v2576_v51 = vpop.f32.mrf.mxu3 }
 0x3c0   : > { %v2682_v62 = vpack.c.bf16 %v2669_v12, %v2668_v8 }
 0x3c2   : > { %2695 = vst [vmem:[%s5071_s5 + $0x60] sm:$0xff] %v2682_v62 }
 0x3c3 PF: > { %s15_s22 = sadd.s32 1, %s3798_s22   ;;  %s5072_s18 = smov %s3786_s19 }
 0x3c4   : > { %p12_p12 = scmp.ge.s32.totalorder %s15_s22, 7   ;;  %s5073_s19 = smov %s3866_s26 }
 0x3c5   : > { %s5074_s20 = smov %s3794_s21  ;;  %s5075_s21 = smov %s5077_s23 }
 0x3c6   :  { %14 = sbr.rel (!%p12_p12) target bundleno = 3 (0x3), region = 123 }

// kernel: nin_forward.11
= control target key start
LH: loop header
LB: loop body
LE: loop exit
PB: predicated region body
PF: predicated region fallthrough
CT: control target
= control target key end

     0   :  { %s335_s6 = smov 0   ;;  %s337_s7 = smov 0   ;;  %s392_s0 = inlined_call_operand.vmem [shape: bf16[9,24,256], index: 0, kind: input, shape index: {}]   ;;  %s393_s1 = inlined_call_operand.vmem [shape: bf16[24,256], index: 1, kind: output, shape index: {}]  }
   0x1   :  { %s339_s8 = smov 0  }
   0x2 LB: > { %s20_s9 = sadd.s32 1, %s319_s7  ;;  %p268_p0 = scmp.ge.s32.totalorder %s323_s8, 1  ;;  %s323_s8 = sphi %s339_s8, %s11_s8   ;;  %s319_s7 = sphi %s337_s7, %s395_s7   ;;  %s315_s6 = sphi %s335_s6, %s394_s6  }
   0x3   : > { %p21_p1 = scmp.ge.s32.totalorder %s20_s9, 9  ;;  %p107_p2 = scmp.lt.s32.totalorder %s323_s8, 10 }
   0x5   : > { %s397_s9 = smov (%p21_p1, %s20_s9), 0  ;;  %p108_p3 = pnand %p268_p0, %p107_p2 }
   0x6   : > { %p134_p4 = scmp.lt.s32.totalorder (!%p108_p3), %s315_s6, 8  ;;  %p270_p5 = scmp.ne.s32.totalorder (!%p108_p3), %s315_s6, 0 }
   0x7   : > { %111 = sbr.rel (%p108_p3) target bundleno = 38 (0x26), region = 24 }
   0xc   : > { %s135_s10 = scalar_select %p134_p4, %s315_s6, 8 }
   0xd   : > { %157 = sbr.rel (%p270_p5) target bundleno = 21 (0x15), region = 28 }
   0xe   : > { %s276_s11 = smul.u32 24, %s135_s10 }
  0x10   : > { %s142_s14 = scalar_lea.vmem %s392_s0, %s276_s11 }
  0x11   : > { %v151_v0 = vld [vmem:[%s142_s14] sm:$0xff]  ;;  %v152_v1 = vld [vmem:[%s142_s14 + $0x8] sm:$0xff]  ;;  %v153_v2 = vld [vmem:[%s142_s14 + $0x10] sm:$0xff] }
  0x12   : > { %158 = vst [vmem:[%s393_s1] sm:$0xff] %v151_v0 }
  0x13   : > { %159 = vst [vmem:[%s393_s1 + $0x8] sm:$0xff] %v152_v1 }
  0x14   : > { %160 = vst [vmem:[%s393_s1 + $0x10] sm:$0xff] %v153_v2 }
  0x15 PF: > { %p271_p6 = scmp.le.s32.totalorder %s315_s6, 0 }
  0x17   : > { %164 = sbr.rel (%p271_p6) target bundleno = 38 (0x26), region = 32 }
  0x1c   : > { %v165_v3 = vld [vmem:[%s393_s1] sm:$0xff]  ;;  %v174_v4 = vunpack.c.l.bf16 %v151_v0  ;;  %v175_v5 = vunpack.c.h.bf16 %v151_v0  ;;  %v166_v6 = vld [vmem:[%s393_s1 + $0x8] sm:$0xff]  ;;  %v176_v7 = vunpack.c.l.bf16 %v152_v1  ;;  %v177_v8 = vunpack.c.h.bf16 %v152_v1  ;;  %v167_v9 = vld [vmem:[%s393_s1 + $0x10] sm:$0xff] }
  0x1d   : > { %v168_v10 = vunpack.c.l.bf16 %v165_v3  ;;  %v169_v11 = vunpack.c.h.bf16 %v165_v3  ;;  %v170_v12 = vunpack.c.l.bf16 %v166_v6  ;;  %v171_v13 = vunpack.c.h.bf16 %v166_v6 }
  0x1e   : > { %v172_v14 = vunpack.c.l.bf16 %v167_v9  ;;  %v173_v15 = vunpack.c.h.bf16 %v167_v9  ;;  %v178_v16 = vunpack.c.l.bf16 %v153_v2  ;;  %v179_v17 = vunpack.c.h.bf16 %v153_v2 }
  0x1f   : > { %v180_v18 = vmax.f32 %v168_v10, %v174_v4  ;;  %v181_v19 = vmax.f32 %v169_v11, %v175_v5  ;;  %v182_v20 = vmax.f32 %v170_v12, %v176_v7  ;;  %v183_v21 = vmax.f32 %v171_v13, %v177_v8 }
  0x20   : > { %v184_v22 = vmax.f32 %v172_v14, %v178_v16  ;;  %v185_v23 = vmax.f32 %v173_v15, %v179_v17 }
  0x21   : > { %v186_v24 = vpack.c.bf16 %v181_v19, %v180_v18  ;;  %v187_v25 = vpack.c.bf16 %v183_v21, %v182_v20 }
  0x22   : > { %v188_v26 = vpack.c.bf16 %v185_v23, %v184_v22 }
  0x23   : > { %189 = vst [vmem:[%s393_s1] sm:$0xff] %v186_v24 }
  0x24   : > { %190 = vst [vmem:[%s393_s1 + $0x8] sm:$0xff] %v187_v25 }
  0x25   : > { %191 = vst [vmem:[%s393_s1 + $0x10] sm:$0xff] %v188_v26 }
  0x26 PF: > { %s11_s8 = sadd.s32 1, %s323_s8   ;;  %s394_s6 = smov %s319_s7 }
  0x27   : > { %p8_p7 = scmp.ge.s32.totalorder %s11_s8, 11   ;;  %s395_s7 = smov %s397_s9 }
  0x29   :  { %10 = sbr.rel (!%p8_p7) target bundleno = 2 (0x2), region = 62 }

// kernel: nin_forward.13
= control target key start
LH: loop header
LB: loop body
LE: loop exit
PB: predicated region body
PF: predicated region fallthrough
CT: control target
= control target key end

     0   :  { %s309_s6 = smov 0   ;;  %s311_s7 = smov 0   ;;  %s357_s0 = inlined_call_operand.vmem [shape: bf16[9,8,384], index: 0, kind: input, shape index: {}]   ;;  %s358_s1 = inlined_call_operand.vmem [shape: bf16[8,384], index: 1, kind: output, shape index: {}]  }
   0x1   :  { %s313_s8 = smov 0  }
   0x2 LB: > { %s20_s9 = sadd.s32 1, %s293_s7  ;;  %p243_p0 = scmp.ge.s32.totalorder %s297_s8, 1  ;;  %s297_s8 = sphi %s313_s8, %s11_s8   ;;  %s293_s7 = sphi %s311_s7, %s360_s7   ;;  %s289_s6 = sphi %s309_s6, %s359_s6  }
   0x3   : > { %p21_p1 = scmp.ge.s32.totalorder %s20_s9, 9  ;;  %p105_p2 = scmp.lt.s32.totalorder %s297_s8, 10 }
   0x5   : > { %s362_s9 = smov (%p21_p1, %s20_s9), 0  ;;  %p106_p3 = pnand %p243_p0, %p105_p2 }
   0x6   : > { %p129_p4 = scmp.lt.s32.totalorder (!%p106_p3), %s289_s6, 8  ;;  %p245_p5 = scmp.ne.s32.totalorder (!%p106_p3), %s289_s6, 0 }
   0x7   : > { %109 = sbr.rel (%p106_p3) target bundleno = 36 (0x24), region = 24 }
   0xc   : > { %s130_s10 = scalar_select %p129_p4, %s289_s6, 8 }
   0xd   : > { %148 = sbr.rel (%p245_p5) target bundleno = 20 (0x14), region = 28 }
   0xe   : > { %s250_s11 = smul.u32 12, %s130_s10 }
  0x10   : > { %s137_s14 = scalar_lea.vmem %s357_s0, %s250_s11 }
  0x11   : > { %v143_v0 = vld [vmem:[%s137_s14] sm:$0xff]  ;;  %v144_v1 = vld [vmem:[%s137_s14 + $0x8] sm:$0xf] }
  0x12   : > { %149 = vst [vmem:[%s358_s1] sm:$0xff] %v143_v0 }
  0x13   : > { %150 = vst [vmem:[%s358_s1 + $0x8] sm:$0xf] %v144_v1 }
  0x14 PF: > { %p246_p6 = scmp.le.s32.totalorder %s289_s6, 0 }
  0x16   : > { %154 = sbr.rel (%p246_p6) target bundleno = 36 (0x24), region = 32 }
  0x1b   : > { %v155_v2 = vld [vmem:[%s358_s1] sm:$0xff]  ;;  %v160_v3 = vunpack.c.l.bf16 %v143_v0  ;;  %v161_v4 = vunpack.c.h.bf16 %v143_v0  ;;  %v156_v5 = vld [vmem:[%s358_s1 + $0x8] sm:$0xf]  ;;  %v162_v6 = vunpack.c.l.bf16 %v144_v1 }
  0x1c   : > { %v157_v7 = vunpack.c.l.bf16 %v155_v2  ;;  %v158_v8 = vunpack.c.h.bf16 %v155_v2  ;;  %v159_v9 = vunpack.c.l.bf16 %v156_v5 }
  0x1e   : > { %v163_v10 = vmax.f32 %v157_v7, %v160_v3  ;;  %v164_v11 = vmax.f32 %v158_v8, %v161_v4  ;;  %v165_v12 = vmax.f32 %v159_v9, %v162_v6 }
  0x20   : > { %v166_v13 = vpack.c.bf16 %v164_v11, %v163_v10  ;;  %v167_v14 = vpack.c.bf16 %v165_v12, %v165_v12 }
  0x22   : > { %168 = vst [vmem:[%s358_s1] sm:$0xff] %v166_v13 }
  0x23   : > { %169 = vst [vmem:[%s358_s1 + $0x8] sm:$0xf] %v167_v14 }
  0x24 PF: > { %s11_s8 = sadd.s32 1, %s297_s8   ;;  %s359_s6 = smov %s293_s7 }
  0x25   : > { %p8_p7 = scmp.ge.s32.totalorder %s11_s8, 11   ;;  %s360_s7 = smov %s362_s9 }
  0x27   :  { %10 = sbr.rel (!%p8_p7) target bundleno = 2 (0x2), region = 62 }

// kernel: nin_forward.15
= control target key start
LH: loop header
LB: loop body
LE: loop exit
PB: predicated region body
PF: predicated region fallthrough
CT: control target
= control target key end

     0   :  { %s95_s0 = inlined_call_operand.vmem [shape: bf16[2,8,128], index: 0, kind: input, shape index: {}]   ;;  %s96_s1 = inlined_call_operand.hbm [shape: f32[2,128], index: 1, kind: output, shape index: {}]  }
   0x1   :  { %v48_v0 = vld [vmem:[%s95_s0] sm:$0xff]  }
   0x2   :  { %6 = vsyncpa [#allocation3], 0  ;;  %v49_v1 = vunpack.c.l.bf16 %v48_v0  ;;  %v50_v2 = vunpack.c.h.bf16 %v48_v0  ;;  %s78_s8 = smov [#allocation2]   ;;  %s38_s12 = sshll.u32 %s96_s1, 4  ;;  %vm27_vm0 = vcmask 1041409   ;;  %s39_s12 = int_to_ptr.hbm [resolvable:$true] %s38_s12 }
   0x3   :  { %s36_s9 = sshll.u32 %s78_s8, 4  ;;  %s37_s9 = int_to_ptr.vmem [resolvable:$true] %s36_s9 }
   0x4   :  { %v13_v3 = vrot.slane %v49_v1, 4  ;;  %v19_v4 = vrot.slane %v50_v2, 4 }
   0x6   :  { %v14_v5 = vadd.f32 %v49_v1, %v13_v3  ;;  %v20_v6 = vadd.f32 %v50_v2, %v19_v4 }
   0x8   :  { %v15_v7 = vrot.slane %v14_v5, 2  ;;  %v21_v8 = vrot.slane %v20_v6, 2 }
   0xa   :  { %v16_v9 = vadd.f32 %v15_v7, %v14_v5  ;;  %v22_v10 = vadd.f32 %v21_v8, %v20_v6 }
   0xc   :  { %v17_v11 = vrot.slane %v16_v9, 1  ;;  %v23_v12 = vrot.slane %v22_v10, 1 }
   0xe   :  { %v18_v13 = vadd.f32 %v17_v11, %v16_v9  ;;  %v24_v14 = vadd.f32 %v23_v12, %v22_v10 }
  0x10   :  { %v28_v15 = vsel %vm27_vm0, %v24_v14, %v18_v13 }
  0x11   :  { %30 = vst [vmem:[#allocation2] sm:$0x3] %v28_v15 }
  0x12   :  { %41 = dma.vmem_to_hbm [thread:$0]  %s37_s9, 32, %s39_s12, [#allocation3]  }
  0x13   :  { %76 = dma.done.wait [#allocation3], 32  }
  0x14   :  { %77 = vsyncadd [#allocation3], 4294967264 }
  0x15   :  { %46 = vsyncpa [#allocation3], 1 }

// kernel: nin_forward.14
= control target key start
LH: loop header
LB: loop body
LE: loop exit
PB: predicated region body
PF: predicated region fallthrough
CT: control target
= control target key end

     0   :  { %s1083_s18 = smov 0   ;;  %s1085_s19 = smov 0   ;;  %s1221_s0 = inlined_call_operand.vmem [shape: bf16[8,3456], index: 0, kind: input, shape index: {}]   ;;  %s1222_s1 = inlined_call_operand.vmem [shape: bf16[3456,128], index: 1, kind: input, shape index: {}]   ;;  %s1223_s2 = inlined_call_operand.vmem [shape: bf16[128,128], index: 2, kind: input, shape index: {}]   ;;  %s1224_s3 = inlined_call_operand.vmem [shape: bf16[128,128], index: 3, kind: input, shape index: {}]   ;;  %s1225_s4 = inlined_call_operand.vmem [shape: f32[8,128], index: 4, kind: input, shape index: {}]   ;;  %s1226_s5 = inlined_call_operand.vmem [shape: bf16[8,128], index: 5, kind: output, shape index: {}]  }
   0x1   :  { %s1087_s20 = smov 0  }
   0x2 LB: > { %s24_s21 = sadd.s32 1, %s1046_s19  ;;  %p789_p0 = scmp.ge.s32.totalorder %s1050_s20, 1  ;;  %s1050_s20 = sphi %s1087_s20, %s15_s20   ;;  %s1046_s19 = sphi %s1085_s19, %s1228_s19   ;;  %s1042_s18 = sphi %s1083_s18, %s1227_s18  }
   0x3   : > { %p25_p1 = scmp.ge.s32.totalorder %s24_s21, 9  ;;  %p217_p2 = scmp.lt.s32.totalorder %s1050_s20, 10 }
   0x5   : > { %s1230_s21 = smov (%p25_p1, %s24_s21), 0  ;;  %p218_p3 = pnand %p789_p0, %p217_p2 }
   0x6   : > { %s253_s22 = smul.u32 (!%p218_p3), 3, %s1042_s18  ;;  %p792_p6 = scmp.ne.s32.totalorder (!%p218_p3), %s1042_s18, 0 }
   0x7   : > { %221 = sbr.rel (%p218_p3) target bundleno = 497 (0x1f1), region = 40 }
   0x8   : > { %s263_s23 = smul.u32 (!%p218_p3), 48, %s1042_s18  ;;  %p256_p4 = scmp.lt.s32.totalorder (!%p218_p3), %s253_s22, 26 }
   0xa   : > { %p264_p5 = scmp.lt.s32.totalorder (!%p218_p3), %s263_s23, 431 }
   0xc   : > { %s1232_s22 = smov (!%p256_p4, %s253_s22), 26  ;;  %s1234_s23 = smov (!%p264_p5, %s263_s23), 431 }
   0xd   : > { %s790_s24 = sshll.u32 %s1232_s22, 2  ;;  %s791_s28 = sshll.u32 %s1234_s23, 2 }
   0xe   : > { %s1108_s27 = scalar_lea.vmem %s1221_s0, %s790_s24  ;;  %s1113_s6 = scalar_lea.vmem %s1222_s1, %s791_s28 }
   0xf   : > { %276 = sbr.rel (%p792_p6) target bundleno = 22 (0x16), region = 44 }
  0x14   : > { %v1052_v0 = vmov 0.0  }
  0x15   : > { %277 = vst [vmem:[#allocation2] sm:$0xff] %v1052_v0 }
  0x16 PF: > { %v964_v1 = vld [vmem:[%s1113_s6 + $0x38] sm:$0xff]  ;;  %v963_v4 = vld [vmem:[%s1113_s6 + $0x30] sm:$0xff]  ;;  %v962_v7 = vld [vmem:[%s1113_s6 + $0x28] sm:$0xff]  ;;  %p889_p7 = scmp.ne.s32.totalorder %s1042_s18, 8 }
  0x17   : > { %v972_v2 = vld [vmem:[%s1113_s6 + $0x78] sm:$0xff]  ;;  %484 = vmatpush.bf16.msra.mxu0 %v964_v1  ;;  %v971_v5 = vld [vmem:[%s1113_s6 + $0x70] sm:$0xff]  ;;  %v970_v8 = vld [vmem:[%s1113_s6 + $0x68] sm:$0xff] }
  0x18   : > { %v980_v3 = vld [vmem:[%s1113_s6 + $0xb8] sm:$0xff]  ;;  %497 = vmatpush.bf16.msra.mxu1 %v972_v2  ;;  %v979_v6 = vld [vmem:[%s1113_s6 + $0xb0] sm:$0xff]  ;;  %v978_v9 = vld [vmem:[%s1113_s6 + $0xa8] sm:$0xff] }
  0x19   : > { %510 = vmatpush.bf16.msra.mxu2 %v980_v3  ;;  %v961_v10 = vld [vmem:[%s1113_s6 + $0x20] sm:$0xff]  ;;  %v960_v13 = vld [vmem:[%s1113_s6 + $0x18] sm:$0xff]  ;;  %v959_v16 = vld [vmem:[%s1113_s6 + $0x10] sm:$0xff] }
  0x1a   : > { %v969_v11 = vld [vmem:[%s1113_s6 + $0x60] sm:$0xff]  ;;  %v968_v14 = vld [vmem:[%s1113_s6 + $0x58] sm:$0xff]  ;;  %v967_v17 = vld [vmem:[%s1113_s6 + $0x50] sm:$0xff] }
  0x1b   : > { %485 = vmatpush.bf16.msra.mxu0 %v963_v4  ;;  %v977_v12 = vld [vmem:[%s1113_s6 + $0xa0] sm:$0xff]  ;;  %v976_v15 = vld [vmem:[%s1113_s6 + $0x98] sm:$0xff]  ;;  %v975_v18 = vld [vmem:[%s1113_s6 + $0x90] sm:$0xff] }
  0x1c   : > { %498 = vmatpush.bf16.msra.mxu1 %v971_v5  ;;  %v958_v19 = vld [vmem:[%s1113_s6 + $0x8] sm:$0xff]  ;;  %v279_v21 = vld [vmem:[%s1108_s27] sm:$0xff] }
  0x1d   : > { %511 = vmatpush.bf16.msra.mxu2 %v979_v6  ;;  %v966_v20 = vld [vmem:[%s1113_s6 + $0x48] sm:$0xff]  ;;  %v331_v24 = vunpack.c.l.b16 %v279_v21  ;;  %v332_v25 = vunpack.c.h.b16 %v279_v21  ;;  %v957_v26 = vld [vmem:[%s1113_s6] sm:$0xff] }
  0x1e   : > { %v974_v22 = vld [vmem:[%s1113_s6 + $0x88] sm:$0xff]  ;;  %v965_v27 = vld [vmem:[%s1113_s6 + $0x40] sm:$0xff] }
  0x1f   : > { %486 = vmatpush.bf16.msra.mxu0 %v962_v7  ;;  %v280_v23 = vld [vmem:[%s1108_s27 + $0x8] sm:$0xf]  ;;  %v973_v29 = vld [vmem:[%s1113_s6 + $0x80] sm:$0xff]  ;;  %v334_v30 = vpack.c.b16 %v331_v24, %v331_v24  ;;  %v335_v31 = vpack.c.b16 %v332_v25, %v332_v25 }
  0x20   : > { %499 = vmatpush.bf16.msra.mxu1 %v970_v8  ;;  %v333_v28 = vunpack.c.l.b16 %v280_v23  ;;  %v278_v36 = vld [vmem:[#allocation2] sm:$0xff] }
  0x21   : > { %512 = vmatpush.bf16.msra.mxu2 %v978_v9 }
  0x22   : > { %v336_v32 = vpack.c.b16 %v333_v28, %v333_v28 }
  0x23   : > { %487 = vmatpush.bf16.msra.mxu0 %v961_v10 }
  0x24   : > { %500 = vmatpush.bf16.msra.mxu1 %v969_v11 }
  0x25   : > { %513 = vmatpush.bf16.msra.mxu2 %v977_v12 }
  0x27   : > { %488 = vmatpush.bf16.msra.mxu0 %v960_v13 }
  0x28   : > { %501 = vmatpush.bf16.msra.mxu1 %v968_v14 }
  0x29   : > { %514 = vmatpush.bf16.msra.mxu2 %v976_v15 }
  0x2b   : > { %489 = vmatpush.bf16.msra.mxu0 %v959_v16 }
  0x2c   : > { %502 = vmatpush.bf16.msra.mxu1 %v967_v17 }
  0x2d   : > { %515 = vmatpush.bf16.msra.mxu2 %v975_v18 }
  0x2f   : > { %490 = vmatpush.bf16.msra.mxu0 %v958_v19 }
  0x30   : > { %503 = vmatpush.bf16.msra.mxu1 %v966_v20 }
  0x31   : > { %516 = vmatpush.bf16.msra.mxu2 %v974_v22 }
  0x33   : > { %491 = vmatpush.bf16.msra.mxu0 %v957_v26 }
  0x34   : > { %504 = vmatpush.bf16.msra.mxu1 %v965_v27 }
  0x35   : > { %517 = vmatpush.bf16.msra.mxu2 %v973_v29 }
  0x36   : > { %492 = vmatmul.bf16.vlgmr.msra.gmra.mxu0 %v334_v30 }
  0x37   : > { %505 = vmatmul.bf16.vlgmr.msra.gmra.mxu1 %v335_v31 }
  0x38   : > { %518 = vmatmul.bf16.vlgmr.msra.gmra.mxu2 %v336_v32 }
  0xb3   : > { %v493_v33 = vpop.f32.mrf.mxu0 }
  0xb4   : > { %v506_v34 = vpop.f32.mrf.mxu1 }
  0xb5   : > { %v507_v35 = vadd.f32 %v506_v34, %v493_v33 }
  0xbb   : > { %v519_v37 = vpop.f32.mrf.mxu2  ;;  %v495_v39 = vpop.f32.mrf.mxu0 }
  0xbc   : > { %v520_v38 = vadd.f32 %v519_v37, %v507_v35  ;;  %v508_v40 = vpop.f32.mrf.mxu1 }
  0xbe   : > { %v523_v41 = vadd.f32 %v520_v38, %v278_v36 }
  0xbf   : > { %528 = sbr.rel (%p889_p7) target bundleno = 497 (0x1f1), region = 48 }
  0xc0   : > { %524 = vst [vmem:[#allocation2] sm:$0xff] %v523_v41 }
  0xc3   : > { %v521_v42 = vpop.f32.mrf.mxu2 }
  0xc4   : > { %v988_v43 = vld [vmem:[%s1223_s2 + $0x38] sm:$0xff]  ;;  %v987_v44 = vld [vmem:[%s1223_s2 + $0x30] sm:$0xff]  ;;  %v986_v46 = vld [vmem:[%s1223_s2 + $0x28] sm:$0xff] }
  0xc5   : > { %602 = vmatpush.bf16.msra.mxu0 %v988_v43  ;;  %v996_v45 = vld [vmem:[%s1224_s3 + $0x38] sm:$0xff]  ;;  %v995_v47 = vld [vmem:[%s1224_s3 + $0x30] sm:$0xff]  ;;  %v985_v48 = vld [vmem:[%s1223_s2 + $0x20] sm:$0xff] }
  0xc6   : > { %687 = vmatpush.bf16.msra.mxu1 %v996_v45  ;;  %v994_v49 = vld [vmem:[%s1224_s3 + $0x28] sm:$0xff]  ;;  %v1022_v50 = vld [vmem:[%s1225_s4] ss:$0 sm:$0xff]  ;;  %v984_v51 = vld [vmem:[%s1223_s2 + $0x18] sm:$0xff] }
  0xc7   : > { %v529_v52 = vld [vmem:[#allocation2] sm:$0xff]  ;;  %v983_v56 = vld [vmem:[%s1223_s2 + $0x10] sm:$0xff]  ;;  %v992_v57 = vld [vmem:[%s1224_s3 + $0x18] sm:$0xff] }
  0xc8   : > { %v993_v53 = vld [vmem:[%s1224_s3 + $0x20] sm:$0xff]  ;;  %v532_v54 = vmul.f32 %v1022_v50, %v529_v52  ;;  %v982_v59 = vld [vmem:[%s1223_s2 + $0x8] sm:$0xff]  ;;  %v991_v60 = vld [vmem:[%s1224_s3 + $0x10] sm:$0xff] }
  0xc9   : > { %603 = vmatpush.bf16.msra.mxu0 %v987_v44  ;;  %v1023_v55 = vld [vmem:[%s1225_s4 + $0x1] ss:$0 sm:$0xff]  ;;  %v990_v0 = vld [vmem:[%s1224_s3 + $0x8] sm:$0xff]  ;;  %v1024_v2 = vld [vmem:[%s1225_s4 + $0x2] ss:$0 sm:$0xff] }
  0xca   : > { %688 = vmatpush.bf16.msra.mxu1 %v995_v47  ;;  %v535_v58 = vadd.f32 %v1023_v55, %v532_v54  ;;  %v981_v62 = vld [vmem:[%s1223_s2] sm:$0xff] }
  0xcb   : > { %v989_v1 = vld [vmem:[%s1224_s3] sm:$0xff] }
  0xcc   : > { %v536_v61 = vmax.f32 %v535_v58, 0.0  ;;  %v1025_v3 = vld [vmem:[%s1225_s4 + $0x3] ss:$0 sm:$0xff]  ;;  %v1026_v10 = vld [vmem:[%s1225_s4 + $0x4] ss:$0 sm:$0xff] }
  0xcd   : > { %604 = vmatpush.bf16.msra.mxu0 %v986_v46  ;;  %v1027_v11 = vld [vmem:[%s1225_s4 + $0x5] ss:$0 sm:$0xff] }
  0xce   : > { %689 = vmatpush.bf16.msra.mxu1 %v994_v49  ;;  %v537_v63 = vpack.c.bf16 %v536_v61, %v536_v61 }
  0xd1   : > { %605 = vmatpush.bf16.msra.mxu0 %v985_v48 }
  0xd2   : > { %690 = vmatpush.bf16.msra.mxu1 %v993_v53 }
  0xd5   : > { %606 = vmatpush.bf16.msra.mxu0 %v984_v51 }
  0xd6   : > { %691 = vmatpush.bf16.msra.mxu1 %v992_v57 }
  0xd9   : > { %607 = vmatpush.bf16.msra.mxu0 %v983_v56 }
  0xda   : > { %692 = vmatpush.bf16.msra.mxu1 %v991_v60 }
  0xdd   : > { %608 = vmatpush.bf16.msra.mxu0 %v982_v59 }
  0xde   : > { %693 = vmatpush.bf16.msra.mxu1 %v990_v0 }
  0xe1   : > { %609 = vmatpush.bf16.msra.mxu0 %v981_v62 }
  0xe2   : > { %694 = vmatpush.bf16.msra.mxu1 %v989_v1 }
  0xe4   : > { %610 = vmatmul.bf16.vlgmr.msra.gmra.mxu0 %v537_v63 }
 0x161   : > { %v611_v4 = vpop.f32.mrf.mxu0 }
 0x162   : > { %v617_v5 = vmul.f32 %v1024_v2, %v611_v4 }
 0x164   : > { %v620_v6 = vadd.f32 %v1025_v3, %v617_v5 }
 0x166   : > { %v621_v7 = vmax.f32 %v620_v6, 0.0 }
 0x168   : > { %v622_v8 = vpack.c.bf16 %v621_v7, %v621_v7 }
 0x169   : > { %v613_v9 = vpop.f32.mrf.mxu0 }
 0x16a   : > { %695 = vmatmul.bf16.vlgmr.msra.gmra.mxu1 %v622_v8 }
 0x1e7   : > { %v696_v12 = vpop.f32.mrf.mxu1 }
 0x1e8   : > { %v702_v13 = vmul.f32 %v1026_v10, %v696_v12 }
 0x1ea   : > { %v705_v14 = vadd.f32 %v1027_v11, %v702_v13 }
 0x1ec   : > { %v706_v15 = vmax.f32 %v705_v14, 0.0 }
 0x1ee   : > { %v707_v16 = vpack.c.bf16 %v706_v15, %v706_v15 }
 0x1ef   : > { %v698_v17 = vpop.f32.mrf.mxu1 }
 0x1f0   : > { %708 = vst [vmem:[%s1226_s5] sm:$0xf] %v707_v16 }
 0x1f1 PF: > { %s15_s20 = sadd.s32 1, %s1050_s20   ;;  %s1227_s18 = smov %s1046_s19 }
 0x1f2   : > { %p12_p8 = scmp.ge.s32.totalorder %s15_s20, 11   ;;  %s1228_s19 = smov %s1230_s21 }
 0x1f4   :  { %14 = sbr.rel (!%p12_p8) target bundleno = 2 (0x2), region = 81 }

// kernel: nin_forward.12
= control target key start
LH: loop header
LB: loop body
LE: loop exit
PB: predicated region body
PF: predicated region fallthrough
CT: control target
= control target key end

     0   :  { %s3829_s18 = smov 0   ;;  %s3831_s19 = smov 0   ;;  %s5176_s0 = inlined_call_operand.vmem [shape: bf16[24,2304], index: 0, kind: input, shape index: {}]   ;;  %s5177_s1 = inlined_call_operand.vmem [shape: bf16[2304,384], index: 1, kind: input, shape index: {}]   ;;  %s5178_s2 = inlined_call_operand.vmem [shape: bf16[384,384], index: 2, kind: input, shape index: {}]   ;;  %s5179_s3 = inlined_call_operand.vmem [shape: bf16[384,384], index: 3, kind: input, shape index: {}]   ;;  %s5180_s4 = inlined_call_operand.vmem [shape: f32[8,384], index: 4, kind: input, shape index: {}]   ;;  %s5181_s5 = inlined_call_operand.vmem [shape: bf16[24,384], index: 5, kind: output, shape index: {}]  }
   0x1   :  { %s3833_s20 = smov 0   ;;  %s3835_s21 = smov 0  }
   0x2   :  { %s3837_s22 = smov 0  }
   0x3 LB: > { %s24_s23 = sadd.s32 1, %s3792_s21  ;;  %p43_p1 = scmp.ne.s32.totalorder %s3784_s19, %s3780_s18  ;;  %s3796_s22 = sphi %s3837_s22, %s15_s22   ;;  %s3792_s21 = sphi %s3835_s21, %s5185_s21   ;;  %s3788_s20 = sphi %s3833_s20, %s5184_s20   ;;  %s3784_s19 = sphi %s3831_s19, %s5183_s19   ;;  %s3780_s18 = sphi %s3829_s18, %s5182_s18  }
   0x4   : > { %p25_p0 = scmp.ge.s32.totalorder %s24_s23, 6  ;;  %p44_p2 = scmp.eq.s32.totalorder %s3796_s22, 0 }
   0x5   : > { %s36_s25 = sadd.s32 1, %s3784_s19  ;;  %p2573_p5 = scmp.ge.s32.totalorder %s3796_s22, 6 }
   0x6   : > { %s5187_s23 = smov (%p25_p0, %s24_s23), 0  ;;  %p45_p3 = por %p44_p2, %p43_p1 }
   0x7   : > { %s32_s24 = ssub.s32 %s3792_s21, %s5187_s23  ;;  %193 = sbr.rel (%p2573_p5) target bundleno = 23 (0x17), region = 28 }
   0x8   : > { %p34_p4 = scmp.eq.s32.totalorder %s32_s24, 0 }
   0xa   : > { %s3864_s26 = scalar_select %p34_p4, %s3784_s19, %s36_s25  }
   0xc   : > { %196 = sbr.rel (!%p45_p3) target bundleno = 23 (0x17), region = 32  ;;  %s198_s27 = sand.u32 (%p45_p3), 1, %s3784_s19  }
   0xd   : > { %s3470_s28 = smul.u32 (%p45_p3), 12, %s3792_s21 }
   0xe   : > { %s3714_s29 = smul.u32 (%p45_p3), 36, %s198_s27 }
   0xf   : > { %s206_s7 = scalar_lea.vmem (%p45_p3), %s5176_s0, %s3470_s28 }
  0x10   : > { %v221_v0 = vld [vmem:[%s206_s7] sm:$0xff] (%p45_p3)  ;;  %v223_v1 = vld [vmem:[%s206_s7 + $0x48] sm:$0xff] (%p45_p3)  ;;  %v225_v2 = vld [vmem:[%s206_s7 + $0x90] sm:$0xff] (%p45_p3)  ;;  %s200_s8 = scalar_lea.vmem (%p45_p3), [#allocation3], %s3714_s29 }
  0x11   : > { %222 = vst [vmem:[%s200_s8] sm:$0xff] %v221_v0  ;;  %v2575_v3 = vld [vmem:[%s206_s7 + $0x8] sm:$0xf]  ;;  %v2577_v4 = vld [vmem:[%s206_s7 + $0x50] sm:$0xf]  ;;  %v2579_v5 = vld [vmem:[%s206_s7 + $0x98] sm:$0xf] }
  0x12   : > { %224 = vst [vmem:[%s200_s8 + $0xc] sm:$0xff] %v223_v1 }
  0x13   : > { %226 = vst [vmem:[%s200_s8 + $0x18] sm:$0xff] %v225_v2 }
  0x14   : > { %2576 = vst [vmem:[%s200_s8 + $0x8] sm:$0xf] %v2575_v3 }
  0x15   : > { %2578 = vst [vmem:[%s200_s8 + $0x14] sm:$0xf] %v2577_v4 }
  0x16   : > { %2580 = vst [vmem:[%s200_s8 + $0x20] sm:$0xf] %v2579_v5 }
  0x17 PF: > { %p2581_p6 = scmp.ge.s32.totalorder %s3796_s22, 1  ;;  %p255_p7 = scmp.lt.s32.totalorder %s3796_s22, 7 }
  0x19   : > { %p256_p8 = pnand %p2581_p6, %p255_p7 }
  0x1a   : > { %s262_s9 = sand.u32 (!%p256_p8), 1, %s3780_s18   ;;  %s298_s10 = smul.u32 (!%p256_p8), 48, %s3788_s20 }
  0x1b   : > { %259 = sbr.rel (%p256_p8) target bundleno = 733 (0x2dd), region = 62  ;;  %p2583_p10 = scmp.ne.s32.totalorder (!%p256_p8), %s3788_s20, 0 }
  0x1c   : > { %s3715_s11 = smul.u32 (!%p256_p8), 36, %s262_s9  ;;  %p299_p9 = scmp.lt.s32.totalorder (!%p256_p8), %s298_s10, 287 }
  0x1e   : > { %s3881_s16 = scalar_lea.vmem (!%p256_p8), [#allocation3], %s3715_s11 }
  0x20   : > { %s5189_s10 = smov (!%p299_p9, %s298_s10), 287  ;;  %315 = sbr.rel (%p2583_p10) target bundleno = 47 (0x2f), region = 70 }
  0x21   : > { %s3716_s12 = smul.u32 12, %s5189_s10 }
  0x23   : > { %s3879_s15 = scalar_lea.vmem %s5177_s1, %s3716_s12 }
  0x25   : > { %v3798_v6 = vmov 0.0  }
  0x26   : > { %316 = vst [vmem:[#allocation2 + $0x30] sm:$0xff] %v3798_v6 }
  0x27   : > { %317 = vst [vmem:[#allocation2] sm:$0xff] %v3798_v6 }
  0x28   : > { %318 = vst [vmem:[#allocation2 + $0x18] sm:$0xff] %v3798_v6 }
  0x29   : > { %319 = vst [vmem:[#allocation2 + $0x10] sm:$0xff] %v3798_v6 }
  0x2a   : > { %320 = vst [vmem:[#allocation2 + $0x20] sm:$0xff] %v3798_v6 }
  0x2b   : > { %321 = vst [vmem:[#allocation2 + $0x28] sm:$0xff] %v3798_v6 }
  0x2c   : > { %322 = vst [vmem:[#allocation2 + $0x40] sm:$0xff] %v3798_v6 }
  0x2d   : > { %323 = vst [vmem:[#allocation2 + $0x38] sm:$0xff] %v3798_v6 }
  0x2e   : > { %324 = vst [vmem:[#allocation2 + $0x8] sm:$0xff] %v3798_v6 }
  0x2f PF: > { %v2682_v7 = vld [vmem:[%s3879_s15 + $0xa8] sm:$0xf]  ;;  %v3496_v8 = vld [vmem:[%s3879_s15 + $0xb0] sm:$0xf0]  ;;  %v2670_v16 = vld [vmem:[%s3879_s15 + $0x90] sm:$0xf] }
  0x30   : > { %v2778_v9 = vld [vmem:[%s3879_s15 + $0x168] sm:$0xf]  ;;  %v2683_v10 = vor.u32 %v3496_v8, %v2682_v7  ;;  %v3520_v11 = vld [vmem:[%s3879_s15 + $0x170] sm:$0xf0]  ;;  %v3493_v17 = vld [vmem:[%s3879_s15 + $0x98] sm:$0xf0] }
  0x31   : > { %v2874_v12 = vld [vmem:[%s3879_s15 + $0x228] sm:$0xf]  ;;  %v3544_v13 = vld [vmem:[%s3879_s15 + $0x230] sm:$0xf0]  ;;  %v2779_v14 = vor.u32 %v3520_v11, %v2778_v9  ;;  %v2766_v18 = vld [vmem:[%s3879_s15 + $0x150] sm:$0xf]  ;;  %v2671_v19 = vor.u32 %v3493_v17, %v2670_v16 }
  0x32   : > { %v2875_v15 = vor.u32 %v3544_v13, %v2874_v12  ;;  %847 = vmatpush.bf16.msra.mxu0 %v2683_v10  ;;  %v3517_v20 = vld [vmem:[%s3879_s15 + $0x158] sm:$0xf0]  ;;  %v2862_v21 = vld [vmem:[%s3879_s15 + $0x210] sm:$0xf]  ;;  %v3495_v25 = vld [vmem:[%s3879_s15 + $0xac] sm:$0xf] }
  0x33   : > { %v3541_v22 = vld [vmem:[%s3879_s15 + $0x218] sm:$0xf0]  ;;  %865 = vmatpush.bf16.msra.mxu1 %v2779_v14  ;;  %v2767_v23 = vor.u32 %v3517_v20, %v2766_v18  ;;  %v2684_v26 = vld [vmem:[%s3879_s15 + $0xb4] sm:$0xf0]  ;;  %v3490_v29 = vld [vmem:[%s3879_s15 + $0x80] sm:$0xf0] }
  0x34   : > { %883 = vmatpush.bf16.msra.mxu2 %v2875_v15  ;;  %v2863_v24 = vor.u32 %v3541_v22, %v2862_v21  ;;  %v2658_v27 = vld [vmem:[%s3879_s15 + $0x78] sm:$0xf]  ;;  %v2687_v28 = vor.u32 %v3495_v25, %v2684_v26  ;;  %v3514_v31 = vld [vmem:[%s3879_s15 + $0x140] sm:$0xf0]  ;;  %v3492_v34 = vld [vmem:[%s3879_s15 + $0x94] sm:$0xf] }
  0x35   : > { %v2754_v30 = vld [vmem:[%s3879_s15 + $0x138] sm:$0xf]  ;;  %v3538_v33 = vld [vmem:[%s3879_s15 + $0x200] sm:$0xf0]  ;;  %v2659_v35 = vor.u32 %v3490_v29, %v2658_v27  ;;  %v2672_v36 = vld [vmem:[%s3879_s15 + $0x9c] sm:$0xf0] }
  0x36   : > { %v2850_v32 = vld [vmem:[%s3879_s15 + $0x1f8] sm:$0xf]  ;;  %848 = vmatpush.bf16.msra.mxu0 %v2671_v19  ;;  %901 = vmatpush.bf16.msra.mxu3 %v2687_v28  ;;  %v2646_v37 = vld [vmem:[%s3879_s15 + $0x60] sm:$0xf]  ;;  %v3487_v38 = vld [vmem:[%s3879_s15 + $0x68] sm:$0xf0]  ;;  %v2755_v39 = vor.u32 %v3514_v31, %v2754_v30  ;;  %v2675_v41 = vor.u32 %v3492_v34, %v2672_v36 }
  0x37   : > { %866 = vmatpush.bf16.msra.mxu1 %v2767_v23  ;;  %v2851_v40 = vor.u32 %v3538_v33, %v2850_v32  ;;  %v2742_v42 = vld [vmem:[%s3879_s15 + $0x120] sm:$0xf]  ;;  %v3511_v43 = vld [vmem:[%s3879_s15 + $0x128] sm:$0xf0]  ;;  %v3489_v46 = vld [vmem:[%s3879_s15 + $0x7c] sm:$0xf]  ;;  %v2647_v48 = vor.u32 %v3487_v38, %v2646_v37 }
  0x38   : > { %884 = vmatpush.bf16.msra.mxu2 %v2863_v24  ;;  %v2838_v44 = vld [vmem:[%s3879_s15 + $0x1e0] sm:$0xf]  ;;  %v3535_v45 = vld [vmem:[%s3879_s15 + $0x1e8] sm:$0xf0]  ;;  %v2660_v47 = vld [vmem:[%s3879_s15 + $0x84] sm:$0xf0]  ;;  %v2743_v52 = vor.u32 %v3511_v43, %v2742_v42 }
  0x39   : > { %v2663_v49 = vor.u32 %v3489_v46, %v2660_v47  ;;  %v2634_v50 = vld [vmem:[%s3879_s15 + $0x48] sm:$0xf]  ;;  %v3484_v51 = vld [vmem:[%s3879_s15 + $0x50] sm:$0xf0]  ;;  %v2839_v53 = vor.u32 %v3535_v45, %v2838_v44  ;;  %v3486_v55 = vld [vmem:[%s3879_s15 + $0x64] sm:$0xf] }
  0x3a   : > { %849 = vmatpush.bf16.msra.mxu0 %v2659_v35  ;;  %902 = vmatpush.bf16.msra.mxu3 %v2675_v41  ;;  %v2730_v54 = vld [vmem:[%s3879_s15 + $0x108] sm:$0xf]  ;;  %v2648_v56 = vld [vmem:[%s3879_s15 + $0x6c] sm:$0xf0]  ;;  %v3508_v57 = vld [vmem:[%s3879_s15 + $0x110] sm:$0xf0]  ;;  %v2635_v60 = vor.u32 %v3484_v51, %v2634_v50 }
  0x3b   : > { %867 = vmatpush.bf16.msra.mxu1 %v2755_v39  ;;  %v2826_v58 = vld [vmem:[%s3879_s15 + $0x1c8] sm:$0xf]  ;;  %v3532_v59 = vld [vmem:[%s3879_s15 + $0x1d0] sm:$0xf0]  ;;  %v2651_v61 = vor.u32 %v3486_v55, %v2648_v56  ;;  %v2622_v62 = vld [vmem:[%s3879_s15 + $0x30] sm:$0xf]  ;;  %v2731_v0 = vor.u32 %v3508_v57, %v2730_v54 }
  0x3c   : > { %885 = vmatpush.bf16.msra.mxu2 %v2851_v40  ;;  %v3481_v63 = vld [vmem:[%s3879_s15 + $0x38] sm:$0xf0]  ;;  %v2827_v1 = vor.u32 %v3532_v59, %v2826_v58  ;;  %v2718_v2 = vld [vmem:[%s3879_s15 + $0xf0] sm:$0xf]  ;;  %v3483_v3 = vld [vmem:[%s3879_s15 + $0x4c] sm:$0xf] }
  0x3d   : > { %v2636_v4 = vld [vmem:[%s3879_s15 + $0x54] sm:$0xf0]  ;;  %v3505_v5 = vld [vmem:[%s3879_s15 + $0xf8] sm:$0xf0]  ;;  %v2814_v6 = vld [vmem:[%s3879_s15 + $0x1b0] sm:$0xf]  ;;  %v2623_v8 = vor.u32 %v3481_v63, %v2622_v62 }
  0x3e   : > { %850 = vmatpush.bf16.msra.mxu0 %v2647_v48  ;;  %903 = vmatpush.bf16.msra.mxu3 %v2663_v49  ;;  %v3529_v7 = vld [vmem:[%s3879_s15 + $0x1b8] sm:$0xf0]  ;;  %v2639_v9 = vor.u32 %v3483_v3, %v2636_v4  ;;  %v2610_v10 = vld [vmem:[%s3879_s15 + $0x18] sm:$0xf]  ;;  %v3478_v11 = vld [vmem:[%s3879_s15 + $0x20] sm:$0xf0]  ;;  %v2719_v12 = vor.u32 %v3505_v5, %v2718_v2 }
  0x3f   : > { %868 = vmatpush.bf16.msra.mxu1 %v2743_v52  ;;  %v2815_v13 = vor.u32 %v3529_v7, %v2814_v6  ;;  %v2706_v14 = vld [vmem:[%s3879_s15 + $0xd8] sm:$0xf]  ;;  %v3480_v15 = vld [vmem:[%s3879_s15 + $0x34] sm:$0xf]  ;;  %v2624_v16 = vld [vmem:[%s3879_s15 + $0x3c] sm:$0xf0]  ;;  %v2611_v22 = vor.u32 %v3478_v11, %v2610_v10 }
  0x40   : > { %886 = vmatpush.bf16.msra.mxu2 %v2839_v53  ;;  %v3502_v17 = vld [vmem:[%s3879_s15 + $0xe0] sm:$0xf0]  ;;  %v2802_v18 = vld [vmem:[%s3879_s15 + $0x198] sm:$0xf]  ;;  %v2598_v20 = vld [vmem:[%s3879_s15] sm:$0xf]  ;;  %v2627_v23 = vor.u32 %v3480_v15, %v2624_v16 }
  0x41   : > { %v3526_v19 = vld [vmem:[%s3879_s15 + $0x1a0] sm:$0xf0]  ;;  %v3475_v21 = vld [vmem:[%s3879_s15 + $0x8] sm:$0xf0]  ;;  %v2694_v24 = vld [vmem:[%s3879_s15 + $0xc0] sm:$0xf]  ;;  %v2707_v27 = vor.u32 %v3502_v17, %v2706_v14 }
  0x42   : > { %851 = vmatpush.bf16.msra.mxu0 %v2635_v60  ;;  %904 = vmatpush.bf16.msra.mxu3 %v2651_v61  ;;  %v3499_v25 = vld [vmem:[%s3879_s15 + $0xc8] sm:$0xf0]  ;;  %v2790_v26 = vld [vmem:[%s3879_s15 + $0x180] sm:$0xf]  ;;  %v2803_v28 = vor.u32 %v3526_v19, %v2802_v18  ;;  %v3477_v30 = vld [vmem:[%s3879_s15 + $0x1c] sm:$0xf]  ;;  %v2599_v39 = vor.u32 %v3475_v21, %v2598_v20 }
  0x43   : > { %869 = vmatpush.bf16.msra.mxu1 %v2731_v0  ;;  %v3523_v29 = vld [vmem:[%s3879_s15 + $0x188] sm:$0xf0]  ;;  %v2612_v31 = vld [vmem:[%s3879_s15 + $0x24] sm:$0xf0]  ;;  %v3472_v33 = vld [vmem:[%s3881_s16 + $0x8] sm:$0xf0]  ;;  %v2695_v44 = vor.u32 %v3499_v25, %v2694_v24 }
  0x44   : > { %887 = vmatpush.bf16.msra.mxu2 %v2827_v1  ;;  %v2586_v32 = vld [vmem:[%s3881_s16] sm:$0xf]  ;;  %v3471_v35 = vld [vmem:[%s3881_s16 + $0x4] sm:$0xf]  ;;  %v2780_v36 = vld [vmem:[%s3879_s15 + $0x174] sm:$0xf0]  ;;  %v2615_v41 = vor.u32 %v3477_v30, %v2612_v31  ;;  %v2791_v45 = vor.u32 %v3523_v29, %v2790_v26 }
  0x45   : > { %v3519_v34 = vld [vmem:[%s3879_s15 + $0x16c] sm:$0xf]  ;;  %v2876_v38 = vld [vmem:[%s3879_s15 + $0x234] sm:$0xf0]  ;;  %v2690_v42 = vld [vmem:[%s3879_s15 + $0xb0] sm:$0xf]  ;;  %v3962_v54 = vor.u32 %v3472_v33, %v2586_v32 }
  0x46   : > { %852 = vmatpush.bf16.msra.mxu0 %v2623_v8  ;;  %905 = vmatpush.bf16.msra.mxu3 %v2639_v9  ;;  %v3543_v37 = vld [vmem:[%s3879_s15 + $0x22c] sm:$0xf]  ;;  %v2588_v40 = vld [vmem:[%s3881_s16 + $0xc] sm:$0xf0]  ;;  %v2594_v46 = vld [vmem:[%s3881_s16 + $0x8] sm:$0xf]  ;;  %v2783_v49 = vor.u32 %v3519_v34, %v2780_v36 }
  0x47   : > { %870 = vmatpush.bf16.msra.mxu1 %v2719_v12  ;;  %v3497_v43 = vld [vmem:[%s3879_s15 + $0xb8] sm:$0xf0]  ;;  %v3474_v48 = vld [vmem:[%s3879_s15 + $0x4] sm:$0xf]  ;;  %v2879_v50 = vor.u32 %v3543_v37, %v2876_v38  ;;  %v2600_v51 = vld [vmem:[%s3879_s15 + $0xc] sm:$0xf0]  ;;  %v3967_v59 = vor.u32 %v3471_v35, %v2588_v40 }
  0x48   : > { %888 = vmatpush.bf16.msra.mxu2 %v2815_v13  ;;  %v3473_v47 = vld [vmem:[%s3881_s16 + $0x10] sm:$0xf0]  ;;  %v3516_v52 = vld [vmem:[%s3879_s15 + $0x154] sm:$0xf]  ;;  %v2691_v57 = vor.u32 %v3497_v43, %v2690_v42  ;;  %v2786_v58 = vld [vmem:[%s3879_s15 + $0x170] sm:$0xf]  ;;  %v2603_v0 = vor.u32 %v3474_v48, %v2600_v51 }
  0x49   : > { %v2768_v53 = vld [vmem:[%s3879_s15 + $0x15c] sm:$0xf0]  ;;  %v3540_v55 = vld [vmem:[%s3879_s15 + $0x214] sm:$0xf]  ;;  %v3969_v60 = vor.u32 %v3473_v47, %v2594_v46  ;;  %v3521_v61 = vld [vmem:[%s3879_s15 + $0x178] sm:$0xf0] }
  0x4a   : > { %853 = vmatpush.bf16.msra.mxu0 %v2611_v22  ;;  %906 = vmatpush.bf16.msra.mxu3 %v2627_v23  ;;  %v2864_v56 = vld [vmem:[%s3879_s15 + $0x21c] sm:$0xf0]  ;;  %v2678_v62 = vld [vmem:[%s3879_s15 + $0x98] sm:$0xf]  ;;  %v3494_v63 = vld [vmem:[%s3879_s15 + $0xa0] sm:$0xf0]  ;;  %v2771_v1 = vor.u32 %v3516_v52, %v2768_v53  ;;  %v2787_v5 = vor.u32 %v3521_v61, %v2786_v58 }
  0x4b   : > { %871 = vmatpush.bf16.msra.mxu1 %v2707_v27  ;;  %v2867_v2 = vor.u32 %v3540_v55, %v2864_v56  ;;  %v3513_v3 = vld [vmem:[%s3879_s15 + $0x13c] sm:$0xf]  ;;  %v2756_v4 = vld [vmem:[%s3879_s15 + $0x144] sm:$0xf0]  ;;  %v2679_v8 = vor.u32 %v3494_v63, %v2678_v62  ;;  %v2774_v9 = vld [vmem:[%s3879_s15 + $0x158] sm:$0xf] }
  0x4c   : > { %889 = vmatpush.bf16.msra.mxu2 %v2803_v28  ;;  %v3537_v6 = vld [vmem:[%s3879_s15 + $0x1fc] sm:$0xf]  ;;  %v2852_v7 = vld [vmem:[%s3879_s15 + $0x204] sm:$0xf0]  ;;  %v3518_v10 = vld [vmem:[%s3879_s15 + $0x160] sm:$0xf0]  ;;  %v2759_v13 = vor.u32 %v3513_v3, %v2756_v4 }
  0x4d   : > { %v2666_v11 = vld [vmem:[%s3879_s15 + $0x80] sm:$0xf]  ;;  %v3491_v12 = vld [vmem:[%s3879_s15 + $0x88] sm:$0xf0]  ;;  %v2855_v14 = vor.u32 %v3537_v6, %v2852_v7  ;;  %v3510_v15 = vld [vmem:[%s3879_s15 + $0x124] sm:$0xf]  ;;  %v2775_v18 = vor.u32 %v3518_v10, %v2774_v9 }
  0x4e   : > { %854 = vmatpush.bf16.msra.mxu0 %v2599_v39  ;;  %907 = vmatpush.bf16.msra.mxu3 %v2615_v41  ;;  %v2744_v16 = vld [vmem:[%s3879_s15 + $0x12c] sm:$0xf0]  ;;  %v3534_v17 = vld [vmem:[%s3879_s15 + $0x1e4] sm:$0xf]  ;;  %v2667_v21 = vor.u32 %v3491_v12, %v2666_v11  ;;  %v2762_v22 = vld [vmem:[%s3879_s15 + $0x140] sm:$0xf] }
  0x4f   : > { %872 = vmatpush.bf16.msra.mxu1 %v2695_v44  ;;  %v2840_v19 = vld [vmem:[%s3879_s15 + $0x1ec] sm:$0xf0]  ;;  %v338_v20 = vld [vmem:[%s3881_s16 + $0x18] sm:$0xff]  ;;  %v3515_v23 = vld [vmem:[%s3879_s15 + $0x148] sm:$0xf0]  ;;  %v2747_v27 = vor.u32 %v3510_v15, %v2744_v16  ;;  %p2884_p11 = scmp.ne.s32.totalorder %s3788_s20, 5 }
  0x50   : > { %890 = vmatpush.bf16.msra.mxu2 %v2791_v45  ;;  %v2654_v24 = vld [vmem:[%s3879_s15 + $0x68] sm:$0xf]  ;;  %v3488_v25 = vld [vmem:[%s3879_s15 + $0x70] sm:$0xf0]  ;;  %v2843_v28 = vor.u32 %v3534_v17, %v2840_v19  ;;  %v3507_v29 = vld [vmem:[%s3879_s15 + $0x10c] sm:$0xf]  ;;  %v448_v30 = vunpack.c.l.b16 %v338_v20  ;;  %v2763_v32 = vor.u32 %v3515_v23, %v2762_v22  ;;  %v449_v36 = vunpack.c.h.b16 %v338_v20 }
  0x51   : > { %855 = vmatmul.bf16.vlgmr.msra.gmra.mxu0 %v3962_v54  ;;  %v339_v26 = vld [vmem:[%s3881_s16 + $0x20] sm:$0xf]  ;;  %v2732_v31 = vld [vmem:[%s3879_s15 + $0x114] sm:$0xf0]  ;;  %v2655_v35 = vor.u32 %v3488_v25, %v2654_v24  ;;  %v3512_v39 = vld [vmem:[%s3879_s15 + $0x130] sm:$0xf0] }
  0x52   : > { %919 = vmatpush.bf16.msrb.mxu0 %v2783_v49  ;;  %873 = vmatmul.bf16.vlgmr.msra.gmra.mxu1 %v3967_v59  ;;  %v3531_v33 = vld [vmem:[%s3879_s15 + $0x1cc] sm:$0xf]  ;;  %v2828_v34 = vld [vmem:[%s3879_s15 + $0x1d4] sm:$0xf0]  ;;  %v450_v37 = vunpack.c.l.b16 %v339_v26  ;;  %v2750_v38 = vld [vmem:[%s3879_s15 + $0x128] sm:$0xf]  ;;  %v2735_v40 = vor.u32 %v3507_v29, %v2732_v31  ;;  %v4005_v45 = vpack.c.b16 %v448_v30, %v448_v30 }
  0x53   : > { %937 = vmatpush.bf16.msrb.mxu1 %v2879_v50  ;;  %891 = vmatmul.bf16.vlgmr.msra.gmra.mxu2 %v3969_v60  ;;  %v2831_v41 = vor.u32 %v3531_v33, %v2828_v34  ;;  %v3504_v42 = vld [vmem:[%s3879_s15 + $0xf4] sm:$0xf]  ;;  %v2642_v43 = vld [vmem:[%s3879_s15 + $0x50] sm:$0xf]  ;;  %v3485_v44 = vld [vmem:[%s3879_s15 + $0x58] sm:$0xf0]  ;;  %v2751_v47 = vor.u32 %v3512_v39, %v2750_v38  ;;  %v4010_v50 = vpack.c.b16 %v449_v36, %v449_v36 }
  0x54   : > { %955 = vmatpush.bf16.msrb.mxu2 %v2691_v57  ;;  %908 = vmatpush.bf16.msra.mxu3 %v2603_v0  ;;  %v2720_v46 = vld [vmem:[%s3879_s15 + $0xfc] sm:$0xf0]  ;;  %v3528_v48 = vld [vmem:[%s3879_s15 + $0x1b4] sm:$0xf]  ;;  %v4012_v51 = vpack.c.b16 %v450_v37, %v450_v37  ;;  %v2738_v52 = vld [vmem:[%s3879_s15 + $0x110] sm:$0xf]  ;;  %v2643_v55 = vor.u32 %v3485_v44, %v2642_v43 }
  0x55   : > { %v2816_v49 = vld [vmem:[%s3879_s15 + $0x1bc] sm:$0xf0]  ;;  %v3509_v53 = vld [vmem:[%s3879_s15 + $0x118] sm:$0xf0]  ;;  %v2723_v56 = vor.u32 %v3504_v42, %v2720_v46  ;;  %v2630_v61 = vld [vmem:[%s3879_s15 + $0x38] sm:$0xf] }
  0x56   : > { %920 = vmatpush.bf16.msrb.mxu0 %v2771_v1  ;;  %v2819_v57 = vor.u32 %v3528_v48, %v2816_v49  ;;  %v3501_v58 = vld [vmem:[%s3879_s15 + $0xdc] sm:$0xf]  ;;  %v3482_v62 = vld [vmem:[%s3879_s15 + $0x40] sm:$0xf0]  ;;  %v2708_v63 = vld [vmem:[%s3879_s15 + $0xe4] sm:$0xf0]  ;;  %v2739_v0 = vor.u32 %v3509_v53, %v2738_v52 }
  0x57   : > { %938 = vmatpush.bf16.msrb.mxu1 %v2867_v2  ;;  %909 = vmatmul.bf16.vlgmr.msra.gmra.mxu3 %v3962_v54  ;;  %v3525_v1 = vld [vmem:[%s3879_s15 + $0x19c] sm:$0xf]  ;;  %v2804_v2 = vld [vmem:[%s3879_s15 + $0x1a4] sm:$0xf0]  ;;  %v2726_v3 = vld [vmem:[%s3879_s15 + $0xf8] sm:$0xf]  ;;  %v2631_v6 = vor.u32 %v3482_v62, %v2630_v61  ;;  %v2711_v7 = vor.u32 %v3501_v58, %v2708_v63 }
  0x58   : > { %973 = vmatpush.bf16.msrb.mxu3 %v2787_v5  ;;  %956 = vmatpush.bf16.msrb.mxu2 %v2679_v8  ;;  %v3506_v4 = vld [vmem:[%s3879_s15 + $0x100] sm:$0xf0]  ;;  %v2807_v8 = vor.u32 %v3525_v1, %v2804_v2  ;;  %v2696_v9 = vld [vmem:[%s3879_s15 + $0xcc] sm:$0xf0]  ;;  %v2618_v10 = vld [vmem:[%s3879_s15 + $0x20] sm:$0xf] }
  0x59   : > { %v3498_v5 = vld [vmem:[%s3879_s15 + $0xc4] sm:$0xf]  ;;  %v3479_v11 = vld [vmem:[%s3879_s15 + $0x28] sm:$0xf0]  ;;  %v2727_v12 = vor.u32 %v3506_v4, %v2726_v3  ;;  %v2714_v15 = vld [vmem:[%s3879_s15 + $0xe0] sm:$0xf] }
  0x5a   : > { %921 = vmatpush.bf16.msrb.mxu0 %v2759_v13  ;;  %v3522_v13 = vld [vmem:[%s3879_s15 + $0x184] sm:$0xf]  ;;  %v3503_v16 = vld [vmem:[%s3879_s15 + $0xe8] sm:$0xf0]  ;;  %v2882_v17 = vld [vmem:[%s3879_s15 + $0x230] sm:$0xf]  ;;  %v2619_v19 = vor.u32 %v3479_v11, %v2618_v10  ;;  %v2699_v20 = vor.u32 %v3498_v5, %v2696_v9 }
  0x5b   : > { %939 = vmatpush.bf16.msrb.mxu1 %v2855_v14  ;;  %v2792_v14 = vld [vmem:[%s3879_s15 + $0x18c] sm:$0xf0]  ;;  %v2606_v22 = vld [vmem:[%s3879_s15 + $0x8] sm:$0xf]  ;;  %v3476_v23 = vld [vmem:[%s3879_s15 + $0x10] sm:$0xf0]  ;;  %v2715_v24 = vor.u32 %v3503_v16, %v2714_v15 }
  0x5c   : > { %974 = vmatpush.bf16.msrb.mxu3 %v2775_v18  ;;  %957 = vmatpush.bf16.msrb.mxu2 %v2667_v21  ;;  %v3545_v18 = vld [vmem:[%s3879_s15 + $0x238] sm:$0xf0]  ;;  %v2795_v21 = vor.u32 %v3522_v13, %v2792_v14  ;;  %v2702_v26 = vld [vmem:[%s3879_s15 + $0xc8] sm:$0xf]  ;;  %v2870_v29 = vld [vmem:[%s3879_s15 + $0x218] sm:$0xf] }
  0x5d   : > { %v2883_v25 = vor.u32 %v3545_v18, %v2882_v17  ;;  %v3542_v30 = vld [vmem:[%s3879_s15 + $0x220] sm:$0xf0]  ;;  %v2858_v33 = vld [vmem:[%s3879_s15 + $0x200] sm:$0xf]  ;;  %v3539_v34 = vld [vmem:[%s3879_s15 + $0x208] sm:$0xf0] }
  0x5e   : > { %922 = vmatpush.bf16.msrb.mxu0 %v2747_v27  ;;  %v3500_v27 = vld [vmem:[%s3879_s15 + $0xd0] sm:$0xf0]  ;;  %v2846_v36 = vld [vmem:[%s3879_s15 + $0x1e8] sm:$0xf]  ;;  %v2834_v39 = vld [vmem:[%s3879_s15 + $0x1d0] sm:$0xf] }
  0x5f   : > { %940 = vmatpush.bf16.msrb.mxu1 %v2843_v28  ;;  %v2607_v28 = vor.u32 %v3476_v23, %v2606_v22  ;;  %v2703_v31 = vor.u32 %v3500_v27, %v2702_v26  ;;  %v3536_v37 = vld [vmem:[%s3879_s15 + $0x1f0] sm:$0xf0]  ;;  %v2822_v42 = vld [vmem:[%s3879_s15 + $0x1b8] sm:$0xf]  ;;  %v3530_v43 = vld [vmem:[%s3879_s15 + $0x1c0] sm:$0xf0] }
  0x60   : > { %975 = vmatpush.bf16.msrb.mxu3 %v2763_v32  ;;  %958 = vmatpush.bf16.msrb.mxu2 %v2655_v35  ;;  %v2871_v32 = vor.u32 %v3542_v30, %v2870_v29  ;;  %v2859_v35 = vor.u32 %v3539_v34, %v2858_v33  ;;  %v2847_v38 = vor.u32 %v3536_v37, %v2846_v36  ;;  %v2810_v44 = vld [vmem:[%s3879_s15 + $0x1a0] sm:$0xf]  ;;  %v3527_v46 = vld [vmem:[%s3879_s15 + $0x1a8] sm:$0xf0]  ;;  %v3524_v48 = vld [vmem:[%s3879_s15 + $0x190] sm:$0xf0] }
  0x61   : > { %860 = vmatmul.bf16.gmra.mxu0 %v4005_v45  ;;  %v326_v17 = vld [vmem:[#allocation2] sm:$0xff]  ;;  %v332_v33 = vld [vmem:[#allocation2 + $0x38] sm:$0xff] }
  0x62   : > { %923 = vmatpush.bf16.msrb.mxu0 %v2735_v40  ;;  %878 = vmatmul.bf16.gmra.mxu1 %v4010_v50  ;;  %v3533_v40 = vld [vmem:[%s3879_s15 + $0x1d8] sm:$0xf0] }
  0x63   : > { %941 = vmatpush.bf16.msrb.mxu1 %v2831_v41  ;;  %896 = vmatmul.bf16.gmra.mxu2 %v4012_v51  ;;  %v2835_v41 = vor.u32 %v3533_v40, %v2834_v39 }
  0x64   : > { %976 = vmatpush.bf16.msrb.mxu3 %v2751_v47  ;;  %959 = vmatpush.bf16.msrb.mxu2 %v2643_v55  ;;  %v2798_v47 = vld [vmem:[%s3879_s15 + $0x188] sm:$0xf] }
  0x65   : > { %v2799_v49 = vor.u32 %v3524_v48, %v2798_v47 }
  0x66   : > { %924 = vmatpush.bf16.msrb.mxu0 %v2723_v56  ;;  %v325_v56 = vld [vmem:[#allocation2 + $0x30] sm:$0xff] }
  0x67   : > { %942 = vmatpush.bf16.msrb.mxu1 %v2819_v57  ;;  %914 = vmatmul.bf16.gmra.mxu3 %v4005_v45 }
  0x68   : > { %977 = vmatpush.bf16.msrb.mxu3 %v2739_v0  ;;  %960 = vmatpush.bf16.msrb.mxu2 %v2631_v6  ;;  %v328_v0 = vld [vmem:[#allocation2 + $0x10] sm:$0xff]  ;;  %v331_v6 = vld [vmem:[#allocation2 + $0x40] sm:$0xff] }
  0x6a   : > { %925 = vmatpush.bf16.msrb.mxu0 %v2711_v7 }
  0x6b   : > { %943 = vmatpush.bf16.msrb.mxu1 %v2807_v8 }
  0x6c   : > { %978 = vmatpush.bf16.msrb.mxu3 %v2727_v12  ;;  %961 = vmatpush.bf16.msrb.mxu2 %v2619_v19 }
  0x6e   : > { %926 = vmatpush.bf16.msrb.mxu0 %v2699_v20 }
  0x6f   : > { %944 = vmatpush.bf16.msrb.mxu1 %v2795_v21 }
  0x70   : > { %979 = vmatpush.bf16.msrb.mxu3 %v2715_v24  ;;  %962 = vmatpush.bf16.msrb.mxu2 %v2607_v28 }
  0x71   : > { %927 = vmatmul.bf16.vlgmr.msrb.gmra.mxu0 %v3967_v59 }
  0x72   : > { %991 = vmatpush.bf16.msra.mxu0 %v2883_v25  ;;  %945 = vmatmul.bf16.vlgmr.msrb.gmra.mxu1 %v3969_v60 }
  0x73   : > { %3690 = vmatpush.bf16.msra.mxu1 %v2883_v25  ;;  %963 = vmatmul.bf16.vlgmr.msrb.gmra.mxu2 %v3962_v54  ;;  %v2823_v54 = vor.u32 %v3530_v43, %v2822_v42  ;;  %v329_v25 = vld [vmem:[#allocation2 + $0x20] sm:$0xff]  ;;  %v327_v43 = vld [vmem:[#allocation2 + $0x18] sm:$0xff] }
  0x74   : > { %980 = vmatpush.bf16.msrb.mxu3 %v2703_v31 }
  0x76   : > { %992 = vmatpush.bf16.msra.mxu0 %v2871_v32 }
  0x77   : > { %3691 = vmatpush.bf16.msra.mxu1 %v2871_v32  ;;  %981 = vmatmul.bf16.vlgmr.msrb.gmra.mxu3 %v3967_v59  ;;  %v2811_v59 = vor.u32 %v3527_v46, %v2810_v44 }
  0x7a   : > { %993 = vmatpush.bf16.msra.mxu0 %v2859_v35 }
  0x7b   : > { %3692 = vmatpush.bf16.msra.mxu1 %v2859_v35 }
  0x7e   : > { %994 = vmatpush.bf16.msra.mxu0 %v2847_v38 }
  0x7f   : > { %3693 = vmatpush.bf16.msra.mxu1 %v2847_v38 }
  0x81   : > { %932 = vmatmul.bf16.gmra.mxu0 %v4010_v50 }
  0x82   : > { %995 = vmatpush.bf16.msra.mxu0 %v2835_v41  ;;  %950 = vmatmul.bf16.gmra.mxu1 %v4012_v51 }
  0x83   : > { %3694 = vmatpush.bf16.msra.mxu1 %v2835_v41  ;;  %968 = vmatmul.bf16.gmra.mxu2 %v4005_v45 }
  0x86   : > { %996 = vmatpush.bf16.msra.mxu0 %v2823_v54 }
  0x87   : > { %3695 = vmatpush.bf16.msra.mxu1 %v2823_v54  ;;  %986 = vmatmul.bf16.gmra.mxu3 %v4010_v50 }
  0x8a   : > { %997 = vmatpush.bf16.msra.mxu0 %v2811_v59 }
  0x8b   : > { %3696 = vmatpush.bf16.msra.mxu1 %v2811_v59  ;;  %v333_v59 = vld [vmem:[#allocation2 + $0x8] sm:$0xff] }
  0x8e   : > { %998 = vmatpush.bf16.msra.mxu0 %v2799_v49 }
  0x8f   : > { %3697 = vmatpush.bf16.msra.mxu1 %v2799_v49 }
  0x91   : > { %999 = vmatmul.bf16.vlgmr.msra.gmra.mxu0 %v3969_v60 }
  0x92   : > { %1004 = vmatmul.bf16.vlgmr.msra.gmra.mxu1 %v4012_v51 }
  0xce   : > { %v856_v52 = vpop.f32.mrf.mxu0 }
  0xcf   : > { %v874_v53 = vpop.f32.mrf.mxu1 }
  0xd0   : > { %v875_v55 = vadd.f32 %v874_v53, %v856_v52 }
  0xd6   : > { %v892_v57 = vpop.f32.mrf.mxu2  ;;  %v858_v45 = vpop.f32.mrf.mxu0 }
  0xd7   : > { %v893_v58 = vadd.f32 %v892_v57, %v875_v55  ;;  %v876_v61 = vpop.f32.mrf.mxu1 }
  0xd8   : > { %v877_v50 = vadd.f32 %v876_v61, %v858_v45 }
  0xd9   : > { %v1009_v62 = vadd.f32 %v893_v58, %v325_v56  ;;  %v330_v56 = vld [vmem:[#allocation2 + $0x28] sm:$0xff] }
  0xda   : > { %v910_v63 = vpop.f32.mrf.mxu3 }
  0xdb   : > { %1018 = vst [vmem:[#allocation2 + $0x30] sm:$0xff] %v1009_v62 }
  0xde   : > { %v894_v1 = vpop.f32.mrf.mxu2  ;;  %v861_v3 = vpop.f32.mrf.mxu0 }
  0xdf   : > { %v895_v2 = vadd.f32 %v894_v1, %v877_v50  ;;  %v879_v4 = vpop.f32.mrf.mxu1 }
  0xe0   : > { %v880_v51 = vadd.f32 %v879_v4, %v861_v3 }
  0xe1   : > { %v1012_v60 = vadd.f32 %v895_v2, %v328_v0 }
  0xe2   : > { %v912_v5 = vpop.f32.mrf.mxu3 }
  0xe3   : > { %1021 = vst [vmem:[#allocation2 + $0x10] sm:$0xff] %v1012_v60 }
  0xe6   : > { %v897_v7 = vpop.f32.mrf.mxu2  ;;  %v863_v9 = vpop.f32.mrf.mxu0 }
  0xe7   : > { %v898_v8 = vadd.f32 %v897_v7, %v880_v51  ;;  %v881_v10 = vpop.f32.mrf.mxu1 }
  0xe9   : > { %v1015_v11 = vadd.f32 %v898_v8, %v331_v6 }
  0xea   : > { %v915_v12 = vpop.f32.mrf.mxu3 }
  0xeb   : > { %1024 = vst [vmem:[#allocation2 + $0x40] sm:$0xff] %v1015_v11 }
  0xee   : > { %v899_v13 = vpop.f32.mrf.mxu2  ;;  %v928_v14 = vpop.f32.mrf.mxu0 }
  0xef   : > { %v929_v15 = vadd.f32 %v928_v14, %v910_v63  ;;  %v946_v16 = vpop.f32.mrf.mxu1 }
  0xf1   : > { %v947_v18 = vadd.f32 %v946_v16, %v929_v15 }
  0xf2   : > { %v917_v19 = vpop.f32.mrf.mxu3 }
  0xf3   : > { %v1010_v20 = vadd.f32 %v947_v18, %v326_v17 }
  0xf5   : > { %1019 = vst [vmem:[#allocation2] sm:$0xff] %v1010_v20 }
  0xf6   : > { %v930_v21 = vpop.f32.mrf.mxu0  ;;  %v964_v22 = vpop.f32.mrf.mxu2 }
  0xf7   : > { %v931_v23 = vadd.f32 %v930_v21, %v912_v5  ;;  %v948_v24 = vpop.f32.mrf.mxu1 }
  0xf9   : > { %v949_v26 = vadd.f32 %v948_v24, %v931_v23 }
  0xfa   : > { %v982_v27 = vpop.f32.mrf.mxu3 }
  0xfb   : > { %v1013_v28 = vadd.f32 %v949_v26, %v329_v25  ;;  %v983_v42 = vadd.f32 %v982_v27, %v964_v22 }
  0xfd   : > { %1022 = vst [vmem:[#allocation2 + $0x20] sm:$0xff] %v1013_v28 }
  0xfe   : > { %v933_v29 = vpop.f32.mrf.mxu0  ;;  %v966_v30 = vpop.f32.mrf.mxu2 }
  0xff   : > { %v934_v31 = vadd.f32 %v933_v29, %v915_v12  ;;  %v951_v32 = vpop.f32.mrf.mxu1 }
 0x101   : > { %v952_v34 = vadd.f32 %v951_v32, %v934_v31 }
 0x102   : > { %v984_v35 = vpop.f32.mrf.mxu3 }
 0x103   : > { %v1016_v36 = vadd.f32 %v952_v34, %v332_v33  ;;  %v985_v55 = vadd.f32 %v984_v35, %v966_v30 }
 0x105   : > { %1025 = vst [vmem:[#allocation2 + $0x38] sm:$0xff] %v1016_v36 }
 0x106   : > { %v935_v37 = vpop.f32.mrf.mxu0  ;;  %v969_v38 = vpop.f32.mrf.mxu2 }
 0x107   : > { %v953_v39 = vpop.f32.mrf.mxu1 }
 0x10a   : > { %v987_v40 = vpop.f32.mrf.mxu3 }
 0x10b   : > { %v988_v41 = vadd.f32 %v987_v40, %v969_v38 }
 0x10e   : > { %v1000_v54 = vpop.f32.mrf.mxu0  ;;  %v971_v44 = vpop.f32.mrf.mxu2 }
 0x10f   : > { %v1001_v46 = vadd.f32 %v1000_v54, %v983_v42  ;;  %v1005_v47 = vpop.f32.mrf.mxu1 }
 0x110   : > { %v1006_v48 = vadd.f32 %v1005_v47, %v988_v41 }
 0x111   : > { %v1011_v49 = vadd.f32 %v1001_v46, %v327_v43 }
 0x112   : > { %v989_v52 = vpop.f32.mrf.mxu3  ;;  %v1017_v53 = vadd.f32 %v1006_v48, %v333_v59 }
 0x113   : > { %1020 = vst [vmem:[#allocation2 + $0x18] sm:$0xff] %v1011_v49 }
 0x114   : > { %1026 = vst [vmem:[#allocation2 + $0x8] sm:$0xff] %v1017_v53 }
 0x116   : > { %v1002_v57 = vpop.f32.mrf.mxu0 }
 0x117   : > { %v1003_v58 = vadd.f32 %v1002_v57, %v985_v55  ;;  %v1007_v45 = vpop.f32.mrf.mxu1  ;;  %1030 = sbr.rel (%p2884_p11) target bundleno = 733 (0x2dd), region = 74 }
 0x119   : > { %v1014_v61 = vadd.f32 %v1003_v58, %v330_v56 }
 0x11b   : > { %1023 = vst [vmem:[#allocation2 + $0x28] sm:$0xff] %v1014_v61 }
 0x11c   : > { %v2972_v62 = vld [vmem:[%s5178_s2 + $0xa8] sm:$0xf]  ;;  %v3568_v63 = vld [vmem:[%s5178_s2 + $0xb0] sm:$0xf0]  ;;  %v2960_v5 = vld [vmem:[%s5178_s2 + $0x90] sm:$0xf] }
 0x11d   : > { %v3068_v50 = vld [vmem:[%s5178_s2 + $0x168] sm:$0xf]  ;;  %v2973_v0 = vor.u32 %v3568_v63, %v2972_v62  ;;  %v3592_v1 = vld [vmem:[%s5178_s2 + $0x170] sm:$0xf0]  ;;  %v3565_v51 = vld [vmem:[%s5178_s2 + $0x98] sm:$0xf0] }
 0x11e   : > { %v3164_v2 = vld [vmem:[%s5178_s2 + $0x228] sm:$0xf]  ;;  %v3616_v3 = vld [vmem:[%s5178_s2 + $0x230] sm:$0xf0]  ;;  %v3069_v4 = vor.u32 %v3592_v1, %v3068_v50  ;;  %v3056_v6 = vld [vmem:[%s5178_s2 + $0x150] sm:$0xf]  ;;  %v2961_v7 = vor.u32 %v3565_v51, %v2960_v5 }
 0x11f   : > { %v3165_v60 = vor.u32 %v3616_v3, %v3164_v2  ;;  %1570 = vmatpush.bf16.msra.mxu0 %v2973_v0  ;;  %v3589_v8 = vld [vmem:[%s5178_s2 + $0x158] sm:$0xf0]  ;;  %v3152_v9 = vld [vmem:[%s5178_s2 + $0x210] sm:$0xf]  ;;  %v2948_v13 = vld [vmem:[%s5178_s2 + $0x78] sm:$0xf] }
 0x120   : > { %v3613_v10 = vld [vmem:[%s5178_s2 + $0x218] sm:$0xf0]  ;;  %1588 = vmatpush.bf16.msra.mxu1 %v3069_v4  ;;  %v3057_v11 = vor.u32 %v3589_v8, %v3056_v6  ;;  %v3562_v14 = vld [vmem:[%s5178_s2 + $0x80] sm:$0xf0]  ;;  %v3044_v15 = vld [vmem:[%s5178_s2 + $0x138] sm:$0xf] }
 0x121   : > { %1606 = vmatpush.bf16.msra.mxu2 %v3165_v60  ;;  %v3153_v12 = vor.u32 %v3613_v10, %v3152_v9  ;;  %v3586_v16 = vld [vmem:[%s5178_s2 + $0x140] sm:$0xf0]  ;;  %v3140_v17 = vld [vmem:[%s5178_s2 + $0x1f8] sm:$0xf]  ;;  %v2949_v19 = vor.u32 %v3562_v14, %v2948_v13  ;;  %v2936_v22 = vld [vmem:[%s5178_s2 + $0x60] sm:$0xf] }
 0x122   : > { %v3610_v18 = vld [vmem:[%s5178_s2 + $0x200] sm:$0xf0]  ;;  %v3045_v20 = vor.u32 %v3586_v16, %v3044_v15  ;;  %v3559_v23 = vld [vmem:[%s5178_s2 + $0x68] sm:$0xf0]  ;;  %v3032_v24 = vld [vmem:[%s5178_s2 + $0x120] sm:$0xf] }
 0x123   : > { %1571 = vmatpush.bf16.msra.mxu0 %v2961_v7  ;;  %v3141_v21 = vor.u32 %v3610_v18, %v3140_v17  ;;  %v3583_v25 = vld [vmem:[%s5178_s2 + $0x128] sm:$0xf0]  ;;  %v3128_v26 = vld [vmem:[%s5178_s2 + $0x1e0] sm:$0xf]  ;;  %v2974_v29 = vld [vmem:[%s5178_s2 + $0xb4] sm:$0xf0]  ;;  %v2937_v30 = vor.u32 %v3559_v23, %v2936_v22 }
 0x124   : > { %1589 = vmatpush.bf16.msra.mxu1 %v3057_v11  ;;  %v3607_v27 = vld [vmem:[%s5178_s2 + $0x1e8] sm:$0xf0]  ;;  %v2924_v31 = vld [vmem:[%s5178_s2 + $0x48] sm:$0xf]  ;;  %v3556_v32 = vld [vmem:[%s5178_s2 + $0x50] sm:$0xf0]  ;;  %v3033_v34 = vor.u32 %v3583_v25, %v3032_v24 }
 0x125   : > { %1607 = vmatpush.bf16.msra.mxu2 %v3153_v12  ;;  %v3567_v28 = vld [vmem:[%s5178_s2 + $0xac] sm:$0xf]  ;;  %v3129_v35 = vor.u32 %v3607_v27, %v3128_v26  ;;  %v3020_v36 = vld [vmem:[%s5178_s2 + $0x108] sm:$0xf]  ;;  %v3580_v37 = vld [vmem:[%s5178_s2 + $0x110] sm:$0xf0]  ;;  %v2925_v44 = vor.u32 %v3556_v32, %v2924_v31 }
 0x126   : > { %v2977_v33 = vor.u32 %v3567_v28, %v2974_v29  ;;  %v3564_v38 = vld [vmem:[%s5178_s2 + $0x94] sm:$0xf]  ;;  %v3116_v39 = vld [vmem:[%s5178_s2 + $0x1c8] sm:$0xf]  ;;  %v2962_v41 = vld [vmem:[%s5178_s2 + $0x9c] sm:$0xf0]  ;;  %v3021_v48 = vor.u32 %v3580_v37, %v3020_v36 }
 0x127   : > { %1572 = vmatpush.bf16.msra.mxu0 %v2949_v19  ;;  %v3604_v40 = vld [vmem:[%s5178_s2 + $0x1d0] sm:$0xf0]  ;;  %v2912_v42 = vld [vmem:[%s5178_s2 + $0x30] sm:$0xf]  ;;  %v3553_v43 = vld [vmem:[%s5178_s2 + $0x38] sm:$0xf0]  ;;  %v2965_v54 = vor.u32 %v3564_v38, %v2962_v41 }
 0x128   : > { %1590 = vmatpush.bf16.msra.mxu1 %v3045_v20  ;;  %1624 = vmatpush.bf16.msra.mxu3 %v2977_v33  ;;  %v3008_v46 = vld [vmem:[%s5178_s2 + $0xf0] sm:$0xf]  ;;  %v3561_v59 = vld [vmem:[%s5178_s2 + $0x7c] sm:$0xf]  ;;  %v2950_v47 = vld [vmem:[%s5178_s2 + $0x84] sm:$0xf0]  ;;  %v3117_v49 = vor.u32 %v3604_v40, %v3116_v39  ;;  %v2913_v2 = vor.u32 %v3553_v43, %v2912_v42 }
 0x129   : > { %1608 = vmatpush.bf16.msra.mxu2 %v3141_v21  ;;  %v3577_v52 = vld [vmem:[%s5178_s2 + $0xf8] sm:$0xf0]  ;;  %v3104_v53 = vld [vmem:[%s5178_s2 + $0x1b0] sm:$0xf]  ;;  %v4196_v56 = vld [vmem:[%s5178_s2 + $0x18] sm:$0xf]  ;;  %v2953_v58 = vor.u32 %v3561_v59, %v2950_v47 }
 0x12a   : > { %v3601_v55 = vld [vmem:[%s5178_s2 + $0x1b8] sm:$0xf0]  ;;  %v4201_v57 = vld [vmem:[%s5178_s2 + $0x20] sm:$0xf0]  ;;  %v4206_v45 = vld [vmem:[%s5178_s2 + $0xd8] sm:$0xf]  ;;  %v3009_v3 = vor.u32 %v3577_v52, %v3008_v46 }
 0x12b   : > { %1573 = vmatpush.bf16.msra.mxu0 %v2937_v30  ;;  %v4211_v61 = vld [vmem:[%s5178_s2 + $0xe0] sm:$0xf0]  ;;  %v4216_v62 = vld [vmem:[%s5178_s2 + $0x198] sm:$0xf]  ;;  %v2938_v0 = vld [vmem:[%s5178_s2 + $0x6c] sm:$0xf0]  ;;  %v3105_v4 = vor.u32 %v3601_v55, %v3104_v53  ;;  %v2901_v6 = vor.u32 %v4201_v57, %v4196_v56 }
 0x12c   : > { %1591 = vmatpush.bf16.msra.mxu1 %v3033_v34  ;;  %1625 = vmatpush.bf16.msra.mxu3 %v2965_v54  ;;  %v4221_v63 = vld [vmem:[%s5178_s2 + $0x1a0] sm:$0xf0]  ;;  %v1031_v1 = vld [vmem:[#allocation2 + $0x30] sm:$0xff]  ;;  %v1033_v14 = vld [vmem:[#allocation2 + $0x18] sm:$0xff]  ;;  %v2997_v24 = vor.u32 %v4211_v61, %v4206_v45 }
 0x12d   : > { %1609 = vmatpush.bf16.msra.mxu2 %v3129_v35  ;;  %v3558_v50 = vld [vmem:[%s5178_s2 + $0x64] sm:$0xf]  ;;  %v1034_v60 = vld [vmem:[#allocation2 + $0x10] sm:$0xff]  ;;  %v1036_v15 = vld [vmem:[#allocation2 + $0x28] sm:$0xff]  ;;  %v3093_v25 = vor.u32 %v4221_v63, %v4216_v62 }
 0x12e   : > { %v1040_v5 = vld [vmem:[%s5180_s4] ss:$8 sm:$0x7]  ;;  %v2941_v7 = vor.u32 %v3558_v50, %v2938_v0  ;;  %v2885_v9 = vld [vmem:[%s5180_s4 + $0x1] ss:$8 sm:$0x7] }
 0x12f   : > { %1574 = vmatpush.bf16.msra.mxu0 %v2925_v44  ;;  %v1032_v51 = vld [vmem:[#allocation2] sm:$0xff]  ;;  %v4234_v8 = vperm.slane %v1040_v5, 0  ;;  %v4239_v11 = vperm.slane %v1040_v5, 1  ;;  %v4241_v12 = vperm.slane %v2885_v9, 0  ;;  %v4243_v13 = vperm.slane %v2885_v9, 1 }
 0x130   : > { %1592 = vmatpush.bf16.msra.mxu1 %v3021_v48  ;;  %v1035_v10 = vld [vmem:[#allocation2 + $0x20] sm:$0xff]  ;;  %1626 = vmatpush.bf16.msra.mxu3 %v2953_v58  ;;  %v4245_v16 = vperm.slane %v1040_v5, 2  ;;  %v4247_v17 = vperm.slane %v2885_v9, 2  ;;  %v3555_v23 = vld [vmem:[%s5178_s2 + $0x4c] sm:$0xf] }
 0x131   : > { %1610 = vmatpush.bf16.msra.mxu2 %v3117_v49  ;;  %v2888_v18 = vld [vmem:[%s5178_s2] sm:$0xf]  ;;  %v1048_v19 = vmul.f32 %v4234_v8, %v1031_v1  ;;  %v1051_v20 = vmul.f32 %v4234_v8, %v1034_v60  ;;  %v1049_v21 = vmul.f32 %v4239_v11, %v1032_v51  ;;  %v1052_v22 = vmul.f32 %v4239_v11, %v1035_v10  ;;  %v3547_v26 = vld [vmem:[%s5178_s2 + $0x8] sm:$0xf0]  ;;  %v2926_v30 = vld [vmem:[%s5178_s2 + $0x54] sm:$0xf0] }
 0x132   : > { %v2984_v27 = vld [vmem:[%s5178_s2 + $0xc0] sm:$0xf]  ;;  %v1050_v28 = vmul.f32 %v4245_v16, %v1033_v14  ;;  %v1053_v29 = vmul.f32 %v4245_v16, %v1036_v15  ;;  %v3571_v31 = vld [vmem:[%s5178_s2 + $0xc8] sm:$0xf0]  ;;  %v3070_v41 = vld [vmem:[%s5178_s2 + $0x174] sm:$0xf0]  ;;  %v2929_v42 = vor.u32 %v3555_v23, %v2926_v30  ;;  %v2889_v54 = vor.u32 %v3547_v26, %v2888_v18 }
 0x133   : > { %1575 = vmatpush.bf16.msra.mxu0 %v2913_v2  ;;  %v3080_v32 = vld [vmem:[%s5178_s2 + $0x180] sm:$0xf]  ;;  %v3595_v33 = vld [vmem:[%s5178_s2 + $0x188] sm:$0xf0]  ;;  %v1066_v34 = vadd.f32 %v4241_v12, %v1048_v19  ;;  %v1069_v35 = vadd.f32 %v4241_v12, %v1051_v20  ;;  %v1067_v36 = vadd.f32 %v4243_v13, %v1049_v21  ;;  %v1070_v37 = vadd.f32 %v4243_v13, %v1052_v22  ;;  %v3166_v59 = vld [vmem:[%s5178_s2 + $0x234] sm:$0xf0] }
 0x134   : > { %1593 = vmatpush.bf16.msra.mxu1 %v3009_v3  ;;  %1627 = vmatpush.bf16.msra.mxu3 %v2941_v7  ;;  %v1068_v38 = vadd.f32 %v4247_v17, %v1050_v28  ;;  %v1071_v39 = vadd.f32 %v4247_v17, %v1053_v29  ;;  %v3591_v40 = vld [vmem:[%s5178_s2 + $0x16c] sm:$0xf]  ;;  %v3552_v47 = vld [vmem:[%s5178_s2 + $0x34] sm:$0xf]  ;;  %v2914_v55 = vld [vmem:[%s5178_s2 + $0x3c] sm:$0xf0]  ;;  %v2985_v56 = vor.u32 %v3571_v31, %v2984_v27 }
 0x135   : > { %1611 = vmatpush.bf16.msra.mxu2 %v3105_v4  ;;  %v3615_v43 = vld [vmem:[%s5178_s2 + $0x22c] sm:$0xf]  ;;  %v1075_v44 = vmax.f32 %v1066_v34, 0.0  ;;  %v1078_v46 = vmax.f32 %v1069_v35, 0.0  ;;  %v1076_v48 = vmax.f32 %v1067_v36, 0.0  ;;  %v1079_v49 = vmax.f32 %v1070_v37, 0.0 }
 0x136   : > { %v1077_v52 = vmax.f32 %v1068_v38, 0.0  ;;  %v1080_v53 = vmax.f32 %v1071_v39, 0.0  ;;  %v3081_v57 = vor.u32 %v3595_v33, %v3080_v32  ;;  %v3073_v58 = vor.u32 %v3591_v40, %v3070_v41  ;;  %v3588_v61 = vld [vmem:[%s5178_s2 + $0x154] sm:$0xf]  ;;  %v3058_v62 = vld [vmem:[%s5178_s2 + $0x15c] sm:$0xf0] }
 0x137   : > { %1576 = vmatpush.bf16.msra.mxu0 %v2901_v6  ;;  %v3169_v45 = vor.u32 %v3615_v43, %v3166_v59  ;;  %v4313_v63 = vpack.c.bf16 %v1078_v46, %v1075_v44  ;;  %v2917_v50 = vor.u32 %v3552_v47, %v2914_v55  ;;  %v3612_v0 = vld [vmem:[%s5178_s2 + $0x214] sm:$0xf]  ;;  %v3154_v1 = vld [vmem:[%s5178_s2 + $0x21c] sm:$0xf0]  ;;  %v4321_v3 = vpack.c.bf16 %v1079_v49, %v1076_v48  ;;  %v3549_v60 = vld [vmem:[%s5178_s2 + $0x1c] sm:$0xf] }
 0x138   : > { %1594 = vmatpush.bf16.msra.mxu1 %v2997_v24  ;;  %1628 = vmatpush.bf16.msra.mxu3 %v2929_v42  ;;  %v1037_v2 = vld [vmem:[#allocation2 + $0x40] sm:$0xff]  ;;  %v4323_v4 = vpack.c.bf16 %v1080_v53, %v1077_v52  ;;  %v2902_v5 = vld [vmem:[%s5178_s2 + $0x24] sm:$0xf0]  ;;  %v1038_v51 = vld [vmem:[#allocation2 + $0x38] sm:$0xff]  ;;  %v3061_v10 = vor.u32 %v3588_v61, %v3058_v62  ;;  %v3157_v14 = vor.u32 %v3612_v0, %v3154_v1 }
 0x139   : > { %1612 = vmatpush.bf16.msra.mxu2 %v3093_v25  ;;  %v1039_v6 = vld [vmem:[#allocation2 + $0x8] sm:$0xff]  ;;  %v2980_v7 = vld [vmem:[%s5178_s2 + $0xb0] sm:$0xf]  ;;  %v3569_v9 = vld [vmem:[%s5178_s2 + $0xb8] sm:$0xf0]  ;;  %v2905_v20 = vor.u32 %v3549_v60, %v2902_v5  ;;  %v1054_v24 = vmul.f32 %v4234_v8, %v1037_v2  ;;  %v1055_v26 = vmul.f32 %v4239_v11, %v1038_v51 }
 0x13a   : > { %v3585_v15 = vld [vmem:[%s5178_s2 + $0x13c] sm:$0xf]  ;;  %v3046_v18 = vld [vmem:[%s5178_s2 + $0x144] sm:$0xf0]  ;;  %v2981_v19 = vor.u32 %v3569_v9, %v2980_v7  ;;  %v3546_v23 = vld [vmem:[%s5178_s2 + $0x4] sm:$0xf]  ;;  %v1056_v27 = vmul.f32 %v4245_v16, %v1039_v6 }
 0x13b   : > { %1577 = vmatpush.bf16.msra.mxu0 %v2889_v54  ;;  %v3609_v21 = vld [vmem:[%s5178_s2 + $0x1fc] sm:$0xf]  ;;  %v3142_v22 = vld [vmem:[%s5178_s2 + $0x204] sm:$0xf0]  ;;  %v2890_v25 = vld [vmem:[%s5178_s2 + $0xc] sm:$0xf0]  ;;  %v3049_v16 = vor.u32 %v3585_v15, %v3046_v18  ;;  %v1072_v37 = vadd.f32 %v4241_v12, %v1054_v24  ;;  %v1073_v40 = vadd.f32 %v4243_v13, %v1055_v26 }
 0x13c   : > { %1595 = vmatpush.bf16.msra.mxu1 %v2985_v56  ;;  %1629 = vmatpush.bf16.msra.mxu3 %v2917_v50  ;;  %v2968_v28 = vld [vmem:[%s5178_s2 + $0x98] sm:$0xf]  ;;  %v3566_v8 = vld [vmem:[%s5178_s2 + $0xa0] sm:$0xf0]  ;;  %v3076_v29 = vld [vmem:[%s5178_s2 + $0x170] sm:$0xf]  ;;  %v3145_v31 = vor.u32 %v3609_v21, %v3142_v22  ;;  %v2893_v35 = vor.u32 %v3546_v23, %v2890_v25  ;;  %v1074_v41 = vadd.f32 %v4247_v17, %v1056_v27 }
 0x13d   : > { %1613 = vmatpush.bf16.msra.mxu2 %v3081_v57  ;;  %v3593_v30 = vld [vmem:[%s5178_s2 + $0x178] sm:$0xf0]  ;;  %v2969_v11 = vor.u32 %v3566_v8, %v2968_v28  ;;  %v3582_v32 = vld [vmem:[%s5178_s2 + $0x124] sm:$0xf]  ;;  %v3034_v33 = vld [vmem:[%s5178_s2 + $0x12c] sm:$0xf0] }
 0x13e   : > { %1578 = vmatmul.bf16.vlgmr.msra.gmra.mxu0 %v4313_v63  ;;  %v3606_v34 = vld [vmem:[%s5178_s2 + $0x1e4] sm:$0xf]  ;;  %v3130_v36 = vld [vmem:[%s5178_s2 + $0x1ec] sm:$0xf0]  ;;  %v2956_v38 = vld [vmem:[%s5178_s2 + $0x80] sm:$0xf]  ;;  %v3077_v42 = vor.u32 %v3593_v30, %v3076_v29  ;;  %v3037_v13 = vor.u32 %v3582_v32, %v3034_v33 }
 0x13f   : > { %1642 = vmatpush.bf16.msrb.mxu0 %v3073_v58  ;;  %1596 = vmatmul.bf16.vlgmr.msra.gmra.mxu1 %v4321_v3  ;;  %v3563_v39 = vld [vmem:[%s5178_s2 + $0x88] sm:$0xf0]  ;;  %v3064_v12 = vld [vmem:[%s5178_s2 + $0x158] sm:$0xf]  ;;  %v3590_v54 = vld [vmem:[%s5178_s2 + $0x160] sm:$0xf0]  ;;  %v3133_v46 = vor.u32 %v3606_v34, %v3130_v36 }
 0x140   : > { %1660 = vmatpush.bf16.msrb.mxu1 %v3169_v45  ;;  %1614 = vmatmul.bf16.vlgmr.msra.gmra.mxu2 %v4323_v4  ;;  %v3579_v43 = vld [vmem:[%s5178_s2 + $0x10c] sm:$0xf]  ;;  %v2957_v44 = vor.u32 %v3563_v39, %v2956_v38  ;;  %v3022_v17 = vld [vmem:[%s5178_s2 + $0x114] sm:$0xf0]  ;;  %v2944_v59 = vld [vmem:[%s5178_s2 + $0x68] sm:$0xf]  ;;  %v3065_v56 = vor.u32 %v3590_v54, %v3064_v12 }
 0x141   : > { %1678 = vmatpush.bf16.msrb.mxu2 %v2981_v19  ;;  %1630 = vmatpush.bf16.msra.mxu3 %v2905_v20  ;;  %v3560_v47 = vld [vmem:[%s5178_s2 + $0x70] sm:$0xf0]  ;;  %v1081_v48 = vmax.f32 %v1072_v37, 0.0  ;;  %v3603_v49 = vld [vmem:[%s5178_s2 + $0x1cc] sm:$0xf]  ;;  %v1082_v53 = vmax.f32 %v1073_v40, 0.0  ;;  %v3025_v61 = vor.u32 %v3579_v43, %v3022_v17 }
 0x142   : > { %v3118_v52 = vld [vmem:[%s5178_s2 + $0x1d4] sm:$0xf0]  ;;  %v1083_v55 = vmax.f32 %v1074_v41, 0.0  ;;  %v3576_v57 = vld [vmem:[%s5178_s2 + $0xf4] sm:$0xf]  ;;  %v2945_v45 = vor.u32 %v3560_v47, %v2944_v59 }
 0x143   : > { %1643 = vmatpush.bf16.msrb.mxu0 %v3061_v10  ;;  %v3052_v58 = vld [vmem:[%s5178_s2 + $0x140] sm:$0xf]  ;;  %v3121_v62 = vor.u32 %v3603_v49, %v3118_v52  ;;  %v3587_v50 = vld [vmem:[%s5178_s2 + $0x148] sm:$0xf0]  ;;  %v2932_v0 = vld [vmem:[%s5178_s2 + $0x50] sm:$0xf]  ;;  %v4433_v2 = vpack.c.bf16 %v1081_v48, %v1081_v48  ;;  %v4445_v6 = vpack.c.bf16 %v1082_v53, %v1082_v53 }
 0x144   : > { %1661 = vmatpush.bf16.msrb.mxu1 %v3157_v14  ;;  %v3557_v1 = vld [vmem:[%s5178_s2 + $0x58] sm:$0xf0]  ;;  %v3010_v60 = vld [vmem:[%s5178_s2 + $0xfc] sm:$0xf0]  ;;  %v3600_v5 = vld [vmem:[%s5178_s2 + $0x1b4] sm:$0xf]  ;;  %v4447_v7 = vpack.c.bf16 %v1083_v55, %v1083_v55  ;;  %v3053_v10 = vor.u32 %v3587_v50, %v3052_v58 }
 0x145   : > { %1679 = vmatpush.bf16.msrb.mxu2 %v2969_v11  ;;  %1631 = vmatpush.bf16.msra.mxu3 %v2893_v35  ;;  %v3106_v51 = vld [vmem:[%s5178_s2 + $0x1bc] sm:$0xf0]  ;;  %v3573_v9 = vld [vmem:[%s5178_s2 + $0xdc] sm:$0xf]  ;;  %v3040_v14 = vld [vmem:[%s5178_s2 + $0x128] sm:$0xf]  ;;  %v2933_v15 = vor.u32 %v3557_v1, %v2932_v0  ;;  %v3013_v18 = vor.u32 %v3576_v57, %v3010_v60 }
 0x146   : > { %v3109_v19 = vor.u32 %v3600_v5, %v3106_v51  ;;  %v3584_v20 = vld [vmem:[%s5178_s2 + $0x130] sm:$0xf0]  ;;  %v2920_v21 = vld [vmem:[%s5178_s2 + $0x38] sm:$0xf]  ;;  %v3554_v22 = vld [vmem:[%s5178_s2 + $0x40] sm:$0xf0] }
 0x147   : > { %1644 = vmatpush.bf16.msrb.mxu0 %v3049_v16  ;;  %v2998_v23 = vld [vmem:[%s5178_s2 + $0xe4] sm:$0xf0]  ;;  %v3597_v24 = vld [vmem:[%s5178_s2 + $0x19c] sm:$0xf]  ;;  %v3570_v26 = vld [vmem:[%s5178_s2 + $0xc4] sm:$0xf]  ;;  %v3041_v27 = vor.u32 %v3584_v20, %v3040_v14  ;;  %v2921_v8 = vor.u32 %v3554_v22, %v2920_v21 }
 0x148   : > { %1662 = vmatpush.bf16.msrb.mxu1 %v3145_v31  ;;  %1632 = vmatmul.bf16.vlgmr.msra.gmra.mxu3 %v4313_v63  ;;  %v3094_v25 = vld [vmem:[%s5178_s2 + $0x1a4] sm:$0xf0]  ;;  %v3028_v28 = vld [vmem:[%s5178_s2 + $0x110] sm:$0xf]  ;;  %v3001_v29 = vor.u32 %v3573_v9, %v2998_v23  ;;  %v3581_v11 = vld [vmem:[%s5178_s2 + $0x118] sm:$0xf0] }
 0x149   : > { %1696 = vmatpush.bf16.msrb.mxu3 %v3077_v42  ;;  %1680 = vmatpush.bf16.msrb.mxu2 %v2957_v44  ;;  %v3097_v30 = vor.u32 %v3597_v24, %v3094_v25  ;;  %v2908_v16 = vld [vmem:[%s5178_s2 + $0x20] sm:$0xf]  ;;  %v3551_v31 = vld [vmem:[%s5178_s2 + $0x28] sm:$0xf0]  ;;  %v2986_v32 = vld [vmem:[%s5178_s2 + $0xcc] sm:$0xf0]  ;;  %v3029_v37 = vor.u32 %v3581_v11, %v3028_v28 }
 0x14a   : > { %v3594_v33 = vld [vmem:[%s5178_s2 + $0x184] sm:$0xf]  ;;  %v3082_v34 = vld [vmem:[%s5178_s2 + $0x18c] sm:$0xf0]  ;;  %v3617_v36 = vld [vmem:[%s5178_s2 + $0x238] sm:$0xf0]  ;;  %v2909_v39 = vor.u32 %v3551_v31, %v2908_v16  ;;  %v2989_v40 = vor.u32 %v3570_v26, %v2986_v32 }
 0x14b   : > { %1645 = vmatpush.bf16.msrb.mxu0 %v3037_v13  ;;  %v3172_v35 = vld [vmem:[%s5178_s2 + $0x230] sm:$0xf]  ;;  %v3016_v38 = vld [vmem:[%s5178_s2 + $0xf8] sm:$0xf]  ;;  %v3085_v41 = vor.u32 %v3594_v33, %v3082_v34  ;;  %v3578_v42 = vld [vmem:[%s5178_s2 + $0x100] sm:$0xf0] }
 0x14c   : > { %1663 = vmatpush.bf16.msrb.mxu1 %v3133_v46  ;;  %v2896_v43 = vld [vmem:[%s5178_s2 + $0x8] sm:$0xf]  ;;  %v3548_v12 = vld [vmem:[%s5178_s2 + $0x10] sm:$0xf0]  ;;  %v3173_v54 = vor.u32 %v3617_v36, %v3172_v35  ;;  %v3160_v44 = vld [vmem:[%s5178_s2 + $0x218] sm:$0xf]  ;;  %v3017_v46 = vor.u32 %v3578_v42, %v3016_v38 }
 0x14d   : > { %1697 = vmatpush.bf16.msrb.mxu3 %v3065_v56  ;;  %1681 = vmatpush.bf16.msrb.mxu2 %v2945_v45  ;;  %v3614_v13 = vld [vmem:[%s5178_s2 + $0x220] sm:$0xf0]  ;;  %v2897_v17 = vor.u32 %v3548_v12, %v2896_v43  ;;  %v3004_v59 = vld [vmem:[%s5178_s2 + $0xe0] sm:$0xf]  ;;  %v3575_v47 = vld [vmem:[%s5178_s2 + $0xe8] sm:$0xf0] }
 0x14e   : > { %1583 = vmatmul.bf16.gmra.mxu0 %v4433_v2  ;;  %v3161_v48 = vor.u32 %v3614_v13, %v3160_v44  ;;  %v3148_v49 = vld [vmem:[%s5178_s2 + $0x200] sm:$0xf]  ;;  %v3611_v52 = vld [vmem:[%s5178_s2 + $0x208] sm:$0xf0]  ;;  %v3005_v53 = vor.u32 %v3575_v47, %v3004_v59  ;;  %v2992_v55 = vld [vmem:[%s5178_s2 + $0xc8] sm:$0xf] }
 0x14f   : > { %1646 = vmatpush.bf16.msrb.mxu0 %v3025_v61  ;;  %1601 = vmatmul.bf16.gmra.mxu1 %v4445_v6  ;;  %v3572_v56 = vld [vmem:[%s5178_s2 + $0xd0] sm:$0xf0]  ;;  %v3149_v57 = vor.u32 %v3611_v52, %v3148_v49  ;;  %v3136_v58 = vld [vmem:[%s5178_s2 + $0x1e8] sm:$0xf]  ;;  %v3124_v50 = vld [vmem:[%s5178_s2 + $0x1d0] sm:$0xf] }
 0x150   : > { %1664 = vmatpush.bf16.msrb.mxu1 %v3121_v62  ;;  %1619 = vmatmul.bf16.gmra.mxu2 %v4447_v7  ;;  %v3608_v45 = vld [vmem:[%s5178_s2 + $0x1f0] sm:$0xf0]  ;;  %v2993_v61 = vor.u32 %v3572_v56, %v2992_v55  ;;  %v3605_v0 = vld [vmem:[%s5178_s2 + $0x1d8] sm:$0xf0]  ;;  %v3112_v60 = vld [vmem:[%s5178_s2 + $0x1b8] sm:$0xf] }
 0x151   : > { %1698 = vmatpush.bf16.msrb.mxu3 %v3053_v10  ;;  %1682 = vmatpush.bf16.msrb.mxu2 %v2933_v15  ;;  %v3137_v62 = vor.u32 %v3608_v45, %v3136_v58  ;;  %v3125_v1 = vor.u32 %v3605_v0, %v3124_v50  ;;  %v3100_v51 = vld [vmem:[%s5178_s2 + $0x1a0] sm:$0xf]  ;;  %v3599_v9 = vld [vmem:[%s5178_s2 + $0x1a8] sm:$0xf0]  ;;  %v3262_v10 = vld [vmem:[%s5179_s3 + $0xa8] sm:$0xf] }
 0x152   : > { %v3101_v14 = vor.u32 %v3599_v9, %v3100_v51  ;;  %v3088_v20 = vld [vmem:[%s5178_s2 + $0x188] sm:$0xf]  ;;  %v3596_v21 = vld [vmem:[%s5178_s2 + $0x190] sm:$0xf0]  ;;  %v3639_v22 = vld [vmem:[%s5179_s3 + $0xac] sm:$0xf] }
 0x153   : > { %1647 = vmatpush.bf16.msrb.mxu0 %v3013_v18  ;;  %v3250_v18 = vld [vmem:[%s5179_s3 + $0x90] sm:$0xf]  ;;  %v3264_v23 = vld [vmem:[%s5179_s3 + $0xb4] sm:$0xf0]  ;;  %v3089_v25 = vor.u32 %v3596_v21, %v3088_v20  ;;  %v3631_v16 = vld [vmem:[%s5179_s3 + $0x68] sm:$0xf0] }
 0x154   : > { %1665 = vmatpush.bf16.msrb.mxu1 %v3109_v19  ;;  %v3637_v19 = vld [vmem:[%s5179_s3 + $0x98] sm:$0xf0]  ;;  %v3267_v26 = vor.u32 %v3639_v22, %v3264_v23  ;;  %v3630_v31 = vld [vmem:[%s5179_s3 + $0x64] sm:$0xf]  ;;  %v3228_v33 = vld [vmem:[%s5179_s3 + $0x6c] sm:$0xf0] }
 0x155   : > { %1699 = vmatpush.bf16.msrb.mxu3 %v3041_v27  ;;  %1683 = vmatpush.bf16.msrb.mxu2 %v2921_v8  ;;  %v3251_v24 = vor.u32 %v3637_v19, %v3250_v18  ;;  %v3636_v27 = vld [vmem:[%s5179_s3 + $0x94] sm:$0xf]  ;;  %v3238_v8 = vld [vmem:[%s5179_s3 + $0x78] sm:$0xf]  ;;  %v3231_v34 = vor.u32 %v3630_v31, %v3228_v33  ;;  %v3214_v35 = vld [vmem:[%s5179_s3 + $0x48] sm:$0xf] }
 0x156   : > { %v3628_v36 = vld [vmem:[%s5179_s3 + $0x50] sm:$0xf0]  ;;  %v3627_v38 = vld [vmem:[%s5179_s3 + $0x4c] sm:$0xf]  ;;  %v3625_v42 = vld [vmem:[%s5179_s3 + $0x38] sm:$0xf0] }
 0x157   : > { %1648 = vmatpush.bf16.msrb.mxu0 %v3001_v29  ;;  %v3634_v29 = vld [vmem:[%s5179_s3 + $0x80] sm:$0xf0]  ;;  %v3624_v43 = vld [vmem:[%s5179_s3 + $0x34] sm:$0xf]  ;;  %v3190_v13 = vld [vmem:[%s5179_s3 + $0x18] sm:$0xf] }
 0x158   : > { %1666 = vmatpush.bf16.msrb.mxu1 %v3097_v30  ;;  %1637 = vmatmul.bf16.gmra.mxu3 %v4433_v2  ;;  %v3633_v30 = vld [vmem:[%s5179_s3 + $0x7c] sm:$0xf]  ;;  %v3239_v11 = vor.u32 %v3634_v29, %v3238_v8  ;;  %v3192_v47 = vld [vmem:[%s5179_s3 + $0x24] sm:$0xf0]  ;;  %v3178_v49 = vld [vmem:[%s5179_s3] sm:$0xf] }
 0x159   : > { %1700 = vmatpush.bf16.msrb.mxu3 %v3029_v37  ;;  %1684 = vmatpush.bf16.msrb.mxu2 %v2909_v39  ;;  %v3215_v37 = vor.u32 %v3628_v36, %v3214_v35  ;;  %v3216_v39 = vld [vmem:[%s5179_s3 + $0x54] sm:$0xf0]  ;;  %v3619_v52 = vld [vmem:[%s5179_s3 + $0x8] sm:$0xf0]  ;;  %v3664_v56 = vld [vmem:[%s5179_s3 + $0x170] sm:$0xf0] }
 0x15a   : > { %v3179_v55 = vor.u32 %v3619_v52, %v3178_v49  ;;  %v3180_v58 = vld [vmem:[%s5179_s3 + $0xc] sm:$0xf0]  ;;  %v3661_v50 = vld [vmem:[%s5179_s3 + $0x158] sm:$0xf0]  ;;  %v3663_v0 = vld [vmem:[%s5179_s3 + $0x16c] sm:$0xf] }
 0x15b   : > { %1649 = vmatpush.bf16.msrb.mxu0 %v2989_v40  ;;  %v3219_v40 = vor.u32 %v3627_v38, %v3216_v39  ;;  %v3348_v18 = vld [vmem:[%s5179_s3 + $0x15c] sm:$0xf0]  ;;  %v3354_v19 = vld [vmem:[%s5179_s3 + $0x158] sm:$0xf]  ;;  %v3662_v20 = vld [vmem:[%s5179_s3 + $0x160] sm:$0xf0] }
 0x15c   : > { %1667 = vmatpush.bf16.msrb.mxu1 %v3085_v41  ;;  %v3202_v41 = vld [vmem:[%s5179_s3 + $0x30] sm:$0xf]  ;;  %v4724_v22 = vor.u32 %v3662_v20, %v3354_v19  ;;  %v3342_v8 = vld [vmem:[%s5179_s3 + $0x140] sm:$0xf]  ;;  %v3659_v29 = vld [vmem:[%s5179_s3 + $0x148] sm:$0xf0] }
 0x15d   : > { %1701 = vmatpush.bf16.msrb.mxu3 %v3017_v46  ;;  %1685 = vmatpush.bf16.msrb.mxu2 %v2897_v17  ;;  %v3203_v12 = vor.u32 %v3625_v42, %v3202_v41  ;;  %v3622_v46 = vld [vmem:[%s5179_s3 + $0x20] sm:$0xf0]  ;;  %v3621_v17 = vld [vmem:[%s5179_s3 + $0x1c] sm:$0xf]  ;;  %v3330_v33 = vld [vmem:[%s5179_s3 + $0x128] sm:$0xf] }
 0x15e   : > { %1650 = vmatmul.bf16.vlgmr.msrb.gmra.mxu0 %v4321_v3  ;;  %v3191_v59 = vor.u32 %v3622_v46, %v3190_v13  ;;  %v3656_v36 = vld [vmem:[%s5179_s3 + $0x130] sm:$0xf0]  ;;  %v4777_v39 = vld [vmem:[%s5180_s4 + $0x3] ss:$8 sm:$0x7] }
 0x15f   : > { %1714 = vmatpush.bf16.msra.mxu0 %v3173_v54  ;;  %1668 = vmatmul.bf16.vlgmr.msrb.gmra.mxu1 %v4323_v4  ;;  %v3204_v54 = vld [vmem:[%s5179_s3 + $0x3c] sm:$0xf0]  ;;  %v3312_v46 = vld [vmem:[%s5179_s3 + $0x114] sm:$0xf0]  ;;  %v4804_v52 = vperm.slane %v4777_v39, 0 }
 0x160   : > { %1686 = vmatmul.bf16.vlgmr.msrb.gmra.mxu2 %v4313_v63  ;;  %v3602_v63 = vld [vmem:[%s5178_s2 + $0x1c0] sm:$0xf0]  ;;  %v3207_v44 = vor.u32 %v3624_v43, %v3204_v54  ;;  %v3298_v43 = vld [vmem:[%s5179_s3 + $0xf0] sm:$0xf]  ;;  %v3651_v54 = vld [vmem:[%s5179_s3 + $0x10c] sm:$0xf] }
 0x161   : > { %1702 = vmatpush.bf16.msrb.mxu3 %v3005_v53  ;;  %v3113_v5 = vor.u32 %v3602_v63, %v3112_v60  ;;  %v3358_v53 = vld [vmem:[%s5179_s3 + $0x168] sm:$0xf]  ;;  %v3360_v60 = vld [vmem:[%s5179_s3 + $0x174] sm:$0xf0]  ;;  %v3366_v63 = vld [vmem:[%s5179_s3 + $0x170] sm:$0xf] }
 0x162   : > { %v3359_v45 = vor.u32 %v3664_v56, %v3358_v53  ;;  %v3363_v51 = vor.u32 %v3663_v0, %v3360_v60  ;;  %v3286_v53 = vld [vmem:[%s5179_s3 + $0xd8] sm:$0xf]  ;;  %v3648_v56 = vld [vmem:[%s5179_s3 + $0xf4] sm:$0xf]  ;;  %v3294_v19 = vld [vmem:[%s5179_s3 + $0xe0] sm:$0xf] }
 0x163   : > { %1715 = vmatpush.bf16.msra.mxu0 %v3161_v48  ;;  %v3195_v48 = vor.u32 %v3621_v17, %v3192_v47  ;;  %v3318_v17 = vld [vmem:[%s5179_s3 + $0x110] sm:$0xf]  ;;  %v3315_v47 = vor.u32 %v3651_v54, %v3312_v46  ;;  %v3647_v20 = vld [vmem:[%s5179_s3 + $0xe8] sm:$0xf0]  ;;  %v3444_v46 = vld [vmem:[%s5179_s3 + $0x21c] sm:$0xf0] }
 0x164   : > { %2281 = vmatpush.bf16.msra.mxu2 %v3359_v45  ;;  %v3306_v45 = vld [vmem:[%s5179_s3 + $0xf8] sm:$0xf] }
 0x165   : > { %1703 = vmatpush.bf16.msrb.mxu3 %v2993_v61 }
 0x167   : > { %1716 = vmatpush.bf16.msra.mxu0 %v3149_v57  ;;  %v3618_v57 = vld [vmem:[%s5179_s3 + $0x4] sm:$0xf] }
 0x168   : > { %1704 = vmatmul.bf16.vlgmr.msrb.gmra.mxu3 %v4321_v3  ;;  %v3640_v3 = vld [vmem:[%s5179_s3 + $0xb0] sm:$0xf0]  ;;  %v3183_v61 = vor.u32 %v3618_v57, %v3180_v58  ;;  %v3300_v58 = vld [vmem:[%s5179_s3 + $0xfc] sm:$0xf0] }
 0x169   : > { %v3263_v15 = vor.u32 %v3640_v3, %v3262_v10  ;;  %v3334_v10 = vld [vmem:[%s5179_s3 + $0x138] sm:$0xf]  ;;  %v3658_v3 = vld [vmem:[%s5179_s3 + $0x140] sm:$0xf0] }
 0x16b   : > { %1717 = vmatpush.bf16.msra.mxu0 %v3137_v62  ;;  %2263 = vmatpush.bf16.msra.mxu1 %v3263_v15  ;;  %v3346_v62 = vld [vmem:[%s5179_s3 + $0x150] sm:$0xf]  ;;  %v3335_v15 = vor.u32 %v3658_v3, %v3334_v10  ;;  %v3643_v10 = vld [vmem:[%s5179_s3 + $0xc8] sm:$0xf0]  ;;  %v3645_v3 = vld [vmem:[%s5179_s3 + $0xdc] sm:$0xf] }
 0x16e   : > { %1655 = vmatmul.bf16.gmra.mxu0 %v4445_v6 }
 0x16f   : > { %1718 = vmatpush.bf16.msra.mxu0 %v3125_v1  ;;  %1673 = vmatmul.bf16.gmra.mxu1 %v4447_v7  ;;  %v3347_v1 = vor.u32 %v3661_v50, %v3346_v62  ;;  %v3303_v50 = vor.u32 %v3648_v56, %v3300_v58  ;;  %v3430_v56 = vld [vmem:[%s5179_s3 + $0x1f8] sm:$0xf] }
 0x170   : > { %1691 = vmatmul.bf16.gmra.mxu2 %v4433_v2  ;;  %2264 = vmatpush.bf16.msra.mxu1 %v3251_v24  ;;  %v3252_v2 = vld [vmem:[%s5179_s3 + $0x9c] sm:$0xf0] }
 0x171   : > { %v3255_v28 = vor.u32 %v3636_v27, %v3252_v2  ;;  %2282 = vmatpush.bf16.msra.mxu2 %v3347_v1  ;;  %v3322_v24 = vld [vmem:[%s5179_s3 + $0x120] sm:$0xf] }
 0x173   : > { %1719 = vmatpush.bf16.msra.mxu0 %v3113_v5  ;;  %v3665_v5 = vld [vmem:[%s5179_s3 + $0x178] sm:$0xf0] }
 0x174   : > { %2265 = vmatpush.bf16.msra.mxu1 %v3239_v11  ;;  %v4703_v9 = vor.u32 %v3665_v5, %v3366_v63  ;;  %v4745_v11 = vor.u32 %v3659_v29, %v3342_v8  ;;  %v3642_v29 = vld [vmem:[%s5179_s3 + $0xc4] sm:$0xf] }
 0x175   : > { %2283 = vmatpush.bf16.msra.mxu2 %v3335_v15 }
 0x177   : > { %1720 = vmatpush.bf16.msra.mxu0 %v3101_v14  ;;  %v3660_v14 = vld [vmem:[%s5179_s3 + $0x154] sm:$0xf] }
 0x178   : > { %1709 = vmatmul.bf16.gmra.mxu3 %v4445_v6  ;;  %v3240_v6 = vld [vmem:[%s5179_s3 + $0x84] sm:$0xf0]  ;;  %v3351_v21 = vor.u32 %v3660_v14, %v3348_v18 }
 0x179   : > { %v3288_v18 = vld [vmem:[%s5179_s3 + $0xe4] sm:$0xf0] }
 0x17b   : > { %1721 = vmatpush.bf16.msra.mxu0 %v3089_v25  ;;  %v3655_v25 = vld [vmem:[%s5179_s3 + $0x128] sm:$0xf0] }
 0x17c   : > { %v3323_v2 = vor.u32 %v3655_v25, %v3322_v24  ;;  %v3291_v24 = vor.u32 %v3645_v3, %v3288_v18  ;;  %v4850_v25 = vor.u32 %v3647_v20, %v3294_v19  ;;  %v3420_v18 = vld [vmem:[%s5179_s3 + $0x1ec] sm:$0xf0]  ;;  %v3438_v19 = vld [vmem:[%s5179_s3 + $0x200] sm:$0xf] }
 0x17e   : > { %1722 = vmatmul.bf16.vlgmr.msra.gmra.mxu0 %v4323_v4  ;;  %v3243_v4 = vor.u32 %v3633_v30, %v3240_v6  ;;  %v4750_v6 = vld [vmem:[%s5180_s4 + $0x2] ss:$8 sm:$0x7]  ;;  %2284 = vmatpush.bf16.msra.mxu2 %v3323_v2 }
 0x17f   : > { %2317 = vmatpush.bf16.msrb.mxu0 %v3267_v26  ;;  %v3657_v26 = vld [vmem:[%s5179_s3 + $0x13c] sm:$0xf]  ;;  %v4772_v38 = vperm.slane %v4750_v6, 0 }
 0x183   : > { %2318 = vmatpush.bf16.msrb.mxu0 %v3255_v28  ;;  %v3336_v28 = vld [vmem:[%s5179_s3 + $0x144] sm:$0xf0] }
 0x184   : > { %v3339_v30 = vor.u32 %v3657_v26, %v3336_v28  ;;  %v3454_v26 = vld [vmem:[%s5179_s3 + $0x228] sm:$0xf] }
 0x187   : > { %2319 = vmatpush.bf16.msrb.mxu0 %v3243_v4  ;;  %v3310_v4 = vld [vmem:[%s5179_s3 + $0x108] sm:$0xf] }
 0x18b   : > { %2320 = vmatpush.bf16.msrb.mxu0 %v3231_v34 }
 0x18e   : > { %1727 = vmatmul.bf16.gmra.mxu0 %v4447_v7  ;;  %v3226_v7 = vld [vmem:[%s5179_s3 + $0x60] sm:$0xf] }
 0x18f   : > { %v3227_v32 = vor.u32 %v3631_v16, %v3226_v7  ;;  %2321 = vmatpush.bf16.msrb.mxu0 %v3219_v40  ;;  %v3652_v7 = vld [vmem:[%s5179_s3 + $0x110] sm:$0xf0]  ;;  %v3654_v16 = vld [vmem:[%s5179_s3 + $0x124] sm:$0xf]  ;;  %v4779_v40 = vor.u32 %v3656_v36, %v3330_v33 }
 0x190   : > { %v3311_v31 = vor.u32 %v3652_v7, %v3310_v4  ;;  %v3687_v4 = vld [vmem:[%s5179_s3 + $0x22c] sm:$0xf] }
 0x191   : > { %2266 = vmatpush.bf16.msra.mxu1 %v3227_v32  ;;  %v3324_v32 = vld [vmem:[%s5179_s3 + $0x12c] sm:$0xf0] }
 0x192   : > { %v3327_v35 = vor.u32 %v3654_v16, %v3324_v32  ;;  %2285 = vmatpush.bf16.msra.mxu2 %v3311_v31  ;;  %v3456_v16 = vld [vmem:[%s5179_s3 + $0x234] sm:$0xf0]  ;;  %v3282_v31 = vld [vmem:[%s5179_s3 + $0xc8] sm:$0xf]  ;;  %v3644_v32 = vld [vmem:[%s5179_s3 + $0xd0] sm:$0xf0] }
 0x193   : > { %2322 = vmatpush.bf16.msrb.mxu0 %v3207_v44  ;;  %v4878_v36 = vor.u32 %v3644_v32, %v3282_v31  ;;  %v3680_v32 = vld [vmem:[%s5179_s3 + $0x1f0] sm:$0xf0] }
 0x195   : > { %2267 = vmatpush.bf16.msra.mxu1 %v3215_v37 }
 0x197   : > { %2323 = vmatpush.bf16.msrb.mxu0 %v3195_v48 }
 0x199   : > { %2268 = vmatpush.bf16.msra.mxu1 %v3203_v12  ;;  %v3649_v12 = vld [vmem:[%s5179_s3 + $0xf8] sm:$0xf0] }
 0x19a   : > { %v3299_v13 = vor.u32 %v3649_v12, %v3298_v43 }
 0x19b   : > { %2324 = vmatpush.bf16.msrb.mxu0 %v3183_v61  ;;  %v3650_v61 = vld [vmem:[%s5179_s3 + $0x100] sm:$0xf0] }
 0x19c   : > { %2286 = vmatpush.bf16.msra.mxu2 %v3299_v13  ;;  %v4825_v0 = vor.u32 %v3650_v61, %v3306_v45  ;;  %v3684_v13 = vld [vmem:[%s5179_s3 + $0x214] sm:$0xf]  ;;  %v3681_v61 = vld [vmem:[%s5179_s3 + $0x1fc] sm:$0xf] }
 0x19d   : > { %2269 = vmatpush.bf16.msra.mxu1 %v3191_v59  ;;  %v3653_v59 = vld [vmem:[%s5179_s3 + $0x118] sm:$0xf0] }
 0x19e   : > { %v4800_v48 = vor.u32 %v3653_v59, %v3318_v17  ;;  %v3462_v17 = vld [vmem:[%s5179_s3 + $0x230] sm:$0xf] }
 0x19f   : > { %2389 = vmatpush.bf16.msra.mxu0 %v4703_v9 }
 0x1a1   : > { %2270 = vmatpush.bf16.msra.mxu1 %v3179_v55  ;;  %v3646_v55 = vld [vmem:[%s5179_s3 + $0xe0] sm:$0xf0] }
 0x1a2   : > { %v3287_v57 = vor.u32 %v3646_v55, %v3286_v53 }
 0x1a3   : > { %2390 = vmatpush.bf16.msra.mxu0 %v4724_v22 }
 0x1a4   : > { %2287 = vmatpush.bf16.msra.mxu2 %v3287_v57  ;;  %v3682_v57 = vld [vmem:[%s5179_s3 + $0x200] sm:$0xf0] }
 0x1a5   : > { %2335 = vmatpush.bf16.msrb.mxu1 %v3363_v51  ;;  %v3274_v51 = vld [vmem:[%s5179_s3 + $0xc0] sm:$0xf]  ;;  %v3431_v45 = vor.u32 %v3682_v57, %v3430_v56  ;;  %v3677_v56 = vld [vmem:[%s5179_s3 + $0x1d8] sm:$0xf0] }
 0x1a6   : > { %v3275_v15 = vor.u32 %v3643_v10, %v3274_v51 }
 0x1a7   : > { %2391 = vmatpush.bf16.msra.mxu0 %v4745_v11 }
 0x1a8   : > { %2288 = vmatpush.bf16.msra.mxu2 %v3275_v15  ;;  %v3678_v15 = vld [vmem:[%s5179_s3 + $0x1e4] sm:$0xf] }
 0x1a9   : > { %2336 = vmatpush.bf16.msrb.mxu1 %v3351_v21 }
 0x1ab   : > { %2392 = vmatpush.bf16.msra.mxu0 %v4779_v40 }
 0x1ad   : > { %2337 = vmatpush.bf16.msrb.mxu1 %v3339_v30  ;;  %v3276_v30 = vld [vmem:[%s5179_s3 + $0xcc] sm:$0xf0] }
 0x1ae   : > { %v3279_v7 = vor.u32 %v3642_v29, %v3276_v30  ;;  %v3675_v29 = vld [vmem:[%s5179_s3 + $0x1cc] sm:$0xf]  ;;  %v3408_v30 = vld [vmem:[%s5179_s3 + $0x1d4] sm:$0xf0] }
 0x1af   : > { %2393 = vmatpush.bf16.msra.mxu0 %v4800_v48  ;;  %v3411_v31 = vor.u32 %v3675_v29, %v3408_v30 }
 0x1b1   : > { %2338 = vmatpush.bf16.msrb.mxu1 %v3327_v35  ;;  %v3459_v35 = vor.u32 %v3687_v4, %v3456_v16  ;;  %v3426_v4 = vld [vmem:[%s5179_s3 + $0x1e8] sm:$0xf]  ;;  %v4969_v16 = vperm.slane %v4750_v6, 1 }
 0x1b3   : > { %2394 = vmatpush.bf16.msra.mxu0 %v4825_v0  ;;  %2353 = vmatpush.bf16.msrb.mxu2 %v3459_v35  ;;  %v3673_v35 = vld [vmem:[%s5179_s3 + $0x1b8] sm:$0xf0] }
 0x1b5   : > { %2339 = vmatpush.bf16.msrb.mxu1 %v3315_v47  ;;  %v3447_v47 = vor.u32 %v3684_v13, %v3444_v46  ;;  %v3414_v13 = vld [vmem:[%s5179_s3 + $0x1d0] sm:$0xf] }
 0x1b7   : > { %2395 = vmatpush.bf16.msra.mxu0 %v4850_v25  ;;  %2354 = vmatpush.bf16.msrb.mxu2 %v3447_v47 }
 0x1b9   : > { %2340 = vmatpush.bf16.msrb.mxu1 %v3303_v50  ;;  %v3450_v50 = vld [vmem:[%s5179_s3 + $0x218] sm:$0xf] }
 0x1bb   : > { %v1579_v23 = vpop.f32.mrf.mxu0  ;;  %2396 = vmatpush.bf16.msra.mxu0 %v4878_v36 }
 0x1bc   : > { %v1597_v27 = vpop.f32.mrf.mxu1 }
 0x1bd   : > { %v1598_v34 = vadd.f32 %v1597_v27, %v1579_v23  ;;  %v3688_v27 = vld [vmem:[%s5179_s3 + $0x230] sm:$0xf0]  ;;  %2341 = vmatpush.bf16.msrb.mxu1 %v3291_v24  ;;  %v3683_v24 = vld [vmem:[%s5179_s3 + $0x208] sm:$0xf0] }
 0x1be   : > { %v3455_v28 = vor.u32 %v3688_v27, %v3454_v26  ;;  %v4950_v27 = vor.u32 %v3683_v24, %v3438_v19  ;;  %v3372_v24 = vld [vmem:[%s5179_s3 + $0x18c] sm:$0xf0] }
 0x1c0   : > { %2299 = vmatpush.bf16.msra.mxu3 %v3455_v28  ;;  %v3676_v28 = vld [vmem:[%s5179_s3 + $0x1d0] sm:$0xf0] }
 0x1c1   : > { %2342 = vmatpush.bf16.msrb.mxu1 %v3279_v7 }
 0x1c3   : > { %v1615_v37 = vpop.f32.mrf.mxu2  ;;  %v1581_v42 = vpop.f32.mrf.mxu0 }
 0x1c4   : > { %v1616_v41 = vadd.f32 %v1615_v37, %v1598_v34  ;;  %v1599_v44 = vpop.f32.mrf.mxu1  ;;  %v3442_v37 = vld [vmem:[%s5179_s3 + $0x210] sm:$0xf] }
 0x1c5   : > { %v1600_v62 = vadd.f32 %v1599_v44, %v1581_v42 }
 0x1c6   : > { %v1741_v49 = vmul.f32 %v4772_v38, %v1616_v41  ;;  %v3685_v41 = vld [vmem:[%s5179_s3 + $0x218] sm:$0xf0] }
 0x1c7   : > { %v3443_v43 = vor.u32 %v3685_v41, %v3442_v37 }
 0x1c8   : > { %v1759_v1 = vadd.f32 %v4804_v52, %v1741_v49  ;;  %v3689_v49 = vld [vmem:[%s5179_s3 + $0x238] sm:$0xf0] }
 0x1c9   : > { %2300 = vmatpush.bf16.msra.mxu3 %v3443_v43  ;;  %v4903_v55 = vor.u32 %v3689_v49, %v3462_v17  ;;  %v4998_v17 = vperm.slane %v4777_v39, 1 }
 0x1ca   : > { %v1768_v2 = vmax.f32 %v1759_v1, 0.0 }
 0x1cb   : > { %v1617_v60 = vpop.f32.mrf.mxu2  ;;  %v1584_v5 = vpop.f32.mrf.mxu0 }
 0x1cc   : > { %v1618_v63 = vadd.f32 %v1617_v60, %v1600_v62  ;;  %v1602_v14 = vpop.f32.mrf.mxu1  ;;  %v4848_v23 = vpop.f32.mrf.mxu3  ;;  %v3432_v62 = vld [vmem:[%s5179_s3 + $0x204] sm:$0xf0]  ;;  %v3418_v60 = vld [vmem:[%s5179_s3 + $0x1e0] sm:$0xf] }
 0x1cd   : > { %v1603_v34 = vadd.f32 %v1602_v14, %v1584_v5  ;;  %v3435_v1 = vor.u32 %v3681_v61, %v3432_v62  ;;  %2301 = vmatpush.bf16.msra.mxu3 %v3431_v45  ;;  %v3382_v45 = vld [vmem:[%s5179_s3 + $0x198] sm:$0xf] }
 0x1ce   : > { %v1744_v21 = vmul.f32 %v4772_v38, %v1618_v63  ;;  %v3679_v63 = vld [vmem:[%s5179_s3 + $0x1e8] sm:$0xf0] }
 0x1cf   : > { %v3419_v51 = vor.u32 %v3679_v63, %v3418_v60  ;;  %2355 = vmatpush.bf16.msrb.mxu2 %v3435_v1  ;;  %v3384_v1 = vld [vmem:[%s5179_s3 + $0x1a4] sm:$0xf0] }
 0x1d0   : > { %v1762_v8 = vadd.f32 %v4804_v52, %v1744_v21  ;;  %v3423_v21 = vor.u32 %v3678_v15, %v3420_v18  ;;  %v3667_v15 = vld [vmem:[%s5179_s3 + $0x188] sm:$0xf0] }
 0x1d1   : > { %2302 = vmatpush.bf16.msra.mxu3 %v3419_v51 }
 0x1d2   : > { %v1771_v33 = vmax.f32 %v1762_v8, 0.0 }
 0x1d3   : > { %v1620_v42 = vpop.f32.mrf.mxu2  ;;  %v1586_v44 = vpop.f32.mrf.mxu0  ;;  %2356 = vmatpush.bf16.msrb.mxu2 %v3423_v21  ;;  %v3666_v21 = vld [vmem:[%s5179_s3 + $0x184] sm:$0xf] }
 0x1d4   : > { %v4886_v12 = vpack.c.bf16 %v1771_v33, %v1768_v2  ;;  %v1621_v54 = vadd.f32 %v1620_v42, %v1603_v34  ;;  %v1604_v59 = vpop.f32.mrf.mxu1  ;;  %v1635_v53 = vpop.f32.mrf.mxu3  ;;  %v3406_v2 = vld [vmem:[%s5179_s3 + $0x1c8] sm:$0xf]  ;;  %v4974_v33 = vor.u32 %v3680_v32, %v3426_v4  ;;  %v3394_v34 = vld [vmem:[%s5179_s3 + $0x1b0] sm:$0xf]  ;;  %v3396_v44 = vld [vmem:[%s5179_s3 + $0x1bc] sm:$0xf0]  ;;  %v3375_v30 = vor.u32 %v3666_v21, %v3372_v24 }
 0x1d5   : > { %v3407_v8 = vor.u32 %v3676_v28, %v3406_v2  ;;  %v3395_v37 = vor.u32 %v3673_v35, %v3394_v34  ;;  %v3390_v2 = vld [vmem:[%s5179_s3 + $0x1a0] sm:$0xf]  ;;  %v3671_v4 = vld [vmem:[%s5179_s3 + $0x1a8] sm:$0xf0]  ;;  %v3270_v32 = vld [vmem:[%s5179_s3 + $0xb0] sm:$0xf] }
 0x1d6   : > { %2271 = vmatmul.bf16.vlgmr.msra.gmra.mxu1 %v4886_v12  ;;  %2325 = vmatmul.bf16.vlgmr.msrb.gmra.mxu0 %v4886_v12  ;;  %v1747_v58 = vmul.f32 %v4772_v38, %v1621_v54  ;;  %v3686_v38 = vld [vmem:[%s5179_s3 + $0x220] sm:$0xf0]  ;;  %v3672_v54 = vld [vmem:[%s5179_s3 + $0x1b4] sm:$0xf]  ;;  %v3641_v34 = vld [vmem:[%s5179_s3 + $0xb8] sm:$0xf0] }
 0x1d7   : > { %2407 = vmatpush.bf16.msra.mxu1 %v4903_v55  ;;  %v4931_v5 = vor.u32 %v3686_v38, %v3450_v50  ;;  %2303 = vmatpush.bf16.msra.mxu3 %v3407_v8  ;;  %v3399_v49 = vor.u32 %v3672_v54, %v3396_v44  ;;  %v3669_v50 = vld [vmem:[%s5179_s3 + $0x19c] sm:$0xf]  ;;  %v3402_v38 = vld [vmem:[%s5179_s3 + $0x1b8] sm:$0xf]  ;;  %v3668_v54 = vld [vmem:[%s5179_s3 + $0x190] sm:$0xf0] }
 0x1d8   : > { %v1765_v10 = vadd.f32 %v4804_v52, %v1747_v58  ;;  %2357 = vmatpush.bf16.msrb.mxu2 %v3411_v31  ;;  %v5005_v58 = vor.u32 %v3677_v56, %v3414_v13  ;;  %v3387_v51 = vor.u32 %v3669_v50, %v3384_v1  ;;  %v5053_v31 = vor.u32 %v3671_v4, %v3390_v2  ;;  %v3258_v13 = vld [vmem:[%s5179_s3 + $0x98] sm:$0xf]  ;;  %v3632_v50 = vld [vmem:[%s5179_s3 + $0x70] sm:$0xf0]  ;;  %v3198_v21 = vld [vmem:[%s5179_s3 + $0x20] sm:$0xf] }
 0x1d9   : > { %v1755_v2 = vperm.slane %v4777_v39, 2  ;;  %v3620_v4 = vld [vmem:[%s5179_s3 + $0x10] sm:$0xf0] }
 0x1db   : > { %v1622_v3 = vpop.f32.mrf.mxu2  ;;  %v1651_v14 = vpop.f32.mrf.mxu0  ;;  %2408 = vmatpush.bf16.msra.mxu1 %v4931_v5  ;;  %2304 = vmatpush.bf16.msra.mxu3 %v3395_v37  ;;  %v3271_v37 = vor.u32 %v3641_v34, %v3270_v32 }
 0x1dc   : > { %v1652_v20 = vadd.f32 %v1651_v14, %v4848_v23  ;;  %v1669_v52 = vpop.f32.mrf.mxu1  ;;  %v4948_v26 = vpop.f32.mrf.mxu3  ;;  %v1774_v23 = vmax.f32 %v1765_v10, 0.0  ;;  %2358 = vmatpush.bf16.msrb.mxu2 %v3399_v49  ;;  %v3674_v10 = vld [vmem:[%s5179_s3 + $0x1c0] sm:$0xf0]  ;;  %v3370_v14 = vld [vmem:[%s5179_s3 + $0x180] sm:$0xf] }
 0x1dd   : > { %v5028_v3 = vor.u32 %v3674_v10, %v3402_v38  ;;  %v3371_v19 = vor.u32 %v3667_v15, %v3370_v14  ;;  %v1737_v15 = vperm.slane %v4750_v6, 2  ;;  %v3623_v6 = vld [vmem:[%s5179_s3 + $0x28] sm:$0xf0] }
 0x1de   : > { %v1670_v7 = vadd.f32 %v1669_v52, %v1652_v20  ;;  %v4982_v42 = vpack.c.bf16 %v1774_v23, %v1774_v23 }
 0x1df   : > { %2409 = vmatpush.bf16.msra.mxu1 %v4950_v27 }
 0x1e0   : > { %v1742_v46 = vmul.f32 %v4969_v16, %v1670_v7  ;;  %2359 = vmatpush.bf16.msrb.mxu2 %v3387_v51 }
 0x1e2   : > { %v1760_v60 = vadd.f32 %v4998_v17, %v1742_v46  ;;  %v3638_v46 = vld [vmem:[%s5179_s3 + $0xa0] sm:$0xf0] }
 0x1e3   : > { %v1653_v41 = vpop.f32.mrf.mxu0  ;;  %v4984_v43 = vpop.f32.mrf.mxu2  ;;  %2410 = vmatpush.bf16.msra.mxu1 %v4974_v33 }
 0x1e4   : > { %v1654_v59 = vadd.f32 %v1653_v41, %v1635_v53  ;;  %v1671_v47 = vpop.f32.mrf.mxu1  ;;  %v1640_v57 = vpop.f32.mrf.mxu3  ;;  %v3670_v53 = vld [vmem:[%s5179_s3 + $0x1a0] sm:$0xf0]  ;;  %v1769_v28 = vmax.f32 %v1760_v60, 0.0  ;;  %2360 = vmatpush.bf16.msrb.mxu2 %v3375_v30  ;;  %v3378_v41 = vld [vmem:[%s5179_s3 + $0x188] sm:$0xf] }
 0x1e5   : > { %v3383_v62 = vor.u32 %v3670_v53, %v3382_v45  ;;  %v5068_v44 = vor.u32 %v3668_v54, %v3378_v41  ;;  %v3246_v53 = vld [vmem:[%s5179_s3 + $0x80] sm:$0xf]  ;;  %v3186_v30 = vld [vmem:[%s5179_s3 + $0x8] sm:$0xf] }
 0x1e6   : > { %2276 = vmatmul.bf16.gmra.mxu1 %v4982_v42  ;;  %2330 = vmatmul.bf16.gmra.mxu0 %v4982_v42  ;;  %v1672_v61 = vadd.f32 %v1671_v47, %v1654_v59  ;;  %v3259_v59 = vor.u32 %v3638_v46, %v3258_v13  ;;  %v3187_v32 = vor.u32 %v3620_v4, %v3186_v30 }
 0x1e7   : > { %2411 = vmatpush.bf16.msra.mxu1 %v5005_v58  ;;  %2305 = vmatpush.bf16.msra.mxu3 %v3383_v62 }
 0x1e8   : > { %v1745_v63 = vmul.f32 %v4969_v16, %v1672_v61 }
 0x1ea   : > { %v1763_v18 = vadd.f32 %v4998_v17, %v1745_v63 }
 0x1eb   : > { %v1656_v20 = vpop.f32.mrf.mxu0  ;;  %v5037_v52 = vpop.f32.mrf.mxu2  ;;  %2412 = vmatpush.bf16.msra.mxu1 %v5028_v3  ;;  %2306 = vmatpush.bf16.msra.mxu3 %v3371_v19  ;;  %v3626_v19 = vld [vmem:[%s5179_s3 + $0x40] sm:$0xf0] }
 0x1ec   : > { %v1772_v23 = vmax.f32 %v1763_v18, 0.0  ;;  %v1657_v8 = vadd.f32 %v1656_v20, %v4948_v26  ;;  %v1674_v29 = vpop.f32.mrf.mxu1  ;;  %v1705_v7 = vpop.f32.mrf.mxu3 }
 0x1ed   : > { %v1706_v38 = vadd.f32 %v1705_v7, %v4984_v43 }
 0x1ee   : > { %v1778_v35 = vpack.c.bf16 %v1772_v23, %v1769_v28  ;;  %v1675_v26 = vadd.f32 %v1674_v29, %v1657_v8  ;;  %v3199_v8 = vor.u32 %v3623_v6, %v3198_v21 }
 0x1ef   : > { %2413 = vmatpush.bf16.msra.mxu1 %v5053_v31  ;;  %2371 = vmatpush.bf16.msrb.mxu3 %v3271_v37 }
 0x1f0   : > { %2289 = vmatmul.bf16.vlgmr.msra.gmra.mxu2 %v1778_v35  ;;  %v1748_v47 = vmul.f32 %v4969_v16, %v1675_v26  ;;  %v3234_v16 = vld [vmem:[%s5179_s3 + $0x68] sm:$0xf] }
 0x1f1   : > { %3698 = vmatpush.bf16.msra.mxu2 %v4703_v9  ;;  %v3635_v9 = vld [vmem:[%s5179_s3 + $0x88] sm:$0xf0]  ;;  %v3235_v1 = vor.u32 %v3632_v50, %v3234_v16 }
 0x1f2   : > { %v1766_v61 = vadd.f32 %v4998_v17, %v1748_v47  ;;  %v3247_v62 = vor.u32 %v3635_v9, %v3246_v53  ;;  %v3629_v17 = vld [vmem:[%s5179_s3 + $0x58] sm:$0xf0]  ;;  %v3465_v53 = vld [vmem:[%s5180_s4 + $0x5] ss:$8 sm:$0x7] }
 0x1f3   : > { %v1658_v49 = vpop.f32.mrf.mxu0  ;;  %v1692_v56 = vpop.f32.mrf.mxu2  ;;  %2414 = vmatpush.bf16.msra.mxu1 %v5068_v44  ;;  %2372 = vmatpush.bf16.msrb.mxu3 %v3259_v59 }
 0x1f4   : > { %v1676_v57 = vpop.f32.mrf.mxu1  ;;  %v1707_v45 = vpop.f32.mrf.mxu3  ;;  %v1775_v60 = vmax.f32 %v1766_v61, 0.0 }
 0x1f5   : > { %3699 = vmatpush.bf16.msra.mxu2 %v4724_v22  ;;  %v3222_v22 = vld [vmem:[%s5179_s3 + $0x50] sm:$0xf] }
 0x1f6   : > { %2343 = vmatmul.bf16.vlgmr.msrb.gmra.mxu1 %v1778_v35  ;;  %2397 = vmatmul.bf16.vlgmr.msra.gmra.mxu0 %v1778_v35  ;;  %v1781_v18 = vpack.c.bf16 %v1775_v60, %v1775_v60  ;;  %v3223_v43 = vor.u32 %v3629_v17, %v3222_v22 }
 0x1f7   : > { %2373 = vmatpush.bf16.msrb.mxu3 %v3247_v62 }
 0x1f9   : > { %3700 = vmatpush.bf16.msra.mxu2 %v4745_v11  ;;  %v3210_v11 = vld [vmem:[%s5179_s3 + $0x38] sm:$0xf] }
 0x1fa   : > { %v3211_v20 = vor.u32 %v3626_v19, %v3210_v11 }
 0x1fb   : > { %v1723_v63 = vpop.f32.mrf.mxu0  ;;  %v1694_v51 = vpop.f32.mrf.mxu2  ;;  %2374 = vmatpush.bf16.msrb.mxu3 %v3235_v1  ;;  %v2446_v1 = vperm.slane %v3465_v53, 0 }
 0x1fc   : > { %v1710_v10 = vpop.f32.mrf.mxu3  ;;  %v1724_v14 = vadd.f32 %v1723_v63, %v1706_v38 }
 0x1fd   : > { %3701 = vmatpush.bf16.msra.mxu2 %v4779_v40  ;;  %v1708_v40 = vadd.f32 %v1707_v45, %v5037_v52 }
 0x1fe   : > { %v1743_v24 = vmul.f32 %v1737_v15, %v1724_v14 }
 0x1ff   : > { %2375 = vmatpush.bf16.msrb.mxu3 %v3223_v43 }
 0x200   : > { %2294 = vmatmul.bf16.gmra.mxu2 %v1781_v18  ;;  %v1761_v52 = vadd.f32 %v1755_v2, %v1743_v24 }
 0x201   : > { %3702 = vmatpush.bf16.msra.mxu2 %v4800_v48  ;;  %v1711_v48 = vadd.f32 %v1710_v10, %v1692_v56  ;;  %v2447_v10 = vperm.slane %v3465_v53, 1 }
 0x202   : > { %v1770_v34 = vmax.f32 %v1761_v52, 0.0 }
 0x203   : > { %v1725_v28 = vpop.f32.mrf.mxu0  ;;  %2376 = vmatpush.bf16.msrb.mxu3 %v3211_v20 }
 0x204   : > { %v1726_v23 = vadd.f32 %v1725_v28, %v1708_v40  ;;  %v1712_v29 = vpop.f32.mrf.mxu3 }
 0x205   : > { %3703 = vmatpush.bf16.msra.mxu2 %v4825_v0 }
 0x206   : > { %2348 = vmatmul.bf16.gmra.mxu1 %v1781_v18  ;;  %v1746_v7 = vmul.f32 %v1737_v15, %v1726_v23 }
 0x207   : > { %2377 = vmatpush.bf16.msrb.mxu3 %v3199_v8 }
 0x208   : > { %v1764_v39 = vadd.f32 %v1755_v2, %v1746_v7 }
 0x209   : > { %3704 = vmatpush.bf16.msra.mxu2 %v4850_v25 }
 0x20a   : > { %v1773_v35 = vmax.f32 %v1764_v39, 0.0 }
 0x20b   : > { %v1728_v26 = vpop.f32.mrf.mxu0  ;;  %2378 = vmatpush.bf16.msrb.mxu3 %v3187_v32 }
 0x20c   : > { %v1779_v37 = vpack.c.bf16 %v1773_v35, %v1770_v34  ;;  %v1729_v41 = vadd.f32 %v1728_v26, %v1711_v48 }
 0x20d   : > { %3705 = vmatpush.bf16.msra.mxu2 %v4878_v36 }
 0x20e   : > { %v1749_v54 = vmul.f32 %v1737_v15, %v1729_v41  ;;  %2307 = vmatmul.bf16.vlgmr.msra.gmra.mxu3 %v1779_v37 }
 0x20f   : > { %3706 = vmatpush.bf16.msra.mxu3 %v4903_v55 }
 0x210   : > { %2361 = vmatmul.bf16.vlgmr.msrb.gmra.mxu2 %v1779_v37  ;;  %v1767_v0 = vadd.f32 %v1755_v2, %v1749_v54 }
 0x212   : > { %v1776_v46 = vmax.f32 %v1767_v0, 0.0 }
 0x213   : > { %v1730_v13 = vpop.f32.mrf.mxu0  ;;  %3707 = vmatpush.bf16.msra.mxu3 %v4931_v5 }
 0x214   : > { %v1782_v25 = vpack.c.bf16 %v1776_v46, %v1776_v46 }
 0x216   : > { %2415 = vmatmul.bf16.vlgmr.msra.gmra.mxu1 %v1779_v37 }
 0x217   : > { %3708 = vmatpush.bf16.msra.mxu3 %v4950_v27 }
 0x21b   : > { %3709 = vmatpush.bf16.msra.mxu3 %v4974_v33 }
 0x21e   : > { %2312 = vmatmul.bf16.gmra.mxu3 %v1782_v25 }
 0x21f   : > { %3710 = vmatpush.bf16.msra.mxu3 %v5005_v58 }
 0x220   : > { %2366 = vmatmul.bf16.gmra.mxu2 %v1782_v25 }
 0x223   : > { %3711 = vmatpush.bf16.msra.mxu3 %v5028_v3 }
 0x227   : > { %3712 = vmatpush.bf16.msra.mxu3 %v5053_v31 }
 0x22b   : > { %3713 = vmatpush.bf16.msra.mxu3 %v5068_v44 }
 0x22e   : > { %2379 = vmatmul.bf16.vlgmr.msrb.gmra.mxu3 %v4886_v12 }
 0x230   : > { %2402 = vmatmul.bf16.vlgmr.msra.gmra.mxu2 %v1781_v18 }
 0x23e   : > { %2384 = vmatmul.bf16.gmra.mxu3 %v4982_v42  ;;  %v3464_v42 = vld [vmem:[%s5180_s4 + $0x4] ss:$8 sm:$0x7] }
 0x23f   : > { %v2428_v16 = vperm.slane %v3464_v42, 0  ;;  %v2429_v38 = vperm.slane %v3464_v42, 1 }
 0x24e   : > { %2420 = vmatmul.bf16.vlgmr.msra.gmra.mxu3 %v1782_v25 }
 0x253   : > { %v2272_v36 = vpop.f32.mrf.mxu1  ;;  %v2326_v55 = vpop.f32.mrf.mxu0 }
 0x25b   : > { %v2274_v5 = vpop.f32.mrf.mxu1  ;;  %v2328_v27 = vpop.f32.mrf.mxu0 }
 0x263   : > { %v2277_v33 = vpop.f32.mrf.mxu1  ;;  %v2331_v59 = vpop.f32.mrf.mxu0 }
 0x26b   : > { %v2279_v58 = vpop.f32.mrf.mxu1  ;;  %v2333_v47 = vpop.f32.mrf.mxu0 }
 0x26c   : > { %v2448_v58 = vperm.slane %v3465_v53, 2 }
 0x273   : > { %v2344_v49 = vpop.f32.mrf.mxu1  ;;  %v2290_v3 = vpop.f32.mrf.mxu2 }
 0x274   : > { %v2291_v9 = vadd.f32 %v2290_v3, %v2272_v36  ;;  %v2345_v62 = vadd.f32 %v2344_v49, %v2326_v55  ;;  %v2398_v25 = vpop.f32.mrf.mxu0 }
 0x27b   : > { %v2346_v56 = vpop.f32.mrf.mxu1  ;;  %v2292_v31 = vpop.f32.mrf.mxu2 }
 0x27c   : > { %v2293_v14 = vadd.f32 %v2292_v31, %v2274_v5  ;;  %v2347_v43 = vadd.f32 %v2346_v56, %v2328_v27  ;;  %v2430_v27 = vperm.slane %v3464_v42, 2  ;;  %v2400_v3 = vpop.f32.mrf.mxu0 }
 0x283   : > { %v2349_v57 = vpop.f32.mrf.mxu1  ;;  %v2295_v44 = vpop.f32.mrf.mxu2 }
 0x284   : > { %v2296_v23 = vadd.f32 %v2295_v44, %v2277_v33  ;;  %v2350_v30 = vadd.f32 %v2349_v57, %v2331_v59 }
 0x28b   : > { %v2351_v45 = vpop.f32.mrf.mxu1  ;;  %v2297_v12 = vpop.f32.mrf.mxu2 }
 0x291   : > { %v2308_v61 = vpop.f32.mrf.mxu3 }
 0x292   : > { %v2309_v50 = vadd.f32 %v2308_v61, %v2291_v9 }
 0x293   : > { %v2362_v60 = vpop.f32.mrf.mxu2  ;;  %v2416_v36 = vpop.f32.mrf.mxu1 }
 0x294   : > { %v2434_v63 = vmul.f32 %v2428_v16, %v2309_v50  ;;  %v2363_v51 = vadd.f32 %v2362_v60, %v2345_v62 }
 0x296   : > { %v2452_v22 = vadd.f32 %v2446_v1, %v2434_v63  ;;  %v2435_v17 = vmul.f32 %v2429_v38, %v2363_v51 }
 0x298   : > { %v2453_v15 = vadd.f32 %v2447_v10, %v2435_v17  ;;  %v2461_v11 = vmax.f32 %v2452_v22, 0.0 }
 0x299   : > { %v2310_v18 = vpop.f32.mrf.mxu3 }
 0x29a   : > { %v2462_v19 = vmax.f32 %v2453_v15, 0.0  ;;  %v2311_v20 = vadd.f32 %v2310_v18, %v2293_v14 }
 0x29b   : > { %v2364_v21 = vpop.f32.mrf.mxu2  ;;  %v2418_v44 = vpop.f32.mrf.mxu1 }
 0x29c   : > { %v2470_v6 = vpack.c.bf16 %v2462_v19, %v2461_v11  ;;  %v2437_v40 = vmul.f32 %v2428_v16, %v2311_v20  ;;  %v2365_v24 = vadd.f32 %v2364_v21, %v2347_v43 }
 0x29e   : > { %2476 = vst [vmem:[%s5181_s5] sm:$0xff] %v2470_v6  ;;  %v2455_v2 = vadd.f32 %v2446_v1, %v2437_v40  ;;  %v2438_v28 = vmul.f32 %v2429_v38, %v2365_v24 }
 0x2a0   : > { %v2456_v8 = vadd.f32 %v2447_v10, %v2438_v28  ;;  %v2464_v4 = vmax.f32 %v2455_v2, 0.0 }
 0x2a1   : > { %v2313_v29 = vpop.f32.mrf.mxu3 }
 0x2a2   : > { %v2465_v52 = vmax.f32 %v2456_v8, 0.0  ;;  %v2314_v7 = vadd.f32 %v2313_v29, %v2296_v23 }
 0x2a3   : > { %v2367_v39 = vpop.f32.mrf.mxu2 }
 0x2a4   : > { %v2472_v48 = vpack.c.bf16 %v2465_v52, %v2464_v4  ;;  %v2440_v32 = vmul.f32 %v2428_v16, %v2314_v7  ;;  %v2368_v34 = vadd.f32 %v2367_v39, %v2350_v30 }
 0x2a6   : > { %2478 = vst [vmem:[%s5181_s5 + $0xc] sm:$0xff] %v2472_v48  ;;  %v2458_v35 = vadd.f32 %v2446_v1, %v2440_v32  ;;  %v2441_v26 = vmul.f32 %v2429_v38, %v2368_v34 }
 0x2a8   : > { %v2459_v37 = vadd.f32 %v2447_v10, %v2441_v26  ;;  %v2467_v54 = vmax.f32 %v2458_v35, 0.0 }
 0x2a9   : > { %v2315_v41 = vpop.f32.mrf.mxu3 }
 0x2aa   : > { %v2468_v0 = vmax.f32 %v2459_v37, 0.0 }
 0x2ab   : > { %v2369_v13 = vpop.f32.mrf.mxu2 }
 0x2ac   : > { %v2474_v46 = vpack.c.bf16 %v2468_v0, %v2467_v54 }
 0x2ae   : > { %2480 = vst [vmem:[%s5181_s5 + $0x18] sm:$0xff] %v2474_v46 }
 0x2b1   : > { %v2380_v55 = vpop.f32.mrf.mxu3 }
 0x2b2   : > { %v2399_v5 = vadd.f32 %v2398_v25, %v2380_v55 }
 0x2b3   : > { %v2403_v33 = vpop.f32.mrf.mxu2 }
 0x2b4   : > { %v2417_v59 = vadd.f32 %v2416_v36, %v2399_v5 }
 0x2b6   : > { %v2436_v47 = vmul.f32 %v2430_v27, %v2417_v59 }
 0x2b8   : > { %v2454_v49 = vadd.f32 %v2448_v58, %v2436_v47 }
 0x2b9   : > { %v2382_v56 = vpop.f32.mrf.mxu3 }
 0x2ba   : > { %v2463_v31 = vmax.f32 %v2454_v49, 0.0  ;;  %v2401_v57 = vadd.f32 %v2400_v3, %v2382_v56 }
 0x2bb   : > { %v2405_v45 = vpop.f32.mrf.mxu2 }
 0x2bc   : > { %v2471_v12 = vpack.c.bf16 %v2463_v31, %v2463_v31  ;;  %v2419_v9 = vadd.f32 %v2418_v44, %v2401_v57 }
 0x2be   : > { %2477 = vst [vmem:[%s5181_s5 + $0x8] sm:$0xf] %v2471_v12  ;;  %v2439_v16 = vmul.f32 %v2430_v27, %v2419_v9 }
 0x2c0   : > { %v2457_v61 = vadd.f32 %v2448_v58, %v2439_v16 }
 0x2c1   : > { %v2385_v42 = vpop.f32.mrf.mxu3 }
 0x2c2   : > { %v2466_v62 = vmax.f32 %v2457_v61, 0.0  ;;  %v2404_v1 = vadd.f32 %v2403_v33, %v2385_v42 }
 0x2c4   : > { %v2473_v50 = vpack.c.bf16 %v2466_v62, %v2466_v62 }
 0x2c6   : > { %2479 = vst [vmem:[%s5181_s5 + $0x14] sm:$0xf] %v2473_v50 }
 0x2c9   : > { %v2387_v53 = vpop.f32.mrf.mxu3 }
 0x2d1   : > { %v2421_v38 = vpop.f32.mrf.mxu3 }
 0x2d2   : > { %v2422_v60 = vadd.f32 %v2421_v38, %v2404_v1 }
 0x2d4   : > { %v2442_v63 = vmul.f32 %v2430_v27, %v2422_v60 }
 0x2d6   : > { %v2460_v51 = vadd.f32 %v2448_v58, %v2442_v63 }
 0x2d8   : > { %v2469_v10 = vmax.f32 %v2460_v51, 0.0 }
 0x2d9   : > { %v2423_v22 = vpop.f32.mrf.mxu3 }
 0x2da   : > { %v2475_v17 = vpack.c.bf16 %v2469_v10, %v2469_v10 }
 0x2dc   : > { %2481 = vst [vmem:[%s5181_s5 + $0x20] sm:$0xf] %v2475_v17 }
 0x2dd PF: > { %s15_s22 = sadd.s32 1, %s3796_s22   ;;  %s5182_s18 = smov %s3784_s19 }
 0x2de   : > { %p12_p12 = scmp.ge.s32.totalorder %s15_s22, 8   ;;  %s5183_s19 = smov %s3864_s26 }
 0x2df   : > { %s5184_s20 = smov %s3792_s21  ;;  %s5185_s21 = smov %s5187_s23 }
 0x2e0   :  { %14 = sbr.rel (!%p12_p12) target bundleno = 3 (0x3), region = 123 }

</bundles_post_ra>
